<compile_context>
chip_gen: v7x
topology: tpu7x:2x2x1
jax: 0.10.0
libtpu: 0.0.40
codegen_flags: <defaults>
</compile_context>

<pallas_src>
import functools

import jax
import jax.numpy as jnp
import numpy as np
from jax.experimental import pallas as pl
from jax.experimental.pallas import tpu as pltpu

LATENT_DIM = 16
IMAGE_CHANNELS = 1
INIT_CHANNELS = 8
IMAGE_SIZE = 32
KERNEL = 4
FC_INPUT_DIM = 64          # 64 * 1 * 1
B_TILE = 8                 # samples per grid step (multiple of 8)
Q = 4                      # h-inner positions per class (uniform across all layers)

assert B_TILE % 8 == 0


# ----------------------------------------------------------------------------
# Static tap tables (shared by the kernel and the host-side weight preparation)
# ----------------------------------------------------------------------------
def _enc_taps(m_in, s):
    """Stride-2/pad-1 forward conv: output class s -> [(input class, carry)] for kh=0..3."""
    taps = []
    for kh in range(KERNEL):
        u = 2 * s + kh - 1
        taps.append((u % m_in, u // m_in))
    return taps


def _dec_khs(c):
    """Stride-2/pad-1 transposed conv: kernel h-indices contributing to output class c."""
    return (1, 3) if c % 2 == 0 else (0, 2)


def _dec_taps(m_in, c):
    """Transposed conv: output class c -> [(input class, carry)] in _dec_khs(c) order."""
    m_out = 2 * m_in
    taps = []
    for kh in _dec_khs(c):
        m = ((c - kh + 1) % m_out) // 2
        u = 2 * m + kh - 1
        taps.append((m, (u - c) // m_out))
    return taps


# ----------------------------------------------------------------------------
# The fused kernel
# ----------------------------------------------------------------------------
def _vae_kernel(x_ref, eps_ref,
                e1w, e1b, e2w, e2b, e3w, e3b, e4w, e4b,
                f1w, f1b, fmw, fmb, f2w, f2b,
                d1w, d1b, d2we, d2wo, d2b, d3we, d3wo, d3b, d4we, d4wo, d4b,
                recon_ref, mulv_ref):
    f32 = jnp.float32
    T = eps_ref.shape[0]            # samples in this grid step
    R = Q * T                       # rows per class slab

    def dot(a, b):
        return jnp.dot(a, b, preferred_element_type=f32)

    def relu(v):
        return jnp.maximum(v, 0.0)

    def shift(arr, delta):
        """result[q*T + t] = arr[(q + delta)*T + t], zero-filled outside [0, Q)."""
        if delta == 0:
            return arr
        z = jnp.zeros((T, arr.shape[1]), f32)
        if delta > 0:
            return jnp.concatenate([arr[T:], z], axis=0)
        return jnp.concatenate([z, arr[:-T]], axis=0)

    def enc_layer(cls_in, m_in, w_ref, b_ref):
        out = {}
        for s in range(m_in // 2):
            slabs = [shift(cls_in[m], carry) for m, carry in _enc_taps(m_in, s)]
            x = jnp.concatenate(slabs, axis=1)              # (R, 4*Win*Cin)
            out[s] = relu(dot(x, w_ref[...]) + b_ref[...])  # (R, Wout*Cout)
        return out

    def dec_layer(cls_in, m_in, we_ref, wo_ref, b_ref, act):
        out = {}
        for c in range(2 * m_in):
            wr = we_ref if c % 2 == 0 else wo_ref
            slabs = [shift(cls_in[m], -carry) for m, carry in _dec_taps(m_in, c)]
            x = jnp.concatenate(slabs, axis=1)              # (R, 2*Win*Cin)
            y = dot(x, wr[...]) + b_ref[...]                # (R, Wout*Cout)
            out[c] = act(y) if act is not None else y
        return out

    # ---------------- encoder ----------------
    xs = x_ref[...]                                          # (8*R, 32)
    cls0 = {m: xs[m * R:(m + 1) * R, :] for m in range(8)}   # image rows by (h mod 8)
    c1 = enc_layer(cls0, 8, e1w, e1b)                        # 4 classes of (R, 128)
    c2 = enc_layer(c1, 4, e2w, e2b)                          # 2 classes of (R, 128)
    c3 = enc_layer(c2, 2, e3w, e3b)                          # 1 class  of (R, 128)
    x3 = c3[0]
    # enc4 (4x4/s2/p0 -> 1x1): full contraction, one matmul
    h4 = jnp.concatenate([x3[kh * T:(kh + 1) * T, :] for kh in range(KERNEL)], axis=1)
    h4 = relu(dot(h4, e4w[...]) + e4b[...])                  # (T, 64)

    # ---------------- latent bottleneck ----------------
    hid = relu(dot(h4, f1w[...]) + f1b[...])                 # (T, 128)
    mulv = dot(hid, fmw[...]) + fmb[...]                     # (T, 32) = [mu | log_var]
    mulv_ref[...] = mulv
    mu = mulv[:, :LATENT_DIM]
    lv = mulv[:, LATENT_DIM:2 * LATENT_DIM]
    z = mu + eps_ref[...] * jnp.exp(0.5 * lv)                # reparameterize
    h2 = dot(z, f2w[...]) + f2b[...]                         # (T, 64)

    # ---------------- decoder ----------------
    # dec1 (1x1 -> 4x4): one matmul, lanes ordered (h, w, c)
    y1 = relu(dot(h2, d1w[...]) + d1b[...])                  # (T, 1024)
    d1 = {0: jnp.concatenate([y1[:, h * 256:(h + 1) * 256] for h in range(KERNEL)],
                             axis=0)}                        # (R, 256)
    d2 = dec_layer(d1, 1, d2we, d2wo, d2b, relu)             # 2 classes of (R, 256)
    d3 = dec_layer(d2, 2, d3we, d3wo, d3b, relu)             # 4 classes of (R, 256)
    d4 = dec_layer(d3, 4, d4we, d4wo, d4b, None)             # 8 classes of (R, 32)
    logits = jnp.concatenate([d4[c] for c in range(8)], axis=1)   # (R, 256) lane-dense
    recon_ref[...] = 1.0 / (1.0 + jnp.exp(-logits))


# ----------------------------------------------------------------------------
# Parameters (same layout / init scheme as the PyTorch module)
# ----------------------------------------------------------------------------
def init_params(key):
    def u(k, shape, fan_in):
        bound = 1.0 / jnp.sqrt(float(fan_in))
        return jax.random.uniform(k, shape, jnp.float32, -bound, bound)

    keys = jax.random.split(key, 32)
    ic, c = IMAGE_CHANNELS, INIT_CHANNELS
    p = {}
    p["enc1_w"] = u(keys[0], (c, ic, KERNEL, KERNEL), ic * KERNEL * KERNEL)
    p["enc1_b"] = u(keys[1], (c,), ic * KERNEL * KERNEL)
    p["enc2_w"] = u(keys[2], (2 * c, c, KERNEL, KERNEL), c * KERNEL * KERNEL)
    p["enc2_b"] = u(keys[3], (2 * c,), c * KERNEL * KERNEL)
    p["enc3_w"] = u(keys[4], (4 * c, 2 * c, KERNEL, KERNEL), 2 * c * KERNEL * KERNEL)
    p["enc3_b"] = u(keys[5], (4 * c,), 2 * c * KERNEL * KERNEL)
    p["enc4_w"] = u(keys[6], (64, 4 * c, KERNEL, KERNEL), 4 * c * KERNEL * KERNEL)
    p["enc4_b"] = u(keys[7], (64,), 4 * c * KERNEL * KERNEL)
    p["fc1_w"] = u(keys[8], (FC_INPUT_DIM, 128), FC_INPUT_DIM)
    p["fc1_b"] = u(keys[9], (128,), FC_INPUT_DIM)
    p["fc_mu_w"] = u(keys[10], (128, LATENT_DIM), 128)
    p["fc_mu_b"] = u(keys[11], (LATENT_DIM,), 128)
    p["fc_lv_w"] = u(keys[12], (128, LATENT_DIM), 128)
    p["fc_lv_b"] = u(keys[13], (LATENT_DIM,), 128)
    p["fc2_w"] = u(keys[14], (LATENT_DIM, FC_INPUT_DIM), LATENT_DIM)
    p["fc2_b"] = u(keys[15], (FC_INPUT_DIM,), LATENT_DIM)
    p["dec1_w"] = u(keys[16], (64, 8 * c, KERNEL, KERNEL), 8 * c * KERNEL * KERNEL)
    p["dec1_b"] = u(keys[17], (8 * c,), 8 * c * KERNEL * KERNEL)
    p["dec2_w"] = u(keys[18], (8 * c, 4 * c, KERNEL, KERNEL), 4 * c * KERNEL * KERNEL)
    p["dec2_b"] = u(keys[19], (4 * c,), 4 * c * KERNEL * KERNEL)
    p["dec3_w"] = u(keys[20], (4 * c, 2 * c, KERNEL, KERNEL), 2 * c * KERNEL * KERNEL)
    p["dec3_b"] = u(keys[21], (2 * c,), 2 * c * KERNEL * KERNEL)
    p["dec4_w"] = u(keys[22], (2 * c, ic, KERNEL, KERNEL), ic * KERNEL * KERNEL)
    p["dec4_b"] = u(keys[23], (ic,), ic * KERNEL * KERNEL)
    return p


# ----------------------------------------------------------------------------
# One-time host-side weight re-layout (banded matrices, fused taps, biases)
# ----------------------------------------------------------------------------
def prepare_params(p):
    f32 = jnp.float32

    def enc_band(w, w_in):
        # w: (Cout, Cin, 4, 4). Returns (4*w_in*Cin, (w_in//2)*Cout):
        # rows ordered (kh, w_in, c_in), cols (w_out, c_out); folds the W-axis taps.
        c_out, c_in = int(w.shape[0]), int(w.shape[1])
        w_out = w_in // 2
        P = np.zeros((KERNEL, w_in, w_out), np.float32)
        for kw in range(KERNEL):
            for wo in range(w_out):
                wi = 2 * wo + kw - 1
                if 0 <= wi < w_in:
                    P[kw, wi, wo] = 1.0
        Wb = jnp.einsum('xvw,oihx->hviwo', jnp.asarray(P), w.astype(f32))
        return Wb.reshape(KERNEL * w_in * c_in, w_out * c_out)

    def dec_band(w, w_in, khs):
        # w: (Cin, Cout, 4, 4). Returns (2*w_in*Cin, 2*w_in*Cout), row blocks in khs order.
        c_in, c_out = int(w.shape[0]), int(w.shape[1])
        w_out = 2 * w_in
        P = np.zeros((KERNEL, w_in, w_out), np.float32)
        for kw in range(KERNEL):
            for wi in range(w_in):
                wo = 2 * wi + kw - 1
                if 0 <= wo < w_out:
                    P[kw, wi, wo] = 1.0
        blocks = []
        for kh in khs:
            blk = jnp.einsum('xvw,iox->viwo', jnp.asarray(P), w[:, :, kh, :].astype(f32))
            blocks.append(blk.reshape(w_in * c_in, w_out * c_out))
        return jnp.concatenate(blocks, axis=0)

    def chan_bias(b, w_out):
        return jnp.broadcast_to(b.astype(f32), (w_out, int(b.shape[0]))).reshape(1, -1)

    def row(v):
        return v.astype(f32).reshape(1, -1)

    return (
        enc_band(p["enc1_w"], 32), chan_bias(p["enc1_b"], 16),
        enc_band(p["enc2_w"], 16), chan_bias(p["enc2_b"], 8),
        enc_band(p["enc3_w"], 8), chan_bias(p["enc3_b"], 4),
        jnp.transpose(p["enc4_w"], (2, 3, 1, 0)).reshape(512, 64).astype(f32),
        row(p["enc4_b"]),
        p["fc1_w"].astype(f32), row(p["fc1_b"]),
        jnp.concatenate([p["fc_mu_w"], p["fc_lv_w"]], axis=1).astype(f32),
        jnp.concatenate([p["fc_mu_b"], p["fc_lv_b"]]).reshape(1, -1).astype(f32),
        p["fc2_w"].astype(f32), row(p["fc2_b"]),
        jnp.transpose(p["dec1_w"], (0, 2, 3, 1)).reshape(64, 1024).astype(f32),
        jnp.broadcast_to(p["dec1_b"].astype(f32), (16, 64)).reshape(1, 1024),
        dec_band(p["dec2_w"], 4, (1, 3)), dec_band(p["dec2_w"], 4, (0, 2)),
        chan_bias(p["dec2_b"], 8),
        dec_band(p["dec3_w"], 8, (1, 3)), dec_band(p["dec3_w"], 8, (0, 2)),
        chan_bias(p["dec3_b"], 16),
        dec_band(p["dec4_w"], 16, (1, 3)), dec_band(p["dec4_w"], 16, (0, 2)),
        chan_bias(p["dec4_b"], 32),
    )


# ----------------------------------------------------------------------------
# Forward pass: one fused Pallas kernel + pure-layout glue in the wrapper
# ----------------------------------------------------------------------------
@jax.jit
def conv_vae_forward(prep, x_nchw, eps):
    f32 = jnp.float32
    B = x_nchw.shape[0]
    T = B_TILE
    S = (B + T - 1) // T
    pad = S * T - B
    xp = jnp.pad(x_nchw.astype(f32), ((0, pad), (0, 0), (0, 0), (0, 0)))
    ep = jnp.pad(eps.astype(f32), ((0, pad), (0, 0)))

    # Input slab: rows ordered (step, h mod 8, h div 8, sample), lanes = w.
    xs = xp[:, 0].reshape(S, T, Q, 8, IMAGE_SIZE)
    xs = jnp.transpose(xs, (0, 3, 2, 1, 4)).reshape(S * 8 * Q * T, IMAGE_SIZE)
    es = ep.reshape(S * T, LATENT_DIM)

    rows_in = 8 * Q * T
    rows_out = Q * T

    def step_spec(r, c):
        return pl.BlockSpec((r, c), lambda s: (s, 0))

    def const_spec(a):
        shp = tuple(int(d) for d in a.shape)
        return pl.BlockSpec(shp, lambda s: (0, 0))

    in_specs = ([step_spec(rows_in, IMAGE_SIZE), step_spec(T, LATENT_DIM)]
                + [const_spec(a) for a in prep])
    out_shape = (
        jax.ShapeDtypeStruct((S * rows_out, 256), f32),          # recon slab (lane-dense)
        jax.ShapeDtypeStruct((S * T, 2 * LATENT_DIM), f32),      # [mu | log_var]
    )
    out_specs = [step_spec(rows_out, 256), step_spec(T, 2 * LATENT_DIM)]

    recon_slab, mulv = pl.pallas_call(
        _vae_kernel,
        out_shape=out_shape,
        grid_spec=pltpu.PrefetchScalarGridSpec(
            num_scalar_prefetch=0,
            grid=(S,),
            in_specs=in_specs,
            out_specs=out_specs,
        ),
        compiler_params=pltpu.CompilerParams(
            dimension_semantics=("parallel",),
            vmem_limit_bytes=32 * 1024 * 1024,
        ),
    )(xs, es, *prep)

    # recon slab rows (step, q, sample), lanes (h mod 8, w) -> (B, 1, 32, 32), h = 8*q + class
    recon = recon_slab.reshape(S, Q, T, 8, IMAGE_SIZE)
    recon = jnp.transpose(recon, (0, 2, 1, 3, 4)).reshape(S * T, 1, IMAGE_SIZE, IMAGE_SIZE)
    recon = recon[:B]
    mu = mulv[:B, :LATENT_DIM]
    logvar = mulv[:B, LATENT_DIM:]
    return recon, mu, logvar


# ----------------------------------------------------------------------------
# Plain-JAX reference forward (correctness cross-check only)
# ----------------------------------------------------------------------------
def _ref_forward(params, x_nchw, eps):
    P = jax.lax.Precision.HIGHEST
    dot = functools.partial(jnp.dot, precision=P)

    def conv(x, w, b, stride, pad):
        y = jax.lax.conv_general_dilated(
            x, jnp.transpose(w, (2, 3, 1, 0)), window_strides=(stride, stride),
            padding=((pad, pad), (pad, pad)),
            dimension_numbers=("NHWC", "HWIO", "NHWC"), precision=P)
        return y + b

    def convT(x, w, b, stride, pad):
        q = KERNEL - 1 - pad
        y = jax.lax.conv_general_dilated(
            x, jnp.transpose(jnp.flip(w, (2, 3)), (2, 3, 0, 1)),
            window_strides=(1, 1), padding=((q, q), (q, q)),
            lhs_dilation=(stride, stride),
            dimension_numbers=("NHWC", "HWIO", "NHWC"), precision=P)
        return y + b

    x = jnp.transpose(x_nchw, (0, 2, 3, 1))
    h = jax.nn.relu(conv(x, params["enc1_w"], params["enc1_b"], 2, 1))
    h = jax.nn.relu(conv(h, params["enc2_w"], params["enc2_b"], 2, 1))
    h = jax.nn.relu(conv(h, params["enc3_w"], params["enc3_b"], 2, 1))
    h = jax.nn.relu(conv(h, params["enc4_w"], params["enc4_b"], 2, 0))
    hf = h.reshape(h.shape[0], FC_INPUT_DIM)
    hid = jax.nn.relu(dot(hf, params["fc1_w"]) + params["fc1_b"])
    mu = dot(hid, params["fc_mu_w"]) + params["fc_mu_b"]
    lv = dot(hid, params["fc_lv_w"]) + params["fc_lv_b"]
    z = mu + eps * jnp.exp(0.5 * lv)
    d = (dot(z, params["fc2_w"]) + params["fc2_b"]).reshape(-1, 1, 1, FC_INPUT_DIM)
    d = jax.nn.relu(convT(d, params["dec1_w"], params["dec1_b"], 1, 0))
    d = jax.nn.relu(convT(d, params["dec2_w"], params["dec2_b"], 2, 1))
    d = jax.nn.relu(convT(d, params["dec3_w"], params["dec3_b"], 2, 1))
    d = jax.nn.sigmoid(convT(d, params["dec4_w"], params["dec4_b"], 2, 1))
    return jnp.transpose(d, (0, 3, 1, 2)), mu, lv


if __name__ == "__main__":
    key = jax.random.PRNGKey(0)
    k_param, k_x, k_eps = jax.random.split(key, 3)

    B = 16   # two grid steps of B_TILE=8 samples each
    params = init_params(k_param)
    prep = prepare_params(params)       # one-time weight re-layout (outside the jitted fwd)
    x = jax.random.normal(k_x, (B, IMAGE_CHANNELS, IMAGE_SIZE, IMAGE_SIZE), jnp.float32)
    # eps for reparameterization (torch.randn_like equivalent, generated host-side)
    eps = jax.random.normal(k_eps, (B, LATENT_DIM), jnp.float32)

    recon, mu, logvar = conv_vae_forward(prep, x, eps)
    jax.block_until_ready((recon, mu, logvar))

    assert recon.shape == (B, IMAGE_CHANNELS, IMAGE_SIZE, IMAGE_SIZE)
    assert mu.shape == (B, LATENT_DIM) and logvar.shape == (B, LATENT_DIM)
    assert bool(jnp.all(jnp.isfinite(recon)))
    assert bool(jnp.all((recon >= 0.0) & (recon <= 1.0)))

    # cross-check the fused kernel against a plain-JAX reference forward pass
    r_ref, mu_r, lv_r = _ref_forward(params, x, eps)
    err = max(float(jnp.max(jnp.abs(recon - r_ref))),
              float(jnp.max(jnp.abs(mu - mu_r))),
              float(jnp.max(jnp.abs(logvar - lv_r))))
    assert err < 2e-3, f"mismatch vs reference: {err}"

    print("KERNEL_OK")
</pallas_src>

<mosaic_0001>
module attributes {stable_mosaic.version = 11 : i64} {
  func.func @_vae_kernel(%arg0: i32, %arg1: memref<256x32xf32, #tpu.memory_space<vmem>>, %arg2: memref<8x16xf32, #tpu.memory_space<vmem>>, %arg3: memref<128x128xf32, #tpu.memory_space<vmem>>, %arg4: memref<1x128xf32, #tpu.memory_space<vmem>>, %arg5: memref<512x128xf32, #tpu.memory_space<vmem>>, %arg6: memref<1x128xf32, #tpu.memory_space<vmem>>, %arg7: memref<512x128xf32, #tpu.memory_space<vmem>>, %arg8: memref<1x128xf32, #tpu.memory_space<vmem>>, %arg9: memref<512x64xf32, #tpu.memory_space<vmem>>, %arg10: memref<1x64xf32, #tpu.memory_space<vmem>>, %arg11: memref<64x128xf32, #tpu.memory_space<vmem>>, %arg12: memref<1x128xf32, #tpu.memory_space<vmem>>, %arg13: memref<128x32xf32, #tpu.memory_space<vmem>>, %arg14: memref<1x32xf32, #tpu.memory_space<vmem>>, %arg15: memref<16x64xf32, #tpu.memory_space<vmem>>, %arg16: memref<1x64xf32, #tpu.memory_space<vmem>>, %arg17: memref<64x1024xf32, #tpu.memory_space<vmem>>, %arg18: memref<1x1024xf32, #tpu.memory_space<vmem>>, %arg19: memref<512x256xf32, #tpu.memory_space<vmem>>, %arg20: memref<512x256xf32, #tpu.memory_space<vmem>>, %arg21: memref<1x256xf32, #tpu.memory_space<vmem>>, %arg22: memref<512x256xf32, #tpu.memory_space<vmem>>, %arg23: memref<512x256xf32, #tpu.memory_space<vmem>>, %arg24: memref<1x256xf32, #tpu.memory_space<vmem>>, %arg25: memref<512x32xf32, #tpu.memory_space<vmem>>, %arg26: memref<512x32xf32, #tpu.memory_space<vmem>>, %arg27: memref<1x32xf32, #tpu.memory_space<vmem>>, %arg28: memref<32x256xf32, #tpu.memory_space<vmem>>, %arg29: memref<8x32xf32, #tpu.memory_space<vmem>>) attributes {dimension_semantics = [#tpu.dimension_semantics<parallel>], iteration_bounds = array<i64: 2>, scalar_prefetch = 0 : i64, scratch_operands = 0 : i64, tpu.core_type = #tpu.core_type<tc>, window_params = [{transform_indices = @transform_0, window_bounds = array<i64: 256, 32>}, {transform_indices = @transform_1, window_bounds = array<i64: 8, 16>}, {pipeline_mode = #tpu.pipeline_mode<synchronous>, transform_indices = @transform_2, window_bounds = array<i64: 128, 128>}, {pipeline_mode = #tpu.pipeline_mode<synchronous>, transform_indices = @transform_3, window_bounds = array<i64: 1, 128>}, {pipeline_mode = #tpu.pipeline_mode<synchronous>, transform_indices = @transform_4, window_bounds = array<i64: 512, 128>}, {pipeline_mode = #tpu.pipeline_mode<synchronous>, transform_indices = @transform_5, window_bounds = array<i64: 1, 128>}, {pipeline_mode = #tpu.pipeline_mode<synchronous>, transform_indices = @transform_6, window_bounds = array<i64: 512, 128>}, {pipeline_mode = #tpu.pipeline_mode<synchronous>, transform_indices = @transform_7, window_bounds = array<i64: 1, 128>}, {pipeline_mode = #tpu.pipeline_mode<synchronous>, transform_indices = @transform_8, window_bounds = array<i64: 512, 64>}, {pipeline_mode = #tpu.pipeline_mode<synchronous>, transform_indices = @transform_9, window_bounds = array<i64: 1, 64>}, {pipeline_mode = #tpu.pipeline_mode<synchronous>, transform_indices = @transform_10, window_bounds = array<i64: 64, 128>}, {pipeline_mode = #tpu.pipeline_mode<synchronous>, transform_indices = @transform_11, window_bounds = array<i64: 1, 128>}, {pipeline_mode = #tpu.pipeline_mode<synchronous>, transform_indices = @transform_12, window_bounds = array<i64: 128, 32>}, {pipeline_mode = #tpu.pipeline_mode<synchronous>, transform_indices = @transform_13, window_bounds = array<i64: 1, 32>}, {pipeline_mode = #tpu.pipeline_mode<synchronous>, transform_indices = @transform_14, window_bounds = array<i64: 16, 64>}, {pipeline_mode = #tpu.pipeline_mode<synchronous>, transform_indices = @transform_15, window_bounds = array<i64: 1, 64>}, {pipeline_mode = #tpu.pipeline_mode<synchronous>, transform_indices = @transform_16, window_bounds = array<i64: 64, 1024>}, {pipeline_mode = #tpu.pipeline_mode<synchronous>, transform_indices = @transform_17, window_bounds = array<i64: 1, 1024>}, {pipeline_mode = #tpu.pipeline_mode<synchronous>, transform_indices = @transform_18, window_bounds = array<i64: 512, 256>}, {pipeline_mode = #tpu.pipeline_mode<synchronous>, transform_indices = @transform_19, window_bounds = array<i64: 512, 256>}, {pipeline_mode = #tpu.pipeline_mode<synchronous>, transform_indices = @transform_20, window_bounds = array<i64: 1, 256>}, {pipeline_mode = #tpu.pipeline_mode<synchronous>, transform_indices = @transform_21, window_bounds = array<i64: 512, 256>}, {pipeline_mode = #tpu.pipeline_mode<synchronous>, transform_indices = @transform_22, window_bounds = array<i64: 512, 256>}, {pipeline_mode = #tpu.pipeline_mode<synchronous>, transform_indices = @transform_23, window_bounds = array<i64: 1, 256>}, {pipeline_mode = #tpu.pipeline_mode<synchronous>, transform_indices = @transform_24, window_bounds = array<i64: 512, 32>}, {pipeline_mode = #tpu.pipeline_mode<synchronous>, transform_indices = @transform_25, window_bounds = array<i64: 512, 32>}, {pipeline_mode = #tpu.pipeline_mode<synchronous>, transform_indices = @transform_26, window_bounds = array<i64: 1, 32>}, {transform_indices = @transform_27, window_bounds = array<i64: 32, 256>}, {transform_indices = @transform_28, window_bounds = array<i64: 8, 32>}]} {
    %c0 = arith.constant 0 : index
    %c0_0 = arith.constant 0 : index
    %0 = vector.load %arg1[%c0, %c0_0] : memref<256x32xf32, #tpu.memory_space<vmem>>, vector<256x32xf32>
    %1 = vector.extract_strided_slice %0 {offsets = [0, 0], sizes = [32, 32], strides = [1, 1]} : vector<256x32xf32> to vector<32x32xf32>
    %2 = vector.extract_strided_slice %0 {offsets = [32, 0], sizes = [32, 32], strides = [1, 1]} : vector<256x32xf32> to vector<32x32xf32>
    %3 = vector.extract_strided_slice %0 {offsets = [64, 0], sizes = [32, 32], strides = [1, 1]} : vector<256x32xf32> to vector<32x32xf32>
    %4 = vector.extract_strided_slice %0 {offsets = [96, 0], sizes = [32, 32], strides = [1, 1]} : vector<256x32xf32> to vector<32x32xf32>
    %5 = vector.extract_strided_slice %0 {offsets = [128, 0], sizes = [32, 32], strides = [1, 1]} : vector<256x32xf32> to vector<32x32xf32>
    %6 = vector.extract_strided_slice %0 {offsets = [160, 0], sizes = [32, 32], strides = [1, 1]} : vector<256x32xf32> to vector<32x32xf32>
    %7 = vector.extract_strided_slice %0 {offsets = [192, 0], sizes = [32, 32], strides = [1, 1]} : vector<256x32xf32> to vector<32x32xf32>
    %8 = vector.extract_strided_slice %0 {offsets = [224, 0], sizes = [32, 32], strides = [1, 1]} : vector<256x32xf32> to vector<32x32xf32>
    %cst = arith.constant 0.000000e+00 : f32
    %9 = vector.broadcast %cst : f32 to vector<8x32xf32>
    %10 = vector.extract_strided_slice %8 {offsets = [0, 0], sizes = [24, 32], strides = [1, 1]} : vector<32x32xf32> to vector<24x32xf32>
    %11 = tpu.concatenate %9, %10 in 0 : vector<8x32xf32>, vector<24x32xf32> -> vector<32x32xf32>
    %12 = tpu.concatenate %11, %1, %2, %3 in 1 : vector<32x32xf32>, vector<32x32xf32>, vector<32x32xf32>, vector<32x32xf32> -> vector<32x128xf32>
    %c0_1 = arith.constant 0 : index
    %c0_2 = arith.constant 0 : index
    %13 = vector.load %arg3[%c0_1, %c0_2] : memref<128x128xf32, #tpu.memory_space<vmem>>, vector<128x128xf32>
    %cst_3 = arith.constant dense<0.000000e+00> : vector<32x128xf32>
    %14 = tpu.matmul %12, %13, %cst_3 {dimension_numbers = #tpu.dot_dimension_numbers<[1], [0], [0], [1], [0, 0, 1, 1], [], []>} : vector<32x128xf32>, vector<128x128xf32>, vector<32x128xf32> -> vector<32x128xf32>
    %c0_4 = arith.constant 0 : index
    %c0_5 = arith.constant 0 : index
    %15 = vector.load %arg4[%c0_4, %c0_5] : memref<1x128xf32, #tpu.memory_space<vmem>>, vector<1x128xf32>
    %16 = vector.broadcast %15 : vector<1x128xf32> to vector<32x128xf32>
    %17 = arith.addf %14, %16 : vector<32x128xf32>
    %cst_6 = arith.constant 0.000000e+00 : f32
    %18 = vector.broadcast %cst_6 : f32 to vector<32x128xf32>
    %19 = arith.maximumf %17, %18 : vector<32x128xf32>
    %20 = tpu.concatenate %2, %3, %4, %5 in 1 : vector<32x32xf32>, vector<32x32xf32>, vector<32x32xf32>, vector<32x32xf32> -> vector<32x128xf32>
    %c0_7 = arith.constant 0 : index
    %c0_8 = arith.constant 0 : index
    %21 = vector.load %arg3[%c0_7, %c0_8] : memref<128x128xf32, #tpu.memory_space<vmem>>, vector<128x128xf32>
    %cst_9 = arith.constant dense<0.000000e+00> : vector<32x128xf32>
    %22 = tpu.matmul %20, %21, %cst_9 {dimension_numbers = #tpu.dot_dimension_numbers<[1], [0], [0], [1], [0, 0, 1, 1], [], []>} : vector<32x128xf32>, vector<128x128xf32>, vector<32x128xf32> -> vector<32x128xf32>
    %c0_10 = arith.constant 0 : index
    %c0_11 = arith.constant 0 : index
    %23 = vector.load %arg4[%c0_10, %c0_11] : memref<1x128xf32, #tpu.memory_space<vmem>>, vector<1x128xf32>
    %24 = vector.broadcast %23 : vector<1x128xf32> to vector<32x128xf32>
    %25 = arith.addf %22, %24 : vector<32x128xf32>
    %cst_12 = arith.constant 0.000000e+00 : f32
    %26 = vector.broadcast %cst_12 : f32 to vector<32x128xf32>
    %27 = arith.maximumf %25, %26 : vector<32x128xf32>
    %28 = tpu.concatenate %4, %5, %6, %7 in 1 : vector<32x32xf32>, vector<32x32xf32>, vector<32x32xf32>, vector<32x32xf32> -> vector<32x128xf32>
    %c0_13 = arith.constant 0 : index
    %c0_14 = arith.constant 0 : index
    %29 = vector.load %arg3[%c0_13, %c0_14] : memref<128x128xf32, #tpu.memory_space<vmem>>, vector<128x128xf32>
    %cst_15 = arith.constant dense<0.000000e+00> : vector<32x128xf32>
    %30 = tpu.matmul %28, %29, %cst_15 {dimension_numbers = #tpu.dot_dimension_numbers<[1], [0], [0], [1], [0, 0, 1, 1], [], []>} : vector<32x128xf32>, vector<128x128xf32>, vector<32x128xf32> -> vector<32x128xf32>
    %c0_16 = arith.constant 0 : index
    %c0_17 = arith.constant 0 : index
    %31 = vector.load %arg4[%c0_16, %c0_17] : memref<1x128xf32, #tpu.memory_space<vmem>>, vector<1x128xf32>
    %32 = vector.broadcast %31 : vector<1x128xf32> to vector<32x128xf32>
    %33 = arith.addf %30, %32 : vector<32x128xf32>
    %cst_18 = arith.constant 0.000000e+00 : f32
    %34 = vector.broadcast %cst_18 : f32 to vector<32x128xf32>
    %35 = arith.maximumf %33, %34 : vector<32x128xf32>
    %cst_19 = arith.constant 0.000000e+00 : f32
    %36 = vector.broadcast %cst_19 : f32 to vector<8x32xf32>
    %37 = vector.extract_strided_slice %1 {offsets = [8, 0], sizes = [24, 32], strides = [1, 1]} : vector<32x32xf32> to vector<24x32xf32>
    %38 = tpu.concatenate %37, %36 in 0 : vector<24x32xf32>, vector<8x32xf32> -> vector<32x32xf32>
    %39 = tpu.concatenate %6, %7, %8, %38 in 1 : vector<32x32xf32>, vector<32x32xf32>, vector<32x32xf32>, vector<32x32xf32> -> vector<32x128xf32>
    %c0_20 = arith.constant 0 : index
    %c0_21 = arith.constant 0 : index
    %40 = vector.load %arg3[%c0_20, %c0_21] : memref<128x128xf32, #tpu.memory_space<vmem>>, vector<128x128xf32>
    %cst_22 = arith.constant dense<0.000000e+00> : vector<32x128xf32>
    %41 = tpu.matmul %39, %40, %cst_22 {dimension_numbers = #tpu.dot_dimension_numbers<[1], [0], [0], [1], [0, 0, 1, 1], [], []>} : vector<32x128xf32>, vector<128x128xf32>, vector<32x128xf32> -> vector<32x128xf32>
    %c0_23 = arith.constant 0 : index
    %c0_24 = arith.constant 0 : index
    %42 = vector.load %arg4[%c0_23, %c0_24] : memref<1x128xf32, #tpu.memory_space<vmem>>, vector<1x128xf32>
    %43 = vector.broadcast %42 : vector<1x128xf32> to vector<32x128xf32>
    %44 = arith.addf %41, %43 : vector<32x128xf32>
    %cst_25 = arith.constant 0.000000e+00 : f32
    %45 = vector.broadcast %cst_25 : f32 to vector<32x128xf32>
    %46 = arith.maximumf %44, %45 : vector<32x128xf32>
    %cst_26 = arith.constant 0.000000e+00 : f32
    %47 = vector.broadcast %cst_26 : f32 to vector<8x128xf32>
    %48 = vector.extract_strided_slice %46 {offsets = [0, 0], sizes = [24, 128], strides = [1, 1]} : vector<32x128xf32> to vector<24x128xf32>
    %49 = tpu.concatenate %47, %48 in 0 : vector<8x128xf32>, vector<24x128xf32> -> vector<32x128xf32>
    %50 = tpu.concatenate %49, %19, %27, %35 in 1 : vector<32x128xf32>, vector<32x128xf32>, vector<32x128xf32>, vector<32x128xf32> -> vector<32x512xf32>
    %c0_27 = arith.constant 0 : index
    %c0_28 = arith.constant 0 : index
    %51 = vector.load %arg5[%c0_27, %c0_28] : memref<512x128xf32, #tpu.memory_space<vmem>>, vector<512x128xf32>
    %cst_29 = arith.constant dense<0.000000e+00> : vector<32x128xf32>
    %52 = tpu.matmul %50, %51, %cst_29 {dimension_numbers = #tpu.dot_dimension_numbers<[1], [0], [0], [1], [0, 0, 1, 1], [], []>} : vector<32x512xf32>, vector<512x128xf32>, vector<32x128xf32> -> vector<32x128xf32>
    %c0_30 = arith.constant 0 : index
    %c0_31 = arith.constant 0 : index
    %53 = vector.load %arg6[%c0_30, %c0_31] : memref<1x128xf32, #tpu.memory_space<vmem>>, vector<1x128xf32>
    %54 = vector.broadcast %53 : vector<1x128xf32> to vector<32x128xf32>
    %55 = arith.addf %52, %54 : vector<32x128xf32>
    %cst_32 = arith.constant 0.000000e+00 : f32
    %56 = vector.broadcast %cst_32 : f32 to vector<32x128xf32>
    %57 = arith.maximumf %55, %56 : vector<32x128xf32>
    %cst_33 = arith.constant 0.000000e+00 : f32
    %58 = vector.broadcast %cst_33 : f32 to vector<8x128xf32>
    %59 = vector.extract_strided_slice %19 {offsets = [8, 0], sizes = [24, 128], strides = [1, 1]} : vector<32x128xf32> to vector<24x128xf32>
    %60 = tpu.concatenate %59, %58 in 0 : vector<24x128xf32>, vector<8x128xf32> -> vector<32x128xf32>
    %61 = tpu.concatenate %27, %35, %46, %60 in 1 : vector<32x128xf32>, vector<32x128xf32>, vector<32x128xf32>, vector<32x128xf32> -> vector<32x512xf32>
    %c0_34 = arith.constant 0 : index
    %c0_35 = arith.constant 0 : index
    %62 = vector.load %arg5[%c0_34, %c0_35] : memref<512x128xf32, #tpu.memory_space<vmem>>, vector<512x128xf32>
    %cst_36 = arith.constant dense<0.000000e+00> : vector<32x128xf32>
    %63 = tpu.matmul %61, %62, %cst_36 {dimension_numbers = #tpu.dot_dimension_numbers<[1], [0], [0], [1], [0, 0, 1, 1], [], []>} : vector<32x512xf32>, vector<512x128xf32>, vector<32x128xf32> -> vector<32x128xf32>
    %c0_37 = arith.constant 0 : index
    %c0_38 = arith.constant 0 : index
    %64 = vector.load %arg6[%c0_37, %c0_38] : memref<1x128xf32, #tpu.memory_space<vmem>>, vector<1x128xf32>
    %65 = vector.broadcast %64 : vector<1x128xf32> to vector<32x128xf32>
    %66 = arith.addf %63, %65 : vector<32x128xf32>
    %cst_39 = arith.constant 0.000000e+00 : f32
    %67 = vector.broadcast %cst_39 : f32 to vector<32x128xf32>
    %68 = arith.maximumf %66, %67 : vector<32x128xf32>
    %cst_40 = arith.constant 0.000000e+00 : f32
    %69 = vector.broadcast %cst_40 : f32 to vector<8x128xf32>
    %70 = vector.extract_strided_slice %68 {offsets = [0, 0], sizes = [24, 128], strides = [1, 1]} : vector<32x128xf32> to vector<24x128xf32>
    %71 = tpu.concatenate %69, %70 in 0 : vector<8x128xf32>, vector<24x128xf32> -> vector<32x128xf32>
    %cst_41 = arith.constant 0.000000e+00 : f32
    %72 = vector.broadcast %cst_41 : f32 to vector<8x128xf32>
    %73 = vector.extract_strided_slice %57 {offsets = [8, 0], sizes = [24, 128], strides = [1, 1]} : vector<32x128xf32> to vector<24x128xf32>
    %74 = tpu.concatenate %73, %72 in 0 : vector<24x128xf32>, vector<8x128xf32> -> vector<32x128xf32>
    %75 = tpu.concatenate %71, %57, %68, %74 in 1 : vector<32x128xf32>, vector<32x128xf32>, vector<32x128xf32>, vector<32x128xf32> -> vector<32x512xf32>
    %c0_42 = arith.constant 0 : index
    %c0_43 = arith.constant 0 : index
    %76 = vector.load %arg7[%c0_42, %c0_43] : memref<512x128xf32, #tpu.memory_space<vmem>>, vector<512x128xf32>
    %cst_44 = arith.constant dense<0.000000e+00> : vector<32x128xf32>
    %77 = tpu.matmul %75, %76, %cst_44 {dimension_numbers = #tpu.dot_dimension_numbers<[1], [0], [0], [1], [0, 0, 1, 1], [], []>} : vector<32x512xf32>, vector<512x128xf32>, vector<32x128xf32> -> vector<32x128xf32>
    %c0_45 = arith.constant 0 : index
    %c0_46 = arith.constant 0 : index
    %78 = vector.load %arg8[%c0_45, %c0_46] : memref<1x128xf32, #tpu.memory_space<vmem>>, vector<1x128xf32>
    %79 = vector.broadcast %78 : vector<1x128xf32> to vector<32x128xf32>
    %80 = arith.addf %77, %79 : vector<32x128xf32>
    %cst_47 = arith.constant 0.000000e+00 : f32
    %81 = vector.broadcast %cst_47 : f32 to vector<32x128xf32>
    %82 = arith.maximumf %80, %81 : vector<32x128xf32>
    %83 = vector.extract_strided_slice %82 {offsets = [0, 0], sizes = [8, 128], strides = [1, 1]} : vector<32x128xf32> to vector<8x128xf32>
    %84 = vector.extract_strided_slice %82 {offsets = [8, 0], sizes = [8, 128], strides = [1, 1]} : vector<32x128xf32> to vector<8x128xf32>
    %85 = vector.extract_strided_slice %82 {offsets = [16, 0], sizes = [8, 128], strides = [1, 1]} : vector<32x128xf32> to vector<8x128xf32>
    %86 = vector.extract_strided_slice %82 {offsets = [24, 0], sizes = [8, 128], strides = [1, 1]} : vector<32x128xf32> to vector<8x128xf32>
    %87 = tpu.concatenate %83, %84, %85, %86 in 1 : vector<8x128xf32>, vector<8x128xf32>, vector<8x128xf32>, vector<8x128xf32> -> vector<8x512xf32>
    %c0_48 = arith.constant 0 : index
    %c0_49 = arith.constant 0 : index
    %88 = vector.load %arg9[%c0_48, %c0_49] : memref<512x64xf32, #tpu.memory_space<vmem>>, vector<512x64xf32>
    %cst_50 = arith.constant dense<0.000000e+00> : vector<8x64xf32>
    %89 = tpu.matmul %87, %88, %cst_50 {dimension_numbers = #tpu.dot_dimension_numbers<[1], [0], [0], [1], [0, 0, 1, 1], [], []>} : vector<8x512xf32>, vector<512x64xf32>, vector<8x64xf32> -> vector<8x64xf32>
    %c0_51 = arith.constant 0 : index
    %c0_52 = arith.constant 0 : index
    %90 = vector.load %arg10[%c0_51, %c0_52] : memref<1x64xf32, #tpu.memory_space<vmem>>, vector<1x64xf32>
    %91 = vector.broadcast %90 : vector<1x64xf32> to vector<8x64xf32>
    %92 = arith.addf %89, %91 : vector<8x64xf32>
    %cst_53 = arith.constant 0.000000e+00 : f32
    %93 = vector.broadcast %cst_53 : f32 to vector<8x64xf32>
    %94 = arith.maximumf %92, %93 : vector<8x64xf32>
    %c0_54 = arith.constant 0 : index
    %c0_55 = arith.constant 0 : index
    %95 = vector.load %arg11[%c0_54, %c0_55] : memref<64x128xf32, #tpu.memory_space<vmem>>, vector<64x128xf32>
    %cst_56 = arith.constant dense<0.000000e+00> : vector<8x128xf32>
    %96 = tpu.matmul %94, %95, %cst_56 {dimension_numbers = #tpu.dot_dimension_numbers<[1], [0], [0], [1], [0, 0, 1, 1], [], []>} : vector<8x64xf32>, vector<64x128xf32>, vector<8x128xf32> -> vector<8x128xf32>
    %c0_57 = arith.constant 0 : index
    %c0_58 = arith.constant 0 : index
    %97 = vector.load %arg12[%c0_57, %c0_58] : memref<1x128xf32, #tpu.memory_space<vmem>>, vector<1x128xf32>
    %98 = vector.broadcast %97 : vector<1x128xf32> to vector<8x128xf32>
    %99 = arith.addf %96, %98 : vector<8x128xf32>
    %cst_59 = arith.constant 0.000000e+00 : f32
    %100 = vector.broadcast %cst_59 : f32 to vector<8x128xf32>
    %101 = arith.maximumf %99, %100 : vector<8x128xf32>
    %c0_60 = arith.constant 0 : index
    %c0_61 = arith.constant 0 : index
    %102 = vector.load %arg13[%c0_60, %c0_61] : memref<128x32xf32, #tpu.memory_space<vmem>>, vector<128x32xf32>
    %cst_62 = arith.constant dense<0.000000e+00> : vector<8x32xf32>
    %103 = tpu.matmul %101, %102, %cst_62 {dimension_numbers = #tpu.dot_dimension_numbers<[1], [0], [0], [1], [0, 0, 1, 1], [], []>} : vector<8x128xf32>, vector<128x32xf32>, vector<8x32xf32> -> vector<8x32xf32>
    %c0_63 = arith.constant 0 : index
    %c0_64 = arith.constant 0 : index
    %104 = vector.load %arg14[%c0_63, %c0_64] : memref<1x32xf32, #tpu.memory_space<vmem>>, vector<1x32xf32>
    %105 = vector.broadcast %104 : vector<1x32xf32> to vector<8x32xf32>
    %106 = arith.addf %103, %105 : vector<8x32xf32>
    %c0_65 = arith.constant 0 : index
    %c0_66 = arith.constant 0 : index
    %107 = vector.load %arg29[%c0_65, %c0_66] : memref<8x32xf32, #tpu.memory_space<vmem>>, vector<8x32xf32>
    tpu.vector_store %arg29[%c0_65, %c0_66], %106 {strides = array<i32>} : memref<8x32xf32, #tpu.memory_space<vmem>>, vector<8x32xf32>,
    %108 = vector.extract_strided_slice %106 {offsets = [0, 0], sizes = [8, 16], strides = [1, 1]} : vector<8x32xf32> to vector<8x16xf32>
    %109 = vector.extract_strided_slice %106 {offsets = [0, 16], sizes = [8, 16], strides = [1, 1]} : vector<8x32xf32> to vector<8x16xf32>
    %c0_67 = arith.constant 0 : index
    %c0_68 = arith.constant 0 : index
    %110 = vector.load %arg2[%c0_67, %c0_68] : memref<8x16xf32, #tpu.memory_space<vmem>>, vector<8x16xf32>
    %cst_69 = arith.constant 5.000000e-01 : f32
    %111 = vector.broadcast %cst_69 : f32 to vector<8x16xf32>
    %112 = arith.mulf %111, %109 : vector<8x16xf32>
    %113 = math.exp %112 : vector<8x16xf32>
    %114 = arith.mulf %110, %113 : vector<8x16xf32>
    %115 = arith.addf %108, %114 : vector<8x16xf32>
    %c0_70 = arith.constant 0 : index
    %c0_71 = arith.constant 0 : index
    %116 = vector.load %arg15[%c0_70, %c0_71] : memref<16x64xf32, #tpu.memory_space<vmem>>, vector<16x64xf32>
    %cst_72 = arith.constant dense<0.000000e+00> : vector<8x64xf32>
    %117 = tpu.matmul %115, %116, %cst_72 {dimension_numbers = #tpu.dot_dimension_numbers<[1], [0], [0], [1], [0, 0, 1, 1], [], []>} : vector<8x16xf32>, vector<16x64xf32>, vector<8x64xf32> -> vector<8x64xf32>
    %c0_73 = arith.constant 0 : index
    %c0_74 = arith.constant 0 : index
    %118 = vector.load %arg16[%c0_73, %c0_74] : memref<1x64xf32, #tpu.memory_space<vmem>>, vector<1x64xf32>
    %119 = vector.broadcast %118 : vector<1x64xf32> to vector<8x64xf32>
    %120 = arith.addf %117, %119 : vector<8x64xf32>
    %c0_75 = arith.constant 0 : index
    %c0_76 = arith.constant 0 : index
    %121 = vector.load %arg17[%c0_75, %c0_76] : memref<64x1024xf32, #tpu.memory_space<vmem>>, vector<64x1024xf32>
    %cst_77 = arith.constant dense<0.000000e+00> : vector<8x1024xf32>
    %122 = tpu.matmul %120, %121, %cst_77 {dimension_numbers = #tpu.dot_dimension_numbers<[1], [0], [0], [1], [0, 0, 1, 1], [], []>} : vector<8x64xf32>, vector<64x1024xf32>, vector<8x1024xf32> -> vector<8x1024xf32>
    %c0_78 = arith.constant 0 : index
    %c0_79 = arith.constant 0 : index
    %123 = vector.load %arg18[%c0_78, %c0_79] : memref<1x1024xf32, #tpu.memory_space<vmem>>, vector<1x1024xf32>
    %124 = vector.broadcast %123 : vector<1x1024xf32> to vector<8x1024xf32>
    %125 = arith.addf %122, %124 : vector<8x1024xf32>
    %cst_80 = arith.constant 0.000000e+00 : f32
    %126 = vector.broadcast %cst_80 : f32 to vector<8x1024xf32>
    %127 = arith.maximumf %125, %126 : vector<8x1024xf32>
    %128 = vector.extract_strided_slice %127 {offsets = [0, 0], sizes = [8, 256], strides = [1, 1]} : vector<8x1024xf32> to vector<8x256xf32>
    %129 = vector.extract_strided_slice %127 {offsets = [0, 256], sizes = [8, 256], strides = [1, 1]} : vector<8x1024xf32> to vector<8x256xf32>
    %130 = vector.extract_strided_slice %127 {offsets = [0, 512], sizes = [8, 256], strides = [1, 1]} : vector<8x1024xf32> to vector<8x256xf32>
    %131 = vector.extract_strided_slice %127 {offsets = [0, 768], sizes = [8, 256], strides = [1, 1]} : vector<8x1024xf32> to vector<8x256xf32>
    %132 = tpu.concatenate %128, %129, %130, %131 in 0 : vector<8x256xf32>, vector<8x256xf32>, vector<8x256xf32>, vector<8x256xf32> -> vector<32x256xf32>
    %cst_81 = arith.constant 0.000000e+00 : f32
    %133 = vector.broadcast %cst_81 : f32 to vector<8x256xf32>
    %134 = vector.extract_strided_slice %132 {offsets = [0, 0], sizes = [24, 256], strides = [1, 1]} : vector<32x256xf32> to vector<24x256xf32>
    %135 = tpu.concatenate %133, %134 in 0 : vector<8x256xf32>, vector<24x256xf32> -> vector<32x256xf32>
    %136 = tpu.concatenate %132, %135 in 1 : vector<32x256xf32>, vector<32x256xf32> -> vector<32x512xf32>
    %c0_82 = arith.constant 0 : index
    %c0_83 = arith.constant 0 : index
    %137 = vector.load %arg19[%c0_82, %c0_83] : memref<512x256xf32, #tpu.memory_space<vmem>>, vector<512x256xf32>
    %cst_84 = arith.constant dense<0.000000e+00> : vector<32x256xf32>
    %138 = tpu.matmul %136, %137, %cst_84 {dimension_numbers = #tpu.dot_dimension_numbers<[1], [0], [0], [1], [0, 0, 1, 1], [], []>} : vector<32x512xf32>, vector<512x256xf32>, vector<32x256xf32> -> vector<32x256xf32>
    %c0_85 = arith.constant 0 : index
    %c0_86 = arith.constant 0 : index
    %139 = vector.load %arg21[%c0_85, %c0_86] : memref<1x256xf32, #tpu.memory_space<vmem>>, vector<1x256xf32>
    %140 = vector.broadcast %139 : vector<1x256xf32> to vector<32x256xf32>
    %141 = arith.addf %138, %140 : vector<32x256xf32>
    %cst_87 = arith.constant 0.000000e+00 : f32
    %142 = vector.broadcast %cst_87 : f32 to vector<32x256xf32>
    %143 = arith.maximumf %141, %142 : vector<32x256xf32>
    %cst_88 = arith.constant 0.000000e+00 : f32
    %144 = vector.broadcast %cst_88 : f32 to vector<8x256xf32>
    %145 = vector.extract_strided_slice %132 {offsets = [8, 0], sizes = [24, 256], strides = [1, 1]} : vector<32x256xf32> to vector<24x256xf32>
    %146 = tpu.concatenate %145, %144 in 0 : vector<24x256xf32>, vector<8x256xf32> -> vector<32x256xf32>
    %147 = tpu.concatenate %146, %132 in 1 : vector<32x256xf32>, vector<32x256xf32> -> vector<32x512xf32>
    %c0_89 = arith.constant 0 : index
    %c0_90 = arith.constant 0 : index
    %148 = vector.load %arg20[%c0_89, %c0_90] : memref<512x256xf32, #tpu.memory_space<vmem>>, vector<512x256xf32>
    %cst_91 = arith.constant dense<0.000000e+00> : vector<32x256xf32>
    %149 = tpu.matmul %147, %148, %cst_91 {dimension_numbers = #tpu.dot_dimension_numbers<[1], [0], [0], [1], [0, 0, 1, 1], [], []>} : vector<32x512xf32>, vector<512x256xf32>, vector<32x256xf32> -> vector<32x256xf32>
    %c0_92 = arith.constant 0 : index
    %c0_93 = arith.constant 0 : index
    %150 = vector.load %arg21[%c0_92, %c0_93] : memref<1x256xf32, #tpu.memory_space<vmem>>, vector<1x256xf32>
    %151 = vector.broadcast %150 : vector<1x256xf32> to vector<32x256xf32>
    %152 = arith.addf %149, %151 : vector<32x256xf32>
    %cst_94 = arith.constant 0.000000e+00 : f32
    %153 = vector.broadcast %cst_94 : f32 to vector<32x256xf32>
    %154 = arith.maximumf %152, %153 : vector<32x256xf32>
    %cst_95 = arith.constant 0.000000e+00 : f32
    %155 = vector.broadcast %cst_95 : f32 to vector<8x256xf32>
    %156 = vector.extract_strided_slice %154 {offsets = [0, 0], sizes = [24, 256], strides = [1, 1]} : vector<32x256xf32> to vector<24x256xf32>
    %157 = tpu.concatenate %155, %156 in 0 : vector<8x256xf32>, vector<24x256xf32> -> vector<32x256xf32>
    %158 = tpu.concatenate %143, %157 in 1 : vector<32x256xf32>, vector<32x256xf32> -> vector<32x512xf32>
    %c0_96 = arith.constant 0 : index
    %c0_97 = arith.constant 0 : index
    %159 = vector.load %arg22[%c0_96, %c0_97] : memref<512x256xf32, #tpu.memory_space<vmem>>, vector<512x256xf32>
    %cst_98 = arith.constant dense<0.000000e+00> : vector<32x256xf32>
    %160 = tpu.matmul %158, %159, %cst_98 {dimension_numbers = #tpu.dot_dimension_numbers<[1], [0], [0], [1], [0, 0, 1, 1], [], []>} : vector<32x512xf32>, vector<512x256xf32>, vector<32x256xf32> -> vector<32x256xf32>
    %c0_99 = arith.constant 0 : index
    %c0_100 = arith.constant 0 : index
    %161 = vector.load %arg24[%c0_99, %c0_100] : memref<1x256xf32, #tpu.memory_space<vmem>>, vector<1x256xf32>
    %162 = vector.broadcast %161 : vector<1x256xf32> to vector<32x256xf32>
    %163 = arith.addf %160, %162 : vector<32x256xf32>
    %cst_101 = arith.constant 0.000000e+00 : f32
    %164 = vector.broadcast %cst_101 : f32 to vector<32x256xf32>
    %165 = arith.maximumf %163, %164 : vector<32x256xf32>
    %166 = tpu.concatenate %154, %143 in 1 : vector<32x256xf32>, vector<32x256xf32> -> vector<32x512xf32>
    %c0_102 = arith.constant 0 : index
    %c0_103 = arith.constant 0 : index
    %167 = vector.load %arg23[%c0_102, %c0_103] : memref<512x256xf32, #tpu.memory_space<vmem>>, vector<512x256xf32>
    %cst_104 = arith.constant dense<0.000000e+00> : vector<32x256xf32>
    %168 = tpu.matmul %166, %167, %cst_104 {dimension_numbers = #tpu.dot_dimension_numbers<[1], [0], [0], [1], [0, 0, 1, 1], [], []>} : vector<32x512xf32>, vector<512x256xf32>, vector<32x256xf32> -> vector<32x256xf32>
    %c0_105 = arith.constant 0 : index
    %c0_106 = arith.constant 0 : index
    %169 = vector.load %arg24[%c0_105, %c0_106] : memref<1x256xf32, #tpu.memory_space<vmem>>, vector<1x256xf32>
    %170 = vector.broadcast %169 : vector<1x256xf32> to vector<32x256xf32>
    %171 = arith.addf %168, %170 : vector<32x256xf32>
    %cst_107 = arith.constant 0.000000e+00 : f32
    %172 = vector.broadcast %cst_107 : f32 to vector<32x256xf32>
    %173 = arith.maximumf %171, %172 : vector<32x256xf32>
    %174 = tpu.concatenate %154, %143 in 1 : vector<32x256xf32>, vector<32x256xf32> -> vector<32x512xf32>
    %c0_108 = arith.constant 0 : index
    %c0_109 = arith.constant 0 : index
    %175 = vector.load %arg22[%c0_108, %c0_109] : memref<512x256xf32, #tpu.memory_space<vmem>>, vector<512x256xf32>
    %cst_110 = arith.constant dense<0.000000e+00> : vector<32x256xf32>
    %176 = tpu.matmul %174, %175, %cst_110 {dimension_numbers = #tpu.dot_dimension_numbers<[1], [0], [0], [1], [0, 0, 1, 1], [], []>} : vector<32x512xf32>, vector<512x256xf32>, vector<32x256xf32> -> vector<32x256xf32>
    %c0_111 = arith.constant 0 : index
    %c0_112 = arith.constant 0 : index
    %177 = vector.load %arg24[%c0_111, %c0_112] : memref<1x256xf32, #tpu.memory_space<vmem>>, vector<1x256xf32>
    %178 = vector.broadcast %177 : vector<1x256xf32> to vector<32x256xf32>
    %179 = arith.addf %176, %178 : vector<32x256xf32>
    %cst_113 = arith.constant 0.000000e+00 : f32
    %180 = vector.broadcast %cst_113 : f32 to vector<32x256xf32>
    %181 = arith.maximumf %179, %180 : vector<32x256xf32>
    %cst_114 = arith.constant 0.000000e+00 : f32
    %182 = vector.broadcast %cst_114 : f32 to vector<8x256xf32>
    %183 = vector.extract_strided_slice %143 {offsets = [8, 0], sizes = [24, 256], strides = [1, 1]} : vector<32x256xf32> to vector<24x256xf32>
    %184 = tpu.concatenate %183, %182 in 0 : vector<24x256xf32>, vector<8x256xf32> -> vector<32x256xf32>
    %185 = tpu.concatenate %184, %154 in 1 : vector<32x256xf32>, vector<32x256xf32> -> vector<32x512xf32>
    %c0_115 = arith.constant 0 : index
    %c0_116 = arith.constant 0 : index
    %186 = vector.load %arg23[%c0_115, %c0_116] : memref<512x256xf32, #tpu.memory_space<vmem>>, vector<512x256xf32>
    %cst_117 = arith.constant dense<0.000000e+00> : vector<32x256xf32>
    %187 = tpu.matmul %185, %186, %cst_117 {dimension_numbers = #tpu.dot_dimension_numbers<[1], [0], [0], [1], [0, 0, 1, 1], [], []>} : vector<32x512xf32>, vector<512x256xf32>, vector<32x256xf32> -> vector<32x256xf32>
    %c0_118 = arith.constant 0 : index
    %c0_119 = arith.constant 0 : index
    %188 = vector.load %arg24[%c0_118, %c0_119] : memref<1x256xf32, #tpu.memory_space<vmem>>, vector<1x256xf32>
    %189 = vector.broadcast %188 : vector<1x256xf32> to vector<32x256xf32>
    %190 = arith.addf %187, %189 : vector<32x256xf32>
    %cst_120 = arith.constant 0.000000e+00 : f32
    %191 = vector.broadcast %cst_120 : f32 to vector<32x256xf32>
    %192 = arith.maximumf %190, %191 : vector<32x256xf32>
    %cst_121 = arith.constant 0.000000e+00 : f32
    %193 = vector.broadcast %cst_121 : f32 to vector<8x256xf32>
    %194 = vector.extract_strided_slice %192 {offsets = [0, 0], sizes = [24, 256], strides = [1, 1]} : vector<32x256xf32> to vector<24x256xf32>
    %195 = tpu.concatenate %193, %194 in 0 : vector<8x256xf32>, vector<24x256xf32> -> vector<32x256xf32>
    %196 = tpu.concatenate %165, %195 in 1 : vector<32x256xf32>, vector<32x256xf32> -> vector<32x512xf32>
    %c0_122 = arith.constant 0 : index
    %c0_123 = arith.constant 0 : index
    %197 = vector.load %arg25[%c0_122, %c0_123] : memref<512x32xf32, #tpu.memory_space<vmem>>, vector<512x32xf32>
    %cst_124 = arith.constant dense<0.000000e+00> : vector<32x32xf32>
    %198 = tpu.matmul %196, %197, %cst_124 {dimension_numbers = #tpu.dot_dimension_numbers<[1], [0], [0], [1], [0, 0, 1, 1], [], []>} : vector<32x512xf32>, vector<512x32xf32>, vector<32x32xf32> -> vector<32x32xf32>
    %c0_125 = arith.constant 0 : index
    %c0_126 = arith.constant 0 : index
    %199 = vector.load %arg27[%c0_125, %c0_126] : memref<1x32xf32, #tpu.memory_space<vmem>>, vector<1x32xf32>
    %200 = vector.broadcast %199 : vector<1x32xf32> to vector<32x32xf32>
    %201 = arith.addf %198, %200 : vector<32x32xf32>
    %202 = tpu.concatenate %173, %165 in 1 : vector<32x256xf32>, vector<32x256xf32> -> vector<32x512xf32>
    %c0_127 = arith.constant 0 : index
    %c0_128 = arith.constant 0 : index
    %203 = vector.load %arg26[%c0_127, %c0_128] : memref<512x32xf32, #tpu.memory_space<vmem>>, vector<512x32xf32>
    %cst_129 = arith.constant dense<0.000000e+00> : vector<32x32xf32>
    %204 = tpu.matmul %202, %203, %cst_129 {dimension_numbers = #tpu.dot_dimension_numbers<[1], [0], [0], [1], [0, 0, 1, 1], [], []>} : vector<32x512xf32>, vector<512x32xf32>, vector<32x32xf32> -> vector<32x32xf32>
    %c0_130 = arith.constant 0 : index
    %c0_131 = arith.constant 0 : index
    %205 = vector.load %arg27[%c0_130, %c0_131] : memref<1x32xf32, #tpu.memory_space<vmem>>, vector<1x32xf32>
    %206 = vector.broadcast %205 : vector<1x32xf32> to vector<32x32xf32>
    %207 = arith.addf %204, %206 : vector<32x32xf32>
    %208 = tpu.concatenate %173, %165 in 1 : vector<32x256xf32>, vector<32x256xf32> -> vector<32x512xf32>
    %c0_132 = arith.constant 0 : index
    %c0_133 = arith.constant 0 : index
    %209 = vector.load %arg25[%c0_132, %c0_133] : memref<512x32xf32, #tpu.memory_space<vmem>>, vector<512x32xf32>
    %cst_134 = arith.constant dense<0.000000e+00> : vector<32x32xf32>
    %210 = tpu.matmul %208, %209, %cst_134 {dimension_numbers = #tpu.dot_dimension_numbers<[1], [0], [0], [1], [0, 0, 1, 1], [], []>} : vector<32x512xf32>, vector<512x32xf32>, vector<32x32xf32> -> vector<32x32xf32>
    %c0_135 = arith.constant 0 : index
    %c0_136 = arith.constant 0 : index
    %211 = vector.load %arg27[%c0_135, %c0_136] : memref<1x32xf32, #tpu.memory_space<vmem>>, vector<1x32xf32>
    %212 = vector.broadcast %211 : vector<1x32xf32> to vector<32x32xf32>
    %213 = arith.addf %210, %212 : vector<32x32xf32>
    %214 = tpu.concatenate %181, %173 in 1 : vector<32x256xf32>, vector<32x256xf32> -> vector<32x512xf32>
    %c0_137 = arith.constant 0 : index
    %c0_138 = arith.constant 0 : index
    %215 = vector.load %arg26[%c0_137, %c0_138] : memref<512x32xf32, #tpu.memory_space<vmem>>, vector<512x32xf32>
    %cst_139 = arith.constant dense<0.000000e+00> : vector<32x32xf32>
    %216 = tpu.matmul %214, %215, %cst_139 {dimension_numbers = #tpu.dot_dimension_numbers<[1], [0], [0], [1], [0, 0, 1, 1], [], []>} : vector<32x512xf32>, vector<512x32xf32>, vector<32x32xf32> -> vector<32x32xf32>
    %c0_140 = arith.constant 0 : index
    %c0_141 = arith.constant 0 : index
    %217 = vector.load %arg27[%c0_140, %c0_141] : memref<1x32xf32, #tpu.memory_space<vmem>>, vector<1x32xf32>
    %218 = vector.broadcast %217 : vector<1x32xf32> to vector<32x32xf32>
    %219 = arith.addf %216, %218 : vector<32x32xf32>
    %220 = tpu.concatenate %181, %173 in 1 : vector<32x256xf32>, vector<32x256xf32> -> vector<32x512xf32>
    %c0_142 = arith.constant 0 : index
    %c0_143 = arith.constant 0 : index
    %221 = vector.load %arg25[%c0_142, %c0_143] : memref<512x32xf32, #tpu.memory_space<vmem>>, vector<512x32xf32>
    %cst_144 = arith.constant dense<0.000000e+00> : vector<32x32xf32>
    %222 = tpu.matmul %220, %221, %cst_144 {dimension_numbers = #tpu.dot_dimension_numbers<[1], [0], [0], [1], [0, 0, 1, 1], [], []>} : vector<32x512xf32>, vector<512x32xf32>, vector<32x32xf32> -> vector<32x32xf32>
    %c0_145 = arith.constant 0 : index
    %c0_146 = arith.constant 0 : index
    %223 = vector.load %arg27[%c0_145, %c0_146] : memref<1x32xf32, #tpu.memory_space<vmem>>, vector<1x32xf32>
    %224 = vector.broadcast %223 : vector<1x32xf32> to vector<32x32xf32>
    %225 = arith.addf %222, %224 : vector<32x32xf32>
    %226 = tpu.concatenate %192, %181 in 1 : vector<32x256xf32>, vector<32x256xf32> -> vector<32x512xf32>
    %c0_147 = arith.constant 0 : index
    %c0_148 = arith.constant 0 : index
    %227 = vector.load %arg26[%c0_147, %c0_148] : memref<512x32xf32, #tpu.memory_space<vmem>>, vector<512x32xf32>
    %cst_149 = arith.constant dense<0.000000e+00> : vector<32x32xf32>
    %228 = tpu.matmul %226, %227, %cst_149 {dimension_numbers = #tpu.dot_dimension_numbers<[1], [0], [0], [1], [0, 0, 1, 1], [], []>} : vector<32x512xf32>, vector<512x32xf32>, vector<32x32xf32> -> vector<32x32xf32>
    %c0_150 = arith.constant 0 : index
    %c0_151 = arith.constant 0 : index
    %229 = vector.load %arg27[%c0_150, %c0_151] : memref<1x32xf32, #tpu.memory_space<vmem>>, vector<1x32xf32>
    %230 = vector.broadcast %229 : vector<1x32xf32> to vector<32x32xf32>
    %231 = arith.addf %228, %230 : vector<32x32xf32>
    %232 = tpu.concatenate %192, %181 in 1 : vector<32x256xf32>, vector<32x256xf32> -> vector<32x512xf32>
    %c0_152 = arith.constant 0 : index
    %c0_153 = arith.constant 0 : index
    %233 = vector.load %arg25[%c0_152, %c0_153] : memref<512x32xf32, #tpu.memory_space<vmem>>, vector<512x32xf32>
    %cst_154 = arith.constant dense<0.000000e+00> : vector<32x32xf32>
    %234 = tpu.matmul %232, %233, %cst_154 {dimension_numbers = #tpu.dot_dimension_numbers<[1], [0], [0], [1], [0, 0, 1, 1], [], []>} : vector<32x512xf32>, vector<512x32xf32>, vector<32x32xf32> -> vector<32x32xf32>
    %c0_155 = arith.constant 0 : index
    %c0_156 = arith.constant 0 : index
    %235 = vector.load %arg27[%c0_155, %c0_156] : memref<1x32xf32, #tpu.memory_space<vmem>>, vector<1x32xf32>
    %236 = vector.broadcast %235 : vector<1x32xf32> to vector<32x32xf32>
    %237 = arith.addf %234, %236 : vector<32x32xf32>
    %cst_157 = arith.constant 0.000000e+00 : f32
    %238 = vector.broadcast %cst_157 : f32 to vector<8x256xf32>
    %239 = vector.extract_strided_slice %165 {offsets = [8, 0], sizes = [24, 256], strides = [1, 1]} : vector<32x256xf32> to vector<24x256xf32>
    %240 = tpu.concatenate %239, %238 in 0 : vector<24x256xf32>, vector<8x256xf32> -> vector<32x256xf32>
    %241 = tpu.concatenate %240, %192 in 1 : vector<32x256xf32>, vector<32x256xf32> -> vector<32x512xf32>
    %c0_158 = arith.constant 0 : index
    %c0_159 = arith.constant 0 : index
    %242 = vector.load %arg26[%c0_158, %c0_159] : memref<512x32xf32, #tpu.memory_space<vmem>>, vector<512x32xf32>
    %cst_160 = arith.constant dense<0.000000e+00> : vector<32x32xf32>
    %243 = tpu.matmul %241, %242, %cst_160 {dimension_numbers = #tpu.dot_dimension_numbers<[1], [0], [0], [1], [0, 0, 1, 1], [], []>} : vector<32x512xf32>, vector<512x32xf32>, vector<32x32xf32> -> vector<32x32xf32>
    %c0_161 = arith.constant 0 : index
    %c0_162 = arith.constant 0 : index
    %244 = vector.load %arg27[%c0_161, %c0_162] : memref<1x32xf32, #tpu.memory_space<vmem>>, vector<1x32xf32>
    %245 = vector.broadcast %244 : vector<1x32xf32> to vector<32x32xf32>
    %246 = arith.addf %243, %245 : vector<32x32xf32>
    %247 = tpu.concatenate %201, %207, %213, %219, %225, %231, %237, %246 in 1 : vector<32x32xf32>, vector<32x32xf32>, vector<32x32xf32>, vector<32x32xf32>, vector<32x32xf32>, vector<32x32xf32>, vector<32x32xf32>, vector<32x32xf32> -> vector<32x256xf32>
    %cst_163 = arith.constant 0.000000e+00 : f32
    %248 = vector.broadcast %cst_163 : f32 to vector<32x256xf32>
    %249 = arith.subf %248, %247 : vector<32x256xf32>
    %250 = math.exp %249 : vector<32x256xf32>
    %cst_164 = arith.constant 1.000000e+00 : f32
    %251 = vector.broadcast %cst_164 : f32 to vector<32x256xf32>
    %252 = arith.addf %251, %250 : vector<32x256xf32>
    %cst_165 = arith.constant 1.000000e+00 : f32
    %253 = vector.broadcast %cst_165 : f32 to vector<32x256xf32>
    %254 = arith.divf %253, %252 : vector<32x256xf32>
    %c0_166 = arith.constant 0 : index
    %c0_167 = arith.constant 0 : index
    %255 = vector.load %arg28[%c0_166, %c0_167] : memref<32x256xf32, #tpu.memory_space<vmem>>, vector<32x256xf32>
    tpu.vector_store %arg28[%c0_166, %c0_167], %254 {strides = array<i32>} : memref<32x256xf32, #tpu.memory_space<vmem>>, vector<32x256xf32>,
    return
  }
  func.func @transform_0(%arg0: i32) -> (i32, i32) {
    %c0_i32 = arith.constant 0 : i32
    %c0_i32_0 = arith.constant 0 : i32
    return %arg0, %c0_i32 : i32, i32
  }
  func.func @transform_1(%arg0: i32) -> (i32, i32) {
    %c0_i32 = arith.constant 0 : i32
    %c0_i32_0 = arith.constant 0 : i32
    return %arg0, %c0_i32 : i32, i32
  }
  func.func @transform_2(%arg0: i32) -> (i32, i32) {
    %c0_i32 = arith.constant 0 : i32
    %c0_i32_0 = arith.constant 0 : i32
    %c0_i32_1 = arith.constant 0 : i32
    return %c0_i32, %c0_i32_0 : i32, i32
  }
  func.func @transform_3(%arg0: i32) -> (i32, i32) {
    %c0_i32 = arith.constant 0 : i32
    %c0_i32_0 = arith.constant 0 : i32
    %c0_i32_1 = arith.constant 0 : i32
    return %c0_i32, %c0_i32_0 : i32, i32
  }
  func.func @transform_4(%arg0: i32) -> (i32, i32) {
    %c0_i32 = arith.constant 0 : i32
    %c0_i32_0 = arith.constant 0 : i32
    %c0_i32_1 = arith.constant 0 : i32
    return %c0_i32, %c0_i32_0 : i32, i32
  }
  func.func @transform_5(%arg0: i32) -> (i32, i32) {
    %c0_i32 = arith.constant 0 : i32
    %c0_i32_0 = arith.constant 0 : i32
    %c0_i32_1 = arith.constant 0 : i32
    return %c0_i32, %c0_i32_0 : i32, i32
  }
  func.func @transform_6(%arg0: i32) -> (i32, i32) {
    %c0_i32 = arith.constant 0 : i32
    %c0_i32_0 = arith.constant 0 : i32
    %c0_i32_1 = arith.constant 0 : i32
    return %c0_i32, %c0_i32_0 : i32, i32
  }
  func.func @transform_7(%arg0: i32) -> (i32, i32) {
    %c0_i32 = arith.constant 0 : i32
    %c0_i32_0 = arith.constant 0 : i32
    %c0_i32_1 = arith.constant 0 : i32
    return %c0_i32, %c0_i32_0 : i32, i32
  }
  func.func @transform_8(%arg0: i32) -> (i32, i32) {
    %c0_i32 = arith.constant 0 : i32
    %c0_i32_0 = arith.constant 0 : i32
    %c0_i32_1 = arith.constant 0 : i32
    return %c0_i32, %c0_i32_0 : i32, i32
  }
  func.func @transform_9(%arg0: i32) -> (i32, i32) {
    %c0_i32 = arith.constant 0 : i32
    %c0_i32_0 = arith.constant 0 : i32
    %c0_i32_1 = arith.constant 0 : i32
    return %c0_i32, %c0_i32_0 : i32, i32
  }
  func.func @transform_10(%arg0: i32) -> (i32, i32) {
    %c0_i32 = arith.constant 0 : i32
    %c0_i32_0 = arith.constant 0 : i32
    %c0_i32_1 = arith.constant 0 : i32
    return %c0_i32, %c0_i32_0 : i32, i32
  }
  func.func @transform_11(%arg0: i32) -> (i32, i32) {
    %c0_i32 = arith.constant 0 : i32
    %c0_i32_0 = arith.constant 0 : i32
    %c0_i32_1 = arith.constant 0 : i32
    return %c0_i32, %c0_i32_0 : i32, i32
  }
  func.func @transform_12(%arg0: i32) -> (i32, i32) {
    %c0_i32 = arith.constant 0 : i32
    %c0_i32_0 = arith.constant 0 : i32
    %c0_i32_1 = arith.constant 0 : i32
    return %c0_i32, %c0_i32_0 : i32, i32
  }
  func.func @transform_13(%arg0: i32) -> (i32, i32) {
    %c0_i32 = arith.constant 0 : i32
    %c0_i32_0 = arith.constant 0 : i32
    %c0_i32_1 = arith.constant 0 : i32
    return %c0_i32, %c0_i32_0 : i32, i32
  }
  func.func @transform_14(%arg0: i32) -> (i32, i32) {
    %c0_i32 = arith.constant 0 : i32
    %c0_i32_0 = arith.constant 0 : i32
    %c0_i32_1 = arith.constant 0 : i32
    return %c0_i32, %c0_i32_0 : i32, i32
  }
  func.func @transform_15(%arg0: i32) -> (i32, i32) {
    %c0_i32 = arith.constant 0 : i32
    %c0_i32_0 = arith.constant 0 : i32
    %c0_i32_1 = arith.constant 0 : i32
    return %c0_i32, %c0_i32_0 : i32, i32
  }
  func.func @transform_16(%arg0: i32) -> (i32, i32) {
    %c0_i32 = arith.constant 0 : i32
    %c0_i32_0 = arith.constant 0 : i32
    %c0_i32_1 = arith.constant 0 : i32
    return %c0_i32, %c0_i32_0 : i32, i32
  }
  func.func @transform_17(%arg0: i32) -> (i32, i32) {
    %c0_i32 = arith.constant 0 : i32
    %c0_i32_0 = arith.constant 0 : i32
    %c0_i32_1 = arith.constant 0 : i32
    return %c0_i32, %c0_i32_0 : i32, i32
  }
  func.func @transform_18(%arg0: i32) -> (i32, i32) {
    %c0_i32 = arith.constant 0 : i32
    %c0_i32_0 = arith.constant 0 : i32
    %c0_i32_1 = arith.constant 0 : i32
    return %c0_i32, %c0_i32_0 : i32, i32
  }
  func.func @transform_19(%arg0: i32) -> (i32, i32) {
    %c0_i32 = arith.constant 0 : i32
    %c0_i32_0 = arith.constant 0 : i32
    %c0_i32_1 = arith.constant 0 : i32
    return %c0_i32, %c0_i32_0 : i32, i32
  }
  func.func @transform_20(%arg0: i32) -> (i32, i32) {
    %c0_i32 = arith.constant 0 : i32
    %c0_i32_0 = arith.constant 0 : i32
    %c0_i32_1 = arith.constant 0 : i32
    return %c0_i32, %c0_i32_0 : i32, i32
  }
  func.func @transform_21(%arg0: i32) -> (i32, i32) {
    %c0_i32 = arith.constant 0 : i32
    %c0_i32_0 = arith.constant 0 : i32
    %c0_i32_1 = arith.constant 0 : i32
    return %c0_i32, %c0_i32_0 : i32, i32
  }
  func.func @transform_22(%arg0: i32) -> (i32, i32) {
    %c0_i32 = arith.constant 0 : i32
    %c0_i32_0 = arith.constant 0 : i32
    %c0_i32_1 = arith.constant 0 : i32
    return %c0_i32, %c0_i32_0 : i32, i32
  }
  func.func @transform_23(%arg0: i32) -> (i32, i32) {
    %c0_i32 = arith.constant 0 : i32
    %c0_i32_0 = arith.constant 0 : i32
    %c0_i32_1 = arith.constant 0 : i32
    return %c0_i32, %c0_i32_0 : i32, i32
  }
  func.func @transform_24(%arg0: i32) -> (i32, i32) {
    %c0_i32 = arith.constant 0 : i32
    %c0_i32_0 = arith.constant 0 : i32
    %c0_i32_1 = arith.constant 0 : i32
    return %c0_i32, %c0_i32_0 : i32, i32
  }
  func.func @transform_25(%arg0: i32) -> (i32, i32) {
    %c0_i32 = arith.constant 0 : i32
    %c0_i32_0 = arith.constant 0 : i32
    %c0_i32_1 = arith.constant 0 : i32
    return %c0_i32, %c0_i32_0 : i32, i32
  }
  func.func @transform_26(%arg0: i32) -> (i32, i32) {
    %c0_i32 = arith.constant 0 : i32
    %c0_i32_0 = arith.constant 0 : i32
    %c0_i32_1 = arith.constant 0 : i32
    return %c0_i32, %c0_i32_0 : i32, i32
  }
  func.func @transform_27(%arg0: i32) -> (i32, i32) {
    %c0_i32 = arith.constant 0 : i32
    %c0_i32_0 = arith.constant 0 : i32
    return %arg0, %c0_i32 : i32, i32
  }
  func.func @transform_28(%arg0: i32) -> (i32, i32) {
    %c0_i32 = arith.constant 0 : i32
    %c0_i32_0 = arith.constant 0 : i32
    return %arg0, %c0_i32 : i32, i32
  }
}

</mosaic_0001>

<bundles_post_ra>
// kernel: conv_vae_forward.1
= control target key start
LH: loop header
LB: loop body
LE: loop exit
PB: predicated region body
PF: predicated region fallthrough
CT: control target
= control target key end

     0   :  { %s15193_s0 = inlined_call_operand.vmem [shape: f32[512,32], index: 0, kind: input, shape index: {}]   ;;  %s15194_s1 = inlined_call_operand.vmem [shape: f32[16,16], index: 1, kind: input, shape index: {}]   ;;  %s15195_s2 = inlined_call_operand.vmem [shape: f32[128,128], index: 2, kind: input, shape index: {}]   ;;  %s15196_s3 = inlined_call_operand.vmem [shape: f32[1,128], index: 3, kind: input, shape index: {}]   ;;  %s15197_s4 = inlined_call_operand.hbm [shape: f32[512,128], index: 4, kind: input, shape index: {}]   ;;  %s15198_s5 = inlined_call_operand.hbm [shape: f32[1,128], index: 5, kind: input, shape index: {}]   ;;  %s15199_s6 = inlined_call_operand.hbm [shape: f32[512,128], index: 6, kind: input, shape index: {}]   ;;  %s15200_s7 = inlined_call_operand.hbm [shape: f32[1,128], index: 7, kind: input, shape index: {}]   ;;  %s15201_s8 = inlined_call_operand.vmem [shape: f32[512,64], index: 8, kind: input, shape index: {}]   ;;  %s15202_s9 = inlined_call_operand.hbm [shape: f32[1,64], index: 9, kind: input, shape index: {}]   ;;  %s15203_s10 = inlined_call_operand.vmem [shape: f32[64,128], index: 10, kind: input, shape index: {}]   ;;  %s15204_s11 = inlined_call_operand.hbm [shape: f32[1,128], index: 11, kind: input, shape index: {}]   ;;  %s15205_s12 = inlined_call_operand.vmem [shape: f32[128,32], index: 12, kind: input, shape index: {}]   ;;  %s15206_s13 = inlined_call_operand.hbm [shape: f32[1,32], index: 13, kind: input, shape index: {}]   ;;  %s15207_s14 = inlined_call_operand.hbm [shape: f32[16,64], index: 14, kind: input, shape index: {}]   ;;  %s15208_s15 = inlined_call_operand.hbm [shape: f32[1,64], index: 15, kind: input, shape index: {}]   ;;  %s15209_s16 = inlined_call_operand.hbm [shape: f32[64,1024], index: 16, kind: input, shape index: {}]   ;;  %s15210_s17 = inlined_call_operand.hbm [shape: f32[1,1024], index: 17, kind: input, shape index: {}]   ;;  %s15211_s18 = inlined_call_operand.vmem [shape: f32[512,256], index: 18, kind: input, shape index: {}]   ;;  %s15212_s19 = inlined_call_operand.vmem [shape: f32[512,256], index: 19, kind: input, shape index: {}]   ;;  %s15213_s20 = inlined_call_operand.vmem [shape: f32[1,256], index: 20, kind: input, shape index: {}]   ;;  %s15214_s21 = inlined_call_operand.vmem [shape: f32[512,256], index: 21, kind: input, shape index: {}]   ;;  %s15215_s22 = inlined_call_operand.hbm [shape: f32[512,256], index: 22, kind: input, shape index: {}]   ;;  %s15216_s23 = inlined_call_operand.vmem [shape: f32[1,256], index: 23, kind: input, shape index: {}]   ;;  %s15217_s24 = inlined_call_operand.vmem [shape: f32[512,32], index: 24, kind: input, shape index: {}]   ;;  %s15218_s25 = inlined_call_operand.vmem [shape: f32[512,32], index: 25, kind: input, shape index: {}]   ;;  %s15219_s26 = inlined_call_operand.vmem [shape: f32[1,32], index: 26, kind: input, shape index: {}]   ;;  %s15220_s27 = inlined_call_operand.vmem [shape: f32[64,256], index: 27, kind: output, shape index: {0}]   ;;  %s15221_s28 = inlined_call_operand.vmem [shape: f32[16,32], index: 28, kind: output, shape index: {1}]  }
   0x1   :  { %15448 = sst [smem:[#allocation120_spill]] %s15193_s0 }
   0x2   :  { %15449 = sst [smem:[#allocation121_spill]] %s15194_s1 }
   0x3   :  { %15450 = sst [smem:[#allocation122_spill]] %s15195_s2 }
   0x4   :  { %15451 = sst [smem:[#allocation123_spill]] %s15196_s3 }
   0x5   :  { %15452 = sst [smem:[#allocation124_spill]] %s15197_s4 }
   0x6   :  { %15453 = sst [smem:[#allocation125_spill]] %s15198_s5 }
   0x7   :  { %15454 = sst [smem:[#allocation126_spill]] %s15199_s6 }
   0x8   :  { %15455 = sst [smem:[#allocation127_spill]] %s15200_s7 }
   0x9   :  { %15456 = sst [smem:[#allocation128_spill]] %s15201_s8 }
   0xa   :  { %15457 = sst [smem:[#allocation129_spill]] %s15202_s9 }
   0xb   :  { %15458 = sst [smem:[#allocation130_spill]] %s15203_s10 }
   0xc   :  { %15459 = sst [smem:[#allocation131_spill]] %s15204_s11 }
   0xd   :  { %15460 = sst [smem:[#allocation132_spill]] %s15205_s12 }
   0xe   :  { %15461 = sst [smem:[#allocation133_spill]] %s15207_s14 }
   0xf   :  { %15462 = sst [smem:[#allocation134_spill]] %s15216_s23 }
  0x10   :  { %15463 = sst [smem:[#allocation135_spill]] %s15218_s25 }
  0x11   :  { %15464 = sst [smem:[#allocation136_spill]] %s15219_s26 }
  0x12   :  { %15465 = sst [smem:[#allocation137_spill]] %s15220_s27 }
  0x13   :  { %34 = vsyncpa [#allocation3], 0 }
  0x14   :  { %35 = vsyncpa [#allocation5], 0 }
  0x15   :  { %36 = vsyncpa [#allocation8], 0 }
  0x16   :  { %37 = vsyncpa [#allocation11], 0 }
  0x17   :  { %38 = vsyncpa [#allocation14], 0 }
  0x18   :  { %39 = vsyncpa [#allocation17], 0 }
  0x19   :  { %40 = vsyncpa [#allocation20], 0  ;;  %s10887_s8 = smov 0  }
  0x1a LB: > { %15466 = sst [smem:[#allocation28_spill]] %s10715_s8  ;;  %s10717_s5 = smov [#allocation4]   ;;  %s10715_s8 = sphi %s10887_s8, %s46_s8  }
  0x1b   : > { %s712_s9 = sshll.u32 %s10717_s5, 4  ;;  %s10893_s30 = sadd.s32 4294967295, %s10715_s8   ;;  %s10898_s9 = int_to_ptr.vmem [resolvable:$true] %s712_s9 }
  0x1c   : > { %p6775_p0 = scmp.ge.s32.totalorder %s10715_s8, 1  ;;  %p680_p1 = scmp.lt.s32.totalorder %s10715_s8, 3 }
  0x1d   : > { %p15234_p2 = scmp.eq.s32.totalorder %s10893_s30, 0  ;;  %s10718_s6 = smov [#allocation7]  }
  0x1e   : > { %p10900_p3 = pnand %p6775_p0, %p680_p1  ;;  %s736_s10 = sshll.u32 %s10718_s6, 4  ;;  %s10906_s10 = int_to_ptr.vmem [resolvable:$true] %s736_s10 }
  0x1f   : > { %s10719_s0 = smov [#allocation10]   ;;  %s10720_s2 = smov [#allocation13]  }
  0x20   : > { %s15467_s3 = scalar_select %p10900_p3, 1, 0 }
  0x21   : > { %p10097_p4 = pneg %p10900_p3  ;;  %s764_s11 = sshll.u32 %s10719_s0, 4  ;;  %s10914_s11 = int_to_ptr.vmem [resolvable:$true] %s764_s11 }
  0x22   : > { %s10916_s7 = sshll.u32 %s10720_s2, 4  ;;  %s15469_s4 = sld [smem:[#allocation125_spill]]  ;;  %s789_s7 = int_to_ptr.vmem [resolvable:$true] %s10916_s7 }
  0x23   : > { %p10910_p5 = pnand %p15234_p2, %p10097_p4 }
  0x25   : > { %p10926_p7 = pneg %p10910_p5 }
  0x28   : > { %s10345_s5 = scalar_lea.hbm %s15469_s4, 16 }
  0x29   : > { %p10346_p6 = scmp.ne.s32.totalorder %s15469_s4, %s10345_s5  ;;  %p10352_p10 = scmp.lt.u32.totalorder %s10345_s5, %s15469_s4 }
  0x2b   : > { %p10348_p8 = pnand %p10926_p7, %p10346_p6 }
  0x2d   : > { %p10349_p9 = pneg %p10348_p8 }
  0x2f   : > { %p10354_p11 = pnand %p10352_p10, %p10349_p9 }
  0x31   : > { %10357 = shalt.err (!%p10354_p11)
}
  0x32   : > { %s10358_s8 = scalar_lea.vmem %s10898_s9, 16  ;;  %s10365_s12 = scalar_lea.vmem %s10898_s9, 32 }
  0x33   : > { %p10359_p12 = scmp.ne.s32.totalorder %s10898_s9, %s10358_s8  ;;  %p10366_p1 = scmp.lt.s32.totalorder %s10898_s9, %s10898_s9 }
  0x34   : > { %p10367_p4 = scmp.lt.s32.totalorder %s10365_s12, %s10358_s8 }
  0x35   : > { %p10361_p13 = pnand %p10359_p12, %p10926_p7 }
  0x36   : > { %p10368_p6 = por %p10367_p4, %p10366_p1 }
  0x37   : > { %p10362_p0 = pneg %p10361_p13 }
  0x39   : > { %p10369_p8 = pnand %p10368_p6, %p10362_p0 }
  0x3b   : > { %10372 = shalt.err (!%p10369_p8)
}
  0x3c   : > { %10103 = dma.hbm_to_vmem [thread:$0]  (!%p10910_p5), %s15469_s4, 16, %s10898_s9, [#allocation5]  }
  0x3d   : > { %s15471_s2 = sld [smem:[#allocation127_spill]] }
  0x43   : > { %s10373_s26 = scalar_lea.hbm %s15471_s2, 16 }
  0x44   : > { %p10374_p9 = scmp.ne.s32.totalorder %s15471_s2, %s10373_s26  ;;  %p10380_p12 = scmp.lt.u32.totalorder %s10373_s26, %s15471_s2 }
  0x46   : > { %p10376_p10 = pnand %p10374_p9, %p10926_p7 }
  0x48   : > { %p10377_p11 = pneg %p10376_p10 }
  0x4a   : > { %p10382_p13 = pnand %p10380_p12, %p10377_p11 }
  0x4c   : > { %10385 = shalt.err (!%p10382_p13)
}
  0x4d   : > { %s10386_s9 = scalar_lea.vmem %s10906_s10, 16  ;;  %s10393_s23 = scalar_lea.vmem %s10906_s10, 32 }
  0x4e   : > { %p10387_p0 = scmp.ne.s32.totalorder %s10906_s10, %s10386_s9  ;;  %p10394_p6 = scmp.lt.s32.totalorder %s10906_s10, %s10906_s10 }
  0x4f   : > { %p10395_p8 = scmp.lt.s32.totalorder %s10393_s23, %s10386_s9 }
  0x50   : > { %p10389_p1 = pnand %p10387_p0, %p10926_p7 }
  0x51   : > { %p10396_p9 = por %p10395_p8, %p10394_p6 }
  0x52   : > { %p10390_p4 = pneg %p10389_p1 }
  0x54   : > { %p10397_p10 = pnand %p10396_p9, %p10390_p4 }
  0x56   : > { %10400 = shalt.err (!%p10397_p10)
}
  0x57   : > { %10109 = dma.hbm_to_vmem [thread:$0]  (!%p10910_p5), %s15471_s2, 16, %s10906_s10, [#allocation8]  }
  0x58   : > { %s15472_s5 = sld [smem:[#allocation131_spill]] }
  0x5e   : > { %s10401_s6 = scalar_lea.hbm %s15472_s5, 16 }
  0x5f   : > { %p10402_p11 = scmp.ne.s32.totalorder %s15472_s5, %s10401_s6  ;;  %p10408_p0 = scmp.lt.u32.totalorder %s10401_s6, %s15472_s5 }
  0x61   : > { %p10404_p12 = pnand %p10402_p11, %p10926_p7 }
  0x63   : > { %p10405_p13 = pneg %p10404_p12 }
  0x65   : > { %p10410_p1 = pnand %p10408_p0, %p10405_p13 }
  0x67   : > { %10413 = shalt.err (!%p10410_p1)
}
  0x68   : > { %s10414_s10 = scalar_lea.vmem %s10914_s11, 16  ;;  %s10421_s25 = scalar_lea.vmem %s10914_s11, 32 }
  0x69   : > { %p10415_p4 = scmp.ne.s32.totalorder %s10914_s11, %s10414_s10  ;;  %p10422_p9 = scmp.lt.s32.totalorder %s10914_s11, %s10914_s11 }
  0x6a   : > { %p10423_p10 = scmp.lt.s32.totalorder %s10421_s25, %s10414_s10 }
  0x6b   : > { %p10417_p6 = pnand %p10415_p4, %p10926_p7 }
  0x6c   : > { %p10424_p11 = por %p10423_p10, %p10422_p9 }
  0x6d   : > { %p10418_p8 = pneg %p10417_p6 }
  0x6f   : > { %p10425_p12 = pnand %p10424_p11, %p10418_p8 }
  0x71   : > { %10428 = shalt.err (!%p10425_p12)
}
  0x72   : > { %10115 = dma.hbm_to_vmem [thread:$0]  (!%p10910_p5), %s15472_s5, 16, %s10914_s11, [#allocation11]  }
  0x73   : > { %s15473_s14 = sld [smem:[#allocation133_spill]] }
  0x79   : > { %s10429_s8 = scalar_lea.hbm %s15473_s14, 256 }
  0x7a   : > { %p10430_p13 = scmp.ne.s32.totalorder %s15473_s14, %s10429_s8  ;;  %p10436_p4 = scmp.lt.u32.totalorder %s10429_s8, %s15473_s14 }
  0x7c   : > { %p10432_p0 = pnand %p10430_p13, %p10926_p7 }
  0x7e   : > { %p10433_p1 = pneg %p10432_p0 }
  0x80   : > { %p10438_p6 = pnand %p10436_p4, %p10433_p1 }
  0x82   : > { %10441 = shalt.err (!%p10438_p6)
}
  0x83   : > { %s10442_s25 = scalar_lea.vmem %s789_s7, 256  ;;  %p10450_p11 = scmp.lt.s32.totalorder %s789_s7, %s789_s7 }
  0x84   : > { %p10443_p8 = scmp.ne.s32.totalorder %s789_s7, %s10442_s25  ;;  %p10451_p12 = scmp.lt.s32.totalorder %s10442_s25, %s10442_s25 }
  0x86   : > { %p10445_p9 = pnand %p10443_p8, %p10926_p7  ;;  %p10452_p2 = por %p10451_p12, %p10450_p11 }
  0x88   : > { %p10446_p10 = pneg %p10445_p9 }
  0x8a   : > { %p10453_p3 = pnand %p10452_p2, %p10446_p10 }
  0x8c   : > { %10456 = shalt.err (!%p10453_p3)
}
  0x8d   : > { %s15238_s11 = smov 128   ;;  %s15240_s26 = smov 8  }
  0x8e   : > { %10121 = dma.hbm_to_vmem [thread:$0]  (!%p10910_p5), %s15473_s14, 256, %s789_s7, [#allocation14], %s15238_s11, %s15238_s11, %s15240_s26  }
  0x8f   : > { %s10723_s6 = smov [#allocation16]   ;;  %s10457_s23 = scalar_lea.hbm %s15209_s16, 8192 }
  0x90   : > { %s812_s8 = sshll.u32 %s10723_s6, 4  ;;  %p10458_p2 = scmp.ne.s32.totalorder %s15209_s16, %s10457_s23  ;;  %s813_s8 = int_to_ptr.vmem [resolvable:$true] %s812_s8 }
  0x91   : > { %p10464_p0 = scmp.lt.u32.totalorder %s10457_s23, %s15209_s16 }
  0x92   : > { %p10460_p3 = pnand %p10458_p2, %p10926_p7 }
  0x94   : > { %p10461_p13 = pneg %p10460_p3 }
  0x96   : > { %p10466_p1 = pnand %p10464_p0, %p10461_p13 }
  0x98   : > { %10469 = shalt.err (!%p10466_p1)
}
  0x99   : > { %s10470_s7 = scalar_lea.vmem %s813_s8, 8192  ;;  %p10478_p9 = scmp.lt.s32.totalorder %s813_s8, %s813_s8 }
  0x9a   : > { %p10471_p4 = scmp.ne.s32.totalorder %s813_s8, %s10470_s7  ;;  %p10479_p10 = scmp.lt.s32.totalorder %s10470_s7, %s10470_s7 }
  0x9c   : > { %p10473_p6 = pnand %p10471_p4, %p10926_p7  ;;  %p10480_p11 = por %p10479_p10, %p10478_p9 }
  0x9e   : > { %p10474_p8 = pneg %p10473_p6 }
  0xa0   : > { %p10481_p12 = pnand %p10480_p11, %p10474_p8 }
  0xa2   : > { %10484 = shalt.err (!%p10481_p12)
}
  0xa3   : > { %s10724_s27 = smov 1024   ;;  %s10725_s1 = smov 64  }
  0xa4   : > { %10127 = dma.hbm_to_vmem [thread:$0]  (!%p10910_p5), %s15209_s16, 8192, %s813_s8, [#allocation17], %s10724_s27, %s10724_s27, %s10725_s1  }
  0xa5   : > { %s10726_s6 = smov [#allocation2]   ;;  %s10727_s9 = smov [#allocation6]  }
  0xa6   : > { %s698_s12 = sshll.u32 %s10726_s6, 4  ;;  %s722_s23 = sshll.u32 %s10727_s9, 4  ;;  %s699_s12 = int_to_ptr.vmem [resolvable:$true] %s698_s12  ;;  %s11036_s23 = int_to_ptr.vmem [resolvable:$true] %s722_s23 }
  0xa7   : > { %s15474_s7 = sld [smem:[#allocation124_spill]] }
  0xad   : > { %s10485_s11 = scalar_lea.hbm %s15474_s7, 8192 }
  0xae   : > { %p10486_p2 = scmp.ne.s32.totalorder %s15474_s7, %s10485_s11  ;;  %p10492_p0 = scmp.lt.u32.totalorder %s10485_s11, %s15474_s7 }
  0xb0   : > { %p10488_p3 = pnand %p10486_p2, %p10926_p7 }
  0xb2   : > { %p10489_p13 = pneg %p10488_p3 }
  0xb4   : > { %p10494_p1 = pnand %p10492_p0, %p10489_p13 }
  0xb6   : > { %10497 = shalt.err (!%p10494_p1)
}
  0xb7   : > { %s10498_s27 = scalar_lea.vmem %s699_s12, 8192  ;;  %p10506_p9 = scmp.lt.s32.totalorder %s699_s12, %s699_s12 }
  0xb8   : > { %p10499_p4 = scmp.ne.s32.totalorder %s699_s12, %s10498_s27  ;;  %p10507_p10 = scmp.lt.s32.totalorder %s10498_s27, %s10498_s27 }
  0xba   : > { %p10501_p6 = pnand %p10499_p4, %p10926_p7  ;;  %p10508_p11 = por %p10507_p10, %p10506_p9 }
  0xbc   : > { %p10502_p8 = pneg %p10501_p6 }
  0xbe   : > { %p10509_p12 = pnand %p10508_p11, %p10502_p8 }
  0xc0   : > { %10512 = shalt.err (!%p10509_p12)
}
  0xc1   : > { %s15475_s5 = smov 8   ;;  %s15476_s26 = smov 128  }
  0xc2   : > { %10100 = dma.hbm_to_vmem [thread:$0]  (!%p10910_p5), %s15474_s7, 8192, %s699_s12, [#allocation3], %s15476_s26, %s15476_s26, %s15475_s5  }
  0xc3   : > { %s15477_s9 = sld [smem:[#allocation126_spill]] }
  0xc9   : > { %s10513_s10 = scalar_lea.hbm %s15477_s9, 8192 }
  0xca   : > { %p10514_p2 = scmp.ne.s32.totalorder %s15477_s9, %s10513_s10  ;;  %p10520_p0 = scmp.lt.u32.totalorder %s10513_s10, %s15477_s9 }
  0xcc   : > { %p10516_p3 = pnand %p10514_p2, %p10926_p7 }
  0xce   : > { %p10517_p13 = pneg %p10516_p3 }
  0xd0   : > { %p10522_p1 = pnand %p10520_p0, %p10517_p13 }
  0xd2   : > { %10525 = shalt.err (!%p10522_p1)
}
  0xd3   : > { %s10526_s12 = scalar_lea.vmem %s11036_s23, 8192  ;;  %p10534_p9 = scmp.lt.s32.totalorder %s11036_s23, %s11036_s23 }
  0xd4   : > { %p10527_p4 = scmp.ne.s32.totalorder %s11036_s23, %s10526_s12  ;;  %p10535_p10 = scmp.lt.s32.totalorder %s10526_s12, %s10526_s12 }
  0xd6   : > { %p10529_p6 = pnand %p10527_p4, %p10926_p7  ;;  %p10536_p11 = por %p10535_p10, %p10534_p9 }
  0xd8   : > { %p10530_p8 = pneg %p10529_p6 }
  0xda   : > { %p10537_p12 = pnand %p10536_p11, %p10530_p8 }
  0xdc   : > { %10540 = shalt.err (!%p10537_p12)
}
  0xdd   : > { %10106 = dma.hbm_to_vmem [thread:$0]  (!%p10910_p5), %s15477_s9, 8192, %s11036_s23, [#allocation5], %s15476_s26, %s15476_s26, %s15475_s5  }
  0xde   : > { %s10728_s2 = smov [#allocation9]   ;;  %s10729_s10 = smov [#allocation12]  }
  0xdf   : > { %s750_s6 = sshll.u32 %s10728_s2, 4  ;;  %s778_s25 = sshll.u32 %s10729_s10, 4  ;;  %s751_s6 = int_to_ptr.vmem [resolvable:$true] %s750_s6  ;;  %s11085_s25 = int_to_ptr.vmem [resolvable:$true] %s778_s25 }
  0xe0   : > { %s15478_s27 = sld [smem:[#allocation129_spill]] }
  0xe6   : > { %s10541_s12 = scalar_lea.hbm %s15478_s27, 16 }
  0xe7   : > { %p10542_p2 = scmp.ne.s32.totalorder %s15478_s27, %s10541_s12  ;;  %p10548_p0 = scmp.lt.u32.totalorder %s10541_s12, %s15478_s27 }
  0xe9   : > { %p10544_p3 = pnand %p10542_p2, %p10926_p7 }
  0xeb   : > { %p10545_p13 = pneg %p10544_p3 }
  0xed   : > { %p10550_p1 = pnand %p10548_p0, %p10545_p13 }
  0xef   : > { %10553 = shalt.err (!%p10550_p1)
}
  0xf0   : > { %s10554_s5 = scalar_lea.vmem %s751_s6, 16  ;;  %s10561_s26 = scalar_lea.vmem %s751_s6, 32 }
  0xf1   : > { %p10555_p4 = scmp.ne.s32.totalorder %s751_s6, %s10554_s5  ;;  %p10562_p9 = scmp.lt.s32.totalorder %s751_s6, %s751_s6 }
  0xf2   : > { %p10563_p10 = scmp.lt.s32.totalorder %s10561_s26, %s10554_s5 }
  0xf3   : > { %p10557_p6 = pnand %p10555_p4, %p10926_p7 }
  0xf4   : > { %p10564_p11 = por %p10563_p10, %p10562_p9 }
  0xf5   : > { %p10558_p8 = pneg %p10557_p6 }
  0xf7   : > { %p10565_p12 = pnand %p10564_p11, %p10558_p8 }
  0xf9   : > { %10568 = shalt.err (!%p10565_p12)
}
  0xfa   : > { %10112 = dma.hbm_to_vmem [thread:$0]  (!%p10910_p5), %s15478_s27, 16, %s751_s6, [#allocation8]  }
  0xfb   : > { %s10569_s10 = scalar_lea.hbm %s15206_s13, 16 }
  0xfc   : > { %p10570_p2 = scmp.ne.s32.totalorder %s15206_s13, %s10569_s10  ;;  %p10576_p0 = scmp.lt.u32.totalorder %s10569_s10, %s15206_s13 }
  0xfe   : > { %p10572_p3 = pnand %p10570_p2, %p10926_p7 }
 0x100   : > { %p10573_p13 = pneg %p10572_p3 }
 0x102   : > { %p10578_p1 = pnand %p10576_p0, %p10573_p13 }
 0x104   : > { %10581 = shalt.err (!%p10578_p1)
}
 0x105   : > { %s10582_s6 = scalar_lea.vmem %s11085_s25, 16  ;;  %s10589_s23 = scalar_lea.vmem %s11085_s25, 32 }
 0x106   : > { %p10583_p4 = scmp.ne.s32.totalorder %s11085_s25, %s10582_s6  ;;  %p10590_p9 = scmp.lt.s32.totalorder %s11085_s25, %s11085_s25 }
 0x107   : > { %p10591_p10 = scmp.lt.s32.totalorder %s10589_s23, %s10582_s6 }
 0x108   : > { %p10585_p6 = pnand %p10583_p4, %p10926_p7 }
 0x109   : > { %p10592_p11 = por %p10591_p10, %p10590_p9 }
 0x10a   : > { %p10586_p8 = pneg %p10585_p6 }
 0x10c   : > { %p10593_p12 = pnand %p10592_p11, %p10586_p8 }
 0x10e   : > { %10596 = shalt.err (!%p10593_p12)
}
 0x10f   : > { %10118 = dma.hbm_to_vmem [thread:$0]  (!%p10910_p5), %s15206_s13, 16, %s11085_s25, [#allocation11]  }
 0x110   : > { %s10730_s14 = smov [#allocation15]   ;;  %s10731_s11 = smov [#allocation18]  }
 0x111   : > { %s802_s7 = sshll.u32 %s10730_s14, 4  ;;  %s826_s2 = sshll.u32 %s10731_s11, 4  ;;  %s803_s7 = int_to_ptr.vmem [resolvable:$true] %s802_s7  ;;  %s11129_s2 = int_to_ptr.vmem [resolvable:$true] %s826_s2 }
 0x112   : > { %s10597_s8 = scalar_lea.hbm %s15208_s15, 16 }
 0x113   : > { %p10598_p2 = scmp.ne.s32.totalorder %s15208_s15, %s10597_s8  ;;  %p10604_p0 = scmp.lt.u32.totalorder %s10597_s8, %s15208_s15 }
 0x115   : > { %p10600_p3 = pnand %p10598_p2, %p10926_p7 }
 0x117   : > { %p10601_p13 = pneg %p10600_p3 }
 0x119   : > { %p10606_p1 = pnand %p10604_p0, %p10601_p13 }
 0x11b   : > { %10609 = shalt.err (!%p10606_p1)
}
 0x11c   : > { %s10610_s23 = scalar_lea.vmem %s803_s7, 16  ;;  %s10617_s5 = scalar_lea.vmem %s803_s7, 32 }
 0x11d   : > { %p10611_p4 = scmp.ne.s32.totalorder %s803_s7, %s10610_s23  ;;  %p10618_p9 = scmp.lt.s32.totalorder %s803_s7, %s803_s7 }
 0x11e   : > { %p10619_p10 = scmp.lt.s32.totalorder %s10617_s5, %s10610_s23 }
 0x11f   : > { %p10613_p6 = pnand %p10611_p4, %p10926_p7 }
 0x120   : > { %p10620_p11 = por %p10619_p10, %p10618_p9 }
 0x121   : > { %p10614_p8 = pneg %p10613_p6 }
 0x123   : > { %p10621_p12 = pnand %p10620_p11, %p10614_p8 }
 0x125   : > { %10624 = shalt.err (!%p10621_p12)
}
 0x126   : > { %10124 = dma.hbm_to_vmem [thread:$0]  (!%p10910_p5), %s15208_s15, 16, %s803_s7, [#allocation14]  }
 0x127   : > { %s10625_s4 = scalar_lea.hbm %s15210_s17, 128 }
 0x128   : > { %p10626_p2 = scmp.ne.s32.totalorder %s15210_s17, %s10625_s4  ;;  %p10632_p0 = scmp.lt.u32.totalorder %s10625_s4, %s15210_s17 }
 0x12a   : > { %p10628_p3 = pnand %p10626_p2, %p10926_p7 }
 0x12c   : > { %p10629_p13 = pneg %p10628_p3 }
 0x12e   : > { %p10634_p1 = pnand %p10632_p0, %p10629_p13 }
 0x130   : > { %10637 = shalt.err (!%p10634_p1)
}
 0x131   : > { %s10638_s7 = scalar_lea.vmem %s11129_s2, 128  ;;  %p10646_p9 = scmp.lt.s32.totalorder %s11129_s2, %s11129_s2 }
 0x132   : > { %p10639_p4 = scmp.ne.s32.totalorder %s11129_s2, %s10638_s7  ;;  %p10647_p10 = scmp.lt.s32.totalorder %s10638_s7, %s10638_s7 }
 0x134   : > { %p10641_p6 = pnand %p10639_p4, %p10926_p7  ;;  %p10648_p11 = por %p10647_p10, %p10646_p9 }
 0x136   : > { %p10642_p8 = pneg %p10641_p6 }
 0x138   : > { %p10649_p12 = pnand %p10648_p11, %p10642_p8 }
 0x13a   : > { %10652 = shalt.err (!%p10649_p12)
}
 0x13b   : > { %10130 = dma.hbm_to_vmem [thread:$0]  (!%p10910_p5), %s15210_s17, 128, %s11129_s2, [#allocation17]  }
 0x13c   : > { %s10732_s5 = smov [#allocation19]   ;;  %s10653_s10 = scalar_lea.hbm %s15215_s22, 16384 }
 0x13d   : > { %s848_s26 = sshll.u32 %s10732_s5, 4  ;;  %p10654_p2 = scmp.ne.s32.totalorder %s15215_s22, %s10653_s10  ;;  %s849_s26 = int_to_ptr.vmem [resolvable:$true] %s848_s26 }
 0x13e   : > { %p10660_p0 = scmp.lt.u32.totalorder %s10653_s10, %s15215_s22 }
 0x13f   : > { %p10656_p3 = pnand %p10654_p2, %p10926_p7 }
 0x141   : > { %p10657_p13 = pneg %p10656_p3 }
 0x143   : > { %p10662_p1 = pnand %p10660_p0, %p10657_p13 }
 0x145   : > { %10665 = shalt.err (!%p10662_p1)
}
 0x146   : > { %s10666_s2 = scalar_lea.vmem %s849_s26, 16384  ;;  %p10674_p9 = scmp.lt.s32.totalorder %s849_s26, %s849_s26 }
 0x147   : > { %p10667_p4 = scmp.ne.s32.totalorder %s849_s26, %s10666_s2  ;;  %p10675_p10 = scmp.lt.s32.totalorder %s10666_s2, %s10666_s2 }
 0x149   : > { %p10669_p6 = pnand %p10667_p4, %p10926_p7  ;;  %p10676_p11 = por %p10675_p10, %p10674_p9 }
 0x14b   : > { %p10670_p8 = pneg %p10669_p6 }
 0x14d   : > { %p10677_p12 = pnand %p10676_p11, %p10670_p8 }
 0x14f   : > { %10680 = shalt.err (!%p10677_p12)
}
 0x150   : > { %s10733_s6 = smov 256   ;;  %s10734_s7 = smov 16  }
 0x151   : > { %10133 = dma.hbm_to_vmem [thread:$0]  (!%p10910_p5), %s15215_s22, 16384, %s849_s26, [#allocation20], %s10733_s6, %s10733_s6, %s10734_s7  }
 0x152   : > { %p15479_p2 = scmp.ne.s32.totalorder %s15467_s3, 0 }
 0x154   : > { %892 = sbr.rel (%p15479_p2) target bundleno = 3724 (0xe8c), region = 128 }
 0x15b   : > { %p15480_p3 = scmp.eq.s32.totalorder %s10893_s30, 0 }
 0x15d   : > { %10686 = dma.done.wait (%p15480_p3), [#allocation3], 8192   ;;  %p15481_p7 = pmov %p15480_p3 }
 0x15e   : > { %p15482_p13 = pmov %p15480_p3 }
 0x15f   : > { %10688 = vsyncadd (%p15481_p7), [#allocation3], 4294959104 }
 0x160   : > { %10690 = dma.done.wait (%p15482_p13), [#allocation5], 8208   ;;  %p15483_p0 = pmov %p15480_p3 }
 0x162   : > { %10692 = vsyncadd (%p15483_p0), [#allocation5], 4294959088  ;;  %p15484_p1 = pmov %p15483_p0 }
 0x163   : > { %p15485_p5 = pmov %p15483_p0 }
 0x164   : > { %10694 = dma.done.wait (%p15484_p1), [#allocation8], 32  }
 0x165   : > { %10696 = vsyncadd (%p15485_p5), [#allocation8], 4294967264  ;;  %p15486_p4 = pmov %p15483_p0 }
 0x166   : > { %p15487_p6 = pmov %p15483_p0 }
 0x167   : > { %10698 = dma.done.wait (%p15486_p4), [#allocation11], 32  }
 0x168   : > { %10700 = vsyncadd (%p15487_p6), [#allocation11], 4294967264  ;;  %p15488_p8 = pmov %p15483_p0 }
 0x169   : > { %p15489_p9 = pmov %p15483_p0 }
 0x16a   : > { %10702 = dma.done.wait (%p15488_p8), [#allocation14], 272  }
 0x16b   : > { %10704 = vsyncadd (%p15489_p9), [#allocation14], 4294967024  ;;  %p15490_p10 = pmov %p15483_p0 }
 0x16c   : > { %p15491_p11 = pmov %p15483_p0 }
 0x16d   : > { %10706 = dma.done.wait (%p15490_p10), [#allocation17], 8320  }
 0x16e   : > { %10708 = vsyncadd (%p15491_p11), [#allocation17], 4294958976  ;;  %p15492_p12 = pmov %p15483_p0 }
 0x16f   : > { %p15493_p2 = pmov %p15483_p0 }
 0x170   : > { %10710 = dma.done.wait (%p15492_p12), [#allocation20], 16384  }
 0x171   : > { %10712 = vsyncadd (%p15493_p2), [#allocation20], 4294950912  ;;  %s6802_s3 = sshll.u32 %s10893_s30, 5  ;;  %s15494_s26 = sld [smem:[#allocation120_spill]]  ;;  %vm1120_vm0 = vcmask 261120   ;;  %vm1125_vm1 = vcmask 523264  }
 0x172   : > { %p1020_p3 = scmp.lt.s32.totalorder %s6802_s3, 63  ;;  %s10735_s11 = smov 32   ;;  %vm1130_vm2 = vcmask 785408   ;;  %vm10740_vm3 = vmmov 0   ;;  %vm2757_vm4 = vcmask 130048  }
 0x173   : > { %s15244_s10 = smov 96   ;;  %s15246_s4 = smov 64  }
 0x174   : > { %s15822_s3 = smov (!%p1020_p3, %s6802_s3), 63  ;;  %s15495_s1 = sld [smem:[#allocation122_spill]] }
 0x175   : > { %s6803_s29 = sshll.u32 %s15822_s3, 3  ;;  %s15496_s0 = sld [smem:[#allocation123_spill]] }
 0x176   : > { %s15497_s8 = sld [smem:[#allocation128_spill]]  ;;  %s15500_s7 = sld [smem:[#allocation132_spill]] }
 0x177   : > { %s11224_s14 = scalar_lea.vmem %s15494_s26, %s6803_s29  ;;  %p1025_p7 = scmp.lt.s32.totalorder %s10893_s30, 1 }
 0x178   : > { %v11227_v0 = vld [vmem:[%s11224_s14 + $0x8] sm:$0xff]  ;;  %v1040_v1 = vld [vmem:[%s11224_s14] sm:$0xff]  ;;  %v11255_v14 = vld [vmem:[%s11224_s14 + $0x10] sm:$0xff]  ;;  %s10741_s5 = smov 112   ;;  %s15501_s2 = sld [smem:[#allocation121_spill]] }
 0x179   : > { %v10191_v2 = vpack.i.bf16 %v11227_v0, %v1040_v1  ;;  %v1048_v3 = vld [vmem:[%s11224_s14 + $0x40] sm:$0xff]  ;;  %v1049_v4 = vld [vmem:[%s11224_s14 + $0x48] sm:$0xff]  ;;  %v11259_v16 = vld [vmem:[%s11224_s14 + $0x18] sm:$0xff]  ;;  %v10276_v59 = vpack.i.bf16 %v11255_v14, %v11227_v0  ;;  %s12039_s25 = scalar_select %p1025_p7, %s10893_s30, 1 }
 0x17a   : > { %v11234_v5 = vld [vmem:[%s11224_s14 + $0x20] sm:$0xff]  ;;  %v10201_v6 = vpack.i.bf16 %v1049_v4, %v1048_v3  ;;  %v11237_v7 = vld [vmem:[%s11224_s14 + $0x28] sm:$0xff]  ;;  %v11262_v17 = vld [vmem:[%s11224_s14 + $0x30] sm:$0xff]  ;;  %v10221_v20 = vpack.i.bf16 %v11259_v16, %v11255_v14  ;;  %s15698_s3 = sld [smem:[#allocation135_spill]]  ;;  %s15708_s26 = sld [smem:[#allocation134_spill]] }
 0x17b   : > { %10192 = vrot.lane.b32.xlu0 %v10191_v2, %s10735_s11  ;;  %v10196_v8 = vpack.i.bf16 %v11237_v7, %v11234_v5  ;;  %v11244_v9 = vld [vmem:[%s11224_s14 + $0x60] sm:$0xff]  ;;  %v11247_v10 = vld [vmem:[%s11224_s14 + $0x68] sm:$0xff]  ;;  %v11265_v18 = vld [vmem:[%s11224_s14 + $0x38] sm:$0xff]  ;;  %s6804_s23 = sshll.u32 %s12039_s25, 3 }
 0x17c   : > { %10202 = vrot.lane.b32.xlu1 %v10201_v6, %s15244_s10  ;;  %v1056_v11 = vld [vmem:[%s11224_s14 + $0x80] sm:$0xff]  ;;  %v1057_v12 = vld [vmem:[%s11224_s14 + $0x88] sm:$0xff]  ;;  %v10211_v13 = vpack.i.bf16 %v11247_v10, %v11244_v9  ;;  %v1137_v22 = vld [vmem:[%s15495_s1 + $0x10] sm:$0xff]  ;;  %v10226_v24 = vpack.i.bf16 %v11265_v18, %v11262_v17  ;;  %s15498_s12 = smov %s15497_s8  ;;  %s1039_s29 = scalar_lea.vmem %s15221_s28, %s6804_s23 }
 0x17d   : > { %v10216_v15 = vpack.i.bf16 %v1057_v12, %v1056_v11  ;;  %v1135_v19 = vld [vmem:[%s15495_s1] sm:$0xff]  ;;  %v1136_v21 = vld [vmem:[%s15495_s1 + $0x8] sm:$0xff]  ;;  %v1138_v23 = vld [vmem:[%s15495_s1 + $0x18] sm:$0xff] }
 0x17e   : > { %v1050_v25 = vld [vmem:[%s11224_s14 + $0x50] sm:$0xff]  ;;  %v1051_v26 = vld [vmem:[%s11224_s14 + $0x58] sm:$0xff]  ;;  %v11287_v27 = vpack.c.bf16 %v1136_v21, %v1135_v19  ;;  %v11289_v28 = vpack.c.bf16 %v1138_v23, %v1137_v22  ;;  %v1139_v29 = vld [vmem:[%s15495_s1 + $0x20] sm:$0xff]  ;;  %s1028_s6 = scalar_lea.vmem %s15501_s2, %s6804_s23  ;;  %s15784_s23 = sld [smem:[#allocation136_spill]] }
 0x17f   : > { %10197 = vrot.lane.b32.xlu0 %v10196_v8, %s15246_s4  ;;  %v1140_v30 = vld [vmem:[%s15495_s1 + $0x28] sm:$0xff]  ;;  %v10231_v31 = vpack.i.bf16 %v1051_v26, %v1050_v25  ;;  %v11303_v32 = vld [vmem:[%s11224_s14 + $0xa0] sm:$0xff]  ;;  %v1141_v37 = vld [vmem:[%s15495_s1 + $0x30] sm:$0xff] }
 0x180   : > { %10207 = vrot.lane.b32.xlu1 %v10201_v6, %s10735_s11  ;;  %8187 = vmatprep.subr.bf16.mxu0 %v11287_v27  ;;  %v11306_v33 = vld [vmem:[%s11224_s14 + $0xa8] sm:$0xff]  ;;  %v1064_v34 = vld [vmem:[%s11224_s14 + $0xc0] sm:$0xff]  ;;  %v11310_v35 = vpack.c.bf16 %v1140_v30, %v1139_v29  ;;  %v1142_v38 = vld [vmem:[%s15495_s1 + $0x38] sm:$0xff] }
 0x181   : > { %8219 = vmatprep.subr.bf16.mxu1 %v11287_v27  ;;  %8189 = vmatpush3.bf16.msra.mxu0 %v11287_v27  ;;  %v1065_v36 = vld [vmem:[%s11224_s14 + $0xc8] sm:$0xff]  ;;  %v10241_v39 = vpack.i.bf16 %v11306_v33, %v11303_v32  ;;  %v11327_v41 = vld [vmem:[%s11224_s14 + $0x70] sm:$0xff]  ;;  %v11330_v42 = vpack.c.bf16 %v1142_v38, %v1141_v37  ;;  %v11333_v43 = vld [vmem:[%s11224_s14 + $0x78] sm:$0xff] }
 0x182   : > { %8191 = vmatprep.subr.bf16.mxu0 %v11289_v28  ;;  %8221 = vmatpush3.bf16.msra.mxu1 %v11287_v27  ;;  %v10246_v40 = vpack.i.bf16 %v1065_v36, %v1064_v34  ;;  %v1143_v44 = vld [vmem:[%s15495_s1 + $0x40] sm:$0xff]  ;;  %v1144_v45 = vld [vmem:[%s15495_s1 + $0x48] sm:$0xff]  ;;  %v10256_v46 = vpack.i.bf16 %v11333_v43, %v11327_v41  ;;  %v1058_v47 = vld [vmem:[%s11224_s14 + $0x90] sm:$0xff] }
 0x183   : > { %10212 = vrot.lane.b32.xlu0 %v10211_v13, %s15246_s4  ;;  %8223 = vmatprep.subr.bf16.mxu1 %v11289_v28  ;;  %v1059_v48 = vld [vmem:[%s11224_s14 + $0x98] sm:$0xff]  ;;  %v11351_v49 = vpack.c.bf16 %v1144_v45, %v1143_v44  ;;  %v1145_v50 = vld [vmem:[%s15495_s1 + $0x50] sm:$0xff]  ;;  %v11365_v53 = vld [vmem:[%s11224_s14 + $0xe0] sm:$0xff]  ;;  %v15248_v13 = vmov 0.0  }
 0x184   : > { %10217 = vrot.lane.b32.xlu1 %v10216_v15, %s15244_s10  ;;  %v1146_v51 = vld [vmem:[%s15495_s1 + $0x58] sm:$0xff]  ;;  %v10261_v52 = vpack.i.bf16 %v1059_v48, %v1058_v47  ;;  %v11368_v54 = vld [vmem:[%s11224_s14 + $0xe8] sm:$0xff]  ;;  %v1147_v56 = vld [vmem:[%s15495_s1 + $0x60] sm:$0xff]  ;;  %v10306_v14 = vpack.i.bf16 %v15248_v13, %v11259_v16 }
 0x185   : > { %8193 = vmatpush3.bf16.msra.mxu0 %v11289_v28  ;;  %v11371_v55 = vpack.c.bf16 %v1146_v51, %v1145_v50  ;;  %v1148_v57 = vld [vmem:[%s15495_s1 + $0x68] sm:$0xff]  ;;  %v10271_v58 = vpack.i.bf16 %v11368_v54, %v11365_v53  ;;  %v11389_v60 = vld [vmem:[%s11224_s14 + $0xb0] sm:$0xff]  ;;  %v11395_v62 = vld [vmem:[%s11224_s14 + $0xb8] sm:$0xff] }
 0x186   : > { %8195 = vmatprep.subr.bf16.mxu0 %v11310_v35  ;;  %8225 = vmatpush3.bf16.msra.mxu1 %v11289_v28  ;;  %v11392_v61 = vpack.c.bf16 %v1148_v57, %v1147_v56  ;;  %v1149_v63 = vld [vmem:[%s15495_s1 + $0x70] sm:$0xff]  ;;  %v1150_v0 = vld [vmem:[%s15495_s1 + $0x78] sm:$0xff]  ;;  %v10286_v1 = vpack.i.bf16 %v11395_v62, %v11389_v60 }
 0x187   : > { %10222 = vrot.lane.b32.xlu0 %v10221_v20, %s10735_s11  ;;  %8227 = vmatprep.subr.bf16.mxu1 %v11310_v35  ;;  %v1066_v2 = vld [vmem:[%s11224_s14 + $0xd0] sm:$0xff]  ;;  %v1067_v3 = vld [vmem:[%s11224_s14 + $0xd8] sm:$0xff]  ;;  %v11413_v4 = vpack.c.bf16 %v1150_v0, %v1149_v63 }
 0x188   : > { %10227 = vrot.lane.b32.xlu1 %v10226_v24, %s15246_s4  ;;  %v10291_v6 = vpack.i.bf16 %v1067_v3, %v1066_v2  ;;  %v11421_v8 = vld [vmem:[%s11224_s14 + $0xf0] sm:$0xff]  ;;  %v1071_v11 = vld [vmem:[%s11224_s14 + $0xf8] sm:$0xff]  ;;  %s15817_s14 = smov 64  }
 0x189   : > { %8197 = vmatpush3.bf16.msra.mxu0 %v11310_v35  ;;  %v10301_v12 = vpack.i.bf16 %v1071_v11, %v11421_v8 }
 0x18a   : > { %8199 = vmatprep.subr.bf16.mxu0 %v11330_v42  ;;  %8229 = vmatpush3.bf16.msra.mxu1 %v11310_v35 }
 0x18b   : > { %10232 = vrot.lane.b32.xlu0 %v10231_v31, %s15244_s10  ;;  %8231 = vmatprep.subr.bf16.mxu1 %v11330_v42 }
 0x18c   : > { %10237 = vrot.lane.b32.xlu1 %v10216_v15, %s10735_s11 }
 0x18d   : > { %8201 = vmatpush3.bf16.msra.mxu0 %v11330_v42 }
 0x18e   : > { %8203 = vmatprep.subr.bf16.mxu0 %v11351_v49  ;;  %8233 = vmatpush3.bf16.msra.mxu1 %v11330_v42 }
 0x18f   : > { %10242 = vrot.lane.b32.xlu0 %v10241_v39, %s15246_s4  ;;  %8235 = vmatprep.subr.bf16.mxu1 %v11351_v49 }
 0x190   : > { %10247 = vrot.lane.b32.xlu1 %v10246_v40, %s15244_s10 }
 0x191   : > { %8205 = vmatpush3.bf16.msra.mxu0 %v11351_v49 }
 0x192   : > { %8207 = vmatprep.subr.bf16.mxu0 %v11371_v55  ;;  %8237 = vmatpush3.bf16.msra.mxu1 %v11351_v49 }
 0x193   : > { %10252 = vrot.lane.b32.xlu0 %v10231_v31, %s10735_s11  ;;  %8239 = vmatprep.subr.bf16.mxu1 %v11371_v55 }
 0x194   : > { %10257 = vrot.lane.b32.xlu1 %v10256_v46, %s15246_s4 }
 0x195   : > { %8209 = vmatpush3.bf16.msra.mxu0 %v11371_v55 }
 0x196   : > { %8211 = vmatprep.subr.bf16.mxu0 %v11392_v61  ;;  %8241 = vmatpush3.bf16.msra.mxu1 %v11371_v55 }
 0x197   : > { %10262 = vrot.lane.b32.xlu0 %v10261_v52, %s15244_s10  ;;  %8243 = vmatprep.subr.bf16.mxu1 %v11392_v61 }
 0x198   : > { %10267 = vrot.lane.b32.xlu1 %v10246_v40, %s10735_s11 }
 0x199   : > { %8213 = vmatpush3.bf16.msra.mxu0 %v11392_v61 }
 0x19a   : > { %8215 = vmatprep.subr.bf16.mxu0 %v11413_v4  ;;  %8245 = vmatpush3.bf16.msra.mxu1 %v11392_v61 }
 0x19b   : > { %10272 = vrot.lane.b32.xlu0 %v10271_v58, %s15246_s4  ;;  %8247 = vmatprep.subr.bf16.mxu1 %v11413_v4 }
 0x19c   : > { %10277 = vrot.lane.b32.xlu1 %v10276_v59, %s15244_s10 }
 0x19d   : > { %8217 = vmatpush3.bf16.msra.mxu0 %v11413_v4 }
 0x19e   : > { %8251 = vmatprep.subr.bf16.mxu0 %v11287_v27  ;;  %8249 = vmatpush3.bf16.msra.mxu1 %v11413_v4 }
 0x19f   : > { %10282 = vrot.lane.b32.xlu0 %v10261_v52, %s10735_s11  ;;  %8283 = vmatprep.subr.bf16.mxu1 %v11287_v27 }
 0x1a0   : > { %10287 = vrot.lane.b32.xlu1 %v10286_v1, %s15246_s4 }
 0x1a3   : > { %10292 = vrot.lane.b32.xlu0 %v10291_v6, %s15244_s10 }
 0x1a4   : > { %10297 = vrot.lane.b32.xlu1 %v10291_v6, %s10735_s11 }
 0x1a7   : > { %10302 = vrot.lane.b32.xlu0 %v10301_v12, %s15246_s4 }
 0x1a8   : > { %10307 = vrot.lane.b32.xlu1 %v10306_v14, %s15244_s10 }
 0x1ed   : > { %v10193_v15 = vpop.permute.xlu0 %10192 }
 0x1ee   : > { %v10203_v19 = vpop.permute.xlu1 %10202  ;;  %v10195_v20 = vunpack.i.h.bf16 %v10193_v15  ;;  %v10194_v21 = vunpack.i.l.bf16 %v10193_v15 }
 0x1ef   : > { %v10205_v22 = vunpack.i.h.bf16 %v10203_v19  ;;  %v10204_v23 = vunpack.i.l.bf16 %v10203_v19 }
 0x1f0   : > { %v1121_v29 = vsel %vm1120_vm0, 0.0, %v10194_v21  ;;  %v1122_v34 = vsel %vm1120_vm0, %v11365_v53, %v10195_v20 }
 0x1f1   : > { %v10198_v24 = vpop.permute.xlu0 %10197 }
 0x1f2   : > { %v10200_v16 = vunpack.i.h.bf16 %v10198_v24  ;;  %v10199_v25 = vunpack.i.l.bf16 %v10198_v24  ;;  %v10208_v26 = vpop.permute.xlu1 %10207 }
 0x1f3   : > { %v10210_v30 = vunpack.i.h.bf16 %v10208_v26  ;;  %v10209_v31 = vunpack.i.l.bf16 %v10208_v26 }
 0x1f4   : > { %v1126_v36 = vsel %vm1125_vm1, %v1121_v29, %v10199_v25  ;;  %v1127_v37 = vsel %vm1125_vm1, %v1122_v34, %v10200_v16 }
 0x1f5   : > { %v10213_v38 = vpop.permute.xlu0 %10212  ;;  %v1131_v39 = vsel %vm1130_vm2, %v1126_v36, %v10204_v23  ;;  %v1132_v40 = vsel %vm1130_vm2, %v1127_v37, %v10205_v22  ;;  %v1291_v44 = vsel %vm1120_vm0, %v11234_v5, %v10209_v31  ;;  %v1292_v45 = vsel %vm1120_vm0, %v11237_v7, %v10210_v30 }
 0x1f6   : > { %v10215_v46 = vunpack.i.h.bf16 %v10213_v38  ;;  %v10214_v47 = vunpack.i.l.bf16 %v10213_v38  ;;  %v10218_v48 = vpop.permute.xlu1 %10217  ;;  %8005 = vmatprep.mubr.f32.mxu0 %v1131_v39 }
 0x1f7   : > { %v10220_v50 = vunpack.i.h.bf16 %v10218_v48  ;;  %v10219_v51 = vunpack.i.l.bf16 %v10218_v48  ;;  %8006 = vmatmul.mubr.f32.vlgmr.msra.gmra.mrb[0].mxu0 %v1132_v40 }
 0x1f8   : > { %8253 = vmatpush3.bf16.msra.mxu0 %v11287_v27  ;;  %v1295_v52 = vsel %vm1125_vm1, %v1291_v44, %v10214_v47  ;;  %v1296_v53 = vsel %vm1125_vm1, %v1292_v45, %v10215_v46 }
 0x1f9   : > { %v1299_v56 = vsel %vm1130_vm2, %v1295_v52, %v10219_v51  ;;  %8255 = vmatprep.subr.bf16.mxu0 %v11289_v28  ;;  %v1300_v5 = vsel %vm1130_vm2, %v1296_v53, %v10220_v50  ;;  %v10223_v7 = vpop.permute.xlu0 %10222  ;;  %v1695_v51 = vld [vmem:[#allocation2 + $0x80] sm:$0xff]  ;;  %v1696_v52 = vld [vmem:[#allocation2 + $0x88] sm:$0xff] }
 0x1fa   : > { %8043 = vmatprep.mubr.f32.mxu1 %v1299_v56  ;;  %v10225_v57 = vunpack.i.h.bf16 %v10223_v7  ;;  %v10224_v58 = vunpack.i.l.bf16 %v10223_v7  ;;  %v10228_v59 = vpop.permute.xlu1 %10227  ;;  %v1680_v7 = vld [vmem:[#allocation2 + $0x8] sm:$0xff] }
 0x1fb   : > { %8044 = vmatmul.mubr.f32.vlgmr.msra.gmra.mrb[0].mxu1 %v1300_v5  ;;  %v10230_v63 = vunpack.i.h.bf16 %v10228_v59  ;;  %v10229_v0 = vunpack.i.l.bf16 %v10228_v59 }
 0x1fc   : > { %8257 = vmatpush3.bf16.msra.mxu0 %v11289_v28  ;;  %8285 = vmatpush3.bf16.msra.mxu1 %v11287_v27  ;;  %v1123_v1 = vsel %vm1120_vm0, %v11368_v54, %v10224_v58  ;;  %v1124_v2 = vsel %vm1120_vm0, %v11421_v8, %v10225_v57 }
 0x1fd   : > { %8259 = vmatprep.subr.bf16.mxu0 %v11310_v35  ;;  %8287 = vmatprep.subr.bf16.mxu1 %v11289_v28  ;;  %v10233_v3 = vpop.permute.xlu0 %10232  ;;  %v1128_v6 = vsel %vm1125_vm1, %v1123_v1, %v10229_v0  ;;  %v1129_v11 = vsel %vm1125_vm1, %v1124_v2, %v10230_v63  ;;  %v11512_v63 = vpack.c.bf16 %v1696_v52, %v1695_v51  ;;  %v1697_v0 = vld [vmem:[#allocation2 + $0x90] sm:$0xff] }
 0x1fe   : > { %v10235_v12 = vunpack.i.h.bf16 %v10233_v3  ;;  %v10234_v14 = vunpack.i.l.bf16 %v10233_v3  ;;  %v10238_v15 = vpop.permute.xlu1 %10237  ;;  %v1685_v52 = vld [vmem:[#allocation2 + $0x30] sm:$0xff] }
 0x1ff   : > { %v10239_v19 = vunpack.i.l.bf16 %v10238_v15 }
 0x200   : > { %8261 = vmatpush3.bf16.msra.mxu0 %v11310_v35  ;;  %8289 = vmatpush3.bf16.msra.mxu1 %v11289_v28  ;;  %v1133_v27 = vsel %vm1130_vm2, %v1128_v6, %v10234_v14  ;;  %v1134_v54 = vsel %vm1130_vm2, %v1129_v11, %v10235_v12 }
 0x201   : > { %8263 = vmatprep.subr.bf16.mxu0 %v11330_v42  ;;  %8291 = vmatprep.subr.bf16.mxu1 %v11310_v35  ;;  %v11471_v8 = vpop.permute.xlu0 %10242  ;;  %v1436_v20 = vsel %vm1120_vm0, %v11244_v9, %v10239_v19 }
 0x202   : > { %v10244_v21 = vunpack.i.l.bf16 %v11471_v8  ;;  %v11476_v22 = vpop.permute.xlu1 %10247  ;;  %8008 = vmatprep.mubr.f32.mxu0 %v1133_v27 }
 0x203   : > { %v10249_v28 = vunpack.i.l.bf16 %v11476_v22  ;;  %8009 = vmatmul.mubr.f32.gmra.mrb[2].mxu0 %v1134_v54  ;;  %v10250_v1 = vunpack.i.h.bf16 %v11476_v22 }
 0x204   : > { %8265 = vmatpush3.bf16.msra.mxu0 %v11330_v42  ;;  %8293 = vmatpush3.bf16.msra.mxu1 %v11310_v35  ;;  %v1440_v23 = vsel %vm1125_vm1, %v1436_v20, %v10244_v21  ;;  %v1682_v20 = vld [vmem:[#allocation2 + $0x18] sm:$0xff] }
 0x205   : > { %8267 = vmatprep.subr.bf16.mxu0 %v11351_v49  ;;  %8295 = vmatprep.subr.bf16.mxu1 %v11330_v42  ;;  %v10253_v24 = vpop.permute.xlu0 %10252  ;;  %v1444_v9 = vsel %vm1130_vm2, %v1440_v23, %v10249_v28 }
 0x206   : > { %v10255_v16 = vunpack.i.h.bf16 %v10253_v24  ;;  %v10254_v25 = vunpack.i.l.bf16 %v10253_v24  ;;  %v10258_v26 = vpop.permute.xlu1 %10257  ;;  %8081 = vmatprep.mubr.f32.mxu0 %v1444_v9  ;;  %v1699_v9 = vld [vmem:[#allocation2 + $0xa0] sm:$0xff] }
 0x207   : > { %v10260_v29 = vunpack.i.h.bf16 %v10258_v26  ;;  %v10259_v30 = vunpack.i.l.bf16 %v10258_v26 }
 0x208   : > { %8269 = vmatpush3.bf16.msra.mxu0 %v11351_v49  ;;  %8297 = vmatpush3.bf16.msra.mxu1 %v11330_v42  ;;  %v1293_v35 = vsel %vm1120_vm0, %v11262_v17, %v10254_v25  ;;  %v1294_v31 = vsel %vm1120_vm0, %v11265_v18, %v10255_v16  ;;  %v10240_v42 = vunpack.i.h.bf16 %v10238_v15  ;;  %v1700_v16 = vld [vmem:[#allocation2 + $0xa8] sm:$0xff] }
 0x209   : > { %8271 = vmatprep.subr.bf16.mxu0 %v11371_v55  ;;  %8299 = vmatprep.subr.bf16.mxu1 %v11351_v49  ;;  %v10263_v34 = vpop.permute.xlu0 %10262  ;;  %v1297_v36 = vsel %vm1125_vm1, %v1293_v35, %v10259_v30  ;;  %v1298_v37 = vsel %vm1125_vm1, %v1294_v31, %v10260_v29 }
 0x20a   : > { %v10265_v38 = vunpack.i.h.bf16 %v10263_v34  ;;  %v10264_v39 = vunpack.i.l.bf16 %v10263_v34  ;;  %v10268_v40 = vpop.permute.xlu1 %10267  ;;  %v1437_v56 = vsel %vm1120_vm0, %v11247_v10, %v10240_v42  ;;  %v1698_v10 = vld [vmem:[#allocation2 + $0x98] sm:$0xff] }
 0x20b   : > { %v10269_v44 = vunpack.i.l.bf16 %v10268_v40  ;;  %v10270_v47 = vunpack.i.h.bf16 %v10268_v40  ;;  %v11526_v54 = vpack.c.bf16 %v1698_v10, %v1697_v0 }
 0x20c   : > { %8273 = vmatpush3.bf16.msra.mxu0 %v11371_v55  ;;  %8301 = vmatpush3.bf16.msra.mxu1 %v11351_v49  ;;  %v1301_v17 = vsel %vm1130_vm2, %v1297_v36, %v10264_v39  ;;  %v1302_v18 = vsel %vm1130_vm2, %v1298_v37, %v10265_v38  ;;  %v10245_v49 = vunpack.i.h.bf16 %v11471_v8  ;;  %v1681_v8 = vld [vmem:[#allocation2 + $0x10] sm:$0xff]  ;;  %v11546_v38 = vpack.c.bf16 %v1700_v16, %v1699_v9  ;;  %v1684_v39 = vld [vmem:[#allocation2 + $0x28] sm:$0xff]  ;;  %v1730_v16 = vld [vmem:[#allocation2 + $0x198] sm:$0xff] }
 0x20d   : > { %8275 = vmatprep.subr.bf16.mxu0 %v11392_v61  ;;  %8303 = vmatprep.subr.bf16.mxu1 %v11371_v55  ;;  %v10273_v45 = vpop.permute.xlu0 %10272  ;;  %v1578_v46 = vsel %vm1120_vm0, %v11303_v32, %v10269_v44  ;;  %v1679_v32 = vld [vmem:[#allocation2] sm:$0xff]  ;;  %v11534_v29 = vpack.c.bf16 %v1682_v20, %v1681_v8  ;;  %v1693_v20 = vld [vmem:[#allocation2 + $0x70] sm:$0xff] }
 0x20e   : > { %v10274_v48 = vunpack.i.l.bf16 %v10273_v45  ;;  %v10278_v50 = vpop.permute.xlu1 %10277  ;;  %8046 = vmatprep.mubr.f32.mxu1 %v1301_v17  ;;  %v10275_v57 = vunpack.i.h.bf16 %v10273_v45  ;;  %v1441_v11 = vsel %vm1125_vm1, %v1437_v56, %v10245_v49  ;;  %v11518_v15 = vpack.c.bf16 %v1680_v7, %v1679_v32  ;;  %v1701_v17 = vld [vmem:[#allocation2 + $0xb0] sm:$0xff]  ;;  %v1686_v49 = vld [vmem:[#allocation2 + $0x38] sm:$0xff]  ;;  %v1704_v56 = vld [vmem:[#allocation2 + $0xc8] sm:$0xff] }
 0x20f   : > { %v10279_v53 = vunpack.i.l.bf16 %v10278_v50  ;;  %8047 = vmatmul.mubr.f32.gmra.mrb[2].mxu1 %v1302_v18  ;;  %v10280_v19 = vunpack.i.h.bf16 %v10278_v50  ;;  %v1702_v18 = vld [vmem:[#allocation2 + $0xb8] sm:$0xff]  ;;  %v1687_v7 = vld [vmem:[#allocation2 + $0x40] sm:$0xff]  ;;  %v1729_v9 = vld [vmem:[#allocation2 + $0x190] sm:$0xff] }
 0x210   : > { %8277 = vmatpush3.bf16.msra.mxu0 %v11392_v61  ;;  %8305 = vmatpush3.bf16.msra.mxu1 %v11371_v55  ;;  %v1582_v5 = vsel %vm1125_vm1, %v1578_v46, %v10274_v48  ;;  %v1579_v55 = vsel %vm1120_vm0, %v11306_v33, %v10270_v47  ;;  %v11556_v51 = vpack.c.bf16 %v1702_v18, %v1701_v17  ;;  %v1718_v17 = vld [vmem:[#allocation2 + $0x138] sm:$0xff]  ;;  %v1735_v18 = vld [vmem:[#allocation2 + $0x1c0] sm:$0xff] }
 0x211   : > { %8279 = vmatprep.subr.bf16.mxu0 %v11413_v4  ;;  %8307 = vmatprep.subr.bf16.mxu1 %v11392_v61  ;;  %v10283_v58 = vpop.permute.xlu0 %10282  ;;  %v1586_v59 = vsel %vm1130_vm2, %v1582_v5, %v10279_v53  ;;  %v1583_v21 = vsel %vm1125_vm1, %v1579_v55, %v10275_v57  ;;  %v1703_v53 = vld [vmem:[#allocation2 + $0xc0] sm:$0xff]  ;;  %v11559_v5 = vpack.c.bf16 %v1686_v49, %v1685_v52  ;;  %v1688_v57 = vld [vmem:[#allocation2 + $0x48] sm:$0xff]  ;;  %v1690_v55 = vld [vmem:[#allocation2 + $0x58] sm:$0xff] }
 0x212   : > { %v10285_v2 = vunpack.i.h.bf16 %v10283_v58  ;;  %v10284_v3 = vunpack.i.l.bf16 %v10283_v58  ;;  %v10288_v6 = vpop.permute.xlu1 %10287  ;;  %8119 = vmatprep.mubr.f32.mxu1 %v1586_v59  ;;  %v1587_v30 = vsel %vm1130_vm2, %v1583_v21, %v10280_v19  ;;  %v11562_v32 = vpack.c.bf16 %v1704_v56, %v1703_v53  ;;  %v1705_v58 = vld [vmem:[#allocation2 + $0xd0] sm:$0xff]  ;;  %v1706_v59 = vld [vmem:[#allocation2 + $0xd8] sm:$0xff] }
 0x213   : > { %v10290_v12 = vunpack.i.h.bf16 %v10288_v6  ;;  %v10289_v14 = vunpack.i.l.bf16 %v10288_v6  ;;  %v11565_v0 = vpack.c.bf16 %v1688_v57, %v1687_v7  ;;  %v11568_v10 = vpack.c.bf16 %v1706_v59, %v1705_v58  ;;  %v1694_v21 = vld [vmem:[#allocation2 + $0x78] sm:$0xff]  ;;  %v1721_v56 = vld [vmem:[#allocation2 + $0x150] sm:$0xff]  ;;  %v1739_v57 = vld [vmem:[#allocation2 + $0x1e0] sm:$0xff] }
 0x214   : > { %8281 = vmatpush3.bf16.msra.mxu0 %v11413_v4  ;;  %8309 = vmatpush3.bf16.msra.mxu1 %v11392_v61  ;;  %v1438_v27 = vsel %vm1120_vm0, %v11327_v41, %v10284_v3  ;;  %v1439_v33 = vsel %vm1120_vm0, %v11333_v43, %v10285_v2  ;;  %v1445_v41 = vsel %vm1130_vm2, %v1441_v11, %v10250_v1  ;;  %v1689_v1 = vld [vmem:[#allocation2 + $0x50] sm:$0xff]  ;;  %v1707_v2 = vld [vmem:[#allocation2 + $0xe0] sm:$0xff]  ;;  %v1708_v3 = vld [vmem:[#allocation2 + $0xe8] sm:$0xff] }
 0x215   : > { %8311 = vmatprep.subr.bf16.mxu1 %v11413_v4  ;;  %v10293_v22 = vpop.permute.xlu0 %10292  ;;  %v1442_v28 = vsel %vm1125_vm1, %v1438_v27, %v10289_v14  ;;  %v1443_v23 = vsel %vm1125_vm1, %v1439_v33, %v10290_v12  ;;  %8315 = vmatprep.subr.bf16.mxu0 %v11512_v63  ;;  %v11571_v6 = vpack.c.bf16 %v1690_v55, %v1689_v1  ;;  %v1691_v12 = vld [vmem:[#allocation2 + $0x60] sm:$0xff]  ;;  %v1692_v14 = vld [vmem:[#allocation2 + $0x68] sm:$0xff]  ;;  %v1709_v27 = vld [vmem:[#allocation2 + $0xf0] sm:$0xff] }
 0x216   : > { %v10295_v61 = vunpack.i.h.bf16 %v10293_v22  ;;  %v10294_v24 = vunpack.i.l.bf16 %v10293_v22  ;;  %v10298_v43 = vpop.permute.xlu1 %10297  ;;  %v11574_v11 = vpack.c.bf16 %v1708_v3, %v1707_v2  ;;  %v11578_v19 = vpack.c.bf16 %v1692_v14, %v1691_v12  ;;  %v1710_v33 = vld [vmem:[#allocation2 + $0xf8] sm:$0xff]  ;;  %v1740_v58 = vld [vmem:[#allocation2 + $0x1e8] sm:$0xff]  ;;  %v1723_v55 = vld [vmem:[#allocation2 + $0x160] sm:$0xff] }
 0x217   : > { %8082 = vmatmul.mubr.f32.vlgmr.msra.gmra.mrb[4].mxu0 %v1445_v41  ;;  %v10300_v25 = vunpack.i.h.bf16 %v10298_v43  ;;  %v10299_v26 = vunpack.i.l.bf16 %v10298_v43  ;;  %v11581_v8 = vpack.c.bf16 %v1710_v33, %v1709_v27  ;;  %v11583_v22 = vpack.c.bf16 %v1694_v21, %v1693_v20  ;;  %v1738_v52 = vld [vmem:[#allocation2 + $0x1d8] sm:$0xff]  ;;  %v1724_v2 = vld [vmem:[#allocation2 + $0x168] sm:$0xff]  ;;  %v1741_v12 = vld [vmem:[#allocation2 + $0x1f0] sm:$0xff] }
 0x218   : > { %8313 = vmatpush3.bf16.msra.mxu1 %v11413_v4  ;;  %v1446_v35 = vsel %vm1130_vm2, %v1442_v28, %v10294_v24  ;;  %v1447_v31 = vsel %vm1130_vm2, %v1443_v23, %v10295_v61  ;;  %8317 = vmatpush3.bf16.msra.mxu0 %v11518_v15  ;;  %v1683_v4 = vld [vmem:[#allocation2 + $0x20] sm:$0xff]  ;;  %v1728_v23 = vld [vmem:[#allocation2 + $0x188] sm:$0xff]  ;;  %v1722_v7 = vld [vmem:[#allocation2 + $0x158] sm:$0xff]  ;;  %v11623_v1 = vpack.c.bf16 %v1740_v58, %v1739_v57 }
 0x219   : > { %v10303_v34 = vpop.permute.xlu0 %10302  ;;  %8084 = vmatprep.mubr.f32.mxu0 %v1446_v35  ;;  %v1580_v36 = vsel %vm1120_vm0, %v11389_v60, %v10299_v26  ;;  %v1581_v37 = vsel %vm1120_vm0, %v11395_v62, %v10300_v25  ;;  %8319 = vmatprep.subr.bf16.mxu0 %v11526_v54  ;;  %v11551_v62 = vpack.c.bf16 %v1684_v39, %v1683_v4  ;;  %v1727_v28 = vld [vmem:[#allocation2 + $0x180] sm:$0xff]  ;;  %v1712_v24 = vld [vmem:[#allocation2 + $0x108] sm:$0xff]  ;;  %v1713_v26 = vld [vmem:[#allocation2 + $0x110] sm:$0xff] }
 0x21a   : > { %v10305_v40 = vunpack.i.h.bf16 %v10303_v34  ;;  %v10304_v44 = vunpack.i.l.bf16 %v10303_v34  ;;  %v10308_v42 = vpop.permute.xlu1 %10307  ;;  %v11586_v41 = vpack.c.bf16 %v1728_v23, %v1727_v28  ;;  %v1711_v61 = vld [vmem:[#allocation2 + $0x100] sm:$0xff]  ;;  %v11594_v25 = vpack.c.bf16 %v1730_v16, %v1729_v9  ;;  %v1732_v34 = vld [vmem:[#allocation2 + $0x1a8] sm:$0xff]  ;;  %v1733_v39 = vld [vmem:[#allocation2 + $0x1b0] sm:$0xff] }
 0x21b   : > { %8120 = vmatmul.mubr.f32.vlgmr.msra.gmra.mrb[4].mxu1 %v1587_v30  ;;  %v10310_v45 = vunpack.i.h.bf16 %v10308_v42  ;;  %v10309_v46 = vunpack.i.l.bf16 %v10308_v42  ;;  %8085 = vmatmul.mubr.f32.gmra.mrb[6].mxu0 %v1447_v31  ;;  %v11589_v43 = vpack.c.bf16 %v1712_v24, %v1711_v61  ;;  %v1714_v30 = vld [vmem:[#allocation2 + $0x118] sm:$0xff]  ;;  %v1731_v35 = vld [vmem:[#allocation2 + $0x1a0] sm:$0xff]  ;;  %v1717_v42 = vld [vmem:[#allocation2 + $0x130] sm:$0xff]  ;;  %v11620_v59 = vpack.c.bf16 %v1722_v7, %v1721_v56 }
 0x21c   : > { %v1584_v60 = vsel %vm1125_vm1, %v1580_v36, %v10304_v44  ;;  %v1585_v47 = vsel %vm1125_vm1, %v1581_v37, %v10305_v40  ;;  %8321 = vmatpush3.bf16.msra.mxu0 %v11534_v29  ;;  %8347 = vmatprep.subr.bf16.mxu1 %v11586_v41  ;;  %v11596_v31 = vpack.c.bf16 %v1714_v30, %v1713_v26  ;;  %v1715_v36 = vld [vmem:[#allocation2 + $0x120] sm:$0xff]  ;;  %v1716_v37 = vld [vmem:[#allocation2 + $0x128] sm:$0xff]  ;;  %v1742_v14 = vld [vmem:[#allocation2 + $0x1f8] sm:$0xff] }
 0x21d   : > { %v1588_v48 = vsel %vm1130_vm2, %v1584_v60, %v10309_v46  ;;  %v1589_v50 = vsel %vm1130_vm2, %v1585_v47, %v10310_v45  ;;  %8323 = vmatprep.subr.bf16.mxu0 %v11546_v38  ;;  %8349 = vmatpush3.bf16.msra.mxu1 %v11589_v43  ;;  %v11599_v4 = vpack.c.bf16 %v1732_v34, %v1731_v35  ;;  %v1736_v45 = vld [vmem:[#allocation2 + $0x1c8] sm:$0xff]  ;;  %v1719_v47 = vld [vmem:[#allocation2 + $0x140] sm:$0xff]  ;;  %v1725_v33 = vld [vmem:[#allocation2 + $0x170] sm:$0xff] }
 0x21e   : > { %8122 = vmatprep.mubr.f32.mxu1 %v1588_v48  ;;  %8351 = vmatprep.subr.bf16.mxu1 %v11594_v25  ;;  %v11602_v40 = vpack.c.bf16 %v1716_v37, %v1715_v36  ;;  %v11608_v46 = vpack.c.bf16 %v1718_v17, %v1717_v42  ;;  %v11611_v60 = vpack.c.bf16 %v1736_v45, %v1735_v18  ;;  %v1720_v48 = vld [vmem:[#allocation2 + $0x148] sm:$0xff]  ;;  %v1726_v20 = vld [vmem:[#allocation2 + $0x178] sm:$0xff]  ;;  %v11640_v28 = vld [vmem:[%s15496_s0] ss:$0 sm:$0xff]  ;;  %s15499_s0 = sld [smem:[#allocation130_spill]] }
 0x21f   : > { %8123 = vmatmul.mubr.f32.gmra.mrb[6].mxu1 %v1589_v50  ;;  %v1737_v50 = vld [vmem:[#allocation2 + $0x1d0] sm:$0xff]  ;;  %v11614_v49 = vpack.c.bf16 %v1720_v48, %v1719_v47  ;;  %v11626_v3 = vpack.c.bf16 %v1724_v2, %v1723_v55  ;;  %v11630_v27 = vpack.c.bf16 %v1742_v14, %v1741_v12  ;;  %v11632_v21 = vpack.c.bf16 %v1726_v20, %v1725_v33 }
 0x220   : > { %8325 = vmatpush3.bf16.msra.mxu0 %v11551_v62  ;;  %v11617_v53 = vpack.c.bf16 %v1738_v52, %v1737_v50 }
 0x221   : > { %8327 = vmatprep.subr.bf16.mxu0 %v11556_v51  ;;  %8353 = vmatpush3.bf16.msra.mxu1 %v11596_v31 }
 0x222   : > { %8355 = vmatprep.subr.bf16.mxu1 %v11599_v4 }
 0x224   : > { %8329 = vmatpush3.bf16.msra.mxu0 %v11559_v5 }
 0x225   : > { %8331 = vmatprep.subr.bf16.mxu0 %v11562_v32  ;;  %8357 = vmatpush3.bf16.msra.mxu1 %v11602_v40 }
 0x228   : > { %8333 = vmatpush3.bf16.msra.mxu0 %v11565_v0 }
 0x229   : > { %8335 = vmatprep.subr.bf16.mxu0 %v11568_v10 }
 0x22c   : > { %8337 = vmatpush3.bf16.msra.mxu0 %v11571_v6 }
 0x22d   : > { %8339 = vmatprep.subr.bf16.mxu0 %v11574_v11 }
 0x230   : > { %8341 = vmatpush3.bf16.msra.mxu0 %v11578_v19 }
 0x231   : > { %8343 = vmatprep.subr.bf16.mxu0 %v11581_v8 }
 0x234   : > { %8345 = vmatpush3.bf16.msra.mxu0 %v11583_v22 }
 0x235   : > { %8379 = vmatprep.subr.bf16.mxu0 %v11512_v63  ;;  %v1734_v63 = vld [vmem:[#allocation2 + $0x1b8] sm:$0xff] }
 0x236   : > { %v11605_v44 = vpack.c.bf16 %v1734_v63, %v1733_v39 }
 0x238   : > { %8359 = vmatprep.subr.bf16.mxu1 %v11605_v44 }
 0x239   : > { %8361 = vmatpush3.bf16.msra.mxu1 %v11608_v46 }
 0x23a   : > { %8363 = vmatprep.subr.bf16.mxu1 %v11611_v60 }
 0x23d   : > { %8365 = vmatpush3.bf16.msra.mxu1 %v11614_v49 }
 0x23e   : > { %8367 = vmatprep.subr.bf16.mxu1 %v11617_v53 }
 0x241   : > { %8369 = vmatpush3.bf16.msra.mxu1 %v11620_v59 }
 0x242   : > { %8371 = vmatprep.subr.bf16.mxu1 %v11623_v1 }
 0x245   : > { %8373 = vmatpush3.bf16.msra.mxu1 %v11626_v3 }
 0x246   : > { %8375 = vmatprep.subr.bf16.mxu1 %v11630_v27 }
 0x249   : > { %8377 = vmatpush3.bf16.msra.mxu1 %v11632_v21 }
 0x24a   : > { %8411 = vmatprep.subr.bf16.mxu1 %v11586_v41 }
 0x2ca   : > { %v8007_v23 = vpop.f32.mrb[0].mxu0 }
 0x2cb   : > { %v1224_v61 = vpop.f32.mrb[1].mxu0  ;;  %v11643_v24 = vadd.f32 %v8007_v23, %v11640_v28  ;;  %v2099_v23 = vld [vmem:[#allocation6 + $0x8] sm:$0xff] }
 0x2cc   : > { %v1225_v9 = vadd.f32 %v11640_v28, %v1224_v61 }
 0x2cd   : > { %v1244_v35 = vmax.f32 %v11643_v24, 0.0  ;;  %v2120_v24 = vld [vmem:[#allocation6 + $0xb0] sm:$0xff] }
 0x2ce   : > { %v1243_v16 = vmax.f32 %v1225_v9, 0.0  ;;  %v8045_v26 = vpop.f32.mrb[0].mxu1  ;;  %v2117_v9 = vld [vmem:[#allocation6 + $0x98] sm:$0xff] }
 0x2cf   : > { %v1369_v30 = vpop.f32.mrb[1].mxu1 }
 0x2d0   : > { %1814 = vmatprep.mubr.f32.mxu0 %v1243_v16  ;;  %v2100_v16 = vld [vmem:[#allocation6 + $0x10] sm:$0xff] }
 0x2d1   : > { %1815 = vmatmul.mubr.f32.vlgmr.msra.gmra.mrb[8].mxu0 %v15248_v13 }
 0x2d2   : > { %1819 = vmatprep.mubr.f32.mxu0 %v1244_v35  ;;  %8381 = vmatpush3.bf16.msra.mxu0 %v11518_v15 }
 0x2d3   : > { %8383 = vmatprep.subr.bf16.mxu0 %v11526_v54  ;;  %v2114_v54 = vld [vmem:[#allocation6 + $0x80] sm:$0xff] }
 0x2d6   : > { %v8010_v41 = vpop.f32.mrb[2].mxu0  ;;  %8385 = vmatpush3.bf16.msra.mxu0 %v11534_v29  ;;  %v2115_v29 = vld [vmem:[#allocation6 + $0x88] sm:$0xff] }
 0x2d7   : > { %v1234_v34 = vpop.f32.mrb[3].mxu0  ;;  %8387 = vmatprep.subr.bf16.mxu0 %v11546_v38  ;;  %v11697_v56 = vadd.f32 %v8010_v41, %v11640_v28 }
 0x2d8   : > { %v11677_v39 = vadd.f32 %v11640_v28, %v1234_v34 }
 0x2da   : > { %8389 = vmatpush3.bf16.msra.mxu0 %v11551_v62  ;;  %v11664_v62 = vadd.f32 %v11640_v28, %v1369_v30  ;;  %v1245_v7 = vmax.f32 %v11677_v39, 0.0  ;;  %v2118_v30 = vld [vmem:[#allocation6 + $0xa0] sm:$0xff]  ;;  %v2111_v39 = vld [vmem:[#allocation6 + $0x68] sm:$0xff] }
 0x2db   : > { %8391 = vmatprep.subr.bf16.mxu0 %v11556_v51 }
 0x2de   : > { %8393 = vmatpush3.bf16.msra.mxu0 %v11559_v5  ;;  %v8442_v5 = vpack.c.bf16 %v2115_v29, %v2114_v54  ;;  %v2104_v54 = vld [vmem:[#allocation6 + $0x30] sm:$0xff]  ;;  %v2105_v29 = vld [vmem:[#allocation6 + $0x38] sm:$0xff] }
 0x2df   : > { %8395 = vmatprep.subr.bf16.mxu0 %v11562_v32 }
 0x2e2   : > { %v8048_v36 = vpop.f32.mrb[2].mxu1  ;;  %8397 = vmatpush3.bf16.msra.mxu0 %v11565_v0 }
 0x2e3   : > { %v1379_v15 = vpop.f32.mrb[3].mxu1  ;;  %8399 = vmatprep.subr.bf16.mxu0 %v11568_v10  ;;  %v11672_v10 = vadd.f32 %v8045_v26, %v11640_v28  ;;  %v1385_v14 = vadd.f32 %v8048_v36, %v11640_v28  ;;  %v2101_v26 = vld [vmem:[#allocation6 + $0x18] sm:$0xff]  ;;  %v2102_v36 = vld [vmem:[#allocation6 + $0x20] sm:$0xff] }
 0x2e4   : > { %v11701_v57 = vadd.f32 %v11640_v28, %v1379_v15  ;;  %v8448_v41 = vpack.c.bf16 %v2101_v26, %v2100_v16  ;;  %v2154_v26 = vld [vmem:[#allocation6 + $0x1c0] sm:$0xff] }
 0x2e5   : > { %v1391_v61 = vmax.f32 %v1385_v14, 0.0  ;;  %v2151_v14 = vld [vmem:[#allocation6 + $0x1a8] sm:$0xff] }
 0x2e6   : > { %8401 = vmatpush3.bf16.msra.mxu0 %v11571_v6  ;;  %v1390_v33 = vmax.f32 %v11701_v57, 0.0  ;;  %v2148_v57 = vld [vmem:[#allocation6 + $0x190] sm:$0xff] }
 0x2e7   : > { %8403 = vmatprep.subr.bf16.mxu0 %v11574_v11 }
 0x2ea   : > { %v8083_v38 = vpop.f32.mrb[4].mxu0  ;;  %8405 = vmatpush3.bf16.msra.mxu0 %v11578_v19  ;;  %v1388_v19 = vmax.f32 %v11664_v62, 0.0 }
 0x2eb   : > { %v1514_v51 = vpop.f32.mrb[5].mxu0  ;;  %8407 = vmatprep.subr.bf16.mxu0 %v11581_v8  ;;  %v11668_v32 = vadd.f32 %v8083_v38, %v11640_v28  ;;  %v2123_v38 = vld [vmem:[#allocation6 + $0xc8] sm:$0xff] }
 0x2ec   : > { %v1515_v0 = vadd.f32 %v11640_v28, %v1514_v51  ;;  %v2125_v51 = vld [vmem:[#allocation6 + $0xd8] sm:$0xff] }
 0x2ed   : > { %v1534_v42 = vmax.f32 %v11668_v32, 0.0  ;;  %v2108_v32 = vld [vmem:[#allocation6 + $0x50] sm:$0xff] }
 0x2ee   : > { %v1533_v6 = vmax.f32 %v1515_v0, 0.0  ;;  %v8121_v11 = vpop.f32.mrb[4].mxu1  ;;  %v8086_v37 = vpop.f32.mrb[6].mxu0  ;;  %8409 = vmatpush3.bf16.msra.mxu0 %v11583_v22  ;;  %v1389_v22 = vmax.f32 %v11672_v10, 0.0  ;;  %v2109_v0 = vld [vmem:[#allocation6 + $0x58] sm:$0xff] }
 0x2ef   : > { %v1656_v8 = vpop.f32.mrb[5].mxu1  ;;  %v1524_v63 = vpop.f32.mrb[7].mxu0  ;;  %8443 = vmatprep.subr.bf16.mxu0 %v8442_v5  ;;  %v11681_v17 = vadd.f32 %v8121_v11, %v11640_v28  ;;  %v11693_v48 = vadd.f32 %v8086_v37, %v11640_v28  ;;  %v8464_v10 = vpack.c.bf16 %v2109_v0, %v2108_v32  ;;  %v2127_v11 = vld [vmem:[#allocation6 + $0xe8] sm:$0xff]  ;;  %v2359_v32 = vld [vmem:[%s15497_s8 + $0x80] sm:$0xff]  ;;  %s15819_s8 = sld [smem:[#allocation137_spill]] }
 0x2f0   : > { %v11684_v18 = vadd.f32 %v11640_v28, %v1656_v8  ;;  %1899 = vmatprep.mubr.f32.mxu1 %v1533_v6  ;;  %v11687_v45 = vadd.f32 %v11640_v28, %v1524_v63  ;;  %v2146_v63 = vld [vmem:[#allocation6 + $0x180] sm:$0xff] }
 0x2f1   : > { %1900 = vmatmul.mubr.f32.vlgmr.msra.gmra.mrb[8].mxu1 %v1388_v19  ;;  %v1676_v55 = vmax.f32 %v11681_v17, 0.0  ;;  %v1536_v12 = vmax.f32 %v11693_v48, 0.0  ;;  %v2131_v48 = vld [vmem:[#allocation6 + $0x108] sm:$0xff] }
 0x2f2   : > { %v1675_v47 = vmax.f32 %v11684_v18, 0.0  ;;  %8413 = vmatpush3.bf16.msra.mxu1 %v11589_v43  ;;  %1904 = vmatprep.mubr.f32.mxu1 %v1534_v42  ;;  %v1535_v50 = vmax.f32 %v11687_v45, 0.0  ;;  %v8124_v52 = vpop.f32.mrb[6].mxu1  ;;  %v2128_v18 = vld [vmem:[#allocation6 + $0xf0] sm:$0xff]  ;;  %v2129_v45 = vld [vmem:[#allocation6 + $0xf8] sm:$0xff]  ;;  %v2360_v0 = vld [vmem:[%s15498_s12 + $0x88] sm:$0xff] }
 0x2f3   : > { %8415 = vmatprep.subr.bf16.mxu1 %v11594_v25  ;;  %v11705_v58 = vadd.f32 %v8124_v52, %v11640_v28  ;;  %v1666_v43 = vpop.f32.mrb[7].mxu1  ;;  %v1246_v25 = vmax.f32 %v11697_v56, 0.0  ;;  %v2113_v52 = vld [vmem:[#allocation6 + $0x78] sm:$0xff] }
 0x2f4   : > { %1820 = vmatmul.mubr.f32.gmra.mrb[10].mxu0 %v1675_v47  ;;  %v11711_v2 = vadd.f32 %v11640_v28, %v1666_v43  ;;  %v2116_v28 = vld [vmem:[#allocation6 + $0x90] sm:$0xff] }
 0x2f5   : > { %1824 = vmatprep.mubr.f32.mxu0 %v1245_v7  ;;  %1905 = vmatmul.mubr.f32.gmra.mrb[10].mxu1 %v1389_v22 }
 0x2f6   : > { %8417 = vmatpush3.bf16.msra.mxu1 %v11596_v31  ;;  %1909 = vmatprep.mubr.f32.mxu1 %v1535_v50  ;;  %v1677_v20 = vmax.f32 %v11711_v2, 0.0  ;;  %v2098_v31 = vld [vmem:[#allocation6] sm:$0xff]  ;;  %v2133_v2 = vld [vmem:[#allocation6 + $0x118] sm:$0xff] }
 0x2f7   : > { %8419 = vmatprep.subr.bf16.mxu1 %v11599_v4  ;;  %v8444_v4 = vpack.c.bf16 %v2099_v23, %v2098_v31  ;;  %v2135_v31 = vld [vmem:[#allocation6 + $0x128] sm:$0xff] }
 0x2f8   : > { %1825 = vmatmul.mubr.f32.gmra.mrb[12].mxu0 %v1676_v55 }
 0x2f9   : > { %1829 = vmatprep.mubr.f32.mxu0 %v1246_v25  ;;  %1910 = vmatmul.mubr.f32.gmra.mrb[12].mxu1 %v1390_v33 }
 0x2fa   : > { %8421 = vmatpush3.bf16.msra.mxu1 %v11602_v40  ;;  %1914 = vmatprep.mubr.f32.mxu1 %v1536_v12  ;;  %v8446_v40 = vpack.c.bf16 %v2117_v9, %v2116_v28  ;;  %v2153_v28 = vld [vmem:[#allocation6 + $0x1b8] sm:$0xff] }
 0x2fb   : > { %8423 = vmatprep.subr.bf16.mxu1 %v11605_v44  ;;  %v2119_v44 = vld [vmem:[#allocation6 + $0xa8] sm:$0xff] }
 0x2fc   : > { %1830 = vmatmul.mubr.f32.gmra.mrb[14].mxu0 %v1677_v20  ;;  %v8450_v34 = vpack.c.bf16 %v2119_v44, %v2118_v30  ;;  %v2155_v30 = vld [vmem:[#allocation6 + $0x1c8] sm:$0xff] }
 0x2fd   : > { %1915 = vmatmul.mubr.f32.gmra.mrb[14].mxu1 %v1391_v61  ;;  %1988 = vmatprep.mubr.f32.mxu0 %v1533_v6  ;;  %v2126_v6 = vld [vmem:[#allocation6 + $0xe0] sm:$0xff]  ;;  %v8490_v44 = vpack.c.bf16 %v2155_v30, %v2154_v26 }
 0x2fe   : > { %8425 = vmatpush3.bf16.msra.mxu1 %v11608_v46  ;;  %2073 = vmatprep.mubr.f32.mxu1 %v1244_v35  ;;  %v2103_v46 = vld [vmem:[#allocation6 + $0x28] sm:$0xff]  ;;  %v2121_v35 = vld [vmem:[#allocation6 + $0xb8] sm:$0xff]  ;;  %v8466_v37 = vpack.c.bf16 %v2127_v11, %v2126_v6 }
 0x2ff   : > { %8427 = vmatprep.subr.bf16.mxu1 %v11611_v60  ;;  %v8452_v60 = vpack.c.bf16 %v2103_v46, %v2102_v36  ;;  %v8454_v15 = vpack.c.bf16 %v2121_v35, %v2120_v24  ;;  %v2156_v46 = vld [vmem:[#allocation6 + $0x1d0] sm:$0xff]  ;;  %v2157_v24 = vld [vmem:[#allocation6 + $0x1d8] sm:$0xff]  ;;  %v2392_v11 = vld [vmem:[%s15498_s12 + $0x188] sm:$0xff] }
 0x300   : > { %1989 = vmatmul.mubr.f32.vlgmr.msra.gmra.mrb[16].mxu0 %v1388_v19  ;;  %v2110_v19 = vld [vmem:[#allocation6 + $0x60] sm:$0xff]  ;;  %v8494_v35 = vpack.c.bf16 %v2157_v24, %v2156_v46 }
 0x301   : > { %1993 = vmatprep.mubr.f32.mxu0 %v1534_v42  ;;  %8445 = vmatpush3.bf16.msra.mxu0 %v8444_v4  ;;  %v8468_v8 = vpack.c.bf16 %v2111_v39, %v2110_v19  ;;  %v2147_v42 = vld [vmem:[#allocation6 + $0x188] sm:$0xff]  ;;  %v2136_v4 = vld [vmem:[#allocation6 + $0x130] sm:$0xff]  ;;  %v2391_v6 = vld [vmem:[%s15498_s12 + $0x180] sm:$0xff] }
 0x302   : > { %8429 = vmatpush3.bf16.msra.mxu1 %v11614_v49  ;;  %8447 = vmatprep.subr.bf16.mxu0 %v8446_v40  ;;  %v2122_v49 = vld [vmem:[#allocation6 + $0xc0] sm:$0xff]  ;;  %v8474_v17 = vpack.c.bf16 %v2147_v42, %v2146_v63  ;;  %v2137_v40 = vld [vmem:[#allocation6 + $0x138] sm:$0xff] }
 0x303   : > { %8431 = vmatprep.subr.bf16.mxu1 %v11617_v53  ;;  %v8456_v53 = vpack.c.bf16 %v2105_v29, %v2104_v54  ;;  %v8458_v62 = vpack.c.bf16 %v2123_v38, %v2122_v49  ;;  %v8488_v16 = vpack.c.bf16 %v2137_v40, %v2136_v4  ;;  %v2158_v29 = vld [vmem:[#allocation6 + $0x1e0] sm:$0xff]  ;;  %v2159_v49 = vld [vmem:[#allocation6 + $0x1e8] sm:$0xff]  ;;  %v11765_v63 = vld [vmem:[#allocation4] ss:$0 sm:$0xff] }
 0x304   : > { %1994 = vmatmul.mubr.f32.gmra.mrb[18].mxu0 %v1389_v22  ;;  %v2130_v22 = vld [vmem:[#allocation6 + $0x100] sm:$0xff]  ;;  %v8498_v38 = vpack.c.bf16 %v2159_v49, %v2158_v29 }
 0x305   : > { %1998 = vmatprep.mubr.f32.mxu0 %v1535_v50  ;;  %8449 = vmatpush3.bf16.msra.mxu0 %v8448_v41  ;;  %v2112_v50 = vld [vmem:[#allocation6 + $0x70] sm:$0xff]  ;;  %v8476_v56 = vpack.c.bf16 %v2131_v48, %v2130_v22  ;;  %v2138_v41 = vld [vmem:[#allocation6 + $0x140] sm:$0xff] }
 0x306   : > { %8433 = vmatpush3.bf16.msra.mxu1 %v11620_v59  ;;  %8451 = vmatprep.subr.bf16.mxu0 %v8450_v34  ;;  %v1678_v59 = vmax.f32 %v11705_v58, 0.0  ;;  %v2149_v58 = vld [vmem:[#allocation6 + $0x198] sm:$0xff]  ;;  %v2139_v34 = vld [vmem:[#allocation6 + $0x148] sm:$0xff] }
 0x307   : > { %8435 = vmatprep.subr.bf16.mxu1 %v11623_v1  ;;  %v2106_v1 = vld [vmem:[#allocation6 + $0x40] sm:$0xff]  ;;  %v8478_v43 = vpack.c.bf16 %v2149_v58, %v2148_v57  ;;  %v8492_v36 = vpack.c.bf16 %v2139_v34, %v2138_v41  ;;  %v2362_v57 = vld [vmem:[%s15498_s12 + $0x98] sm:$0xff] }
 0x308   : > { %1999 = vmatmul.mubr.f32.gmra.mrb[20].mxu0 %v1390_v33  ;;  %v2344_v48 = vld [vmem:[%s15498_s12 + $0x8] sm:$0xff]  ;;  %v2347_v46 = vld [vmem:[%s15498_s12 + $0x20] sm:$0xff] }
 0x309   : > { %2003 = vmatprep.mubr.f32.mxu0 %v1536_v12  ;;  %8453 = vmatpush3.bf16.msra.mxu0 %v8452_v60  ;;  %v2140_v60 = vld [vmem:[#allocation6 + $0x150] sm:$0xff]  ;;  %v2348_v24 = vld [vmem:[%s15498_s12 + $0x28] sm:$0xff] }
 0x30a   : > { %8437 = vmatpush3.bf16.msra.mxu1 %v11626_v3  ;;  %8455 = vmatprep.subr.bf16.mxu0 %v8454_v15  ;;  %v2107_v3 = vld [vmem:[#allocation6 + $0x48] sm:$0xff]  ;;  %v2141_v15 = vld [vmem:[#allocation6 + $0x158] sm:$0xff] }
 0x30b   : > { %8439 = vmatprep.subr.bf16.mxu1 %v11630_v27  ;;  %v8460_v27 = vpack.c.bf16 %v2107_v3, %v2106_v1  ;;  %v8496_v54 = vpack.c.bf16 %v2141_v15, %v2140_v60  ;;  %v2160_v1 = vld [vmem:[#allocation6 + $0x1f0] sm:$0xff]  ;;  %v2161_v3 = vld [vmem:[#allocation6 + $0x1f8] sm:$0xff] }
 0x30c   : > { %2004 = vmatmul.mubr.f32.gmra.mrb[22].mxu0 %v1391_v61  ;;  %v2152_v61 = vld [vmem:[#allocation6 + $0x1b0] sm:$0xff] }
 0x30d   : > { %8457 = vmatpush3.bf16.msra.mxu0 %v8456_v53  ;;  %v8486_v9 = vpack.c.bf16 %v2153_v28, %v2152_v61  ;;  %v2142_v53 = vld [vmem:[#allocation6 + $0x160] sm:$0xff]  ;;  %v2365_v15 = vld [vmem:[%s15498_s12 + $0xb0] sm:$0xff] }
 0x30e   : > { %8441 = vmatpush3.bf16.msra.mxu1 %v11632_v21  ;;  %8459 = vmatprep.subr.bf16.mxu0 %v8458_v62  ;;  %v2124_v21 = vld [vmem:[#allocation6 + $0xd0] sm:$0xff]  ;;  %v2143_v62 = vld [vmem:[#allocation6 + $0x168] sm:$0xff]  ;;  %v2363_v28 = vld [vmem:[%s15498_s12 + $0xa0] sm:$0xff] }
 0x30f   : > { %v8462_v5 = vpack.c.bf16 %v2125_v51, %v2124_v21  ;;  %8475 = vmatprep.subr.bf16.mxu1 %v8474_v17  ;;  %v2144_v21 = vld [vmem:[#allocation6 + $0x170] sm:$0xff]  ;;  %v2145_v51 = vld [vmem:[#allocation6 + $0x178] sm:$0xff] }
 0x311   : > { %2074 = vmatmul.mubr.f32.vlgmr.msra.gmra.mrb[16].mxu1 %v1675_v47  ;;  %8461 = vmatpush3.bf16.msra.mxu0 %v8460_v27  ;;  %v8470_v47 = vpack.c.bf16 %v2129_v45, %v2128_v18  ;;  %v8502_v27 = vpack.c.bf16 %v2161_v3, %v2160_v1 }
 0x312   : > { %2078 = vmatprep.mubr.f32.mxu1 %v1245_v7  ;;  %8463 = vmatprep.subr.bf16.mxu0 %v8462_v5  ;;  %v8472_v7 = vpack.c.bf16 %v2113_v52, %v2112_v50  ;;  %v8504_v5 = vpack.c.bf16 %v2145_v51, %v2144_v21  ;;  %v2350_v21 = vld [vmem:[%s15498_s12 + $0x38] sm:$0xff] }
 0x313   : > { %8477 = vmatpush3.bf16.msra.mxu1 %v8476_v56 }
 0x314   : > { %8479 = vmatprep.subr.bf16.mxu1 %v8478_v43 }
 0x315   : > { %2079 = vmatmul.mubr.f32.gmra.mrb[18].mxu1 %v1676_v55  ;;  %8465 = vmatpush3.bf16.msra.mxu0 %v8464_v10  ;;  %v2132_v55 = vld [vmem:[#allocation6 + $0x110] sm:$0xff]  ;;  %v8506_v10 = vpack.c.bf16 %v2360_v0, %v2359_v32 }
 0x316   : > { %2083 = vmatprep.mubr.f32.mxu1 %v1246_v25  ;;  %8467 = vmatprep.subr.bf16.mxu0 %v8466_v37  ;;  %v8480_v12 = vpack.c.bf16 %v2133_v2, %v2132_v55  ;;  %v2150_v25 = vld [vmem:[#allocation6 + $0x1a0] sm:$0xff]  ;;  %v8538_v37 = vpack.c.bf16 %v2392_v11, %v2391_v6 }
 0x317   : > { %v8482_v33 = vpack.c.bf16 %v2151_v14, %v2150_v25 }
 0x318   : > { %8481 = vmatpush3.bf16.msra.mxu1 %v8480_v12 }
 0x319   : > { %2084 = vmatmul.mubr.f32.gmra.mrb[20].mxu1 %v1677_v20  ;;  %8469 = vmatpush3.bf16.msra.mxu0 %v8468_v8  ;;  %v2134_v20 = vld [vmem:[#allocation6 + $0x120] sm:$0xff] }
 0x31a   : > { %2088 = vmatprep.mubr.f32.mxu1 %v15248_v13  ;;  %8471 = vmatprep.subr.bf16.mxu0 %v8470_v47  ;;  %v8484_v23 = vpack.c.bf16 %v2135_v31, %v2134_v20  ;;  %v2343_v47 = vld [vmem:[%s15498_s12] sm:$0xff]  ;;  %v2345_v20 = vld [vmem:[%s15498_s12 + $0x10] sm:$0xff]  ;;  %v2346_v31 = vld [vmem:[%s15498_s12 + $0x18] sm:$0xff] }
 0x31b   : > { %8483 = vmatprep.subr.bf16.mxu1 %v8482_v33  ;;  %v8508_v12 = vpack.c.bf16 %v2344_v48, %v2343_v47  ;;  %v8512_v30 = vpack.c.bf16 %v2346_v31, %v2345_v20  ;;  %v2375_v48 = vld [vmem:[%s15498_s12 + $0x100] sm:$0xff]  ;;  %v2378_v20 = vld [vmem:[%s15498_s12 + $0x118] sm:$0xff] }
 0x31c   : > { %8485 = vmatpush3.bf16.msra.mxu1 %v8484_v23 }
 0x31d   : > { %2089 = vmatmul.mubr.f32.gmra.mrb[22].mxu1 %v1678_v59  ;;  %8473 = vmatpush3.bf16.msra.mxu0 %v8472_v7  ;;  %v8500_v59 = vpack.c.bf16 %v2143_v62, %v2142_v53  ;;  %v2361_v7 = vld [vmem:[%s15498_s12 + $0x90] sm:$0xff]  ;;  %v8516_v62 = vpack.c.bf16 %v2348_v24, %v2347_v46 }
 0x31e   : > { %8487 = vmatprep.subr.bf16.mxu1 %v8486_v9  ;;  %8507 = vmatprep.subr.bf16.mxu0 %v8506_v10  ;;  %v8510_v33 = vpack.c.bf16 %v2362_v57, %v2361_v7  ;;  %v2364_v9 = vld [vmem:[%s15498_s12 + $0xa8] sm:$0xff]  ;;  %v2393_v7 = vld [vmem:[%s15498_s12 + $0x190] sm:$0xff]  ;;  %v2394_v57 = vld [vmem:[%s15498_s12 + $0x198] sm:$0xff] }
 0x320   : > { %8489 = vmatpush3.bf16.msra.mxu1 %v8488_v16 }
 0x321   : > { %8491 = vmatprep.subr.bf16.mxu1 %v8490_v44 }
 0x324   : > { %8493 = vmatpush3.bf16.msra.mxu1 %v8492_v36  ;;  %v8514_v36 = vpack.c.bf16 %v2364_v9, %v2363_v28 }
 0x325   : > { %8495 = vmatprep.subr.bf16.mxu1 %v8494_v35 }
 0x328   : > { %8497 = vmatpush3.bf16.msra.mxu1 %v8496_v54  ;;  %v2366_v54 = vld [vmem:[%s15498_s12 + $0xb8] sm:$0xff] }
 0x329   : > { %8499 = vmatprep.subr.bf16.mxu1 %v8498_v38  ;;  %v8518_v3 = vpack.c.bf16 %v2366_v54, %v2365_v15  ;;  %v2396_v54 = vld [vmem:[%s15498_s12 + $0x1a8] sm:$0xff] }
 0x32c   : > { %8501 = vmatpush3.bf16.msra.mxu1 %v8500_v59 }
 0x32d   : > { %8503 = vmatprep.subr.bf16.mxu1 %v8502_v27  ;;  %v2349_v27 = vld [vmem:[%s15498_s12 + $0x30] sm:$0xff] }
 0x32e   : > { %v8520_v0 = vpack.c.bf16 %v2350_v21, %v2349_v27  ;;  %v2370_v27 = vld [vmem:[%s15498_s12 + $0xd8] sm:$0xff]  ;;  %v2397_v21 = vld [vmem:[%s15498_s12 + $0x1b0] sm:$0xff] }
 0x330   : > { %8505 = vmatpush3.bf16.msra.mxu1 %v8504_v5 }
 0x331   : > { %8539 = vmatprep.subr.bf16.mxu1 %v8538_v37 }
 0x3a4   : > { %v6938_v19 = vpop.f32.mrb[8].mxu0 }
 0x3a5   : > { %v6939_v39 = vpop.f32.mrb[9].mxu0 }
 0x3a6   : > { %v6940_v8 = vadd.f32 %v6939_v39, %v6938_v19 }
 0x3a8   : > { %v1817_v42 = vadd.f32 %v6940_v8, %v11765_v63 }
 0x3c4   : > { %v6982_v17 = vpop.f32.mrb[8].mxu1 }
 0x3c5   : > { %v6983_v18 = vpop.f32.mrb[9].mxu1 }
 0x3c6   : > { %v6984_v45 = vadd.f32 %v6983_v18, %v6982_v17 }
 0x3c7   : > { %v6941_v22 = vpop.f32.mrb[10].mxu0 }
 0x3c8   : > { %v1902_v50 = vadd.f32 %v6984_v45, %v1817_v42  ;;  %v6942_v52 = vpop.f32.mrb[11].mxu0  ;;  %v6985_v56 = vpop.f32.mrb[10].mxu1 }
 0x3c9   : > { %v6943_v58 = vadd.f32 %v6942_v52, %v6941_v22  ;;  %v6986_v43 = vpop.f32.mrb[11].mxu1 }
 0x3ca   : > { %v1920_v55 = vmax.f32 %v1902_v50, 0.0  ;;  %v6987_v2 = vadd.f32 %v6986_v43, %v6985_v56  ;;  %v2376_v50 = vld [vmem:[%s15498_s12 + $0x108] sm:$0xff] }
 0x3cb   : > { %v1822_v25 = vadd.f32 %v6943_v58, %v11765_v63  ;;  %v6944_v14 = vpop.f32.mrb[12].mxu0 }
 0x3cc   : > { %v6945_v23 = vpop.f32.mrb[13].mxu0  ;;  %v6988_v61 = vpop.f32.mrb[12].mxu1  ;;  %2233 = vmatprep.mubr.f32.mxu0 %v1920_v55 }
 0x3cd   : > { %v1907_v4 = vadd.f32 %v6987_v2, %v1822_v25  ;;  %v6946_v40 = vadd.f32 %v6945_v23, %v6944_v14  ;;  %v6989_v16 = vpop.f32.mrb[13].mxu1  ;;  %2234 = vmatmul.mubr.f32.vlgmr.msra.gmra.mrb[24].mxu0 %v15248_v13  ;;  %v8542_v14 = vpack.c.bf16 %v2394_v57, %v2393_v7  ;;  %v2373_v7 = vld [vmem:[%s15498_s12 + $0xf0] sm:$0xff]  ;;  %v2374_v57 = vld [vmem:[%s15498_s12 + $0xf8] sm:$0xff] }
 0x3ce   : > { %v6990_v26 = vadd.f32 %v6989_v16, %v6988_v61  ;;  %8509 = vmatpush3.bf16.msra.mxu0 %v8508_v12  ;;  %v8540_v12 = vpack.c.bf16 %v2376_v50, %v2375_v48  ;;  %v2383_v50 = vld [vmem:[%s15498_s12 + $0x140] sm:$0xff] }
 0x3cf   : > { %v1921_v44 = vmax.f32 %v1907_v4, 0.0  ;;  %v1827_v41 = vadd.f32 %v6946_v40, %v11765_v63  ;;  %v6947_v34 = vpop.f32.mrb[14].mxu0  ;;  %8511 = vmatprep.subr.bf16.mxu0 %v8510_v33  ;;  %v2377_v33 = vld [vmem:[%s15498_s12 + $0x110] sm:$0xff] }
 0x3d0   : > { %v6948_v35 = vpop.f32.mrb[15].mxu0  ;;  %v6991_v60 = vpop.f32.mrb[14].mxu1  ;;  %v8544_v40 = vpack.c.bf16 %v2378_v20, %v2377_v33  ;;  %v2385_v33 = vld [vmem:[%s15498_s12 + $0x150] sm:$0xff]  ;;  %v2386_v20 = vld [vmem:[%s15498_s12 + $0x158] sm:$0xff] }
 0x3d1   : > { %v1912_v29 = vadd.f32 %v6990_v26, %v1827_v41  ;;  %v6949_v49 = vadd.f32 %v6948_v35, %v6947_v34  ;;  %v6992_v38 = vpop.f32.mrb[15].mxu1  ;;  %2238 = vmatprep.mubr.f32.mxu0 %v1921_v44  ;;  %2318 = vmatprep.mubr.f32.mxu1 %v1921_v44  ;;  %v2367_v35 = vld [vmem:[%s15498_s12 + $0xc0] sm:$0xff] }
 0x3d2   : > { %v6993_v53 = vadd.f32 %v6992_v38, %v6991_v60  ;;  %8513 = vmatpush3.bf16.msra.mxu0 %v8512_v30  ;;  %v2368_v60 = vld [vmem:[%s15498_s12 + $0xc8] sm:$0xff] }
 0x3d3   : > { %v1832_v59 = vadd.f32 %v6949_v49, %v11765_v63  ;;  %v7026_v1 = vpop.f32.mrb[16].mxu0  ;;  %8515 = vmatprep.subr.bf16.mxu0 %v8514_v36  ;;  %v1922_v25 = vmax.f32 %v1912_v29, 0.0  ;;  %v8522_v15 = vpack.c.bf16 %v2368_v60, %v2367_v35  ;;  %v2351_v49 = vld [vmem:[%s15498_s12 + $0x40] sm:$0xff]  ;;  %v2352_v38 = vld [vmem:[%s15498_s12 + $0x48] sm:$0xff] }
 0x3d4   : > { %v7027_v51 = vpop.f32.mrb[17].mxu0  ;;  %v6811_v35 = vld [vmem:[#allocation7] ss:$0 sm:$0xff] }
 0x3d5   : > { %v1917_v5 = vadd.f32 %v6993_v53, %v1832_v59  ;;  %v7028_v32 = vadd.f32 %v7027_v51, %v7026_v1  ;;  %v2379_v53 = vld [vmem:[%s15498_s12 + $0x120] sm:$0xff]  ;;  %v2380_v59 = vld [vmem:[%s15498_s12 + $0x128] sm:$0xff] }
 0x3d6   : > { %8517 = vmatpush3.bf16.msra.mxu0 %v8516_v62  ;;  %v8524_v62 = vpack.c.bf16 %v2352_v38, %v2351_v49  ;;  %v8548_v1 = vpack.c.bf16 %v2380_v59, %v2379_v53 }
 0x3d7   : > { %v7029_v10 = vpop.f32.mrb[18].mxu0  ;;  %8519 = vmatprep.subr.bf16.mxu0 %v8518_v3  ;;  %v1991_v22 = vadd.f32 %v7028_v32, %v11765_v63  ;;  %v1923_v16 = vmax.f32 %v1917_v5, 0.0  ;;  %v2369_v3 = vld [vmem:[%s15498_s12 + $0xd0] sm:$0xff]  ;;  %v2398_v5 = vld [vmem:[%s15498_s12 + $0x1b8] sm:$0xff] }
 0x3d8   : > { %v7030_v6 = vpop.f32.mrb[19].mxu0  ;;  %v8526_v51 = vpack.c.bf16 %v2370_v27, %v2369_v3  ;;  %v2353_v32 = vld [vmem:[%s15498_s12 + $0x50] sm:$0xff] }
 0x3d9   : > { %v7031_v11 = vadd.f32 %v7030_v6, %v7029_v10  ;;  %v8550_v10 = vpack.c.bf16 %v2398_v5, %v2397_v21 }
 0x3da   : > { %8521 = vmatpush3.bf16.msra.mxu0 %v8520_v0  ;;  %v2354_v0 = vld [vmem:[%s15498_s12 + $0x58] sm:$0xff] }
 0x3db   : > { %v7032_v37 = vpop.f32.mrb[20].mxu0  ;;  %v1996_v43 = vadd.f32 %v7031_v11, %v11765_v63  ;;  %8523 = vmatprep.subr.bf16.mxu0 %v8522_v15  ;;  %v8528_v6 = vpack.c.bf16 %v2354_v0, %v2353_v32  ;;  %v2381_v11 = vld [vmem:[%s15498_s12 + $0x130] sm:$0xff] }
 0x3dc   : > { %v7033_v19 = vpop.f32.mrb[21].mxu0 }
 0x3dd   : > { %v7034_v39 = vadd.f32 %v7033_v19, %v7032_v37  ;;  %v2382_v37 = vld [vmem:[%s15498_s12 + $0x138] sm:$0xff] }
 0x3de   : > { %8525 = vmatpush3.bf16.msra.mxu0 %v8524_v62  ;;  %v8552_v19 = vpack.c.bf16 %v2382_v37, %v2381_v11 }
 0x3df   : > { %v7035_v8 = vpop.f32.mrb[22].mxu0  ;;  %v2001_v28 = vadd.f32 %v7034_v39, %v11765_v63  ;;  %8527 = vmatprep.subr.bf16.mxu0 %v8526_v51  ;;  %v2371_v39 = vld [vmem:[%s15498_s12 + $0xe0] sm:$0xff] }
 0x3e0   : > { %v7036_v42 = vpop.f32.mrb[23].mxu0 }
 0x3e1   : > { %v7037_v17 = vadd.f32 %v7036_v42, %v7035_v8  ;;  %v2372_v8 = vld [vmem:[%s15498_s12 + $0xe8] sm:$0xff]  ;;  %v2399_v42 = vld [vmem:[%s15498_s12 + $0x1c0] sm:$0xff] }
 0x3e2   : > { %8529 = vmatpush3.bf16.msra.mxu0 %v8528_v6 }
 0x3e3   : > { %v2006_v41 = vadd.f32 %v7037_v17, %v11765_v63  ;;  %v2395_v63 = vld [vmem:[%s15498_s12 + $0x1a0] sm:$0xff]  ;;  %v8530_v17 = vpack.c.bf16 %v2372_v8, %v2371_v39 }
 0x3e4   : > { %v7070_v18 = vpop.f32.mrb[16].mxu1  ;;  %v8546_v29 = vpack.c.bf16 %v2396_v54, %v2395_v63 }
 0x3e5   : > { %v7071_v45 = vpop.f32.mrb[17].mxu1  ;;  %8531 = vmatprep.subr.bf16.mxu0 %v8530_v17 }
 0x3e6   : > { %v7072_v47 = vadd.f32 %v7071_v45, %v7070_v18  ;;  %v2400_v18 = vld [vmem:[%s15498_s12 + $0x1c8] sm:$0xff]  ;;  %v2355_v45 = vld [vmem:[%s15498_s12 + $0x60] sm:$0xff] }
 0x3e8   : > { %v2076_v52 = vadd.f32 %v7072_v47, %v1991_v22  ;;  %v7073_v56 = vpop.f32.mrb[18].mxu1  ;;  %v2356_v22 = vld [vmem:[%s15498_s12 + $0x68] sm:$0xff]  ;;  %v8554_v47 = vpack.c.bf16 %v2400_v18, %v2399_v42 }
 0x3e9   : > { %v7074_v58 = vpop.f32.mrb[19].mxu1  ;;  %v8532_v48 = vpack.c.bf16 %v2356_v22, %v2355_v45 }
 0x3ea   : > { %v2094_v55 = vmax.f32 %v2076_v52, 0.0  ;;  %v7075_v2 = vadd.f32 %v7074_v58, %v7073_v56  ;;  %v2384_v52 = vld [vmem:[%s15498_s12 + $0x148] sm:$0xff]  ;;  %v2401_v58 = vld [vmem:[%s15498_s12 + $0x1d0] sm:$0xff] }
 0x3eb   : > { %v8556_v56 = vpack.c.bf16 %v2384_v52, %v2383_v50  ;;  %8533 = vmatpush3.bf16.msra.mxu0 %v8532_v48  ;;  %v2555_v52 = vld [vmem:[%s15499_s0] sm:$0xff] }
 0x3ec   : > { %v2081_v31 = vadd.f32 %v7075_v2, %v1996_v43  ;;  %v7076_v23 = vpop.f32.mrb[20].mxu1  ;;  %2239 = vmatmul.mubr.f32.gmra.mrb[26].mxu0 %v2094_v55  ;;  %2319 = vmatmul.mubr.f32.vlgmr.msra.gmra.mrb[24].mxu1 %v2094_v55  ;;  %v8534_v43 = vpack.c.bf16 %v2374_v57, %v2373_v7  ;;  %v2402_v55 = vld [vmem:[%s15498_s12 + $0x1d8] sm:$0xff]  ;;  %v2357_v2 = vld [vmem:[%s15498_s12 + $0x70] sm:$0xff]  ;;  %v10739_v57 = vmov 0.0|0.0  }
 0x3ed   : > { %v7077_v61 = vpop.f32.mrb[21].mxu1  ;;  %2243 = vmatprep.mubr.f32.mxu0 %v1922_v25  ;;  %2323 = vmatprep.mubr.f32.mxu1 %v1922_v25  ;;  %v8558_v25 = vpack.c.bf16 %v2402_v55, %v2401_v58  ;;  %v2557_v58 = vld [vmem:[%s15499_s0 + $0x10] sm:$0xff] }
 0x3ee   : > { %v2095_v9 = vmax.f32 %v2081_v31, 0.0  ;;  %v7078_v4 = vadd.f32 %v7077_v61, %v7076_v23  ;;  %8541 = vmatpush3.bf16.msra.mxu1 %v8540_v12  ;;  %v2358_v12 = vld [vmem:[%s15498_s12 + $0x78] sm:$0xff]  ;;  %8535 = vmatprep.subr.bf16.mxu0 %v8534_v43  ;;  %v8560_v31 = vpack.c.bf16 %v2386_v20, %v2385_v33  ;;  %v2403_v23 = vld [vmem:[%s15498_s12 + $0x1e0] sm:$0xff]  ;;  %v2404_v61 = vld [vmem:[%s15498_s12 + $0x1e8] sm:$0xff] }
 0x3ef   : > { %8543 = vmatprep.subr.bf16.mxu1 %v8542_v14  ;;  %v8536_v14 = vpack.c.bf16 %v2358_v12, %v2357_v2  ;;  %v2558_v43 = vld [vmem:[%s15499_s0 + $0x18] sm:$0xff]  ;;  %v2559_v2 = vld [vmem:[%s15499_s0 + $0x20] sm:$0xff]  ;;  %v2560_v12 = vld [vmem:[%s15499_s0 + $0x28] sm:$0xff] }
 0x3f0   : > { %v2086_v26 = vadd.f32 %v7078_v4, %v2001_v28  ;;  %v7079_v30 = vpop.f32.mrb[22].mxu1  ;;  %2244 = vmatmul.mubr.f32.gmra.mrb[28].mxu0 %v2095_v9  ;;  %2324 = vmatmul.mubr.f32.gmra.mrb[26].mxu1 %v2095_v9  ;;  %v8562_v28 = vpack.c.bf16 %v2404_v61, %v2403_v23  ;;  %v2387_v9 = vld [vmem:[%s15498_s12 + $0x160] sm:$0xff]  ;;  %v2388_v4 = vld [vmem:[%s15498_s12 + $0x168] sm:$0xff]  ;;  %v8574_v55 = vpack.c.bf16 %v2558_v43, %v2557_v58  ;;  %v2562_v33 = vld [vmem:[%s15499_s0 + $0x38] sm:$0xff] }
 0x3f1   : > { %v7080_v44 = vpop.f32.mrb[23].mxu1  ;;  %2248 = vmatprep.mubr.f32.mxu0 %v1923_v16  ;;  %2328 = vmatprep.mubr.f32.mxu1 %v1923_v16  ;;  %v2405_v16 = vld [vmem:[%s15498_s12 + $0x1f0] sm:$0xff]  ;;  %v2645_v23 = vld [vmem:[%s15500_s7 + $0x8] sm:$0xff] }
 0x3f2   : > { %v2096_v34 = vmax.f32 %v2086_v26, 0.0  ;;  %v7081_v36 = vadd.f32 %v7080_v44, %v7079_v30  ;;  %8545 = vmatpush3.bf16.msra.mxu1 %v8544_v40  ;;  %8537 = vmatpush3.bf16.msra.mxu0 %v8536_v14  ;;  %v8564_v40 = vpack.c.bf16 %v2388_v4, %v2387_v9  ;;  %v2406_v26 = vld [vmem:[%s15498_s12 + $0x1f8] sm:$0xff]  ;;  %v2389_v44 = vld [vmem:[%s15498_s12 + $0x170] sm:$0xff] }
 0x3f3   : > { %8547 = vmatprep.subr.bf16.mxu1 %v8546_v29  ;;  %v8566_v30 = vpack.c.bf16 %v2406_v26, %v2405_v16  ;;  %8570 = vmatprep.subr.bf16.mxu0 %v10739_v57  ;;  %v2561_v14 = vld [vmem:[%s15499_s0 + $0x30] sm:$0xff]  ;;  %v2647_v9 = vld [vmem:[%s15500_s7 + $0x18] sm:$0xff]  ;;  %v2649_v16 = vld [vmem:[%s15500_s7 + $0x28] sm:$0xff] }
 0x3f4   : > { %v2091_v46 = vadd.f32 %v7081_v36, %v2006_v41  ;;  %2249 = vmatmul.mubr.f32.gmra.mrb[30].mxu0 %v2096_v34  ;;  %2329 = vmatmul.mubr.f32.gmra.mrb[28].mxu1 %v2096_v34  ;;  %v2390_v41 = vld [vmem:[%s15498_s12 + $0x178] sm:$0xff]  ;;  %v8580_v20 = vpack.c.bf16 %v2562_v33, %v2561_v14  ;;  %v2646_v61 = vld [vmem:[%s15500_s7 + $0x10] sm:$0xff] }
 0x3f5   : > { %2333 = vmatprep.mubr.f32.mxu1 %v15248_v13  ;;  %v8568_v34 = vpack.c.bf16 %v2390_v41, %v2389_v44  ;;  %v8586_v4 = vpack.c.bf16 %v2647_v9, %v2646_v61  ;;  %v2651_v44 = vld [vmem:[%s15500_s7 + $0x38] sm:$0xff]  ;;  %v2833_v58 = vld [vmem:[#allocation16 + $0x10] sm:$0xff] }
 0x3f6   : > { %v2097_v24 = vmax.f32 %v2091_v46, 0.0  ;;  %8549 = vmatpush3.bf16.msra.mxu1 %v8548_v1  ;;  %v2841_v43 = vld [vmem:[#allocation16 + $0x50] sm:$0xff] }
 0x3f7   : > { %8551 = vmatprep.subr.bf16.mxu1 %v8550_v10  ;;  %v2849_v14 = vld [vmem:[#allocation16 + $0x90] sm:$0xff] }
 0x3f8   : > { %2334 = vmatmul.mubr.f32.gmra.mrb[30].mxu1 %v2097_v24  ;;  %v2857_v33 = vld [vmem:[#allocation16 + $0xd0] sm:$0xff] }
 0x3f9   : > { %v2865_v9 = vld [vmem:[#allocation16 + $0x110] sm:$0xff] }
 0x3fa   : > { %8553 = vmatpush3.bf16.msra.mxu1 %v8552_v19 }
 0x3fb   : > { %8555 = vmatprep.subr.bf16.mxu1 %v8554_v47 }
 0x3fe   : > { %8557 = vmatpush3.bf16.msra.mxu1 %v8556_v56  ;;  %v2556_v56 = vld [vmem:[%s15499_s0 + $0x8] sm:$0xff] }
 0x3ff   : > { %8559 = vmatprep.subr.bf16.mxu1 %v8558_v25  ;;  %v8571_v7 = vpack.c.bf16 %v2556_v56, %v2555_v52  ;;  %v8577_v25 = vpack.c.bf16 %v2560_v12, %v2559_v2  ;;  %v2834_v52 = vld [vmem:[#allocation16 + $0x18] sm:$0xff] }
 0x400   : > { %v2850_v2 = vld [vmem:[#allocation16 + $0x98] sm:$0xff] }
 0x401   : > { %v2858_v12 = vld [vmem:[#allocation16 + $0xd8] sm:$0xff] }
 0x402   : > { %8561 = vmatpush3.bf16.msra.mxu1 %v8560_v31  ;;  %v2644_v31 = vld [vmem:[%s15500_s7] sm:$0xff] }
 0x403   : > { %8563 = vmatprep.subr.bf16.mxu1 %v8562_v28  ;;  %v8583_v28 = vpack.c.bf16 %v2645_v23, %v2644_v31  ;;  %v2866_v31 = vld [vmem:[#allocation16 + $0x118] sm:$0xff] }
 0x404   : > { %v2874_v23 = vld [vmem:[#allocation16 + $0x158] sm:$0xff] }
 0x405   : > { %v8633_v61 = vpack.c.bf16 %v2874_v23, %v2866_v31  ;;  %v2861_v31 = vld [vmem:[#allocation16 + $0xf0] sm:$0xff]  ;;  %v2868_v23 = vld [vmem:[#allocation16 + $0x128] sm:$0xff] }
 0x406   : > { %8565 = vmatpush3.bf16.msra.mxu1 %v8564_v40  ;;  %v2648_v40 = vld [vmem:[%s15500_s7 + $0x20] sm:$0xff] }
 0x407   : > { %8567 = vmatprep.subr.bf16.mxu1 %v8566_v30  ;;  %v8589_v26 = vpack.c.bf16 %v2649_v16, %v2648_v40  ;;  %v2650_v30 = vld [vmem:[%s15500_s7 + $0x30] sm:$0xff] }
 0x408   : > { %v8592_v41 = vpack.c.bf16 %v2651_v44, %v2650_v30  ;;  %v2882_v16 = vld [vmem:[#allocation16 + $0x198] sm:$0xff]  ;;  %v2881_v44 = vld [vmem:[#allocation16 + $0x190] sm:$0xff] }
 0x40a   : > { %8569 = vmatpush3.bf16.msra.mxu1 %v8568_v34  ;;  %v2652_v34 = vld [vmem:[%s15500_s7 + $0x40] sm:$0xff] }
 0x40b   : > { %8582 = vmatprep.subr.bf16.mxu1 %v10739_v57 }
 0x4a0   : > { %v7114_v36 = vpop.f32.mrb[24].mxu0 }
 0x4a1   : > { %v7115_v46 = vpop.f32.mrb[25].mxu0 }
 0x4a2   : > { %v7116_v24 = vadd.f32 %v7115_v46, %v7114_v36  ;;  %v2653_v36 = vld [vmem:[%s15500_s7 + $0x48] sm:$0xff] }
 0x4a3   : > { %v8595_v46 = vpack.c.bf16 %v2653_v36, %v2652_v34  ;;  %v2738_v36 = vld [vmem:[%s1028_s6] sm:$0xff] }
 0x4a4   : > { %v2236_v60 = vadd.f32 %v7116_v24, %v6811_v35  ;;  %v2654_v24 = vld [vmem:[%s15500_s7 + $0x50] sm:$0xff] }
 0x4bf   : > { %v7117_v63 = vpop.f32.mrb[26].mxu0  ;;  %v7158_v15 = vpop.f32.mrb[24].mxu1 }
 0x4c0   : > { %v7118_v54 = vpop.f32.mrb[27].mxu0  ;;  %v7159_v29 = vpop.f32.mrb[25].mxu1 }
 0x4c1   : > { %v7119_v49 = vadd.f32 %v7118_v54, %v7117_v63  ;;  %v7160_v38 = vadd.f32 %v7159_v29, %v7158_v15  ;;  %v2656_v63 = vld [vmem:[%s15500_s7 + $0x60] sm:$0xff]  ;;  %v2657_v15 = vld [vmem:[%s15500_s7 + $0x68] sm:$0xff] }
 0x4c2   : > { %v8601_v54 = vpack.c.bf16 %v2657_v15, %v2656_v63  ;;  %v2856_v63 = vld [vmem:[#allocation16 + $0xc8] sm:$0xff] }
 0x4c3   : > { %v2321_v53 = vadd.f32 %v7160_v38, %v2236_v60  ;;  %v7120_v62 = vpop.f32.mrb[28].mxu0  ;;  %v7161_v59 = vpop.f32.mrb[26].mxu1  ;;  %v2241_v27 = vadd.f32 %v7119_v49, %v6811_v35 }
 0x4c4   : > { %v7121_v1 = vpop.f32.mrb[29].mxu0  ;;  %v7162_v3 = vpop.f32.mrb[27].mxu1 }
 0x4c5   : > { %v7122_v21 = vadd.f32 %v7121_v1, %v7120_v62  ;;  %v7163_v51 = vadd.f32 %v7162_v3, %v7161_v59  ;;  %v2339_v8 = vmax.f32 %v2321_v53, 0.0  ;;  %v6812_v53 = vld [vmem:[#allocation9] ss:$0 sm:$0xff] }
 0x4c7   : > { %v2326_v5 = vadd.f32 %v7163_v51, %v2241_v27  ;;  %v7123_v32 = vpop.f32.mrb[30].mxu0  ;;  %v7164_v0 = vpop.f32.mrb[28].mxu1  ;;  %v2246_v11 = vadd.f32 %v7122_v21, %v6811_v35  ;;  %v2658_v51 = vld [vmem:[%s15500_s7 + $0x70] sm:$0xff] }
 0x4c8   : > { %v7124_v10 = vpop.f32.mrb[31].mxu0  ;;  %v7165_v6 = vpop.f32.mrb[29].mxu1 }
 0x4c9   : > { %v2340_v37 = vmax.f32 %v2326_v5, 0.0  ;;  %v7125_v19 = vadd.f32 %v7124_v10, %v7123_v32  ;;  %v7166_v39 = vadd.f32 %v7165_v6, %v7164_v0  ;;  %v2659_v5 = vld [vmem:[%s15500_s7 + $0x78] sm:$0xff]  ;;  %v6813_v0 = vld [vmem:[#allocation10] ss:$0 sm:$0xff] }
 0x4ca   : > { %v8604_v32 = vpack.c.bf16 %v2659_v5, %v2658_v51  ;;  %v2880_v51 = vld [vmem:[#allocation16 + $0x188] sm:$0xff] }
 0x4cb   : > { %v2331_v42 = vadd.f32 %v7166_v39, %v2246_v11  ;;  %v7167_v17 = vpop.f32.mrb[30].mxu1  ;;  %2478 = vmatprep.mubr.f32.mxu0 %v2340_v37  ;;  %v2251_v45 = vadd.f32 %v7125_v19, %v6811_v35  ;;  %v2655_v35 = vld [vmem:[%s15500_s7 + $0x58] sm:$0xff]  ;;  %v6815_v19 = vld [vmem:[#allocation12] ss:$0 sm:$0xff] }
 0x4cc   : > { %v7168_v18 = vpop.f32.mrb[31].mxu1  ;;  %2479 = vmatmul.mubr.f32.vlgmr.msra.gmra.mrb[32].mxu0 %v2339_v8  ;;  %v8598_v60 = vpack.c.bf16 %v2655_v35, %v2654_v24  ;;  %v2839_v24 = vld [vmem:[#allocation16 + $0x40] sm:$0xff]  ;;  %v2888_v5 = vld [vmem:[#allocation16 + $0x1c8] sm:$0xff] }
 0x4cd   : > { %v7169_v22 = vadd.f32 %v7168_v18, %v7167_v17  ;;  %v2341_v50 = vmax.f32 %v2331_v42, 0.0  ;;  %8572 = vmatpush3.bf16.msra.mxu0 %v8571_v7  ;;  %8141 = vmatprep.mubr.msk.f32.mxu0 %vm10740_vm3, %v15248_v13  ;;  %v2748_v18 = vld [vmem:[#allocation13] sm:$0xff]  ;;  %v2842_v7 = vld [vmem:[#allocation16 + $0x58] sm:$0xff] }
 0x4ce   : > { %8573 = vmatprep.subr.bf16.mxu0 %v10739_v57 }
 0x4cf   : > { %v2336_v47 = vadd.f32 %v7169_v22, %v2251_v45  ;;  %v2749_v45 = vld [vmem:[#allocation13 + $0x8] sm:$0xff] }
 0x4d0   : > { %v8607_v22 = vpack.c.bf16 %v2749_v45, %v2748_v18  ;;  %v6816_v18 = vld [vmem:[#allocation15] ss:$0 sm:$0xff]  ;;  %v2835_v45 = vld [vmem:[#allocation16 + $0x20] sm:$0xff] }
 0x4d1   : > { %v2342_v48 = vmax.f32 %v2336_v47, 0.0  ;;  %8575 = vmatpush3.bf16.msra.mxu0 %v8574_v55  ;;  %v8627_v55 = vpack.c.bf16 %v2841_v43, %v2833_v58 }
 0x4d2   : > { %8576 = vmatprep.subr.bf16.mxu0 %v10739_v57 }
 0x4d3   : > { %2548 = vmatprep.mubr.f32.mxu1 %v2342_v48  ;;  %v2832_v48 = vld [vmem:[#allocation16 + $0x8] sm:$0xff] }
 0x4d4   : > { %2549 = vmatmul.mubr.f32.vlgmr.msra.gmra.mrb[32].mxu1 %v2341_v50  ;;  %v2840_v50 = vld [vmem:[#allocation16 + $0x48] sm:$0xff] }
 0x4d5   : > { %8578 = vmatpush3.bf16.msra.mxu0 %v8577_v25  ;;  %8176 = vmatprep.mubr.msk.f32.mxu1 %vm10740_vm3, %v15248_v13  ;;  %v8609_v56 = vpack.c.bf16 %v2840_v50, %v2832_v48  ;;  %v8629_v25 = vpack.c.bf16 %v2858_v12, %v2850_v2  ;;  %v2845_v48 = vld [vmem:[#allocation16 + $0x70] sm:$0xff]  ;;  %v2852_v50 = vld [vmem:[#allocation16 + $0xa8] sm:$0xff]  ;;  %v2859_v2 = vld [vmem:[#allocation16 + $0xe0] sm:$0xff] }
 0x4d6   : > { %8579 = vmatprep.subr.bf16.mxu0 %v10739_v57  ;;  %8584 = vmatpush3.bf16.msra.mxu1 %v8583_v28 }
 0x4d7   : > { %8585 = vmatprep.subr.bf16.mxu1 %v10739_v57 }
 0x4d9   : > { %8581 = vmatpush3.bf16.msra.mxu0 %v8580_v20  ;;  %v8631_v20 = vpack.c.bf16 %v2857_v33, %v2849_v14 }
 0x4da   : > { %8606 = vmatprep.subr.bf16.mxu0 %v10739_v57  ;;  %8587 = vmatpush3.bf16.msra.mxu1 %v8586_v4  ;;  %v2873_v4 = vld [vmem:[#allocation16 + $0x150] sm:$0xff] }
 0x4db   : > { %8588 = vmatprep.subr.bf16.mxu1 %v10739_v57  ;;  %v8635_v40 = vpack.c.bf16 %v2873_v4, %v2865_v9  ;;  %v2878_v9 = vld [vmem:[#allocation16 + $0x178] sm:$0xff] }
 0x4de   : > { %8590 = vmatpush3.bf16.msra.mxu1 %v8589_v26  ;;  %v2890_v26 = vld [vmem:[#allocation16 + $0x1d8] sm:$0xff] }
 0x4df   : > { %8591 = vmatprep.subr.bf16.mxu1 %v10739_v57  ;;  %v8637_v30 = vpack.c.bf16 %v2890_v26, %v2882_v16  ;;  %v2867_v16 = vld [vmem:[#allocation16 + $0x120] sm:$0xff] }
 0x4e0   : > { %v2875_v26 = vld [vmem:[#allocation16 + $0x160] sm:$0xff] }
 0x4e2   : > { %8593 = vmatpush3.bf16.msra.mxu1 %v8592_v41  ;;  %v2889_v41 = vld [vmem:[#allocation16 + $0x1d0] sm:$0xff] }
 0x4e3   : > { %8594 = vmatprep.subr.bf16.mxu1 %v10739_v57  ;;  %v8639_v34 = vpack.c.bf16 %v2889_v41, %v2881_v44  ;;  %v2869_v41 = vld [vmem:[#allocation16 + $0x130] sm:$0xff] }
 0x4e6   : > { %8596 = vmatpush3.bf16.msra.mxu1 %v8595_v46  ;;  %v2831_v46 = vld [vmem:[#allocation16] sm:$0xff] }
 0x4e7   : > { %8597 = vmatprep.subr.bf16.mxu1 %v10739_v57 }
 0x4ea   : > { %8599 = vmatpush3.bf16.msra.mxu1 %v8598_v60  ;;  %v2848_v60 = vld [vmem:[#allocation16 + $0x88] sm:$0xff] }
 0x4eb   : > { %8600 = vmatprep.subr.bf16.mxu1 %v10739_v57 }
 0x4ee   : > { %8602 = vmatpush3.bf16.msra.mxu1 %v8601_v54  ;;  %v8611_v54 = vpack.c.bf16 %v2839_v24, %v2831_v46  ;;  %v2892_v46 = vld [vmem:[#allocation16 + $0x1e8] sm:$0xff]  ;;  %v2886_v24 = vld [vmem:[#allocation16 + $0x1b8] sm:$0xff] }
 0x4ef   : > { %8603 = vmatprep.subr.bf16.mxu1 %v10739_v57  ;;  %v8625_v57 = vpack.c.bf16 %v2842_v7, %v2834_v52  ;;  %v2860_v52 = vld [vmem:[#allocation16 + $0xe8] sm:$0xff]  ;;  %v2862_v7 = vld [vmem:[#allocation16 + $0xf8] sm:$0xff] }
 0x4f0   : > { %v8645_v14 = vpack.c.bf16 %v2860_v52, %v2852_v50  ;;  %v3241_v50 = vld [vmem:[%s15211_s18 + $0x48] sm:$0xff]  ;;  %v3243_v52 = vld [vmem:[%s15211_s18 + $0x58] sm:$0xff] }
 0x4f2   : > { %8605 = vmatpush3.bf16.msra.mxu1 %v8604_v32 }
 0x4f3   : > { %8626 = vmatprep.subr.bf16.mxu1 %v8625_v57 }
 0x59f   : > { %v7202_v29 = vpop.f32.mrb[32].mxu0 }
 0x5a0   : > { %v7203_v49 = vpop.f32.mrb[33].mxu0 }
 0x5a1   : > { %v7204_v38 = vadd.f32 %v7203_v49, %v7202_v29  ;;  %v8613_v49 = vpack.c.bf16 %v2856_v63, %v2848_v60  ;;  %v8651_v60 = vpack.c.bf16 %v2875_v26, %v2867_v16  ;;  %v3570_v26 = vld [vmem:[%s15212_s19 + $0x60] sm:$0xff] }
 0x5a3   : > { %v2481_v1 = vadd.f32 %v7204_v38, %v6812_v53  ;;  %v2847_v38 = vld [vmem:[#allocation16 + $0x80] sm:$0xff] }
 0x5a4   : > { %v2855_v53 = vld [vmem:[#allocation16 + $0xc0] sm:$0xff] }
 0x5a7   : > { %v7237_v62 = vpop.f32.mrb[32].mxu1 }
 0x5a8   : > { %v7238_v59 = vpop.f32.mrb[33].mxu1 }
 0x5a9   : > { %v7239_v3 = vadd.f32 %v7238_v59, %v7237_v62  ;;  %v2864_v62 = vld [vmem:[#allocation16 + $0x108] sm:$0xff] }
 0x5aa   : > { %v2872_v59 = vld [vmem:[#allocation16 + $0x148] sm:$0xff] }
 0x5ab   : > { %v2551_v27 = vadd.f32 %v7239_v3, %v2481_v1  ;;  %v8615_v1 = vpack.c.bf16 %v2855_v53, %v2847_v38  ;;  %v8617_v3 = vpack.c.bf16 %v2872_v59, %v2864_v62  ;;  %v2885_v38 = vld [vmem:[#allocation16 + $0x1b0] sm:$0xff]  ;;  %v3235_v59 = vld [vmem:[%s15211_s18 + $0x18] sm:$0xff] }
 0x5ac   : > { %v2893_v53 = vld [vmem:[#allocation16 + $0x1f0] sm:$0xff] }
 0x5ad   : > { %v2554_v21 = vmax.f32 %v2551_v27, 0.0  ;;  %v2863_v27 = vld [vmem:[#allocation16 + $0x100] sm:$0xff]  ;;  %v3233_v62 = vld [vmem:[%s15211_s18 + $0x8] sm:$0xff] }
 0x5af   : > { %8142 = vmatmul.mubr.msk.f32.vlgmr.msra.gmra.mrb[34].mxu0 %vm1125_vm1, %v2554_v21  ;;  %v2871_v21 = vld [vmem:[#allocation16 + $0x140] sm:$0xff] }
 0x5b0   : > { %8183 = vmatprep.mubr.msk.f32.mxu0 %vm10740_vm3, %v15248_v13  ;;  %8608 = vmatpush3.bf16.msra.mxu0 %v8607_v22  ;;  %v8619_v32 = vpack.c.bf16 %v2871_v21, %v2863_v27  ;;  %v2843_v22 = vld [vmem:[#allocation16 + $0x60] sm:$0xff]  ;;  %v8671_v21 = vpack.c.bf16 %v2893_v53, %v2885_v38  ;;  %v3579_v53 = vld [vmem:[%s15212_s19 + $0xa8] sm:$0xff] }
 0x5b1   : > { %8610 = vmatprep.subr.bf16.mxu0 %v8609_v56  ;;  %v2854_v56 = vld [vmem:[#allocation16 + $0xb8] sm:$0xff]  ;;  %v8643_v58 = vpack.c.bf16 %v2843_v22, %v2835_v45 }
 0x5b2   : > { %v8661_v33 = vpack.c.bf16 %v2862_v7, %v2854_v56  ;;  %v3567_v56 = vld [vmem:[%s15212_s19 + $0x48] sm:$0xff]  ;;  %v3569_v7 = vld [vmem:[%s15212_s19 + $0x58] sm:$0xff] }
 0x5b3   : > { %v3255_v38 = vld [vmem:[%s15211_s18 + $0xb8] sm:$0xff] }
 0x682   : > { %v2639_v10 = vpop.f32.mrb[34].mxu0 }
 0x683   : > { %v2640_v6 = vadd.f32 %v6813_v0, %v2639_v10  ;;  %v8143_v11 = vpop.f32.mrb[35].mxu0  ;;  %v8621_v0 = vpack.c.bf16 %v2888_v5, %v2880_v51  ;;  %v2879_v10 = vld [vmem:[#allocation16 + $0x180] sm:$0xff]  ;;  %v3234_v5 = vld [vmem:[%s15211_s18 + $0x10] sm:$0xff] }
 0x684   : > { %v3232_v51 = vld [vmem:[%s15211_s18] sm:$0xff] }
 0x685   : > { %v2643_v37 = vmax.f32 %v2640_v6, 0.0  ;;  %v2887_v6 = vld [vmem:[#allocation16 + $0x1c0] sm:$0xff] }
 0x686   : > { %v8623_v11 = vpack.c.bf16 %v2887_v6, %v2879_v10  ;;  %v3558_v10 = vld [vmem:[%s15212_s19] sm:$0xff]  ;;  %v3560_v6 = vld [vmem:[%s15212_s19 + $0x10] sm:$0xff] }
 0x687   : > { %8177 = vmatmul.mubr.f32.vlgmr.msra.gmra.mrb[34].mxu1 %v2643_v37  ;;  %v2836_v37 = vld [vmem:[#allocation16 + $0x28] sm:$0xff] }
 0x688   : > { %3075 = vmatprep.mubr.f32.mxu1 %v15248_v13  ;;  %8628 = vmatpush1.bf16.msra.mxu1 %v8627_v55  ;;  %v2851_v55 = vld [vmem:[#allocation16 + $0xa0] sm:$0xff] }
 0x689   : > { %8630 = vmatprep.subr.bf16.mxu1 %v8629_v25  ;;  %v8647_v4 = vpack.c.bf16 %v2859_v2, %v2851_v55  ;;  %v3242_v55 = vld [vmem:[%s15211_s18 + $0x50] sm:$0xff]  ;;  %v8681_v2 = vpack.c.bf16 %v3243_v52, %v3241_v50  ;;  %v3589_v50 = vld [vmem:[%s15212_s19 + $0xf8] sm:$0xff] }
 0x68c   : > { %8632 = vmatpush1.bf16.msra.mxu1 %v8631_v20  ;;  %v2853_v20 = vld [vmem:[#allocation16 + $0xb0] sm:$0xff] }
 0x68d   : > { %8634 = vmatprep.subr.bf16.mxu1 %v8633_v61  ;;  %v2876_v61 = vld [vmem:[#allocation16 + $0x168] sm:$0xff] }
 0x690   : > { %8636 = vmatpush1.bf16.msra.mxu1 %v8635_v40  ;;  %v8663_v40 = vpack.c.bf16 %v2861_v31, %v2853_v20  ;;  %v3247_v20 = vld [vmem:[%s15211_s18 + $0x78] sm:$0xff]  ;;  %v3571_v31 = vld [vmem:[%s15212_s19 + $0x68] sm:$0xff] }
 0x691   : > { %8638 = vmatprep.subr.bf16.mxu1 %v8637_v30  ;;  %v8649_v30 = vpack.c.bf16 %v2876_v61, %v2868_v23  ;;  %v3573_v23 = vld [vmem:[%s15212_s19 + $0x78] sm:$0xff] }
 0x692   : > { %v8813_v16 = vpack.c.bf16 %v3573_v23, %v3571_v31  ;;  %v3264_v23 = vld [vmem:[%s15211_s18 + $0x100] sm:$0xff] }
 0x694   : > { %8640 = vmatpush1.bf16.msra.mxu1 %v8639_v34  ;;  %v2877_v34 = vld [vmem:[#allocation16 + $0x170] sm:$0xff] }
 0x695   : > { %v8667_v63 = vpack.c.bf16 %v2877_v34, %v2869_v41  ;;  %v3251_v41 = vld [vmem:[%s15211_s18 + $0x98] sm:$0xff]  ;;  %v3575_v34 = vld [vmem:[%s15212_s19 + $0x88] sm:$0xff] }
 0x75a   : > { %v2733_v39 = vpop.f32.mrb[34].mxu1 }
 0x75b   : > { %v2734_v8 = vadd.f32 %v6815_v19, %v2733_v39  ;;  %v8178_v42 = vpop.f32.mrb[35].mxu1  ;;  %v2844_v19 = vld [vmem:[#allocation16 + $0x68] sm:$0xff]  ;;  %v2838_v39 = vld [vmem:[#allocation16 + $0x38] sm:$0xff] }
 0x75c   : > { %v2846_v42 = vld [vmem:[#allocation16 + $0x78] sm:$0xff] }
 0x75d   : > { %v2739_v17 = vmul.f32 0.5, %v2734_v8  ;;  %2737 = vst.msk [vmem:[%s1039_s29] sm:$0xff] %vm1120_vm0, %v2734_v8  ;;  %s15818_s29 = smov 96  }
 0x75f   : > { %v2740_v47 = vmul.f32 1.442695, %v2739_v17  ;;  %v8657_v17 = vpack.c.bf16 %v2846_v42, %v2838_v39  ;;  %v3565_v39 = vld [vmem:[%s15212_s19 + $0x38] sm:$0xff]  ;;  %v8803_v42 = vpack.c.bf16 %v3560_v6, %v3558_v10  ;;  %v3583_v6 = vld [vmem:[%s15212_s19 + $0xc8] sm:$0xff] }
 0x760   : > { %v3259_v10 = vld [vmem:[%s15211_s18 + $0xd8] sm:$0xff] }
 0x761   : > { %10311 = vpow2.f32 %v2740_v47  ;;  %8658 = vmatprep.subr.bf16.mxu1 %v8657_v17  ;;  %v2837_v47 = vld [vmem:[#allocation16 + $0x30] sm:$0xff]  ;;  %v3236_v17 = vld [vmem:[%s15211_s18 + $0x20] sm:$0xff] }
 0x762   : > { %v8659_v43 = vpack.c.bf16 %v2845_v48, %v2837_v47  ;;  %v3562_v47 = vld [vmem:[%s15212_s19 + $0x20] sm:$0xff]  ;;  %v3564_v48 = vld [vmem:[%s15212_s19 + $0x30] sm:$0xff] }
 0x76b   : > { %v10312_v28 = vpop.eup %10311 }
 0x76c   : > { %2743 = vrot.lane.b32.xlu0 %v10312_v28, %s10741_s5  ;;  %v2870_v28 = vld [vmem:[#allocation16 + $0x138] sm:$0xff] }
 0x76d   : > { %v8665_v44 = vpack.c.bf16 %v2878_v9, %v2870_v28  ;;  %v3244_v9 = vld [vmem:[%s15211_s18 + $0x60] sm:$0xff] }
 0x7de   : > { %v2744_v35 = vpop.permute.xlu0 %2743 }
 0x7df   : > { %v2746_v15 = vmul.f32 %v2744_v35, %v2738_v36  ;;  %v2884_v36 = vld [vmem:[#allocation16 + $0x1a8] sm:$0xff]  ;;  %v2894_v35 = vld [vmem:[#allocation16 + $0x1f8] sm:$0xff] }
 0x7e1   : > { %v2747_v29 = vadd.f32 %v2746_v15, %v2734_v8  ;;  %v8641_v8 = vpack.c.bf16 %v2844_v19, %v2836_v37  ;;  %v2883_v15 = vld [vmem:[#allocation16 + $0x1a0] sm:$0xff]  ;;  %v3563_v19 = vld [vmem:[%s15212_s19 + $0x28] sm:$0xff] }
 0x7e2   : > { %v3239_v37 = vld [vmem:[%s15211_s18 + $0x38] sm:$0xff]  ;;  %v8805_v22 = vpack.c.bf16 %v3565_v39, %v3563_v19  ;;  %v3256_v39 = vld [vmem:[%s15211_s18 + $0xc0] sm:$0xff] }
 0x7e3   : > { %8184 = vmatmul.mubr.msk.f32.vlgmr.msra.gmra.mrb[36].mxu0 %vm2757_vm4, %v2747_v29  ;;  %v8653_v29 = vpack.c.bf16 %v2892_v46, %v2884_v36  ;;  %v3577_v36 = vld [vmem:[%s15212_s19 + $0x98] sm:$0xff] }
 0x7e4   : > { %8612 = vmatpush1.bf16.msra.mxu0 %v8611_v54  ;;  %3004 = vmatprep.mubr.f32.mxu0 %v15248_v13  ;;  %v2891_v54 = vld [vmem:[#allocation16 + $0x1e0] sm:$0xff] }
 0x7e5   : > { %8614 = vmatprep.subr.bf16.mxu0 %v8613_v49  ;;  %v8669_v49 = vpack.c.bf16 %v2894_v35, %v2886_v24  ;;  %v8655_v27 = vpack.c.bf16 %v2891_v54, %v2883_v15  ;;  %v3248_v35 = vld [vmem:[%s15211_s18 + $0x80] sm:$0xff]  ;;  %v8817_v15 = vpack.c.bf16 %v3577_v36, %v3575_v34 }
 0x7e6   : > { %v3574_v54 = vld [vmem:[%s15212_s19 + $0x80] sm:$0xff] }
 0x7e7   : > { %v3268_v36 = vld [vmem:[%s15211_s18 + $0x120] sm:$0xff] }
 0x7e8   : > { %8616 = vmatpush1.bf16.msra.mxu0 %v8615_v1  ;;  %v3559_v1 = vld [vmem:[%s15212_s19 + $0x8] sm:$0xff] }
 0x7e9   : > { %8618 = vmatprep.subr.bf16.mxu0 %v8617_v3  ;;  %v3561_v3 = vld [vmem:[%s15212_s19 + $0x18] sm:$0xff] }
 0x7ec   : > { %8620 = vmatpush1.bf16.msra.mxu0 %v8619_v32  ;;  %v8673_v32 = vpack.c.bf16 %v3235_v59, %v3233_v62  ;;  %v3581_v62 = vld [vmem:[%s15212_s19 + $0xb8] sm:$0xff] }
 0x7ed   : > { %8622 = vmatprep.subr.bf16.mxu0 %v8621_v0  ;;  %v8801_v0 = vpack.c.bf16 %v3561_v3, %v3559_v1  ;;  %v3252_v3 = vld [vmem:[%s15211_s18 + $0xa0] sm:$0xff] }
 0x7f0   : > { %8624 = vmatpush1.bf16.msra.mxu0 %v8623_v11  ;;  %v3237_v11 = vld [vmem:[%s15211_s18 + $0x28] sm:$0xff] }
 0x7f1   : > { %8642 = vmatprep.subr.bf16.mxu0 %v8641_v8  ;;  %v8675_v8 = vpack.c.bf16 %v3234_v5, %v3232_v51  ;;  %v8677_v45 = vpack.c.bf16 %v3239_v37, %v3237_v11  ;;  %v8821_v51 = vpack.c.bf16 %v3581_v62, %v3579_v53  ;;  %v3578_v5 = vld [vmem:[%s15212_s19 + $0xa0] sm:$0xff]  ;;  %v3585_v11 = vld [vmem:[%s15212_s19 + $0xd8] sm:$0xff] }
 0x7f2   : > { %v3272_v62 = vld [vmem:[%s15211_s18 + $0x140] sm:$0xff] }
 0x8b6   : > { %v2827_v57 = vpop.f32.mrb[36].mxu0 }
 0x8b7   : > { %v12054_v12 = vadd.f32 %v6816_v18, %v2827_v57  ;;  %v8185_v25 = vpop.f32.mrb[37].mxu0  ;;  %v3238_v18 = vld [vmem:[%s15211_s18 + $0x30] sm:$0xff] }
 0x8b8   : > { %v8679_v57 = vpack.c.bf16 %v3238_v18, %v3236_v17  ;;  %v8809_v25 = vpack.c.bf16 %v3569_v7, %v3567_v56  ;;  %v8825_v17 = vpack.c.bf16 %v3585_v11, %v3583_v6  ;;  %v3582_v18 = vld [vmem:[%s15212_s19 + $0xc0] sm:$0xff] }
 0x8b9   : > { %6818 = vmatmul.mubr.msk.f32.vlgmr.msra.gmra.mrb[38].mxu0 %vm1125_vm1, %v12054_v12  ;;  %6819 = vmatmul.mubr.msk.f32.vlgmr.msra.gmra.mrb[36].mxu1 %vm1125_vm1, %v12054_v12  ;;  %v3260_v7 = vld [vmem:[%s15211_s18 + $0xe0] sm:$0xff] }
 0x8ba   : > { %8644 = vmatpush1.bf16.msra.mxu0 %v8643_v58  ;;  %8660 = vmatpush1.bf16.msra.mxu1 %v8659_v43  ;;  %v8807_v58 = vpack.c.bf16 %v3564_v48, %v3562_v47  ;;  %v3240_v43 = vld [vmem:[%s15211_s18 + $0x40] sm:$0xff]  ;;  %v3263_v47 = vld [vmem:[%s15211_s18 + $0xf8] sm:$0xff]  ;;  %v3587_v48 = vld [vmem:[%s15212_s19 + $0xe8] sm:$0xff] }
 0x8bb   : > { %8646 = vmatprep.subr.bf16.mxu0 %v8645_v14  ;;  %8662 = vmatprep.subr.bf16.mxu1 %v8661_v33  ;;  %v3568_v14 = vld [vmem:[%s15212_s19 + $0x50] sm:$0xff]  ;;  %v3245_v33 = vld [vmem:[%s15211_s18 + $0x68] sm:$0xff]  ;;  %v8683_v61 = vpack.c.bf16 %v3242_v55, %v3240_v43  ;;  %v8829_v43 = vpack.c.bf16 %v3589_v50, %v3587_v48  ;;  %v3586_v55 = vld [vmem:[%s15212_s19 + $0xe0] sm:$0xff] }
 0x8bc   : > { %3146 = vmatprep.mubr.f32.mxu0 %v15248_v13  ;;  %3217 = vmatprep.mubr.f32.mxu1 %v15248_v13  ;;  %v3276_v11 = vld [vmem:[%s15211_s18 + $0x160] sm:$0xff] }
 0x8bd   : > { %v3280_v50 = vld [vmem:[%s15211_s18 + $0x180] sm:$0xff] }
 0x8be   : > { %8648 = vmatpush1.bf16.msra.mxu0 %v8647_v4  ;;  %8664 = vmatpush1.bf16.msra.mxu1 %v8663_v40  ;;  %v3246_v4 = vld [vmem:[%s15211_s18 + $0x70] sm:$0xff]  ;;  %v8685_v40 = vpack.c.bf16 %v3247_v20, %v3245_v33  ;;  %v3593_v33 = vld [vmem:[%s15212_s19 + $0x118] sm:$0xff] }
 0x8bf   : > { %8650 = vmatprep.subr.bf16.mxu0 %v8649_v30  ;;  %8666 = vmatprep.subr.bf16.mxu1 %v8665_v44  ;;  %v3572_v30 = vld [vmem:[%s15212_s19 + $0x70] sm:$0xff]  ;;  %v3249_v44 = vld [vmem:[%s15211_s18 + $0x88] sm:$0xff]  ;;  %v8687_v46 = vpack.c.bf16 %v3246_v4, %v3244_v9  ;;  %v3590_v4 = vld [vmem:[%s15212_s19 + $0x100] sm:$0xff] }
 0x8c0   : > { %v8815_v24 = vpack.c.bf16 %v3572_v30, %v3570_v26  ;;  %v3271_v26 = vld [vmem:[%s15211_s18 + $0x138] sm:$0xff]  ;;  %v3595_v30 = vld [vmem:[%s15212_s19 + $0x128] sm:$0xff] }
 0x8c2   : > { %8652 = vmatpush1.bf16.msra.mxu0 %v8651_v60  ;;  %8668 = vmatpush1.bf16.msra.mxu1 %v8667_v63  ;;  %v3250_v60 = vld [vmem:[%s15211_s18 + $0x90] sm:$0xff]  ;;  %v8689_v63 = vpack.c.bf16 %v3251_v41, %v3249_v44  ;;  %v3597_v44 = vld [vmem:[%s15212_s19 + $0x138] sm:$0xff] }
 0x8c3   : > { %8654 = vmatprep.subr.bf16.mxu0 %v8653_v29  ;;  %8670 = vmatprep.subr.bf16.mxu1 %v8669_v49  ;;  %v3576_v29 = vld [vmem:[%s15212_s19 + $0x90] sm:$0xff]  ;;  %v3253_v49 = vld [vmem:[%s15211_s18 + $0xa8] sm:$0xff]  ;;  %v8691_v59 = vpack.c.bf16 %v3250_v60, %v3248_v35  ;;  %v8837_v35 = vpack.c.bf16 %v3597_v44, %v3595_v30  ;;  %v3594_v60 = vld [vmem:[%s15212_s19 + $0x120] sm:$0xff] }
 0x8c4   : > { %v8819_v1 = vpack.c.bf16 %v3576_v29, %v3574_v54  ;;  %v3275_v54 = vld [vmem:[%s15211_s18 + $0x158] sm:$0xff]  ;;  %v3599_v29 = vld [vmem:[%s15212_s19 + $0x148] sm:$0xff]  ;;  %v3288_v44 = vld [vmem:[%s15211_s18 + $0x1c0] sm:$0xff] }
 0x8c6   : > { %8656 = vmatpush1.bf16.msra.mxu0 %v8655_v27  ;;  %8672 = vmatpush1.bf16.msra.mxu1 %v8671_v21  ;;  %v3254_v27 = vld [vmem:[%s15211_s18 + $0xb0] sm:$0xff]  ;;  %v8693_v21 = vpack.c.bf16 %v3255_v38, %v3253_v49  ;;  %v3601_v49 = vld [vmem:[%s15212_s19 + $0x158] sm:$0xff] }
 0x8c7   : > { %8674 = vmatprep.subr.bf16.mxu0 %v8673_v32  ;;  %8802 = vmatprep.subr.bf16.mxu1 %v8801_v0  ;;  %v3580_v32 = vld [vmem:[%s15212_s19 + $0xb0] sm:$0xff]  ;;  %v3257_v0 = vld [vmem:[%s15211_s18 + $0xc8] sm:$0xff]  ;;  %v8695_v37 = vpack.c.bf16 %v3254_v27, %v3252_v3  ;;  %v8841_v3 = vpack.c.bf16 %v3601_v49, %v3599_v29  ;;  %v3598_v27 = vld [vmem:[%s15212_s19 + $0x140] sm:$0xff] }
 0x8c8   : > { %v8823_v19 = vpack.c.bf16 %v3580_v32, %v3578_v5  ;;  %v3279_v5 = vld [vmem:[%s15211_s18 + $0x178] sm:$0xff]  ;;  %v3603_v32 = vld [vmem:[%s15212_s19 + $0x168] sm:$0xff] }
 0x8c9   : > { %6820 = vmatmul.mubr.msk.f32.vlgmr.msra.gmra.mrb[40].mxu0 %vm1125_vm1, %v12054_v12  ;;  %6821 = vmatmul.mubr.msk.f32.vlgmr.msra.gmra.mrb[38].mxu1 %vm1125_vm1, %v12054_v12  ;;  %v3566_v12 = vld [vmem:[%s15212_s19 + $0x40] sm:$0xff]  ;;  %v3621_v49 = vld [vmem:[%s15212_s19 + $0x1f8] sm:$0xff] }
 0x8ca   : > { %8676 = vmatpush1.bf16.msra.mxu0 %v8675_v8  ;;  %8804 = vmatpush1.bf16.msra.mxu1 %v8803_v42  ;;  %v8811_v28 = vpack.c.bf16 %v3568_v14, %v3566_v12  ;;  %v3258_v8 = vld [vmem:[%s15211_s18 + $0xd0] sm:$0xff]  ;;  %v8697_v42 = vpack.c.bf16 %v3259_v10, %v3257_v0  ;;  %v3267_v12 = vld [vmem:[%s15211_s18 + $0x118] sm:$0xff]  ;;  %v3591_v14 = vld [vmem:[%s15212_s19 + $0x108] sm:$0xff] }
 0x8cb   : > { %8678 = vmatprep.subr.bf16.mxu0 %v8677_v45  ;;  %8806 = vmatprep.subr.bf16.mxu1 %v8805_v22  ;;  %v3584_v45 = vld [vmem:[%s15212_s19 + $0xd0] sm:$0xff]  ;;  %v3261_v22 = vld [vmem:[%s15211_s18 + $0xe8] sm:$0xff]  ;;  %v8699_v52 = vpack.c.bf16 %v3258_v8, %v3256_v39  ;;  %v8833_v9 = vpack.c.bf16 %v3593_v33, %v3591_v14  ;;  %v3605_v0 = vld [vmem:[%s15212_s19 + $0x178] sm:$0xff] }
 0x8cc   : > { %v8827_v56 = vpack.c.bf16 %v3584_v45, %v3582_v18  ;;  %v8845_v39 = vpack.c.bf16 %v3605_v0, %v3603_v32  ;;  %v3602_v8 = vld [vmem:[%s15212_s19 + $0x160] sm:$0xff]  ;;  %v3283_v18 = vld [vmem:[%s15211_s18 + $0x198] sm:$0xff]  ;;  %v3607_v45 = vld [vmem:[%s15212_s19 + $0x188] sm:$0xff] }
 0x8cd   : > { %v3284_v33 = vld [vmem:[%s15211_s18 + $0x1a0] sm:$0xff]  ;;  %v3625_v0 = vld [vmem:[%s15212_s19 + $0x218] sm:$0xff] }
 0x8ce   : > { %8680 = vmatpush1.bf16.msra.mxu0 %v8679_v57  ;;  %8808 = vmatpush1.bf16.msra.mxu1 %v8807_v58  ;;  %v3262_v57 = vld [vmem:[%s15211_s18 + $0xf0] sm:$0xff]  ;;  %v8701_v58 = vpack.c.bf16 %v3263_v47, %v3261_v22  ;;  %v3609_v22 = vld [vmem:[%s15212_s19 + $0x198] sm:$0xff] }
 0x8cf   : > { %8682 = vmatprep.subr.bf16.mxu0 %v8681_v2  ;;  %8810 = vmatprep.subr.bf16.mxu1 %v8809_v25  ;;  %v3588_v2 = vld [vmem:[%s15212_s19 + $0xf0] sm:$0xff]  ;;  %v3265_v25 = vld [vmem:[%s15211_s18 + $0x108] sm:$0xff]  ;;  %v8703_v20 = vpack.c.bf16 %v3262_v57, %v3260_v7  ;;  %v8849_v7 = vpack.c.bf16 %v3609_v22, %v3607_v45  ;;  %v3606_v57 = vld [vmem:[%s15212_s19 + $0x180] sm:$0xff] }
 0x8d0   : > { %v8831_v31 = vpack.c.bf16 %v3588_v2, %v3586_v55  ;;  %v3287_v55 = vld [vmem:[%s15211_s18 + $0x1b8] sm:$0xff]  ;;  %v3611_v2 = vld [vmem:[%s15212_s19 + $0x1a8] sm:$0xff] }
 0x8d2   : > { %8684 = vmatpush1.bf16.msra.mxu0 %v8683_v61  ;;  %8812 = vmatpush1.bf16.msra.mxu1 %v8811_v28  ;;  %v3266_v61 = vld [vmem:[%s15211_s18 + $0x110] sm:$0xff]  ;;  %v8705_v28 = vpack.c.bf16 %v3267_v12, %v3265_v25  ;;  %v3613_v25 = vld [vmem:[%s15212_s19 + $0x1b8] sm:$0xff] }
 0x8d3   : > { %8686 = vmatprep.subr.bf16.mxu0 %v8685_v40  ;;  %8814 = vmatprep.subr.bf16.mxu1 %v8813_v16  ;;  %v3592_v40 = vld [vmem:[%s15212_s19 + $0x110] sm:$0xff]  ;;  %v3269_v16 = vld [vmem:[%s15211_s18 + $0x128] sm:$0xff]  ;;  %v8707_v41 = vpack.c.bf16 %v3266_v61, %v3264_v23  ;;  %v8853_v23 = vpack.c.bf16 %v3613_v25, %v3611_v2  ;;  %v3610_v61 = vld [vmem:[%s15212_s19 + $0x1a0] sm:$0xff] }
 0x8d4   : > { %v8835_v34 = vpack.c.bf16 %v3592_v40, %v3590_v4  ;;  %v3291_v4 = vld [vmem:[%s15211_s18 + $0x1d8] sm:$0xff]  ;;  %v3615_v40 = vld [vmem:[%s15212_s19 + $0x1c8] sm:$0xff] }
 0x8d6   : > { %8688 = vmatpush1.bf16.msra.mxu0 %v8687_v46  ;;  %8816 = vmatpush1.bf16.msra.mxu1 %v8815_v24  ;;  %v3270_v46 = vld [vmem:[%s15211_s18 + $0x130] sm:$0xff]  ;;  %v8709_v24 = vpack.c.bf16 %v3271_v26, %v3269_v16  ;;  %v3617_v16 = vld [vmem:[%s15212_s19 + $0x1d8] sm:$0xff] }
 0x8d7   : > { %8690 = vmatprep.subr.bf16.mxu0 %v8689_v63  ;;  %8818 = vmatprep.subr.bf16.mxu1 %v8817_v15  ;;  %v3596_v63 = vld [vmem:[%s15212_s19 + $0x130] sm:$0xff]  ;;  %v3273_v15 = vld [vmem:[%s15211_s18 + $0x148] sm:$0xff]  ;;  %v8711_v38 = vpack.c.bf16 %v3270_v46, %v3268_v36  ;;  %v3614_v46 = vld [vmem:[%s15212_s19 + $0x1c0] sm:$0xff] }
 0x8d8   : > { %v8839_v53 = vpack.c.bf16 %v3596_v63, %v3594_v60  ;;  %v3290_v36 = vld [vmem:[%s15211_s18 + $0x1d0] sm:$0xff]  ;;  %v3293_v63 = vld [vmem:[%s15211_s18 + $0x1e8] sm:$0xff] }
 0x8da   : > { %8692 = vmatpush1.bf16.msra.mxu0 %v8691_v59  ;;  %8820 = vmatpush1.bf16.msra.mxu1 %v8819_v1  ;;  %v3274_v59 = vld [vmem:[%s15211_s18 + $0x150] sm:$0xff]  ;;  %v8713_v1 = vpack.c.bf16 %v3275_v54, %v3273_v15  ;;  %v3295_v15 = vld [vmem:[%s15211_s18 + $0x1f8] sm:$0xff]  ;;  %v3619_v54 = vld [vmem:[%s15212_s19 + $0x1e8] sm:$0xff] }
 0x8db   : > { %8694 = vmatprep.subr.bf16.mxu0 %v8693_v21  ;;  %8822 = vmatprep.subr.bf16.mxu1 %v8821_v51  ;;  %v3600_v21 = vld [vmem:[%s15212_s19 + $0x150] sm:$0xff]  ;;  %v3277_v51 = vld [vmem:[%s15211_s18 + $0x168] sm:$0xff]  ;;  %v8715_v10 = vpack.c.bf16 %v3274_v59, %v3272_v62  ;;  %v8733_v29 = vpack.c.bf16 %v3295_v15, %v3293_v63  ;;  %v8861_v62 = vpack.c.bf16 %v3621_v49, %v3619_v54  ;;  %v3304_v63 = vld [vmem:[%s15211_s18 + $0x240] sm:$0xff] }
 0x8dc   : > { %v8843_v6 = vpack.c.bf16 %v3600_v21, %v3598_v27  ;;  %v3297_v21 = vld [vmem:[%s15211_s18 + $0x208] sm:$0xff]  ;;  %v3306_v15 = vld [vmem:[%s15211_s18 + $0x250] sm:$0xff] }
 0x8de   : > { %8696 = vmatpush1.bf16.msra.mxu0 %v8695_v37  ;;  %8824 = vmatpush1.bf16.msra.mxu1 %v8823_v19  ;;  %v3278_v37 = vld [vmem:[%s15211_s18 + $0x170] sm:$0xff]  ;;  %v8717_v19 = vpack.c.bf16 %v3279_v5, %v3277_v51  ;;  %v3299_v51 = vld [vmem:[%s15211_s18 + $0x218] sm:$0xff]  ;;  %v3623_v5 = vld [vmem:[%s15212_s19 + $0x208] sm:$0xff] }
 0x8df   : > { %8698 = vmatprep.subr.bf16.mxu0 %v8697_v42  ;;  %8826 = vmatprep.subr.bf16.mxu1 %v8825_v17  ;;  %v3604_v42 = vld [vmem:[%s15212_s19 + $0x170] sm:$0xff]  ;;  %v3281_v17 = vld [vmem:[%s15211_s18 + $0x188] sm:$0xff]  ;;  %v8719_v47 = vpack.c.bf16 %v3278_v37, %v3276_v11  ;;  %v8737_v32 = vpack.c.bf16 %v3299_v51, %v3297_v21  ;;  %v3637_v21 = vld [vmem:[%s15212_s19 + $0x278] sm:$0xff] }
 0x8e0   : > { %v8847_v48 = vpack.c.bf16 %v3604_v42, %v3602_v8 }
 0x8e2   : > { %8700 = vmatpush1.bf16.msra.mxu0 %v8699_v52  ;;  %8828 = vmatpush1.bf16.msra.mxu1 %v8827_v56  ;;  %v3282_v52 = vld [vmem:[%s15211_s18 + $0x190] sm:$0xff]  ;;  %v8721_v56 = vpack.c.bf16 %v3283_v18, %v3281_v17 }
 0x8e3   : > { %8702 = vmatprep.subr.bf16.mxu0 %v8701_v58  ;;  %8830 = vmatprep.subr.bf16.mxu1 %v8829_v43  ;;  %v3608_v58 = vld [vmem:[%s15212_s19 + $0x190] sm:$0xff]  ;;  %v3285_v43 = vld [vmem:[%s15211_s18 + $0x1a8] sm:$0xff]  ;;  %v8723_v12 = vpack.c.bf16 %v3282_v52, %v3280_v50  ;;  %v3296_v50 = vld [vmem:[%s15211_s18 + $0x200] sm:$0xff] }
 0x8e4   : > { %v8851_v14 = vpack.c.bf16 %v3608_v58, %v3606_v57  ;;  %v3298_v58 = vld [vmem:[%s15211_s18 + $0x210] sm:$0xff] }
 0x8e6   : > { %8704 = vmatpush1.bf16.msra.mxu0 %v8703_v20  ;;  %8832 = vmatpush1.bf16.msra.mxu1 %v8831_v31  ;;  %v3286_v20 = vld [vmem:[%s15211_s18 + $0x1b0] sm:$0xff]  ;;  %v8725_v31 = vpack.c.bf16 %v3287_v55, %v3285_v43  ;;  %v3622_v43 = vld [vmem:[%s15212_s19 + $0x200] sm:$0xff] }
 0x8e7   : > { %8706 = vmatprep.subr.bf16.mxu0 %v8705_v28  ;;  %8834 = vmatprep.subr.bf16.mxu1 %v8833_v9  ;;  %v3612_v28 = vld [vmem:[%s15212_s19 + $0x1b0] sm:$0xff]  ;;  %v3289_v9 = vld [vmem:[%s15211_s18 + $0x1c8] sm:$0xff]  ;;  %v8727_v26 = vpack.c.bf16 %v3286_v20, %v3284_v33  ;;  %v3629_v20 = vld [vmem:[%s15212_s19 + $0x238] sm:$0xff] }
 0x8e8   : > { %v8855_v30 = vpack.c.bf16 %v3612_v28, %v3610_v61  ;;  %v3624_v55 = vld [vmem:[%s15212_s19 + $0x210] sm:$0xff]  ;;  %v3627_v33 = vld [vmem:[%s15212_s19 + $0x228] sm:$0xff]  ;;  %v8739_v61 = vpack.c.bf16 %v3298_v58, %v3296_v50  ;;  %v3641_v50 = vld [vmem:[%s15212_s19 + $0x298] sm:$0xff] }
 0x8e9   : > { %v8867_v28 = vpack.c.bf16 %v3624_v55, %v3622_v43 }
 0x8ea   : > { %8708 = vmatpush1.bf16.msra.mxu0 %v8707_v41  ;;  %8836 = vmatpush1.bf16.msra.mxu1 %v8835_v34  ;;  %v8729_v41 = vpack.c.bf16 %v3291_v4, %v3289_v9  ;;  %v8857_v34 = vpack.c.bf16 %v3617_v16, %v3615_v40  ;;  %v3300_v9 = vld [vmem:[%s15211_s18 + $0x220] sm:$0xff]  ;;  %v3302_v4 = vld [vmem:[%s15211_s18 + $0x230] sm:$0xff] }
 0x8eb   : > { %8710 = vmatprep.subr.bf16.mxu0 %v8709_v24  ;;  %8838 = vmatprep.subr.bf16.mxu1 %v8837_v35  ;;  %v3616_v24 = vld [vmem:[%s15212_s19 + $0x1d0] sm:$0xff]  ;;  %v8731_v35 = vpack.c.bf16 %v3290_v36, %v3288_v44  ;;  %v3307_v36 = vld [vmem:[%s15211_s18 + $0x258] sm:$0xff] }
 0x8ec   : > { %v8859_v60 = vpack.c.bf16 %v3616_v24, %v3614_v46  ;;  %v3628_v44 = vld [vmem:[%s15212_s19 + $0x230] sm:$0xff]  ;;  %v3631_v46 = vld [vmem:[%s15212_s19 + $0x248] sm:$0xff]  ;;  %v3633_v24 = vld [vmem:[%s15212_s19 + $0x258] sm:$0xff] }
 0x8ee   : > { %8712 = vmatpush1.bf16.msra.mxu0 %v8711_v38  ;;  %8840 = vmatpush1.bf16.msra.mxu1 %v8839_v53  ;;  %v3292_v38 = vld [vmem:[%s15211_s18 + $0x1e0] sm:$0xff]  ;;  %v3294_v53 = vld [vmem:[%s15211_s18 + $0x1f0] sm:$0xff] }
 0x8ef   : > { %8714 = vmatprep.subr.bf16.mxu0 %v8713_v1  ;;  %8842 = vmatprep.subr.bf16.mxu1 %v8841_v3  ;;  %v8735_v59 = vpack.c.bf16 %v3294_v53, %v3292_v38  ;;  %v3618_v1 = vld [vmem:[%s15212_s19 + $0x1e0] sm:$0xff]  ;;  %v3620_v3 = vld [vmem:[%s15212_s19 + $0x1f0] sm:$0xff] }
 0x8f0   : > { %v8863_v27 = vpack.c.bf16 %v3620_v3, %v3618_v1  ;;  %v3630_v38 = vld [vmem:[%s15212_s19 + $0x240] sm:$0xff]  ;;  %v3632_v53 = vld [vmem:[%s15212_s19 + $0x250] sm:$0xff]  ;;  %v3311_v3 = vld [vmem:[%s15211_s18 + $0x278] sm:$0xff] }
 0x8f2   : > { %8716 = vmatpush1.bf16.msra.mxu0 %v8715_v10  ;;  %8844 = vmatpush1.bf16.msra.mxu1 %v8843_v6  ;;  %v8865_v10 = vpack.c.bf16 %v3625_v0, %v3623_v5  ;;  %v2897_v6 = vlaneseq  ;;  %v8747_v5 = vpack.c.bf16 %v3306_v15, %v3304_v63  ;;  %v3308_v0 = vld [vmem:[%s15211_s18 + $0x260] sm:$0xff] }
 0x8f3   : > { %8718 = vmatprep.subr.bf16.mxu0 %v8717_v19  ;;  %8846 = vmatprep.subr.bf16.mxu1 %v8845_v39  ;;  %v12468_v39 = vld [vmem:[#allocation18] sm:$0xff] }
 0x8f4   : > { %v12462_v11 = vshrl.u32 %v2897_v6, 7 }
 0x8f6   : > { %8720 = vmatpush1.bf16.msra.mxu0 %v8719_v47  ;;  %8848 = vmatpush1.bf16.msra.mxu1 %v8847_v48  ;;  %v12465_v37 = vsub.s32 0, %v12462_v11  ;;  %v2907_v19 = vsub.s32 2, %v12462_v11  ;;  %v12471_v8 = vsub.s32 1, %v12462_v11  ;;  %v2911_v42 = vsub.s32 3, %v12462_v11 }
 0x8f7   : > { %8722 = vmatprep.subr.bf16.mxu0 %v8721_v56  ;;  %8850 = vmatprep.subr.bf16.mxu1 %v8849_v7  ;;  %v2915_v49 = vsub.s32 4, %v12462_v11  ;;  %v2927_v1 = vsub.s32 7, %v12462_v11  ;;  %v2923_v51 = vsub.s32 6, %v12462_v11 }
 0x8f8   : > { %15502 = vst [vmem:[#allocation29_spill] sm:$0xff] %v12465_v37  ;;  %15503 = vst [vmem:[#allocation30_spill] sm:$0xff] %v12471_v8  ;;  %v2900_v17 = vrot.slane %v12468_v39, %v12465_v37  ;;  %v2908_v18 = vrot.slane %v12468_v39, %v2907_v19  ;;  %v2904_v45 = vrot.slane %v12468_v39, %v12471_v8 }
 0x8f9   : > { %v2912_v22 = vrot.slane %v12468_v39, %v2911_v42  ;;  %v2916_v6 = vrot.slane %v12468_v39, %v2915_v49  ;;  %v3321_v49 = vld [vmem:[%s15211_s18 + $0x2c8] sm:$0xff] }
 0x8fa   : > { %8724 = vmatpush1.bf16.msra.mxu0 %v8723_v12  ;;  %8852 = vmatpush1.bf16.msra.mxu1 %v8851_v14  ;;  %v3301_v12 = vld [vmem:[%s15211_s18 + $0x228] sm:$0xff]  ;;  %v3303_v14 = vld [vmem:[%s15211_s18 + $0x238] sm:$0xff] }
 0x8fb   : > { %8726 = vmatprep.subr.bf16.mxu0 %v8725_v31  ;;  %8854 = vmatprep.subr.bf16.mxu1 %v8853_v23 }
 0x8fe   : > { %8728 = vmatpush1.bf16.msra.mxu0 %v8727_v26  ;;  %8856 = vmatpush1.bf16.msra.mxu1 %v8855_v30  ;;  %v8741_v26 = vpack.c.bf16 %v3303_v14, %v3301_v12  ;;  %v3626_v30 = vld [vmem:[%s15212_s19 + $0x220] sm:$0xff] }
 0x8ff   : > { %8730 = vmatprep.subr.bf16.mxu0 %v8729_v41  ;;  %8858 = vmatprep.subr.bf16.mxu1 %v8857_v34  ;;  %v3305_v41 = vld [vmem:[%s15211_s18 + $0x248] sm:$0xff]  ;;  %v8869_v34 = vpack.c.bf16 %v3629_v20, %v3627_v33  ;;  %v3312_v14 = vld [vmem:[%s15211_s18 + $0x280] sm:$0xff] }
 0x900   : > { %v8745_v54 = vpack.c.bf16 %v3307_v36, %v3305_v41 }
 0x902   : > { %8732 = vmatpush1.bf16.msra.mxu0 %v8731_v35  ;;  %8860 = vmatpush1.bf16.msra.mxu1 %v8859_v60  ;;  %v8743_v35 = vpack.c.bf16 %v3302_v4, %v3300_v9  ;;  %v8871_v60 = vpack.c.bf16 %v3628_v44, %v3626_v30  ;;  %v3317_v9 = vld [vmem:[%s15211_s18 + $0x2a8] sm:$0xff]  ;;  %v3319_v4 = vld [vmem:[%s15211_s18 + $0x2b8] sm:$0xff] }
 0x903   : > { %8734 = vmatprep.subr.bf16.mxu0 %v8733_v29  ;;  %8862 = vmatprep.subr.bf16.mxu1 %v8861_v62  ;;  %v8873_v29 = vpack.c.bf16 %v3633_v24, %v3631_v46  ;;  %v3309_v62 = vld [vmem:[%s15211_s18 + $0x268] sm:$0xff]  ;;  %v3645_v30 = vld [vmem:[%s15212_s19 + $0x2b8] sm:$0xff]  ;;  %v3316_v24 = vld [vmem:[%s15211_s18 + $0x2a0] sm:$0xff]  ;;  %v8757_v15 = vpack.c.bf16 %v3319_v4, %v3317_v9 }
 0x904   : > { %v8749_v19 = vpack.c.bf16 %v3311_v3, %v3309_v62  ;;  %v3649_v62 = vld [vmem:[%s15212_s19 + $0x2d8] sm:$0xff] }
 0x906   : > { %8736 = vmatpush1.bf16.msra.mxu0 %v8735_v59  ;;  %8864 = vmatpush1.bf16.msra.mxu1 %v8863_v27  ;;  %v2919_v59 = vsub.s32 5, %v12462_v11  ;;  %v3635_v27 = vld [vmem:[%s15212_s19 + $0x268] sm:$0xff]  ;;  %v3634_v11 = vld [vmem:[%s15212_s19 + $0x260] sm:$0xff] }
 0x907   : > { %8738 = vmatprep.subr.bf16.mxu0 %v8737_v32  ;;  %8866 = vmatprep.subr.bf16.mxu1 %v8865_v10  ;;  %v8875_v32 = vpack.c.bf16 %v3632_v53, %v3630_v38  ;;  %v3310_v10 = vld [vmem:[%s15211_s18 + $0x270] sm:$0xff]  ;;  %v8877_v42 = vpack.c.bf16 %v3637_v21, %v3635_v27  ;;  %v3323_v38 = vld [vmem:[%s15211_s18 + $0x2d8] sm:$0xff]  ;;  %v3647_v53 = vld [vmem:[%s15212_s19 + $0x2c8] sm:$0xff] }
 0x908   : > { %v8761_v27 = vpack.c.bf16 %v3323_v38, %v3321_v49  ;;  %v3320_v21 = vld [vmem:[%s15211_s18 + $0x2c0] sm:$0xff] }
 0x98c   : > { %v3006_v47 = vpop.f32.mrb[38].mxu0  ;;  %v3077_v48 = vpop.f32.mrb[36].mxu1 }
 0x98d   : > { %v3007_v52 = vadd.f32 %v3006_v47, %v2900_v17  ;;  %v3078_v56 = vadd.f32 %v3077_v48, %v2908_v18  ;;  %v3008_v7 = vpop.f32.mrb[39].mxu0  ;;  %v3079_v57 = vpop.f32.mrb[37].mxu1  ;;  %v3636_v17 = vld [vmem:[%s15212_s19 + $0x270] sm:$0xff]  ;;  %v3313_v18 = vld [vmem:[%s15211_s18 + $0x288] sm:$0xff]  ;;  %v3315_v47 = vld [vmem:[%s15211_s18 + $0x298] sm:$0xff] }
 0x98e   : > { %v3009_v2 = vadd.f32 %v3008_v7, %v2904_v45  ;;  %v3080_v25 = vadd.f32 %v3079_v57, %v2912_v22  ;;  %v2920_v45 = vrot.slane %v12468_v39, %v2919_v59  ;;  %v2928_v22 = vrot.slane %v12468_v39, %v2927_v1  ;;  %v3639_v48 = vld [vmem:[%s15212_s19 + $0x288] sm:$0xff] }
 0x98f   : > { %v12514_v40 = vmax.f32 %v3007_v52, 0.0  ;;  %v12516_v16 = vmax.f32 %v3078_v56, 0.0  ;;  %v2924_v56 = vrot.slane %v12468_v39, %v2923_v51  ;;  %v8751_v57 = vpack.c.bf16 %v3310_v10, %v3308_v0  ;;  %v3314_v39 = vld [vmem:[%s15211_s18 + $0x290] sm:$0xff]  ;;  %v3325_v10 = vld [vmem:[%s15211_s18 + $0x2e8] sm:$0xff] }
 0x990   : > { %v12504_v31 = vmax.f32 %v3009_v2, 0.0  ;;  %v12506_v23 = vmax.f32 %v3080_v25, 0.0  ;;  %v8879_v58 = vpack.c.bf16 %v3636_v17, %v3634_v11  ;;  %v8753_v25 = vpack.c.bf16 %v3315_v47, %v3313_v18  ;;  %v3322_v51 = vld [vmem:[%s15211_s18 + $0x2d0] sm:$0xff]  ;;  %v3650_v47 = vld [vmem:[%s15212_s19 + $0x2e0] sm:$0xff] }
 0x991   : > { %v8881_v12 = vpack.c.bf16 %v3641_v50, %v3639_v48  ;;  %v8755_v41 = vpack.c.bf16 %v3314_v39, %v3312_v14  ;;  %v3648_v0 = vld [vmem:[%s15212_s19 + $0x2d0] sm:$0xff]  ;;  %v8763_v11 = vpack.c.bf16 %v3322_v51, %v3320_v21  ;;  %v3341_v21 = vld [vmem:[%s15211_s18 + $0x368] sm:$0xff]  ;;  %v3343_v51 = vld [vmem:[%s15211_s18 + $0x378] sm:$0xff] }
 0x992   : > { %3436 = vmatprep.mubr.f32.mxu0 %v12504_v31  ;;  %3750 = vmatprep.mubr.f32.mxu1 %v12506_v23  ;;  %v3652_v50 = vld [vmem:[%s15212_s19 + $0x2f0] sm:$0xff] }
 0x993   : > { %3437 = vmatmul.mubr.f32.vlgmr.msra.gmra.mrb[42].mxu0 %v12514_v40  ;;  %3751 = vmatmul.mubr.f32.vlgmr.msra.gmra.mrb[40].mxu1 %v12516_v16  ;;  %v3656_v39 = vld [vmem:[%s15212_s19 + $0x310] sm:$0xff] }
 0x994   : > { %8740 = vmatpush1.bf16.msra.mxu0 %v8739_v61  ;;  %8868 = vmatpush1.bf16.msra.mxu1 %v8867_v28  ;;  %v3638_v61 = vld [vmem:[%s15212_s19 + $0x280] sm:$0xff]  ;;  %v3640_v28 = vld [vmem:[%s15212_s19 + $0x290] sm:$0xff] }
 0x995   : > { %3442 = vmatprep.mubr.f32.mxu0 %v12506_v23  ;;  %8742 = vmatprep.subr.bf16.mxu0 %v8741_v26  ;;  %v3643_v26 = vld [vmem:[%s15212_s19 + $0x2a8] sm:$0xff]  ;;  %v8883_v46 = vpack.c.bf16 %v3640_v28, %v3638_v61  ;;  %v3661_v28 = vld [vmem:[%s15212_s19 + $0x338] sm:$0xff] }
 0x996   : > { %8870 = vmatprep.subr.bf16.mxu1 %v8869_v34  ;;  %v3659_v61 = vld [vmem:[%s15212_s19 + $0x328] sm:$0xff] }
 0x997   : > { %3443 = vmatmul.mubr.f32.gmra.mrb[44].mxu0 %v12516_v16 }
 0x998   : > { %8744 = vmatpush1.bf16.msra.mxu0 %v8743_v35  ;;  %8872 = vmatpush1.bf16.msra.mxu1 %v8871_v60  ;;  %v3318_v35 = vld [vmem:[%s15211_s18 + $0x2b0] sm:$0xff]  ;;  %v3642_v60 = vld [vmem:[%s15212_s19 + $0x2a0] sm:$0xff] }
 0x999   : > { %8746 = vmatprep.subr.bf16.mxu0 %v8745_v54  ;;  %8874 = vmatprep.subr.bf16.mxu1 %v8873_v29  ;;  %v8885_v54 = vpack.c.bf16 %v3645_v30, %v3643_v26  ;;  %v3644_v29 = vld [vmem:[%s15212_s19 + $0x2b0] sm:$0xff]  ;;  %v8759_v59 = vpack.c.bf16 %v3318_v35, %v3316_v24  ;;  %v3332_v30 = vld [vmem:[%s15211_s18 + $0x320] sm:$0xff]  ;;  %v3337_v35 = vld [vmem:[%s15211_s18 + $0x348] sm:$0xff] }
 0x99a   : > { %v8887_v3 = vpack.c.bf16 %v3644_v29, %v3642_v60  ;;  %v3660_v24 = vld [vmem:[%s15212_s19 + $0x330] sm:$0xff]  ;;  %v3339_v60 = vld [vmem:[%s15211_s18 + $0x358] sm:$0xff] }
 0x99b   : > { %v8777_v38 = vpack.c.bf16 %v3339_v60, %v3337_v35 }
 0x99c   : > { %v3148_v52 = vpop.f32.mrb[40].mxu0  ;;  %v3219_v7 = vpop.f32.mrb[38].mxu1  ;;  %8748 = vmatpush1.bf16.msra.mxu0 %v8747_v5  ;;  %8876 = vmatpush1.bf16.msra.mxu1 %v8875_v32  ;;  %v3646_v5 = vld [vmem:[%s15212_s19 + $0x2c0] sm:$0xff]  ;;  %v8889_v32 = vpack.c.bf16 %v3649_v62, %v3647_v53  ;;  %v3338_v62 = vld [vmem:[%s15211_s18 + $0x350] sm:$0xff] }
 0x99d   : > { %v3149_v43 = vadd.f32 %v3148_v52, %v2916_v6  ;;  %v3150_v55 = vpop.f32.mrb[41].mxu0  ;;  %v3221_v2 = vpop.f32.mrb[39].mxu1  ;;  %8750 = vmatprep.subr.bf16.mxu0 %v8749_v19  ;;  %8878 = vmatprep.subr.bf16.mxu1 %v8877_v42  ;;  %v3220_v36 = vadd.f32 %v3219_v7, %v2924_v56  ;;  %v3327_v6 = vld [vmem:[%s15211_s18 + $0x2f8] sm:$0xff]  ;;  %v3651_v19 = vld [vmem:[%s15212_s19 + $0x2e8] sm:$0xff]  ;;  %v8891_v17 = vpack.c.bf16 %v3648_v0, %v3646_v5  ;;  %v3336_v53 = vld [vmem:[%s15211_s18 + $0x340] sm:$0xff] }
 0x99e   : > { %v3151_v33 = vadd.f32 %v3150_v55, %v2920_v45  ;;  %v3222_v20 = vadd.f32 %v3221_v2, %v2928_v22  ;;  %v3653_v42 = vld [vmem:[%s15212_s19 + $0x2f8] sm:$0xff]  ;;  %v8765_v18 = vpack.c.bf16 %v3327_v6, %v3325_v10  ;;  %v3324_v45 = vld [vmem:[%s15211_s18 + $0x2e0] sm:$0xff]  ;;  %v3326_v22 = vld [vmem:[%s15211_s18 + $0x2f0] sm:$0xff]  ;;  %v8779_v0 = vpack.c.bf16 %v3338_v62, %v3336_v53 }
 0x99f   : > { %v12624_v34 = vmax.f32 %v3149_v43, 0.0  ;;  %v12657_v1 = vmax.f32 %v3220_v36, 0.0  ;;  %v8893_v48 = vpack.c.bf16 %v3653_v42, %v3651_v19  ;;  %v3329_v52 = vld [vmem:[%s15211_s18 + $0x308] sm:$0xff]  ;;  %v3331_v56 = vld [vmem:[%s15211_s18 + $0x318] sm:$0xff]  ;;  %v8895_v43 = vpack.c.bf16 %v3652_v50, %v3650_v47  ;;  %v3328_v2 = vld [vmem:[%s15211_s18 + $0x300] sm:$0xff] }
 0x9a0   : > { %v12622_v44 = vmax.f32 %v3151_v33, 0.0  ;;  %8752 = vmatpush1.bf16.msra.mxu0 %v8751_v57  ;;  %8880 = vmatpush1.bf16.msra.mxu1 %v8879_v58  ;;  %v12635_v63 = vmax.f32 %v3222_v20, 0.0  ;;  %v3655_v7 = vld [vmem:[%s15212_s19 + $0x308] sm:$0xff]  ;;  %v3657_v57 = vld [vmem:[%s15212_s19 + $0x318] sm:$0xff]  ;;  %v8767_v58 = vpack.c.bf16 %v3326_v22, %v3324_v45  ;;  %v8769_v55 = vpack.c.bf16 %v3331_v56, %v3329_v52  ;;  %v3658_v36 = vld [vmem:[%s15212_s19 + $0x320] sm:$0xff] }
 0x9a1   : > { %8754 = vmatprep.subr.bf16.mxu0 %v8753_v25  ;;  %8882 = vmatprep.subr.bf16.mxu1 %v8881_v12  ;;  %v3330_v25 = vld [vmem:[%s15211_s18 + $0x310] sm:$0xff]  ;;  %v3654_v12 = vld [vmem:[%s15212_s19 + $0x300] sm:$0xff]  ;;  %v8897_v14 = vpack.c.bf16 %v3657_v57, %v3655_v7  ;;  %v3333_v33 = vld [vmem:[%s15211_s18 + $0x328] sm:$0xff]  ;;  %v8903_v49 = vpack.c.bf16 %v3660_v24, %v3658_v36  ;;  %v8781_v6 = vpack.c.bf16 %v3343_v51, %v3341_v21 }
 0x9a2   : > { %3448 = vmatprep.mubr.f32.mxu0 %v12622_v44  ;;  %3756 = vmatprep.mubr.f32.mxu1 %v12622_v44  ;;  %v3335_v20 = vld [vmem:[%s15211_s18 + $0x338] sm:$0xff]  ;;  %v8771_v9 = vpack.c.bf16 %v3330_v25, %v3328_v2  ;;  %v8899_v4 = vpack.c.bf16 %v3656_v39, %v3654_v12  ;;  %v3667_v5 = vld [vmem:[%s15212_s19 + $0x368] sm:$0xff]  ;;  %v3340_v19 = vld [vmem:[%s15211_s18 + $0x360] sm:$0xff] }
 0x9a3   : > { %3449 = vmatmul.mubr.f32.gmra.mrb[46].mxu0 %v12624_v34  ;;  %3757 = vmatmul.mubr.f32.gmra.mrb[42].mxu1 %v12624_v34  ;;  %v8773_v26 = vpack.c.bf16 %v3335_v20, %v3333_v33  ;;  %v3342_v42 = vld [vmem:[%s15211_s18 + $0x370] sm:$0xff]  ;;  %v3345_v45 = vld [vmem:[%s15211_s18 + $0x388] sm:$0xff]  ;;  %v3347_v22 = vld [vmem:[%s15211_s18 + $0x398] sm:$0xff] }
 0x9a4   : > { %3454 = vmatprep.mubr.f32.mxu0 %v12635_v63  ;;  %8756 = vmatpush1.bf16.msra.mxu0 %v8755_v41  ;;  %v3334_v41 = vld [vmem:[%s15211_s18 + $0x330] sm:$0xff]  ;;  %v3671_v47 = vld [vmem:[%s15212_s19 + $0x388] sm:$0xff]  ;;  %v8783_v50 = vpack.c.bf16 %v3342_v42, %v3340_v19  ;;  %v8785_v56 = vpack.c.bf16 %v3347_v22, %v3345_v45  ;;  %v3344_v7 = vld [vmem:[%s15211_s18 + $0x380] sm:$0xff] }
 0x9a5   : > { %3762 = vmatprep.mubr.f32.mxu1 %v12635_v63  ;;  %8884 = vmatpush1.bf16.msra.mxu1 %v8883_v46  ;;  %v8901_v46 = vpack.c.bf16 %v3661_v28, %v3659_v61  ;;  %v8775_v29 = vpack.c.bf16 %v3334_v41, %v3332_v30  ;;  %v3346_v57 = vld [vmem:[%s15211_s18 + $0x390] sm:$0xff]  ;;  %v3349_v2 = vld [vmem:[%s15211_s18 + $0x3a8] sm:$0xff]  ;;  %v3351_v25 = vld [vmem:[%s15211_s18 + $0x3b8] sm:$0xff] }
 0x9a6   : > { %8758 = vmatprep.subr.bf16.mxu0 %v8757_v15  ;;  %8886 = vmatprep.subr.bf16.mxu1 %v8885_v54  ;;  %v3663_v15 = vld [vmem:[%s15212_s19 + $0x348] sm:$0xff]  ;;  %v3665_v54 = vld [vmem:[%s15212_s19 + $0x358] sm:$0xff]  ;;  %v8787_v39 = vpack.c.bf16 %v3346_v57, %v3344_v7  ;;  %v8789_v20 = vpack.c.bf16 %v3351_v25, %v3349_v2  ;;  %v3348_v61 = vld [vmem:[%s15211_s18 + $0x3a0] sm:$0xff] }
 0x9a7   : > { %3455 = vmatmul.mubr.f32.gmra.mrb[48].mxu0 %v12657_v1  ;;  %3763 = vmatmul.mubr.f32.gmra.mrb[44].mxu1 %v12657_v1  ;;  %v3675_v12 = vld [vmem:[%s15212_s19 + $0x3a8] sm:$0xff]  ;;  %v3350_v28 = vld [vmem:[%s15211_s18 + $0x3b0] sm:$0xff]  ;;  %v3355_v41 = vld [vmem:[%s15211_s18 + $0x3d8] sm:$0xff] }
 0x9a8   : > { %8760 = vmatpush1.bf16.msra.mxu0 %v8759_v59  ;;  %3768 = vmatprep.mubr.f32.mxu1 %v15248_v13  ;;  %v3662_v59 = vld [vmem:[%s15212_s19 + $0x340] sm:$0xff]  ;;  %v3353_v30 = vld [vmem:[%s15211_s18 + $0x3c8] sm:$0xff]  ;;  %v8791_v24 = vpack.c.bf16 %v3350_v28, %v3348_v61  ;;  %v3359_v62 = vld [vmem:[%s15211_s18 + $0x3f8] sm:$0xff] }
 0x9a9   : > { %8888 = vmatpush1.bf16.msra.mxu1 %v8887_v3  ;;  %8762 = vmatprep.subr.bf16.mxu0 %v8761_v27  ;;  %v8905_v3 = vpack.c.bf16 %v3665_v54, %v3663_v15  ;;  %v3664_v27 = vld [vmem:[%s15212_s19 + $0x350] sm:$0xff]  ;;  %v3679_v36 = vld [vmem:[%s15212_s19 + $0x3c8] sm:$0xff]  ;;  %v8793_v60 = vpack.c.bf16 %v3355_v41, %v3353_v30  ;;  %v3352_v15 = vld [vmem:[%s15211_s18 + $0x3c0] sm:$0xff] }
 0x9aa   : > { %8890 = vmatprep.subr.bf16.mxu1 %v8889_v32  ;;  %3525 = vmatprep.mubr.f32.mxu0 %v15248_v13  ;;  %v3669_v32 = vld [vmem:[%s15212_s19 + $0x378] sm:$0xff]  ;;  %v8907_v10 = vpack.c.bf16 %v3664_v27, %v3662_v59  ;;  %v3354_v54 = vld [vmem:[%s15211_s18 + $0x3d0] sm:$0xff]  ;;  %v3357_v53 = vld [vmem:[%s15211_s18 + $0x3e8] sm:$0xff] }
 0x9ab   : > { %3769 = vmatmul.mubr.f32.gmra.mrb[46].mxu1 %v15248_v13  ;;  %v3683_v59 = vld [vmem:[%s15212_s19 + $0x3e8] sm:$0xff]  ;;  %v8795_v27 = vpack.c.bf16 %v3354_v54, %v3352_v15  ;;  %v8797_v51 = vpack.c.bf16 %v3359_v62, %v3357_v53  ;;  %v3875_v42 = vld [vmem:[%s15214_s21 + $0x18] sm:$0xff]  ;;  %v3886_v53 = vld [vmem:[%s15214_s21 + $0x70] sm:$0xff] }
 0x9ac   : > { %8764 = vmatpush1.bf16.msra.mxu0 %v8763_v11  ;;  %3839 = vmatprep.mubr.f32.mxu1 %v12504_v31  ;;  %v3666_v11 = vld [vmem:[%s15212_s19 + $0x360] sm:$0xff]  ;;  %v3873_v19 = vld [vmem:[%s15214_s21 + $0x8] sm:$0xff]  ;;  %v3879_v57 = vld [vmem:[%s15214_s21 + $0x38] sm:$0xff] }
 0x9ad   : > { %8892 = vmatpush1.bf16.msra.mxu1 %v8891_v17  ;;  %8766 = vmatprep.subr.bf16.mxu0 %v8765_v18  ;;  %v8909_v17 = vpack.c.bf16 %v3669_v32, %v3667_v5  ;;  %v3668_v18 = vld [vmem:[%s15212_s19 + $0x370] sm:$0xff]  ;;  %v3356_v5 = vld [vmem:[%s15211_s18 + $0x3e0] sm:$0xff]  ;;  %v12900_v22 = vpack.c.bf16 %v3875_v42, %v3873_v19  ;;  %v3877_v7 = vld [vmem:[%s15214_s21 + $0x28] sm:$0xff] }
 0x9ae   : > { %8894 = vmatprep.subr.bf16.mxu1 %v8893_v48  ;;  %v3673_v48 = vld [vmem:[%s15212_s19 + $0x398] sm:$0xff]  ;;  %v8911_v52 = vpack.c.bf16 %v3668_v18, %v3666_v11  ;;  %v3358_v32 = vld [vmem:[%s15211_s18 + $0x3f0] sm:$0xff]  ;;  %v12922_v25 = vpack.c.bf16 %v3879_v57, %v3877_v7  ;;  %v3881_v61 = vld [vmem:[%s15214_s21 + $0x48] sm:$0xff] }
 0x9af   : > { %v4199_v11 = vld [vmem:[#allocation19 + $0x8] sm:$0xff]  ;;  %v8799_v18 = vpack.c.bf16 %v3358_v32, %v3356_v5  ;;  %v3883_v28 = vld [vmem:[%s15214_s21 + $0x58] sm:$0xff]  ;;  %v4210_v62 = vld [vmem:[#allocation19 + $0x60] sm:$0xff] }
 0x9b0   : > { %8768 = vmatpush1.bf16.msra.mxu0 %v8767_v58  ;;  %v3670_v58 = vld [vmem:[%s15212_s19 + $0x380] sm:$0xff]  ;;  %v12949_v41 = vpack.c.bf16 %v3883_v28, %v3881_v61  ;;  %v3887_v15 = vld [vmem:[%s15214_s21 + $0x78] sm:$0xff]  ;;  %v4211_v54 = vld [vmem:[#allocation19 + $0x68] sm:$0xff] }
 0x9b1   : > { %8896 = vmatpush1.bf16.msra.mxu1 %v8895_v43  ;;  %8770 = vmatprep.subr.bf16.mxu0 %v8769_v55  ;;  %v8913_v43 = vpack.c.bf16 %v3673_v48, %v3671_v47  ;;  %v3672_v55 = vld [vmem:[%s15212_s19 + $0x390] sm:$0xff]  ;;  %v3872_v48 = vld [vmem:[%s15214_s21] sm:$0xff]  ;;  %v3893_v42 = vld [vmem:[%s15214_s21 + $0xa8] sm:$0xff] }
 0x9b2   : > { %8898 = vmatprep.subr.bf16.mxu1 %v8897_v14  ;;  %v3677_v14 = vld [vmem:[%s15212_s19 + $0x3b8] sm:$0xff]  ;;  %v8915_v33 = vpack.c.bf16 %v3672_v55, %v3670_v58  ;;  %v4203_v58 = vld [vmem:[#allocation19 + $0x28] sm:$0xff]  ;;  %v3896_v61 = vld [vmem:[%s15214_s21 + $0xc0] sm:$0xff] }
 0x9b3   : > { %v4217_v5 = vld [vmem:[#allocation19 + $0x98] sm:$0xff]  ;;  %v4216_v19 = vld [vmem:[#allocation19 + $0x90] sm:$0xff]  ;;  %v3897_v57 = vld [vmem:[%s15214_s21 + $0xc8] sm:$0xff] }
 0x9b4   : > { %8772 = vmatpush1.bf16.msra.mxu0 %v8771_v9  ;;  %v3674_v9 = vld [vmem:[%s15212_s19 + $0x3a0] sm:$0xff]  ;;  %v4220_v7 = vld [vmem:[#allocation19 + $0xb0] sm:$0xff] }
 0x9b5   : > { %8900 = vmatpush1.bf16.msra.mxu1 %v8899_v4  ;;  %8774 = vmatprep.subr.bf16.mxu0 %v8773_v26  ;;  %v8917_v4 = vpack.c.bf16 %v3677_v14, %v3675_v12  ;;  %v3676_v26 = vld [vmem:[%s15212_s19 + $0x3b0] sm:$0xff]  ;;  %v3876_v12 = vld [vmem:[%s15214_s21 + $0x20] sm:$0xff] }
 0x9b6   : > { %8902 = vmatprep.subr.bf16.mxu1 %v8901_v46  ;;  %v3681_v46 = vld [vmem:[%s15212_s19 + $0x3d8] sm:$0xff]  ;;  %v8919_v35 = vpack.c.bf16 %v3676_v26, %v3674_v9  ;;  %v3878_v14 = vld [vmem:[%s15214_s21 + $0x30] sm:$0xff] }
 0x9b7   : > { %v4207_v9 = vld [vmem:[#allocation19 + $0x48] sm:$0xff]  ;;  %v12943_v26 = vpack.c.bf16 %v3878_v14, %v3876_v12  ;;  %v4225_v12 = vld [vmem:[#allocation19 + $0xd8] sm:$0xff] }
 0x9b8   : > { %8776 = vmatpush1.bf16.msra.mxu0 %v8775_v29  ;;  %v3678_v29 = vld [vmem:[%s15212_s19 + $0x3c0] sm:$0xff]  ;;  %v3898_v28 = vld [vmem:[%s15214_s21 + $0xd0] sm:$0xff] }
 0x9b9   : > { %8904 = vmatpush1.bf16.msra.mxu1 %v8903_v49  ;;  %8778 = vmatprep.subr.bf16.mxu0 %v8777_v38  ;;  %v8921_v49 = vpack.c.bf16 %v3681_v46, %v3679_v36  ;;  %v3680_v38 = vld [vmem:[%s15212_s19 + $0x3d0] sm:$0xff]  ;;  %v4206_v46 = vld [vmem:[#allocation19 + $0x40] sm:$0xff] }
 0x9ba   : > { %8906 = vmatprep.subr.bf16.mxu1 %v8905_v3  ;;  %v3685_v3 = vld [vmem:[%s15212_s19 + $0x3f8] sm:$0xff]  ;;  %v8923_v21 = vpack.c.bf16 %v3680_v38, %v3678_v29  ;;  %v3882_v36 = vld [vmem:[%s15214_s21 + $0x50] sm:$0xff] }
 0x9bb   : > { %v4213_v29 = vld [vmem:[#allocation19 + $0x78] sm:$0xff] }
 0x9bc   : > { %8780 = vmatpush1.bf16.msra.mxu0 %v8779_v0  ;;  %v3682_v0 = vld [vmem:[%s15212_s19 + $0x3e0] sm:$0xff] }
 0x9bd   : > { %8908 = vmatpush1.bf16.msra.mxu1 %v8907_v10  ;;  %8782 = vmatprep.subr.bf16.mxu0 %v8781_v6  ;;  %v8925_v10 = vpack.c.bf16 %v3685_v3, %v3683_v59  ;;  %v3684_v6 = vld [vmem:[%s15212_s19 + $0x3f0] sm:$0xff]  ;;  %v12987_v59 = vpack.c.bf16 %v4213_v29, %v4211_v54 }
 0x9be   : > { %8910 = vmatprep.subr.bf16.mxu1 %v8909_v17  ;;  %v4201_v17 = vld [vmem:[#allocation19 + $0x18] sm:$0xff]  ;;  %v8927_v45 = vpack.c.bf16 %v3684_v6, %v3682_v0  ;;  %v4212_v3 = vld [vmem:[#allocation19 + $0x70] sm:$0xff] }
 0x9bf   : > { %v12902_v47 = vpack.c.bf16 %v4201_v17, %v4199_v11  ;;  %v13003_v32 = vpack.c.bf16 %v4212_v3, %v4210_v62  ;;  %v3895_v11 = vld [vmem:[%s15214_s21 + $0xb8] sm:$0xff]  ;;  %v4219_v17 = vld [vmem:[#allocation19 + $0xa8] sm:$0xff]  ;;  %v4226_v62 = vld [vmem:[#allocation19 + $0xe0] sm:$0xff] }
 0x9c0   : > { %8784 = vmatpush1.bf16.msra.mxu0 %v8783_v50  ;;  %v3874_v50 = vld [vmem:[%s15214_s21 + $0x10] sm:$0xff] }
 0x9c1   : > { %8912 = vmatpush1.bf16.msra.mxu1 %v8911_v52  ;;  %8786 = vmatprep.subr.bf16.mxu0 %v8785_v56  ;;  %v4198_v52 = vld [vmem:[#allocation19] sm:$0xff]  ;;  %v4200_v56 = vld [vmem:[#allocation19 + $0x10] sm:$0xff]  ;;  %v12917_v55 = vpack.c.bf16 %v3874_v50, %v3872_v48  ;;  %v13031_v48 = vpack.c.bf16 %v3895_v11, %v3893_v42 }
 0x9c2   : > { %8914 = vmatprep.subr.bf16.mxu1 %v8913_v43  ;;  %v4205_v43 = vld [vmem:[#allocation19 + $0x38] sm:$0xff]  ;;  %v12920_v2 = vpack.c.bf16 %v4200_v56, %v4198_v52  ;;  %v4218_v52 = vld [vmem:[#allocation19 + $0xa0] sm:$0xff]  ;;  %v3906_v11 = vld [vmem:[%s15214_s21 + $0x110] sm:$0xff] }
 0x9c3   : > { %v3892_v50 = vld [vmem:[%s15214_s21 + $0xa0] sm:$0xff] }
 0x9c4   : > { %8788 = vmatpush1.bf16.msra.mxu0 %v8787_v39  ;;  %v4202_v39 = vld [vmem:[#allocation19 + $0x20] sm:$0xff] }
 0x9c5   : > { %8916 = vmatpush1.bf16.msra.mxu1 %v8915_v33  ;;  %8790 = vmatprep.subr.bf16.mxu0 %v8789_v20  ;;  %v12931_v33 = vpack.c.bf16 %v4205_v43, %v4203_v58  ;;  %v4204_v20 = vld [vmem:[#allocation19 + $0x30] sm:$0xff]  ;;  %v4223_v43 = vld [vmem:[#allocation19 + $0xc8] sm:$0xff]  ;;  %v3904_v42 = vld [vmem:[%s15214_s21 + $0x100] sm:$0xff] }
 0x9c6   : > { %8918 = vmatprep.subr.bf16.mxu1 %v8917_v4  ;;  %v4209_v4 = vld [vmem:[#allocation19 + $0x58] sm:$0xff]  ;;  %v12947_v30 = vpack.c.bf16 %v4204_v20, %v4202_v39  ;;  %v13053_v39 = vpack.c.bf16 %v4220_v7, %v4218_v52  ;;  %v4235_v7 = vld [vmem:[#allocation19 + $0x128] sm:$0xff] }
 0x9c7   : > { %v3899_v58 = vld [vmem:[%s15214_s21 + $0xd8] sm:$0xff] }
 0x9c8   : > { %8792 = vmatpush1.bf16.msra.mxu0 %v8791_v24  ;;  %v12959_v24 = vpack.c.bf16 %v4209_v4, %v4207_v9  ;;  %v13055_v20 = vpack.c.bf16 %v3899_v58, %v3897_v57  ;;  %v4222_v9 = vld [vmem:[#allocation19 + $0xc0] sm:$0xff]  ;;  %v13064_v4 = vpack.c.bf16 %v4225_v12, %v4223_v43  ;;  %v3911_v52 = vld [vmem:[%s15214_s21 + $0x138] sm:$0xff]  ;;  %v13121_v58 = vpack.c.bf16 %v3906_v11, %v3904_v42 }
 0x9c9   : > { %8920 = vmatpush1.bf16.msra.mxu1 %v8919_v35  ;;  %8794 = vmatprep.subr.bf16.mxu0 %v8793_v60  ;;  %v4208_v35 = vld [vmem:[#allocation19 + $0x50] sm:$0xff]  ;;  %v3885_v60 = vld [vmem:[%s15214_s21 + $0x68] sm:$0xff]  ;;  %v4237_v57 = vld [vmem:[#allocation19 + $0x138] sm:$0xff] }
 0x9ca   : > { %8922 = vmatprep.subr.bf16.mxu1 %v8921_v49  ;;  %v12975_v49 = vpack.c.bf16 %v4208_v35, %v4206_v46  ;;  %v12977_v38 = vpack.c.bf16 %v3887_v15, %v3885_v60  ;;  %v3903_v46 = vld [vmem:[%s15214_s21 + $0xf8] sm:$0xff]  ;;  %v4227_v35 = vld [vmem:[#allocation19 + $0xe8] sm:$0xff]  ;;  %v13073_v15 = vpack.c.bf16 %v3898_v28, %v3896_v61  ;;  %15508 = vst [vmem:[#allocation35_spill] sm:$0xff] %v13121_v58  ;;  %v3908_v61 = vld [vmem:[%s15214_s21 + $0x120] sm:$0xff] }
 0x9cb   : > { %v4229_v60 = vld [vmem:[#allocation19 + $0xf8] sm:$0xff]  ;;  %v3910_v28 = vld [vmem:[%s15214_s21 + $0x130] sm:$0xff]  ;;  %v3917_v11 = vld [vmem:[%s15214_s21 + $0x168] sm:$0xff] }
 0x9cc   : > { %8796 = vmatpush1.bf16.msra.mxu0 %v8795_v27  ;;  %v3889_v27 = vld [vmem:[%s15214_s21 + $0x88] sm:$0xff]  ;;  %v13088_v3 = vpack.c.bf16 %v4229_v60, %v4227_v35  ;;  %v3915_v35 = vld [vmem:[%s15214_s21 + $0x158] sm:$0xff] }
 0x9cd   : > { %8924 = vmatpush1.bf16.msra.mxu1 %v8923_v21  ;;  %8798 = vmatprep.subr.bf16.mxu0 %v8797_v51  ;;  %v3891_v21 = vld [vmem:[%s15214_s21 + $0x98] sm:$0xff]  ;;  %v4215_v51 = vld [vmem:[#allocation19 + $0x88] sm:$0xff] }
 0x9ce   : > { %8926 = vmatprep.subr.bf16.mxu1 %v8925_v10  ;;  %v13005_v0 = vpack.c.bf16 %v3891_v21, %v3889_v27  ;;  %v4214_v10 = vld [vmem:[#allocation19 + $0x80] sm:$0xff]  ;;  %v13015_v6 = vpack.c.bf16 %v4217_v5, %v4215_v51  ;;  %v4228_v27 = vld [vmem:[#allocation19 + $0xf0] sm:$0xff]  ;;  %v4231_v5 = vld [vmem:[#allocation19 + $0x108] sm:$0xff] }
 0x9cf   : > { %v3905_v21 = vld [vmem:[%s15214_s21 + $0x108] sm:$0xff]  ;;  %v3907_v51 = vld [vmem:[%s15214_s21 + $0x118] sm:$0xff] }
 0x9d0   : > { %8800 = vmatpush1.bf16.msra.mxu0 %v8799_v18  ;;  %v4221_v18 = vld [vmem:[#allocation19 + $0xb8] sm:$0xff]  ;;  %v4239_v60 = vld [vmem:[#allocation19 + $0x148] sm:$0xff]  ;;  %v4240_v42 = vld [vmem:[#allocation19 + $0x150] sm:$0xff] }
 0x9d1   : > { %8928 = vmatpush1.bf16.msra.mxu1 %v8927_v45  ;;  %8930 = vmatprep.subr.bf16.mxu0 %v12900_v22  ;;  %v13029_v45 = vpack.c.bf16 %v4216_v19, %v4214_v10  ;;  %v13040_v56 = vpack.c.bf16 %v4221_v18, %v4219_v17  ;;  %v13101_v10 = vpack.c.bf16 %v4228_v27, %v4226_v62  ;;  %v4230_v17 = vld [vmem:[#allocation19 + $0x100] sm:$0xff] }
 0x9d2   : > { %9058 = vmatprep.subr.bf16.mxu1 %v12902_v47  ;;  %v13103_v19 = vpack.c.bf16 %v3907_v51, %v3905_v21  ;;  %v3912_v21 = vld [vmem:[%s15214_s21 + $0x140] sm:$0xff]  ;;  %v3914_v51 = vld [vmem:[%s15214_s21 + $0x150] sm:$0xff] }
 0x9d3   : > { %3526 = vmatmul.mubr.f32.vlgmr.msra.gmra.mrb[42].mxu0 %v15248_v13  ;;  %15505 = vst [vmem:[#allocation32_spill] sm:$0xff] %v13101_v10  ;;  %v3924_v13 = vld [vmem:[%s15214_s21 + $0x1a0] sm:$0xff] }
 0x9d4   : > { %3840 = vmatmul.mubr.f32.vlgmr.msra.gmra.mrb[40].mxu1 %v12514_v40  ;;  %3531 = vmatprep.mubr.f32.mxu0 %v12504_v31  ;;  %v3880_v31 = vld [vmem:[%s15214_s21 + $0x40] sm:$0xff]  ;;  %15506 = vst [vmem:[#allocation33_spill] sm:$0xff] %v13103_v19 }
 0x9d5   : > { %3845 = vmatprep.mubr.f32.mxu1 %v12506_v23  ;;  %8932 = vmatpush1.bf16.msra.mxu0 %v12917_v55 }
 0x9d6   : > { %9060 = vmatpush1.bf16.msra.mxu1 %v12920_v2  ;;  %8934 = vmatprep.subr.bf16.mxu0 %v12922_v25 }
 0x9d7   : > { %3532 = vmatmul.mubr.f32.gmra.mrb[44].mxu0 %v12514_v40  ;;  %9062 = vmatprep.subr.bf16.mxu1 %v12931_v33  ;;  %v12971_v40 = vpack.c.bf16 %v3882_v36, %v3880_v31  ;;  %v4224_v31 = vld [vmem:[#allocation19 + $0xd0] sm:$0xff]  ;;  %v3901_v36 = vld [vmem:[%s15214_s21 + $0xe8] sm:$0xff] }
 0x9d8   : > { %3846 = vmatmul.mubr.f32.gmra.mrb[42].mxu1 %v12516_v16  ;;  %3537 = vmatprep.mubr.f32.mxu0 %v12506_v23  ;;  %v3884_v23 = vld [vmem:[%s15214_s21 + $0x60] sm:$0xff]  ;;  %v13077_v54 = vpack.c.bf16 %v4224_v31, %v4222_v9  ;;  %v13079_v29 = vpack.c.bf16 %v3903_v46, %v3901_v36  ;;  %v13136_v31 = vpack.c.bf16 %v4237_v57, %v4235_v7  ;;  %v4236_v36 = vld [vmem:[#allocation19 + $0x130] sm:$0xff]  ;;  %v3913_v46 = vld [vmem:[%s15214_s21 + $0x148] sm:$0xff] }
 0x9d9   : > { %3851 = vmatprep.mubr.f32.mxu1 %v12622_v44  ;;  %8936 = vmatpush1.bf16.msra.mxu0 %v12943_v26  ;;  %v4234_v9 = vld [vmem:[#allocation19 + $0x120] sm:$0xff]  ;;  %v13151_v27 = vpack.c.bf16 %v3915_v35, %v3913_v46  ;;  %v4244_v46 = vld [vmem:[#allocation19 + $0x170] sm:$0xff] }
 0x9da   : > { %9064 = vmatpush1.bf16.msra.mxu1 %v12947_v30  ;;  %8938 = vmatprep.subr.bf16.mxu0 %v12949_v41  ;;  %15511 = vst [vmem:[#allocation38_spill] sm:$0xff] %v13136_v31  ;;  %v13149_v62 = vpack.c.bf16 %v4236_v36, %v4234_v9  ;;  %v4242_v9 = vld [vmem:[#allocation19 + $0x160] sm:$0xff] }
 0x9db   : > { %3538 = vmatmul.mubr.f32.gmra.mrb[46].mxu0 %v12516_v16  ;;  %9066 = vmatprep.subr.bf16.mxu1 %v12959_v24  ;;  %v12999_v16 = vpack.c.bf16 %v3886_v53, %v3884_v23  ;;  %v3900_v23 = vld [vmem:[%s15214_s21 + $0xe0] sm:$0xff]  ;;  %v3902_v53 = vld [vmem:[%s15214_s21 + $0xf0] sm:$0xff]  ;;  %15514 = vst [vmem:[#allocation41_spill] sm:$0xff] %v13151_v27  ;;  %v3921_v35 = vld [vmem:[%s15214_s21 + $0x188] sm:$0xff] }
 0x9dc   : > { %3852 = vmatmul.mubr.f32.gmra.mrb[44].mxu1 %v12624_v34  ;;  %3543 = vmatprep.mubr.f32.mxu0 %v12622_v44  ;;  %v3888_v44 = vld [vmem:[%s15214_s21 + $0x80] sm:$0xff]  ;;  %15513 = vst [vmem:[#allocation40_spill] sm:$0xff] %v13149_v62 }
 0x9dd   : > { %3857 = vmatprep.mubr.f32.mxu1 %v12635_v63  ;;  %8940 = vmatpush1.bf16.msra.mxu0 %v12971_v40  ;;  %v3890_v63 = vld [vmem:[%s15214_s21 + $0x90] sm:$0xff] }
 0x9de   : > { %9068 = vmatpush1.bf16.msra.mxu1 %v12975_v49  ;;  %8942 = vmatprep.subr.bf16.mxu0 %v12977_v38 }
 0x9df   : > { %3544 = vmatmul.mubr.f32.gmra.mrb[48].mxu0 %v12624_v34  ;;  %9070 = vmatprep.subr.bf16.mxu1 %v12987_v59  ;;  %v13025_v34 = vpack.c.bf16 %v3890_v63, %v3888_v44  ;;  %v4233_v44 = vld [vmem:[#allocation19 + $0x118] sm:$0xff]  ;;  %v13097_v63 = vpack.c.bf16 %v3902_v53, %v3900_v23  ;;  %v13145_v53 = vpack.c.bf16 %v3910_v28, %v3908_v61  ;;  %v3918_v28 = vld [vmem:[%s15214_s21 + $0x170] sm:$0xff] }
 0x9e0   : > { %3858 = vmatmul.mubr.f32.gmra.mrb[46].mxu1 %v12657_v1  ;;  %v3894_v1 = vld [vmem:[%s15214_s21 + $0xb0] sm:$0xff]  ;;  %v13112_v18 = vpack.c.bf16 %v4233_v44, %v4231_v5  ;;  %v4241_v23 = vld [vmem:[#allocation19 + $0x158] sm:$0xff]  ;;  %v4238_v5 = vld [vmem:[#allocation19 + $0x140] sm:$0xff] }
 0x9e1   : > { %8944 = vmatpush1.bf16.msra.mxu0 %v12999_v16  ;;  %v13049_v14 = vpack.c.bf16 %v3894_v1, %v3892_v50  ;;  %15504 = vst [vmem:[#allocation31_spill] sm:$0xff] %v13097_v63  ;;  %v4232_v50 = vld [vmem:[#allocation19 + $0x110] sm:$0xff]  ;;  %v3909_v1 = vld [vmem:[%s15214_s21 + $0x128] sm:$0xff]  ;;  %15512 = vst [vmem:[#allocation39_spill] sm:$0xff] %v13145_v53  ;;  %v13160_v44 = vpack.c.bf16 %v4241_v23, %v4239_v60  ;;  %v13173_v7 = vpack.c.bf16 %v4240_v42, %v4238_v5 }
 0x9e2   : > { %9072 = vmatpush1.bf16.msra.mxu1 %v13003_v32  ;;  %8946 = vmatprep.subr.bf16.mxu0 %v13005_v0  ;;  %15507 = vst [vmem:[#allocation34_spill] sm:$0xff] %v13112_v18  ;;  %v13125_v43 = vpack.c.bf16 %v4232_v50, %v4230_v17  ;;  %v13127_v12 = vpack.c.bf16 %v3911_v52, %v3909_v1  ;;  %v3919_v17 = vld [vmem:[%s15214_s21 + $0x178] sm:$0xff]  ;;  %v4243_v50 = vld [vmem:[#allocation19 + $0x168] sm:$0xff]  ;;  %v3916_v61 = vld [vmem:[%s15214_s21 + $0x160] sm:$0xff] }
 0x9e3   : > { %9074 = vmatprep.subr.bf16.mxu1 %v13015_v6  ;;  %15515 = vst [vmem:[#allocation42_spill] sm:$0xff] %v13160_v44  ;;  %v4245_v1 = vld [vmem:[#allocation19 + $0x178] sm:$0xff]  ;;  %v13169_v52 = vpack.c.bf16 %v3914_v51, %v3912_v21  ;;  %15517 = vst [vmem:[#allocation44_spill] sm:$0xff] %v13173_v7  ;;  %v13175_v57 = vpack.c.bf16 %v3919_v17, %v3917_v11  ;;  %v4247_v23 = vld [vmem:[#allocation19 + $0x188] sm:$0xff]  ;;  %v13193_v51 = vpack.c.bf16 %v3918_v28, %v3916_v61 }
 0x9e4   : > { %15509 = vst [vmem:[#allocation36_spill] sm:$0xff] %v13125_v43  ;;  %15510 = vst [vmem:[#allocation37_spill] sm:$0xff] %v13127_v12  ;;  %v13184_v36 = vpack.c.bf16 %v4245_v1, %v4243_v50  ;;  %v3923_v60 = vld [vmem:[%s15214_s21 + $0x198] sm:$0xff]  ;;  %v13197_v5 = vpack.c.bf16 %v4244_v46, %v4242_v9  ;;  %v3920_v11 = vld [vmem:[%s15214_s21 + $0x180] sm:$0xff] }
 0x9e5   : > { %8948 = vmatpush1.bf16.msra.mxu0 %v13025_v34  ;;  %15516 = vst [vmem:[#allocation43_spill] sm:$0xff] %v13169_v52  ;;  %15518 = vst [vmem:[#allocation45_spill] sm:$0xff] %v13175_v57  ;;  %v4249_v21 = vld [vmem:[#allocation19 + $0x198] sm:$0xff]  ;;  %v13199_v42 = vpack.c.bf16 %v3923_v60, %v3921_v35  ;;  %v3922_v17 = vld [vmem:[%s15214_s21 + $0x190] sm:$0xff] }
 0x9e6   : > { %9076 = vmatpush1.bf16.msra.mxu1 %v13029_v45  ;;  %8950 = vmatprep.subr.bf16.mxu0 %v13031_v48  ;;  %15519 = vst [vmem:[#allocation46_spill] sm:$0xff] %v13184_v36  ;;  %15520 = vst [vmem:[#allocation47_spill] sm:$0xff] %v13193_v51  ;;  %v4246_v50 = vld [vmem:[#allocation19 + $0x180] sm:$0xff]  ;;  %v13208_v1 = vpack.c.bf16 %v4249_v21, %v4247_v23  ;;  %v4248_v61 = vld [vmem:[#allocation19 + $0x190] sm:$0xff]  ;;  %v13217_v60 = vpack.c.bf16 %v3922_v17, %v3920_v11 }
 0x9e7   : > { %9078 = vmatprep.subr.bf16.mxu1 %v13040_v56  ;;  %15521 = vst [vmem:[#allocation48_spill] sm:$0xff] %v13197_v5  ;;  %15522 = vst [vmem:[#allocation49_spill] sm:$0xff] %v13199_v42  ;;  %v3925_v28 = vld [vmem:[%s15214_s21 + $0x1a8] sm:$0xff]  ;;  %v3927_v9 = vld [vmem:[%s15214_s21 + $0x1b8] sm:$0xff]  ;;  %v13221_v23 = vpack.c.bf16 %v4248_v61, %v4246_v50 }
 0x9e8   : > { %15523 = vst [vmem:[#allocation50_spill] sm:$0xff] %v13208_v1  ;;  %v4251_v46 = vld [vmem:[#allocation19 + $0x1a8] sm:$0xff]  ;;  %v4253_v35 = vld [vmem:[#allocation19 + $0x1b8] sm:$0xff]  ;;  %15524 = vst [vmem:[#allocation51_spill] sm:$0xff] %v13217_v60  ;;  %v13223_v21 = vpack.c.bf16 %v3927_v9, %v3925_v28 }
 0x9e9   : > { %8952 = vmatpush1.bf16.msra.mxu0 %v13049_v14  ;;  %15525 = vst [vmem:[#allocation52_spill] sm:$0xff] %v13221_v23  ;;  %v13232_v11 = vpack.c.bf16 %v4253_v35, %v4251_v46  ;;  %v4252_v17 = vld [vmem:[#allocation19 + $0x1b0] sm:$0xff]  ;;  %v3929_v50 = vld [vmem:[%s15214_s21 + $0x1c8] sm:$0xff]  ;;  %v4257_v9 = vld [vmem:[#allocation19 + $0x1d8] sm:$0xff] }
 0x9ea   : > { %9080 = vmatpush1.bf16.msra.mxu1 %v13053_v39  ;;  %8954 = vmatprep.subr.bf16.mxu0 %v13055_v20  ;;  %15526 = vst [vmem:[#allocation53_spill] sm:$0xff] %v13223_v21  ;;  %v3931_v61 = vld [vmem:[%s15214_s21 + $0x1d8] sm:$0xff]  ;;  %v4255_v28 = vld [vmem:[#allocation19 + $0x1c8] sm:$0xff] }
 0x9eb   : > { %9082 = vmatprep.subr.bf16.mxu1 %v13064_v4  ;;  %15527 = vst [vmem:[#allocation54_spill] sm:$0xff] %v13232_v11  ;;  %v13247_v35 = vpack.c.bf16 %v3931_v61, %v3929_v50  ;;  %v3933_v50 = vld [vmem:[%s15214_s21 + $0x1e8] sm:$0xff] }
 0x9ed   : > { %8956 = vmatpush1.bf16.msra.mxu0 %v13073_v15  ;;  %15530 = vst [vmem:[#allocation57_spill] sm:$0xff] %v13247_v35 }
 0x9ee   : > { %9084 = vmatpush1.bf16.msra.mxu1 %v13077_v54  ;;  %8958 = vmatprep.subr.bf16.mxu0 %v13079_v29 }
 0x9ef   : > { %9086 = vmatprep.subr.bf16.mxu1 %v13088_v3 }
 0x9f1   : > { %8960 = vmatpush1.bf16.msra.mxu0 %v13097_v63 }
 0x9f2   : > { %9088 = vmatpush1.bf16.msra.mxu1 %v13101_v10  ;;  %8962 = vmatprep.subr.bf16.mxu0 %v13103_v19 }
 0x9f3   : > { %9090 = vmatprep.subr.bf16.mxu1 %v13112_v18 }
 0x9f5   : > { %8964 = vmatpush1.bf16.msra.mxu0 %v13121_v58  ;;  %v4272_v58 = vld [vmem:[#allocation19 + $0x250] sm:$0xff] }
 0x9f6   : > { %9092 = vmatpush1.bf16.msra.mxu1 %v13125_v43  ;;  %8966 = vmatprep.subr.bf16.mxu0 %v13127_v12  ;;  %v3946_v12 = vld [vmem:[%s15214_s21 + $0x250] sm:$0xff] }
 0x9f7   : > { %9094 = vmatprep.subr.bf16.mxu1 %v13136_v31 }
 0x9f9   : > { %8968 = vmatpush1.bf16.msra.mxu0 %v13145_v53 }
 0x9fa   : > { %9096 = vmatpush1.bf16.msra.mxu1 %v13149_v62  ;;  %8970 = vmatprep.subr.bf16.mxu0 %v13151_v27 }
 0x9fb   : > { %9098 = vmatprep.subr.bf16.mxu1 %v13160_v44 }
 0x9fd   : > { %8972 = vmatpush1.bf16.msra.mxu0 %v13169_v52 }
 0x9fe   : > { %9100 = vmatpush1.bf16.msra.mxu1 %v13173_v7  ;;  %8974 = vmatprep.subr.bf16.mxu0 %v13175_v57  ;;  %v4250_v57 = vld [vmem:[#allocation19 + $0x1a0] sm:$0xff]  ;;  %v3942_v7 = vld [vmem:[%s15214_s21 + $0x230] sm:$0xff] }
 0x9ff   : > { %9102 = vmatprep.subr.bf16.mxu1 %v13184_v36  ;;  %v3926_v36 = vld [vmem:[%s15214_s21 + $0x1b0] sm:$0xff]  ;;  %v13245_v46 = vpack.c.bf16 %v4252_v17, %v4250_v57 }
 0xa01   : > { %8976 = vmatpush1.bf16.msra.mxu0 %v13193_v51  ;;  %15529 = vst [vmem:[#allocation56_spill] sm:$0xff] %v13245_v46 }
 0xa02   : > { %9104 = vmatpush1.bf16.msra.mxu1 %v13197_v5  ;;  %8978 = vmatprep.subr.bf16.mxu0 %v13199_v42  ;;  %v13241_v42 = vpack.c.bf16 %v3926_v36, %v3924_v13  ;;  %v3930_v5 = vld [vmem:[%s15214_s21 + $0x1d0] sm:$0xff]  ;;  %v13256_v13 = vpack.c.bf16 %v4257_v9, %v4255_v28  ;;  %v4254_v36 = vld [vmem:[#allocation19 + $0x1c0] sm:$0xff]  ;;  %v4261_v28 = vld [vmem:[#allocation19 + $0x1f8] sm:$0xff] }
 0xa03   : > { %9106 = vmatprep.subr.bf16.mxu1 %v13208_v1  ;;  %v3928_v1 = vld [vmem:[%s15214_s21 + $0x1c0] sm:$0xff]  ;;  %v3934_v9 = vld [vmem:[%s15214_s21 + $0x1f0] sm:$0xff] }
 0xa04   : > { %15528 = vst [vmem:[#allocation55_spill] sm:$0xff] %v13241_v42  ;;  %15531 = vst [vmem:[#allocation58_spill] sm:$0xff] %v13256_v13  ;;  %v13259_v57 = vpack.c.bf16 %v3930_v5, %v3928_v1  ;;  %v3935_v5 = vld [vmem:[%s15214_s21 + $0x1f8] sm:$0xff]  ;;  %v4259_v1 = vld [vmem:[#allocation19 + $0x1e8] sm:$0xff] }
 0xa05   : > { %8980 = vmatpush1.bf16.msra.mxu0 %v13217_v60  ;;  %v13274_v61 = vpack.c.bf16 %v3935_v5, %v3933_v50  ;;  %v3937_v50 = vld [vmem:[%s15214_s21 + $0x208] sm:$0xff]  ;;  %v3939_v5 = vld [vmem:[%s15214_s21 + $0x218] sm:$0xff] }
 0xa06   : > { %9108 = vmatpush1.bf16.msra.mxu1 %v13221_v23  ;;  %8982 = vmatprep.subr.bf16.mxu0 %v13223_v21  ;;  %v4256_v23 = vld [vmem:[#allocation19 + $0x1d0] sm:$0xff]  ;;  %15532 = vst [vmem:[#allocation59_spill] sm:$0xff] %v13259_v57 }
 0xa07   : > { %9110 = vmatprep.subr.bf16.mxu1 %v13232_v11  ;;  %v13263_v17 = vpack.c.bf16 %v4256_v23, %v4254_v36  ;;  %15534 = vst [vmem:[#allocation61_spill] sm:$0xff] %v13274_v61  ;;  %v3932_v23 = vld [vmem:[%s15214_s21 + $0x1e0] sm:$0xff]  ;;  %v13282_v36 = vpack.c.bf16 %v4261_v28, %v4259_v1  ;;  %v4263_v1 = vld [vmem:[#allocation19 + $0x208] sm:$0xff]  ;;  %v13298_v28 = vpack.c.bf16 %v3939_v5, %v3937_v50 }
 0xa08   : > { %v3936_v50 = vld [vmem:[%s15214_s21 + $0x200] sm:$0xff] }
 0xa09   : > { %8984 = vmatpush1.bf16.msra.mxu0 %v13241_v42  ;;  %15533 = vst [vmem:[#allocation60_spill] sm:$0xff] %v13263_v17  ;;  %15535 = vst [vmem:[#allocation62_spill] sm:$0xff] %v13282_v36  ;;  %v4267_v42 = vld [vmem:[#allocation19 + $0x228] sm:$0xff]  ;;  %v4269_v11 = vld [vmem:[#allocation19 + $0x238] sm:$0xff] }
 0xa0a   : > { %9112 = vmatpush1.bf16.msra.mxu1 %v13245_v46  ;;  %8986 = vmatprep.subr.bf16.mxu0 %v13247_v35  ;;  %15538 = vst [vmem:[#allocation65_spill] sm:$0xff] %v13298_v28 }
 0xa0b   : > { %9114 = vmatprep.subr.bf16.mxu1 %v13256_v13  ;;  %v4260_v13 = vld [vmem:[#allocation19 + $0x1f0] sm:$0xff] }
 0xa0d   : > { %8988 = vmatpush1.bf16.msra.mxu0 %v13259_v57  ;;  %v4258_v57 = vld [vmem:[#allocation19 + $0x1e0] sm:$0xff] }
 0xa0e   : > { %9116 = vmatpush1.bf16.msra.mxu1 %v13263_v17  ;;  %v13284_v17 = vpack.c.bf16 %v3934_v9, %v3932_v23  ;;  %8990 = vmatprep.subr.bf16.mxu0 %v13274_v61  ;;  %v13287_v35 = vpack.c.bf16 %v4260_v13, %v4258_v57  ;;  %v4265_v23 = vld [vmem:[#allocation19 + $0x218] sm:$0xff]  ;;  %v3941_v61 = vld [vmem:[%s15214_s21 + $0x228] sm:$0xff] }
 0xa0f   : > { %9118 = vmatprep.subr.bf16.mxu1 %v13282_v36  ;;  %v13300_v13 = vpack.c.bf16 %v4265_v23, %v4263_v1  ;;  %v3360_v57 = vld [vmem:[%s15213_s20] sm:$0x3]  ;;  %v4264_v36 = vld [vmem:[#allocation19 + $0x210] sm:$0xff] }
 0xa10   : > { %15536 = vst [vmem:[#allocation63_spill] sm:$0xff] %v13284_v17  ;;  %15537 = vst [vmem:[#allocation64_spill] sm:$0xff] %v13287_v35  ;;  %v13308_v9 = vrot.slane %v3360_v57, %v12465_v37 }
 0xa11   : > { %8992 = vmatpush1.bf16.msra.mxu0 %v13284_v17  ;;  %15539 = vst [vmem:[#allocation66_spill] sm:$0xff] %v13300_v13  ;;  %v13311_v17 = vrot.slane %v3360_v57, %v12471_v8 }
 0xa12   : > { %9120 = vmatpush1.bf16.msra.mxu1 %v13287_v35  ;;  %8994 = vmatprep.subr.bf16.mxu0 %v13298_v28  ;;  %v4262_v28 = vld [vmem:[#allocation19 + $0x200] sm:$0xff] }
 0xa13   : > { %9122 = vmatprep.subr.bf16.mxu1 %v13300_v13  ;;  %v3938_v13 = vld [vmem:[%s15214_s21 + $0x210] sm:$0xff] }
 0xa14   : > { %v13331_v51 = vpack.c.bf16 %v3938_v13, %v3936_v50 }
 0xa16   : > { %15541 = vst [vmem:[#allocation68_spill] sm:$0xff] %v13331_v51 }
 0xaa6   : > { %v3527_v35 = vpop.f32.mrb[42].mxu0 }
 0xaa7   : > { %v9953_v5 = vadd.f32 %v3527_v35, %v13308_v9  ;;  %v3841_v1 = vpop.f32.mrb[40].mxu1  ;;  %v3529_v23 = vpop.f32.mrb[43].mxu0  ;;  %v3943_v35 = vld [vmem:[%s15214_s21 + $0x238] sm:$0xff] }
 0xaa8   : > { %v9961_v37 = vadd.f32 %v3841_v1, %v13308_v9  ;;  %v9954_v57 = vadd.f32 %v3529_v23, %v13311_v17  ;;  %v3843_v8 = vpop.f32.mrb[41].mxu1  ;;  %v13333_v1 = vpack.c.bf16 %v4264_v36, %v4262_v28  ;;  %v3940_v23 = vld [vmem:[%s15214_s21 + $0x220] sm:$0xff]  ;;  %v13346_v13 = vpack.c.bf16 %v3943_v35, %v3941_v61  ;;  %v4268_v28 = vld [vmem:[#allocation19 + $0x230] sm:$0xff] }
 0xaa9   : > { %v9962_v46 = vadd.f32 %v3843_v8, %v13311_v17  ;;  %v13341_v52 = vmax.f32 %v9953_v5, 0.0  ;;  %v4266_v36 = vld [vmem:[#allocation19 + $0x220] sm:$0xff]  ;;  %v13353_v5 = vpack.c.bf16 %v4269_v11, %v4267_v42  ;;  %v13368_v11 = vpack.c.bf16 %v3942_v7, %v3940_v23 }
 0xaaa   : > { %v13329_v21 = vmax.f32 %v9954_v57, 0.0  ;;  %v3533_v60 = vpop.f32.mrb[44].mxu0  ;;  %15542 = vst [vmem:[#allocation69_spill] sm:$0xff] %v13333_v1  ;;  %15543 = vst [vmem:[#allocation70_spill] sm:$0xff] %v13346_v13  ;;  %v13348_v50 = vmax.f32 %v9961_v37, 0.0  ;;  %v13370_v35 = vpack.c.bf16 %v4268_v28, %v4266_v36  ;;  %v4270_v28 = vld [vmem:[#allocation19 + $0x240] sm:$0xff] }
 0xaab   : > { %v13343_v8 = vmax.f32 %v9962_v46, 0.0  ;;  %v9955_v57 = vadd.f32 %v3533_v60, %v13308_v9  ;;  %v3847_v44 = vpop.f32.mrb[42].mxu1  ;;  %v3535_v27 = vpop.f32.mrb[45].mxu0  ;;  %15544 = vst [vmem:[#allocation71_spill] sm:$0xff] %v13353_v5  ;;  %v3945_v60 = vld [vmem:[%s15214_s21 + $0x248] sm:$0xff]  ;;  %v3947_v46 = vld [vmem:[%s15214_s21 + $0x258] sm:$0xff] }
 0xaac   : > { %15540 = vst [vmem:[#allocation67_spill] sm:$0xff] %v13329_v21  ;;  %v9963_v62 = vadd.f32 %v3847_v44, %v13308_v9  ;;  %v9956_v53 = vadd.f32 %v3535_v27, %v13311_v17  ;;  %v3849_v31 = vpop.f32.mrb[43].mxu1  ;;  %4076 = vmatprep.mubr.f32.mxu0 %v13329_v21  ;;  %v4271_v27 = vld [vmem:[#allocation19 + $0x248] sm:$0xff]  ;;  %v4273_v44 = vld [vmem:[#allocation19 + $0x258] sm:$0xff]  ;;  %15545 = vst [vmem:[#allocation72_spill] sm:$0xff] %v13368_v11  ;;  %v13385_v36 = vpack.c.bf16 %v3947_v46, %v3945_v60 }
 0xaad   : > { %v9964_v37 = vadd.f32 %v3849_v31, %v13311_v17  ;;  %4390 = vmatprep.mubr.f32.mxu1 %v13343_v8  ;;  %4077 = vmatmul.mubr.f32.vlgmr.msra.gmra.mrb[50].mxu0 %v13341_v52  ;;  %v3944_v31 = vld [vmem:[%s15214_s21 + $0x240] sm:$0xff]  ;;  %v13378_v43 = vmax.f32 %v9955_v57, 0.0  ;;  %v3949_v60 = vld [vmem:[%s15214_s21 + $0x268] sm:$0xff] }
 0xaae   : > { %v13364_v61 = vmax.f32 %v9956_v53, 0.0  ;;  %8996 = vmatpush1.bf16.msra.mxu0 %v13331_v51  ;;  %4391 = vmatmul.mubr.f32.vlgmr.msra.gmra.mrb[48].mxu1 %v13348_v50  ;;  %v3539_v42 = vpop.f32.mrb[46].mxu0  ;;  %15546 = vst [vmem:[#allocation73_spill] sm:$0xff] %v13385_v36  ;;  %v13387_v18 = vmax.f32 %v9963_v62, 0.0  ;;  %v3951_v62 = vld [vmem:[%s15214_s21 + $0x278] sm:$0xff] }
 0xaaf   : > { %v13380_v53 = vmax.f32 %v9964_v37, 0.0  ;;  %9124 = vmatpush1.bf16.msra.mxu1 %v13333_v1  ;;  %v9957_v51 = vadd.f32 %v3539_v42, %v13308_v9  ;;  %v3853_v7 = vpop.f32.mrb[44].mxu1  ;;  %v3541_v23 = vpop.f32.mrb[47].mxu0  ;;  %8998 = vmatprep.subr.bf16.mxu0 %v13346_v13  ;;  %v13393_v42 = vpack.c.bf16 %v4273_v44, %v4271_v27  ;;  %v13408_v44 = vpack.c.bf16 %v3946_v12, %v3944_v31  ;;  %v3948_v12 = vld [vmem:[%s15214_s21 + $0x260] sm:$0xff] }
 0xab0   : > { %v9965_v19 = vadd.f32 %v3853_v7, %v13308_v9  ;;  %v9958_v57 = vadd.f32 %v3541_v23, %v13311_v17  ;;  %v3855_v37 = vpop.f32.mrb[45].mxu1  ;;  %4082 = vmatprep.mubr.f32.mxu0 %v13364_v61  ;;  %9126 = vmatprep.subr.bf16.mxu1 %v13353_v5  ;;  %v4275_v7 = vld [vmem:[#allocation19 + $0x268] sm:$0xff]  ;;  %v4277_v23 = vld [vmem:[#allocation19 + $0x278] sm:$0xff]  ;;  %v13410_v5 = vpack.c.bf16 %v4272_v58, %v4270_v28 }
 0xab1   : > { %15547 = vst [vmem:[#allocation74_spill] sm:$0xff] %v13393_v42  ;;  %v9966_v46 = vadd.f32 %v3855_v37, %v13311_v17  ;;  %4396 = vmatprep.mubr.f32.mxu1 %v13380_v53  ;;  %4083 = vmatmul.mubr.f32.gmra.mrb[52].mxu0 %v13378_v43  ;;  %15548 = vst [vmem:[#allocation75_spill] sm:$0xff] %v13408_v44  ;;  %v13412_v1 = vmax.f32 %v9957_v51, 0.0  ;;  %v3950_v58 = vld [vmem:[%s15214_s21 + $0x270] sm:$0xff] }
 0xab2   : > { %v13404_v13 = vmax.f32 %v9958_v57, 0.0  ;;  %9000 = vmatpush1.bf16.msra.mxu0 %v13368_v11  ;;  %4397 = vmatmul.mubr.f32.gmra.mrb[50].mxu1 %v13387_v18  ;;  %v3545_v27 = vpop.f32.mrb[48].mxu0  ;;  %15549 = vst [vmem:[#allocation76_spill] sm:$0xff] %v13410_v5  ;;  %v13419_v11 = vpack.c.bf16 %v3951_v62, %v3949_v60  ;;  %v13427_v51 = vmax.f32 %v9965_v19, 0.0  ;;  %v13433_v60 = vpack.c.bf16 %v4277_v23, %v4275_v7  ;;  %v4274_v62 = vld [vmem:[#allocation19 + $0x260] sm:$0xff] }
 0xab3   : > { %v13414_v37 = vmax.f32 %v9966_v46, 0.0  ;;  %9128 = vmatpush1.bf16.msra.mxu1 %v13370_v35  ;;  %v9959_v10 = vadd.f32 %v3545_v27, %v13308_v9  ;;  %v3859_v63 = vpop.f32.mrb[46].mxu1  ;;  %v3547_v57 = vpop.f32.mrb[49].mxu0  ;;  %9002 = vmatprep.subr.bf16.mxu0 %v13385_v36  ;;  %v4276_v27 = vld [vmem:[#allocation19 + $0x270] sm:$0xff]  ;;  %v3953_v36 = vld [vmem:[%s15214_s21 + $0x288] sm:$0xff]  ;;  %v13448_v23 = vpack.c.bf16 %v3950_v58, %v3948_v12 }
 0xab4   : > { %15550 = vst [vmem:[#allocation77_spill] sm:$0xff] %v13419_v11  ;;  %v9967_v31 = vadd.f32 %v3859_v63, %v13308_v9  ;;  %v9960_v28 = vadd.f32 %v3547_v57, %v13311_v17  ;;  %v3861_v46 = vpop.f32.mrb[47].mxu1  ;;  %4088 = vmatprep.mubr.f32.mxu0 %v13404_v13  ;;  %9130 = vmatprep.subr.bf16.mxu1 %v13393_v42  ;;  %15551 = vst [vmem:[#allocation78_spill] sm:$0xff] %v13433_v60  ;;  %v3955_v63 = vld [vmem:[%s15214_s21 + $0x298] sm:$0xff]  ;;  %v4279_v9 = vld [vmem:[#allocation19 + $0x288] sm:$0xff] }
 0xab5   : > { %v9968_v19 = vadd.f32 %v3861_v46, %v13311_v17  ;;  %4402 = vmatprep.mubr.f32.mxu1 %v13414_v37  ;;  %4089 = vmatmul.mubr.f32.gmra.mrb[54].mxu0 %v13412_v1  ;;  %v4281_v57 = vld [vmem:[#allocation19 + $0x298] sm:$0xff]  ;;  %15552 = vst [vmem:[#allocation79_spill] sm:$0xff] %v13448_v23  ;;  %v13450_v42 = vmax.f32 %v9959_v10, 0.0  ;;  %v13456_v46 = vpack.c.bf16 %v4276_v27, %v4274_v62  ;;  %v4278_v12 = vld [vmem:[#allocation19 + $0x280] sm:$0xff]  ;;  %v4280_v62 = vld [vmem:[#allocation19 + $0x290] sm:$0xff] }
 0xab6   : > { %v13444_v7 = vmax.f32 %v9960_v28, 0.0  ;;  %9004 = vmatpush1.bf16.msra.mxu0 %v13408_v44  ;;  %4403 = vmatmul.mubr.f32.gmra.mrb[52].mxu1 %v13427_v51  ;;  %v3952_v28 = vld [vmem:[%s15214_s21 + $0x280] sm:$0xff]  ;;  %v3954_v44 = vld [vmem:[%s15214_s21 + $0x290] sm:$0xff]  ;;  %v13464_v58 = vmax.f32 %v9967_v31, 0.0  ;;  %v13468_v10 = vpack.c.bf16 %v3955_v63, %v3953_v36  ;;  %v3957_v27 = vld [vmem:[%s15214_s21 + $0x2a8] sm:$0xff]  ;;  %v13486_v63 = vpack.c.bf16 %v4280_v62, %v4278_v12 }
 0xab7   : > { %v13452_v17 = vmax.f32 %v9968_v19, 0.0  ;;  %9132 = vmatpush1.bf16.msra.mxu1 %v13410_v5  ;;  %9006 = vmatprep.subr.bf16.mxu0 %v13419_v11  ;;  %15553 = vst [vmem:[#allocation80_spill] sm:$0xff] %v13456_v46  ;;  %v13470_v19 = vpack.c.bf16 %v4281_v57, %v4279_v9  ;;  %v3959_v11 = vld [vmem:[%s15214_s21 + $0x2b8] sm:$0xff]  ;;  %v4283_v31 = vld [vmem:[#allocation19 + $0x2a8] sm:$0xff]  ;;  %v13482_v36 = vpack.c.bf16 %v3954_v44, %v3952_v28  ;;  %v3956_v57 = vld [vmem:[%s15214_s21 + $0x2a0] sm:$0xff] }
 0xab8   : > { %15554 = vst [vmem:[#allocation81_spill] sm:$0xff] %v13464_v58  ;;  %4094 = vmatprep.mubr.f32.mxu0 %v13444_v7  ;;  %9134 = vmatprep.subr.bf16.mxu1 %v13433_v60  ;;  %15555 = vst [vmem:[#allocation82_spill] sm:$0xff] %v13468_v10  ;;  %v4285_v5 = vld [vmem:[#allocation19 + $0x2b8] sm:$0xff]  ;;  %v13488_v9 = vpack.c.bf16 %v3959_v11, %v3957_v27  ;;  %v4282_v60 = vld [vmem:[#allocation19 + $0x2a0] sm:$0xff] }
 0xab9   : > { %15556 = vst [vmem:[#allocation83_spill] sm:$0xff] %v13470_v19  ;;  %4408 = vmatprep.mubr.f32.mxu1 %v13452_v17  ;;  %4095 = vmatmul.mubr.f32.gmra.mrb[56].mxu0 %v13450_v42  ;;  %15557 = vst [vmem:[#allocation84_spill] sm:$0xff] %v13482_v36  ;;  %v13498_v44 = vpack.c.bf16 %v4285_v5, %v4283_v31  ;;  %v4284_v28 = vld [vmem:[#allocation19 + $0x2b0] sm:$0xff]  ;;  %v3961_v11 = vld [vmem:[%s15214_s21 + $0x2c8] sm:$0xff] }
 0xaba   : > { %9008 = vmatpush1.bf16.msra.mxu0 %v13448_v23  ;;  %4409 = vmatmul.mubr.f32.gmra.mrb[54].mxu1 %v13464_v58  ;;  %15558 = vst [vmem:[#allocation85_spill] sm:$0xff] %v13486_v63  ;;  %15559 = vst [vmem:[#allocation86_spill] sm:$0xff] %v13488_v9  ;;  %v3958_v23 = vld [vmem:[%s15214_s21 + $0x2b0] sm:$0xff]  ;;  %v3963_v12 = vld [vmem:[%s15214_s21 + $0x2d8] sm:$0xff]  ;;  %v13512_v5 = vpack.c.bf16 %v4284_v28, %v4282_v60 }
 0xabb   : > { %9136 = vmatpush1.bf16.msra.mxu1 %v13456_v46  ;;  %4479 = vmatprep.mubr.f32.mxu1 %v13329_v21  ;;  %15560 = vst [vmem:[#allocation87_spill] sm:$0xff] %v13498_v44  ;;  %v4287_v62 = vld [vmem:[#allocation19 + $0x2c8] sm:$0xff]  ;;  %v4289_v27 = vld [vmem:[#allocation19 + $0x2d8] sm:$0xff]  ;;  %v15561_v46 = vmov 0.0   ;;  %v13514_v31 = vpack.c.bf16 %v3963_v12, %v3961_v11  ;;  %v4286_v58 = vld [vmem:[#allocation19 + $0x2c0] sm:$0xff] }
 0xabc   : > { %9010 = vmatprep.subr.bf16.mxu0 %v13468_v10  ;;  %9138 = vmatprep.subr.bf16.mxu1 %v13470_v19  ;;  %v13508_v10 = vpack.c.bf16 %v3958_v23, %v3956_v57  ;;  %15563 = vst [vmem:[#allocation89_spill] sm:$0xff] %v13512_v5  ;;  %v3960_v19 = vld [vmem:[%s15214_s21 + $0x2c0] sm:$0xff]  ;;  %v3962_v21 = vld [vmem:[%s15214_s21 + $0x2d0] sm:$0xff]  ;;  %v13523_v23 = vpack.c.bf16 %v4289_v27, %v4287_v62  ;;  %v3965_v60 = vld [vmem:[%s15214_s21 + $0x2e8] sm:$0xff] }
 0xabd   : > { %4165 = vmatprep.mubr.f32.mxu0 %v15561_v46  ;;  %15564 = vst [vmem:[#allocation90_spill] sm:$0xff] %v13514_v31  ;;  %v4288_v57 = vld [vmem:[#allocation19 + $0x2d0] sm:$0xff]  ;;  %v4291_v11 = vld [vmem:[#allocation19 + $0x2e8] sm:$0xff]  ;;  %v4293_v12 = vld [vmem:[#allocation19 + $0x2f8] sm:$0xff] }
 0xabe   : > { %9012 = vmatpush1.bf16.msra.mxu0 %v13482_v36  ;;  %15562 = vst [vmem:[#allocation88_spill] sm:$0xff] %v13508_v10  ;;  %15565 = vst [vmem:[#allocation91_spill] sm:$0xff] %v13523_v23  ;;  %v3967_v28 = vld [vmem:[%s15214_s21 + $0x2f8] sm:$0xff]  ;;  %v13536_v62 = vpack.c.bf16 %v4288_v57, %v4286_v58  ;;  %v4290_v36 = vld [vmem:[#allocation19 + $0x2e0] sm:$0xff] }
 0xabf   : > { %9140 = vmatpush1.bf16.msra.mxu1 %v13486_v63  ;;  %9014 = vmatprep.subr.bf16.mxu0 %v13488_v9  ;;  %v13532_v9 = vpack.c.bf16 %v3962_v21, %v3960_v19  ;;  %v13538_v27 = vpack.c.bf16 %v3967_v28, %v3965_v60  ;;  %v3966_v63 = vld [vmem:[%s15214_s21 + $0x2f0] sm:$0xff]  ;;  %v13547_v21 = vpack.c.bf16 %v4293_v12, %v4291_v11  ;;  %v3969_v58 = vld [vmem:[%s15214_s21 + $0x308] sm:$0xff]  ;;  %v3971_v57 = vld [vmem:[%s15214_s21 + $0x318] sm:$0xff] }
 0xac0   : > { %9142 = vmatprep.subr.bf16.mxu1 %v13498_v44  ;;  %15567 = vst [vmem:[#allocation93_spill] sm:$0xff] %v13536_v62  ;;  %v3964_v44 = vld [vmem:[%s15214_s21 + $0x2e0] sm:$0xff]  ;;  %v4292_v19 = vld [vmem:[#allocation19 + $0x2f0] sm:$0xff]  ;;  %v4295_v60 = vld [vmem:[#allocation19 + $0x308] sm:$0xff]  ;;  %v13562_v12 = vpack.c.bf16 %v3971_v57, %v3969_v58 }
 0xac1   : > { %15566 = vst [vmem:[#allocation92_spill] sm:$0xff] %v13532_v9  ;;  %15568 = vst [vmem:[#allocation94_spill] sm:$0xff] %v13538_v27  ;;  %v4297_v28 = vld [vmem:[#allocation19 + $0x318] sm:$0xff]  ;;  %v13560_v11 = vpack.c.bf16 %v4292_v19, %v4290_v36  ;;  %v3973_v36 = vld [vmem:[%s15214_s21 + $0x328] sm:$0xff] }
 0xac2   : > { %9016 = vmatpush1.bf16.msra.mxu0 %v13508_v10  ;;  %15569 = vst [vmem:[#allocation95_spill] sm:$0xff] %v13547_v21  ;;  %15572 = vst [vmem:[#allocation98_spill] sm:$0xff] %v13562_v12  ;;  %v4294_v10 = vld [vmem:[#allocation19 + $0x300] sm:$0xff]  ;;  %v3975_v19 = vld [vmem:[%s15214_s21 + $0x338] sm:$0xff] }
 0xac3   : > { %9144 = vmatpush1.bf16.msra.mxu1 %v13512_v5  ;;  %9018 = vmatprep.subr.bf16.mxu0 %v13514_v31  ;;  %v13556_v31 = vpack.c.bf16 %v3966_v63, %v3964_v44  ;;  %15571 = vst [vmem:[#allocation97_spill] sm:$0xff] %v13560_v11  ;;  %v3970_v5 = vld [vmem:[%s15214_s21 + $0x310] sm:$0xff]  ;;  %v13571_v63 = vpack.c.bf16 %v4297_v28, %v4295_v60  ;;  %v4301_v57 = vld [vmem:[#allocation19 + $0x338] sm:$0xff] }
 0xac4   : > { %9146 = vmatprep.subr.bf16.mxu1 %v13523_v23  ;;  %v3968_v23 = vld [vmem:[%s15214_s21 + $0x300] sm:$0xff]  ;;  %v4296_v44 = vld [vmem:[#allocation19 + $0x310] sm:$0xff]  ;;  %v4299_v58 = vld [vmem:[#allocation19 + $0x328] sm:$0xff]  ;;  %v13586_v28 = vpack.c.bf16 %v3975_v19, %v3973_v36 }
 0xac5   : > { %15570 = vst [vmem:[#allocation96_spill] sm:$0xff] %v13556_v31  ;;  %15573 = vst [vmem:[#allocation99_spill] sm:$0xff] %v13571_v63  ;;  %v13584_v60 = vpack.c.bf16 %v4296_v44, %v4294_v10  ;;  %v3977_v10 = vld [vmem:[%s15214_s21 + $0x348] sm:$0xff]  ;;  %v3979_v44 = vld [vmem:[%s15214_s21 + $0x358] sm:$0xff] }
 0xac6   : > { %9020 = vmatpush1.bf16.msra.mxu0 %v13532_v9  ;;  %15576 = vst [vmem:[#allocation102_spill] sm:$0xff] %v13586_v28  ;;  %v4298_v9 = vld [vmem:[#allocation19 + $0x320] sm:$0xff]  ;;  %v4303_v36 = vld [vmem:[#allocation19 + $0x348] sm:$0xff]  ;;  %v4305_v19 = vld [vmem:[#allocation19 + $0x358] sm:$0xff] }
 0xac7   : > { %9148 = vmatpush1.bf16.msra.mxu1 %v13536_v62  ;;  %9022 = vmatprep.subr.bf16.mxu0 %v13538_v27  ;;  %v13580_v27 = vpack.c.bf16 %v3970_v5, %v3968_v23  ;;  %15575 = vst [vmem:[#allocation101_spill] sm:$0xff] %v13584_v60  ;;  %v3974_v62 = vld [vmem:[%s15214_s21 + $0x330] sm:$0xff]  ;;  %v13595_v5 = vpack.c.bf16 %v4301_v57, %v4299_v58 }
 0xac8   : > { %9150 = vmatprep.subr.bf16.mxu1 %v13547_v21  ;;  %v3972_v21 = vld [vmem:[%s15214_s21 + $0x320] sm:$0xff]  ;;  %v4300_v23 = vld [vmem:[#allocation19 + $0x330] sm:$0xff]  ;;  %v13610_v57 = vpack.c.bf16 %v3979_v44, %v3977_v10  ;;  %v4307_v10 = vld [vmem:[#allocation19 + $0x368] sm:$0xff] }
 0xac9   : > { %15574 = vst [vmem:[#allocation100_spill] sm:$0xff] %v13580_v27  ;;  %15577 = vst [vmem:[#allocation103_spill] sm:$0xff] %v13595_v5  ;;  %v13608_v58 = vpack.c.bf16 %v4300_v23, %v4298_v9  ;;  %v3981_v9 = vld [vmem:[%s15214_s21 + $0x368] sm:$0xff]  ;;  %v3983_v23 = vld [vmem:[%s15214_s21 + $0x378] sm:$0xff] }
 0xaca   : > { %9024 = vmatpush1.bf16.msra.mxu0 %v13556_v31  ;;  %15580 = vst [vmem:[#allocation106_spill] sm:$0xff] %v13610_v57  ;;  %v4302_v31 = vld [vmem:[#allocation19 + $0x340] sm:$0xff]  ;;  %v4309_v44 = vld [vmem:[#allocation19 + $0x378] sm:$0xff] }
 0xacb   : > { %9152 = vmatpush1.bf16.msra.mxu1 %v13560_v11  ;;  %9026 = vmatprep.subr.bf16.mxu0 %v13562_v12  ;;  %v13604_v12 = vpack.c.bf16 %v3974_v62, %v3972_v21  ;;  %15579 = vst [vmem:[#allocation105_spill] sm:$0xff] %v13608_v58  ;;  %v3978_v11 = vld [vmem:[%s15214_s21 + $0x350] sm:$0xff]  ;;  %v13619_v62 = vpack.c.bf16 %v4305_v19, %v4303_v36 }
 0xacc   : > { %9154 = vmatprep.subr.bf16.mxu1 %v13571_v63  ;;  %v3976_v63 = vld [vmem:[%s15214_s21 + $0x340] sm:$0xff]  ;;  %v4304_v21 = vld [vmem:[#allocation19 + $0x350] sm:$0xff]  ;;  %v13634_v19 = vpack.c.bf16 %v3983_v23, %v3981_v9  ;;  %v4311_v9 = vld [vmem:[#allocation19 + $0x388] sm:$0xff] }
 0xacd   : > { %15578 = vst [vmem:[#allocation104_spill] sm:$0xff] %v13604_v12  ;;  %15581 = vst [vmem:[#allocation107_spill] sm:$0xff] %v13619_v62  ;;  %v13632_v36 = vpack.c.bf16 %v4304_v21, %v4302_v31  ;;  %v3985_v31 = vld [vmem:[%s15214_s21 + $0x388] sm:$0xff]  ;;  %v3987_v21 = vld [vmem:[%s15214_s21 + $0x398] sm:$0xff] }
 0xace   : > { %9028 = vmatpush1.bf16.msra.mxu0 %v13580_v27  ;;  %15584 = vst [vmem:[#allocation110_spill] sm:$0xff] %v13634_v19  ;;  %v4306_v27 = vld [vmem:[#allocation19 + $0x360] sm:$0xff]  ;;  %v4313_v23 = vld [vmem:[#allocation19 + $0x398] sm:$0xff] }
 0xacf   : > { %9156 = vmatpush1.bf16.msra.mxu1 %v13584_v60  ;;  %9030 = vmatprep.subr.bf16.mxu0 %v13586_v28  ;;  %v13628_v28 = vpack.c.bf16 %v3978_v11, %v3976_v63  ;;  %15583 = vst [vmem:[#allocation109_spill] sm:$0xff] %v13632_v36  ;;  %v3982_v60 = vld [vmem:[%s15214_s21 + $0x370] sm:$0xff]  ;;  %v13643_v11 = vpack.c.bf16 %v4309_v44, %v4307_v10 }
 0xad0   : > { %9158 = vmatprep.subr.bf16.mxu1 %v13595_v5  ;;  %v3980_v5 = vld [vmem:[%s15214_s21 + $0x360] sm:$0xff]  ;;  %v4308_v63 = vld [vmem:[#allocation19 + $0x370] sm:$0xff]  ;;  %v13658_v44 = vpack.c.bf16 %v3987_v21, %v3985_v31  ;;  %v4315_v31 = vld [vmem:[#allocation19 + $0x3a8] sm:$0xff] }
 0xad1   : > { %15582 = vst [vmem:[#allocation108_spill] sm:$0xff] %v13628_v28  ;;  %15585 = vst [vmem:[#allocation111_spill] sm:$0xff] %v13643_v11  ;;  %v13656_v10 = vpack.c.bf16 %v4308_v63, %v4306_v27  ;;  %v3989_v27 = vld [vmem:[%s15214_s21 + $0x3a8] sm:$0xff]  ;;  %v3991_v63 = vld [vmem:[%s15214_s21 + $0x3b8] sm:$0xff] }
 0xad2   : > { %9032 = vmatpush1.bf16.msra.mxu0 %v13604_v12  ;;  %15588 = vst [vmem:[#allocation114_spill] sm:$0xff] %v13658_v44  ;;  %v4310_v12 = vld [vmem:[#allocation19 + $0x380] sm:$0xff]  ;;  %v4317_v21 = vld [vmem:[#allocation19 + $0x3b8] sm:$0xff] }
 0xad3   : > { %9160 = vmatpush1.bf16.msra.mxu1 %v13608_v58  ;;  %9034 = vmatprep.subr.bf16.mxu0 %v13610_v57  ;;  %v13652_v57 = vpack.c.bf16 %v3982_v60, %v3980_v5  ;;  %15587 = vst [vmem:[#allocation113_spill] sm:$0xff] %v13656_v10  ;;  %v3986_v58 = vld [vmem:[%s15214_s21 + $0x390] sm:$0xff]  ;;  %v13667_v60 = vpack.c.bf16 %v4313_v23, %v4311_v9 }
 0xad4   : > { %9162 = vmatprep.subr.bf16.mxu1 %v13619_v62  ;;  %v3984_v62 = vld [vmem:[%s15214_s21 + $0x380] sm:$0xff]  ;;  %v4312_v5 = vld [vmem:[#allocation19 + $0x390] sm:$0xff]  ;;  %v13682_v23 = vpack.c.bf16 %v3991_v63, %v3989_v27  ;;  %v4319_v27 = vld [vmem:[#allocation19 + $0x3c8] sm:$0xff] }
 0xad5   : > { %15586 = vst [vmem:[#allocation112_spill] sm:$0xff] %v13652_v57  ;;  %15589 = vst [vmem:[#allocation115_spill] sm:$0xff] %v13667_v60  ;;  %v13680_v9 = vpack.c.bf16 %v4312_v5, %v4310_v12  ;;  %v3993_v12 = vld [vmem:[%s15214_s21 + $0x3c8] sm:$0xff]  ;;  %v3995_v5 = vld [vmem:[%s15214_s21 + $0x3d8] sm:$0xff] }
 0xad6   : > { %9036 = vmatpush1.bf16.msra.mxu0 %v13628_v28  ;;  %15591 = vst [vmem:[#allocation117_spill] sm:$0xff] %v13682_v23  ;;  %v4314_v28 = vld [vmem:[#allocation19 + $0x3a0] sm:$0xff]  ;;  %v4321_v63 = vld [vmem:[#allocation19 + $0x3d8] sm:$0xff] }
 0xad7   : > { %9164 = vmatpush1.bf16.msra.mxu1 %v13632_v36  ;;  %9038 = vmatprep.subr.bf16.mxu0 %v13634_v19  ;;  %v13676_v19 = vpack.c.bf16 %v3986_v58, %v3984_v62  ;;  %15590 = vst [vmem:[#allocation116_spill] sm:$0xff] %v13680_v9  ;;  %v3990_v36 = vld [vmem:[%s15214_s21 + $0x3b0] sm:$0xff]  ;;  %v13691_v58 = vpack.c.bf16 %v4317_v21, %v4315_v31 }
 0xad8   : > { %9166 = vmatprep.subr.bf16.mxu1 %v13643_v11  ;;  %v3988_v11 = vld [vmem:[%s15214_s21 + $0x3a0] sm:$0xff]  ;;  %v4316_v62 = vld [vmem:[#allocation19 + $0x3b0] sm:$0xff]  ;;  %v13706_v21 = vpack.c.bf16 %v3995_v5, %v3993_v12  ;;  %v4323_v12 = vld [vmem:[#allocation19 + $0x3e8] sm:$0xff] }
 0xad9   : > { %15592 = vst [vmem:[#allocation118_spill] sm:$0xff] %v13691_v58  ;;  %v13704_v31 = vpack.c.bf16 %v4316_v62, %v4314_v28  ;;  %v3997_v28 = vld [vmem:[%s15214_s21 + $0x3e8] sm:$0xff]  ;;  %v3999_v62 = vld [vmem:[%s15214_s21 + $0x3f8] sm:$0xff] }
 0xada   : > { %9040 = vmatpush1.bf16.msra.mxu0 %v13652_v57  ;;  %v4318_v57 = vld [vmem:[#allocation19 + $0x3c0] sm:$0xff]  ;;  %v4325_v5 = vld [vmem:[#allocation19 + $0x3f8] sm:$0xff] }
 0xadb   : > { %9168 = vmatpush1.bf16.msra.mxu1 %v13656_v10  ;;  %9042 = vmatprep.subr.bf16.mxu0 %v13658_v44  ;;  %v13700_v44 = vpack.c.bf16 %v3990_v36, %v3988_v11  ;;  %15593 = vst [vmem:[#allocation119_spill] sm:$0xff] %v13704_v31  ;;  %v3994_v10 = vld [vmem:[%s15214_s21 + $0x3d0] sm:$0xff]  ;;  %v13715_v36 = vpack.c.bf16 %v4321_v63, %v4319_v27 }
 0xadc   : > { %9170 = vmatprep.subr.bf16.mxu1 %v13667_v60  ;;  %v3992_v60 = vld [vmem:[%s15214_s21 + $0x3c0] sm:$0xff]  ;;  %v4320_v11 = vld [vmem:[#allocation19 + $0x3d0] sm:$0xff]  ;;  %v13730_v63 = vpack.c.bf16 %v3999_v62, %v3997_v28 }
 0xadd   : > { %v13728_v27 = vpack.c.bf16 %v4320_v11, %v4318_v57  ;;  %v15627_v28 = vld [vmem:[#allocation64_spill] sm:$0xff]  ;;  %v15628_v62 = vld [vmem:[#allocation65_spill] sm:$0xff] }
 0xade   : > { %9044 = vmatpush1.bf16.msra.mxu0 %v13676_v19 }
 0xadf   : > { %9172 = vmatpush1.bf16.msra.mxu1 %v13680_v9  ;;  %9046 = vmatprep.subr.bf16.mxu0 %v13682_v23  ;;  %v13724_v23 = vpack.c.bf16 %v3994_v10, %v3992_v60  ;;  %v3998_v9 = vld [vmem:[%s15214_s21 + $0x3f0] sm:$0xff]  ;;  %v13739_v10 = vpack.c.bf16 %v4325_v5, %v4323_v12  ;;  %v4322_v60 = vld [vmem:[#allocation19 + $0x3e0] sm:$0xff]  ;;  %v15630_v5 = vld [vmem:[#allocation68_spill] sm:$0xff] }
 0xae0   : > { %9174 = vmatprep.subr.bf16.mxu1 %v13691_v58  ;;  %v3996_v58 = vld [vmem:[%s15214_s21 + $0x3e0] sm:$0xff]  ;;  %v15629_v12 = vld [vmem:[#allocation66_spill] sm:$0xff] }
 0xae1   : > { %v13742_v57 = vpack.c.bf16 %v3998_v9, %v3996_v58  ;;  %v15624_v9 = vld [vmem:[#allocation61_spill] sm:$0xff]  ;;  %v15625_v58 = vld [vmem:[#allocation62_spill] sm:$0xff] }
 0xae2   : > { %9048 = vmatpush1.bf16.msra.mxu0 %v13700_v44 }
 0xae3   : > { %9176 = vmatpush1.bf16.msra.mxu1 %v13704_v31  ;;  %9050 = vmatprep.subr.bf16.mxu0 %v13706_v21  ;;  %v4324_v31 = vld [vmem:[#allocation19 + $0x3f0] sm:$0xff] }
 0xae4   : > { %9178 = vmatprep.subr.bf16.mxu1 %v13715_v36  ;;  %v13746_v11 = vpack.c.bf16 %v4324_v31, %v4322_v60  ;;  %v15626_v31 = vld [vmem:[#allocation63_spill] sm:$0xff]  ;;  %v15631_v60 = vld [vmem:[#allocation69_spill] sm:$0xff] }
 0xae6   : > { %9052 = vmatpush1.bf16.msra.mxu0 %v13724_v23 }
 0xae7   : > { %9180 = vmatpush1.bf16.msra.mxu1 %v13728_v27  ;;  %9054 = vmatprep.subr.bf16.mxu0 %v13730_v63 }
 0xae8   : > { %9182 = vmatprep.subr.bf16.mxu1 %v13739_v10 }
 0xaea   : > { %9056 = vmatpush1.bf16.msra.mxu0 %v13742_v57 }
 0xaeb   : > { %9184 = vmatpush1.bf16.msra.mxu1 %v13746_v11  ;;  %9186 = vmatprep.subr.bf16.mxu0 %v12900_v22  ;;  %v15594_v22 = vld [vmem:[#allocation31_spill] sm:$0xff] }
 0xaec   : > { %9314 = vmatprep.subr.bf16.mxu1 %v12902_v47  ;;  %v15595_v47 = vld [vmem:[#allocation32_spill] sm:$0xff] }
 0xaed   : > { %4166 = vmatmul.mubr.f32.vlgmr.msra.gmra.mrb[50].mxu0 %v15561_v46 }
 0xaee   : > { %4480 = vmatmul.mubr.f32.vlgmr.msra.gmra.mrb[48].mxu1 %v13341_v52  ;;  %4171 = vmatprep.mubr.f32.mxu0 %v13343_v8 }
 0xaef   : > { %4485 = vmatprep.mubr.f32.mxu1 %v13364_v61  ;;  %9188 = vmatpush1.bf16.msra.mxu0 %v12917_v55  ;;  %v15596_v55 = vld [vmem:[#allocation33_spill] sm:$0xff] }
 0xaf0   : > { %9316 = vmatpush1.bf16.msra.mxu1 %v12920_v2  ;;  %9190 = vmatprep.subr.bf16.mxu0 %v12922_v25  ;;  %v15597_v2 = vld [vmem:[#allocation34_spill] sm:$0xff]  ;;  %v15598_v25 = vld [vmem:[#allocation35_spill] sm:$0xff] }
 0xaf1   : > { %4172 = vmatmul.mubr.f32.gmra.mrb[52].mxu0 %v13348_v50  ;;  %9318 = vmatprep.subr.bf16.mxu1 %v12931_v33  ;;  %v15599_v33 = vld [vmem:[#allocation36_spill] sm:$0xff] }
 0xaf2   : > { %4486 = vmatmul.mubr.f32.gmra.mrb[50].mxu1 %v13378_v43  ;;  %4177 = vmatprep.mubr.f32.mxu0 %v13380_v53 }
 0xaf3   : > { %4491 = vmatprep.mubr.f32.mxu1 %v13404_v13  ;;  %9192 = vmatpush1.bf16.msra.mxu0 %v12943_v26  ;;  %v15600_v26 = vld [vmem:[#allocation37_spill] sm:$0xff] }
 0xaf4   : > { %9320 = vmatpush1.bf16.msra.mxu1 %v12947_v30  ;;  %9194 = vmatprep.subr.bf16.mxu0 %v12949_v41  ;;  %v15601_v30 = vld [vmem:[#allocation38_spill] sm:$0xff]  ;;  %v15602_v41 = vld [vmem:[#allocation39_spill] sm:$0xff] }
 0xaf5   : > { %4178 = vmatmul.mubr.f32.gmra.mrb[54].mxu0 %v13387_v18  ;;  %9322 = vmatprep.subr.bf16.mxu1 %v12959_v24  ;;  %v15603_v24 = vld [vmem:[#allocation40_spill] sm:$0xff] }
 0xaf6   : > { %4492 = vmatmul.mubr.f32.gmra.mrb[52].mxu1 %v13412_v1  ;;  %4183 = vmatprep.mubr.f32.mxu0 %v13414_v37 }
 0xaf7   : > { %4497 = vmatprep.mubr.f32.mxu1 %v13444_v7  ;;  %9196 = vmatpush1.bf16.msra.mxu0 %v12971_v40  ;;  %v15604_v40 = vld [vmem:[#allocation41_spill] sm:$0xff] }
 0xaf8   : > { %9324 = vmatpush1.bf16.msra.mxu1 %v12975_v49  ;;  %9198 = vmatprep.subr.bf16.mxu0 %v12977_v38  ;;  %v15605_v49 = vld [vmem:[#allocation42_spill] sm:$0xff]  ;;  %v15606_v38 = vld [vmem:[#allocation43_spill] sm:$0xff] }
 0xaf9   : > { %4184 = vmatmul.mubr.f32.gmra.mrb[56].mxu0 %v13427_v51  ;;  %9326 = vmatprep.subr.bf16.mxu1 %v12987_v59  ;;  %v15607_v59 = vld [vmem:[#allocation44_spill] sm:$0xff] }
 0xafa   : > { %4498 = vmatmul.mubr.f32.gmra.mrb[54].mxu1 %v13450_v42  ;;  %4576 = vmatprep.mubr.f32.mxu0 %v13343_v8 }
 0xafb   : > { %9200 = vmatpush1.bf16.msra.mxu0 %v12999_v16  ;;  %4762 = vmatprep.mubr.f32.mxu1 %v13364_v61  ;;  %v15608_v16 = vld [vmem:[#allocation45_spill] sm:$0xff] }
 0xafc   : > { %9328 = vmatpush1.bf16.msra.mxu1 %v13003_v32  ;;  %9202 = vmatprep.subr.bf16.mxu0 %v13005_v0  ;;  %v15609_v32 = vld [vmem:[#allocation46_spill] sm:$0xff]  ;;  %v15610_v0 = vld [vmem:[#allocation47_spill] sm:$0xff] }
 0xafd   : > { %9330 = vmatprep.subr.bf16.mxu1 %v13015_v6  ;;  %v15611_v6 = vld [vmem:[#allocation48_spill] sm:$0xff] }
 0xaff   : > { %9204 = vmatpush1.bf16.msra.mxu0 %v13025_v34  ;;  %v15612_v34 = vld [vmem:[#allocation49_spill] sm:$0xff] }
 0xb00   : > { %9332 = vmatpush1.bf16.msra.mxu1 %v13029_v45  ;;  %9206 = vmatprep.subr.bf16.mxu0 %v13031_v48  ;;  %v15613_v45 = vld [vmem:[#allocation50_spill] sm:$0xff]  ;;  %v15614_v48 = vld [vmem:[#allocation51_spill] sm:$0xff] }
 0xb01   : > { %9334 = vmatprep.subr.bf16.mxu1 %v13040_v56  ;;  %v15615_v56 = vld [vmem:[#allocation52_spill] sm:$0xff] }
 0xb03   : > { %9208 = vmatpush1.bf16.msra.mxu0 %v13049_v14  ;;  %v15616_v14 = vld [vmem:[#allocation53_spill] sm:$0xff] }
 0xb04   : > { %9336 = vmatpush1.bf16.msra.mxu1 %v13053_v39  ;;  %9210 = vmatprep.subr.bf16.mxu0 %v13055_v20  ;;  %v15617_v39 = vld [vmem:[#allocation54_spill] sm:$0xff]  ;;  %v15618_v20 = vld [vmem:[#allocation55_spill] sm:$0xff] }
 0xb05   : > { %9338 = vmatprep.subr.bf16.mxu1 %v13064_v4  ;;  %v15619_v4 = vld [vmem:[#allocation56_spill] sm:$0xff] }
 0xb07   : > { %9212 = vmatpush1.bf16.msra.mxu0 %v13073_v15  ;;  %v15620_v15 = vld [vmem:[#allocation57_spill] sm:$0xff] }
 0xb08   : > { %9340 = vmatpush1.bf16.msra.mxu1 %v13077_v54  ;;  %9214 = vmatprep.subr.bf16.mxu0 %v13079_v29  ;;  %v15621_v54 = vld [vmem:[#allocation58_spill] sm:$0xff]  ;;  %v15622_v29 = vld [vmem:[#allocation59_spill] sm:$0xff] }
 0xb09   : > { %9342 = vmatprep.subr.bf16.mxu1 %v13088_v3  ;;  %v15623_v3 = vld [vmem:[#allocation60_spill] sm:$0xff] }
 0xb0b   : > { %9216 = vmatpush1.bf16.msra.mxu0 %v15594_v22  ;;  %v15632_v22 = vld [vmem:[#allocation70_spill] sm:$0xff] }
 0xb0c   : > { %9344 = vmatpush1.bf16.msra.mxu1 %v15595_v47  ;;  %9218 = vmatprep.subr.bf16.mxu0 %v15596_v55  ;;  %v15633_v47 = vld [vmem:[#allocation71_spill] sm:$0xff]  ;;  %v15634_v55 = vld [vmem:[#allocation72_spill] sm:$0xff] }
 0xb0d   : > { %9346 = vmatprep.subr.bf16.mxu1 %v15597_v2  ;;  %v15635_v2 = vld [vmem:[#allocation73_spill] sm:$0xff] }
 0xb0f   : > { %9220 = vmatpush1.bf16.msra.mxu0 %v15598_v25  ;;  %v15636_v25 = vld [vmem:[#allocation74_spill] sm:$0xff] }
 0xb10   : > { %9348 = vmatpush1.bf16.msra.mxu1 %v15599_v33  ;;  %9222 = vmatprep.subr.bf16.mxu0 %v15600_v26  ;;  %v15637_v33 = vld [vmem:[#allocation75_spill] sm:$0xff]  ;;  %v15638_v26 = vld [vmem:[#allocation76_spill] sm:$0xff] }
 0xb11   : > { %9350 = vmatprep.subr.bf16.mxu1 %v15601_v30  ;;  %v15639_v30 = vld [vmem:[#allocation77_spill] sm:$0xff] }
 0xb13   : > { %9224 = vmatpush1.bf16.msra.mxu0 %v15602_v41  ;;  %v15640_v41 = vld [vmem:[#allocation81_spill] sm:$0xff] }
 0xb14   : > { %9352 = vmatpush1.bf16.msra.mxu1 %v15603_v24  ;;  %9226 = vmatprep.subr.bf16.mxu0 %v15604_v40  ;;  %v15642_v24 = vld [vmem:[#allocation67_spill] sm:$0xff] }
 0xb15   : > { %9354 = vmatprep.subr.bf16.mxu1 %v15605_v49  ;;  %v15643_v40 = vld [vmem:[#allocation79_spill] sm:$0xff]  ;;  %v15644_v49 = vld [vmem:[#allocation80_spill] sm:$0xff] }
 0xb17   : > { %9228 = vmatpush1.bf16.msra.mxu0 %v15606_v38  ;;  %v15645_v38 = vld [vmem:[#allocation82_spill] sm:$0xff] }
 0xb18   : > { %9356 = vmatpush1.bf16.msra.mxu1 %v15607_v59  ;;  %9230 = vmatprep.subr.bf16.mxu0 %v15608_v16  ;;  %v15646_v59 = vld [vmem:[#allocation83_spill] sm:$0xff]  ;;  %v15647_v16 = vld [vmem:[#allocation84_spill] sm:$0xff] }
 0xb19   : > { %9358 = vmatprep.subr.bf16.mxu1 %v15609_v32  ;;  %v15648_v32 = vld [vmem:[#allocation85_spill] sm:$0xff] }
 0xb1b   : > { %9232 = vmatpush1.bf16.msra.mxu0 %v15610_v0  ;;  %v15649_v0 = vld [vmem:[#allocation86_spill] sm:$0xff] }
 0xb1c   : > { %9360 = vmatpush1.bf16.msra.mxu1 %v15611_v6  ;;  %9234 = vmatprep.subr.bf16.mxu0 %v15612_v34  ;;  %v15650_v6 = vld [vmem:[#allocation87_spill] sm:$0xff]  ;;  %v15651_v34 = vld [vmem:[#allocation88_spill] sm:$0xff] }
 0xb1d   : > { %9362 = vmatprep.subr.bf16.mxu1 %v15613_v45  ;;  %v15652_v45 = vld [vmem:[#allocation89_spill] sm:$0xff] }
 0xb1f   : > { %9236 = vmatpush1.bf16.msra.mxu0 %v15614_v48  ;;  %v15653_v48 = vld [vmem:[#allocation90_spill] sm:$0xff] }
 0xb20   : > { %9364 = vmatpush1.bf16.msra.mxu1 %v15615_v56  ;;  %9238 = vmatprep.subr.bf16.mxu0 %v15616_v14  ;;  %v15655_v56 = vld [vmem:[#allocation92_spill] sm:$0xff]  ;;  %v15656_v14 = vld [vmem:[#allocation93_spill] sm:$0xff] }
 0xb21   : > { %9366 = vmatprep.subr.bf16.mxu1 %v15617_v39  ;;  %v15657_v39 = vld [vmem:[#allocation94_spill] sm:$0xff] }
 0xb23   : > { %9240 = vmatpush1.bf16.msra.mxu0 %v15618_v20  ;;  %v15658_v20 = vld [vmem:[#allocation95_spill] sm:$0xff] }
 0xb24   : > { %9368 = vmatpush1.bf16.msra.mxu1 %v15619_v4  ;;  %9242 = vmatprep.subr.bf16.mxu0 %v15620_v15  ;;  %v15659_v4 = vld [vmem:[#allocation96_spill] sm:$0xff]  ;;  %v15660_v15 = vld [vmem:[#allocation97_spill] sm:$0xff] }
 0xb25   : > { %9370 = vmatprep.subr.bf16.mxu1 %v15621_v54  ;;  %v15661_v54 = vld [vmem:[#allocation98_spill] sm:$0xff] }
 0xb27   : > { %9244 = vmatpush1.bf16.msra.mxu0 %v15622_v29  ;;  %v15662_v29 = vld [vmem:[#allocation99_spill] sm:$0xff] }
 0xb28   : > { %9372 = vmatpush1.bf16.msra.mxu1 %v15623_v3  ;;  %9246 = vmatprep.subr.bf16.mxu0 %v15624_v9  ;;  %v15663_v3 = vld [vmem:[#allocation100_spill] sm:$0xff]  ;;  %v15664_v9 = vld [vmem:[#allocation101_spill] sm:$0xff] }
 0xb29   : > { %9374 = vmatprep.subr.bf16.mxu1 %v15625_v58  ;;  %v15665_v58 = vld [vmem:[#allocation102_spill] sm:$0xff] }
 0xb2b   : > { %9248 = vmatpush1.bf16.msra.mxu0 %v15626_v31  ;;  %v15666_v31 = vld [vmem:[#allocation103_spill] sm:$0xff] }
 0xb2c   : > { %9376 = vmatpush1.bf16.msra.mxu1 %v15627_v28  ;;  %9250 = vmatprep.subr.bf16.mxu0 %v15628_v62  ;;  %v15667_v28 = vld [vmem:[#allocation104_spill] sm:$0xff]  ;;  %v15668_v62 = vld [vmem:[#allocation105_spill] sm:$0xff] }
 0xb2d   : > { %9378 = vmatprep.subr.bf16.mxu1 %v15629_v12  ;;  %v15669_v12 = vld [vmem:[#allocation106_spill] sm:$0xff] }
 0xb2e   : > { %4577 = vmatmul.mubr.f32.vlgmr.msra.gmra.mrb[58].mxu0 %v13348_v50 }
 0xb2f   : > { %4763 = vmatmul.mubr.f32.vlgmr.msra.gmra.mrb[56].mxu1 %v13378_v43  ;;  %4582 = vmatprep.mubr.f32.mxu0 %v13380_v53 }
 0xb30   : > { %9252 = vmatpush1.bf16.msra.mxu0 %v15630_v5  ;;  %4768 = vmatprep.mubr.f32.mxu1 %v13404_v13  ;;  %v15670_v5 = vld [vmem:[#allocation107_spill] sm:$0xff] }
 0xb31   : > { %9380 = vmatpush1.bf16.msra.mxu1 %v15631_v60  ;;  %9254 = vmatprep.subr.bf16.mxu0 %v15632_v22  ;;  %v15671_v60 = vld [vmem:[#allocation108_spill] sm:$0xff]  ;;  %v15672_v22 = vld [vmem:[#allocation109_spill] sm:$0xff] }
 0xb32   : > { %4583 = vmatmul.mubr.f32.gmra.mrb[60].mxu0 %v13387_v18  ;;  %9382 = vmatprep.subr.bf16.mxu1 %v15633_v47  ;;  %v15673_v47 = vld [vmem:[#allocation110_spill] sm:$0xff] }
 0xb33   : > { %4769 = vmatmul.mubr.f32.gmra.mrb[58].mxu1 %v13412_v1  ;;  %4588 = vmatprep.mubr.f32.mxu0 %v13414_v37 }
 0xb34   : > { %9256 = vmatpush1.bf16.msra.mxu0 %v15634_v55  ;;  %4774 = vmatprep.mubr.f32.mxu1 %v13444_v7  ;;  %v15674_v55 = vld [vmem:[#allocation111_spill] sm:$0xff] }
 0xb35   : > { %9384 = vmatpush1.bf16.msra.mxu1 %v13370_v35  ;;  %9258 = vmatprep.subr.bf16.mxu0 %v15635_v2  ;;  %v15641_v35 = vld [vmem:[#allocation78_spill] sm:$0xff]  ;;  %v15675_v2 = vld [vmem:[#allocation112_spill] sm:$0xff] }
 0xb36   : > { %4589 = vmatmul.mubr.f32.gmra.mrb[62].mxu0 %v13427_v51  ;;  %9386 = vmatprep.subr.bf16.mxu1 %v15636_v25  ;;  %v15676_v25 = vld [vmem:[#allocation113_spill] sm:$0xff] }
 0xb37   : > { %4775 = vmatmul.mubr.f32.gmra.mrb[60].mxu1 %v13450_v42  ;;  %4594 = vmatprep.mubr.f32.mxu0 %v13452_v17 }
 0xb38   : > { %9260 = vmatpush1.bf16.msra.mxu0 %v15637_v33  ;;  %4780 = vmatprep.mubr.f32.mxu1 %v15561_v46  ;;  %v15677_v33 = vld [vmem:[#allocation114_spill] sm:$0xff] }
 0xb39   : > { %9388 = vmatpush1.bf16.msra.mxu1 %v15638_v26  ;;  %9262 = vmatprep.subr.bf16.mxu0 %v15639_v30  ;;  %v15678_v26 = vld [vmem:[#allocation115_spill] sm:$0xff]  ;;  %v15679_v30 = vld [vmem:[#allocation116_spill] sm:$0xff] }
 0xb3a   : > { %4595 = vmatmul.mubr.f32.gmra.mrb[64].mxu0 %v15640_v41  ;;  %9390 = vmatprep.subr.bf16.mxu1 %v15641_v35  ;;  %v15680_v35 = vld [vmem:[#allocation117_spill] sm:$0xff] }
 0xb3b   : > { %4781 = vmatmul.mubr.f32.gmra.mrb[62].mxu1 %v15561_v46  ;;  %4665 = vmatprep.mubr.f32.mxu0 %v15642_v24  ;;  %v15681_v24 = vld [vmem:[#allocation118_spill] sm:$0xff] }
 0xb3c   : > { %9264 = vmatpush1.bf16.msra.mxu0 %v15643_v40  ;;  %4851 = vmatprep.mubr.f32.mxu1 %v13343_v8  ;;  %v15654_v8 = vld [vmem:[#allocation91_spill] sm:$0xff] }
 0xb3d   : > { %9392 = vmatpush1.bf16.msra.mxu1 %v15644_v49  ;;  %9266 = vmatprep.subr.bf16.mxu0 %v15645_v38  ;;  %v15682_v40 = vld [vmem:[#allocation119_spill] sm:$0xff]  ;;  %v4900_v49 = vld [vmem:[%s15217_s24 + $0x80] sm:$0xff] }
 0xb3e   : > { %9394 = vmatprep.subr.bf16.mxu1 %v15646_v59  ;;  %v4932_v38 = vld [vmem:[%s15217_s24 + $0x180] sm:$0xff]  ;;  %v4885_v59 = vld [vmem:[%s15217_s24 + $0x8] sm:$0xff] }
 0xb40   : > { %9268 = vmatpush1.bf16.msra.mxu0 %v15647_v16 }
 0xb41   : > { %9396 = vmatpush1.bf16.msra.mxu1 %v15648_v32  ;;  %9270 = vmatprep.subr.bf16.mxu0 %v15649_v0  ;;  %v4934_v32 = vld [vmem:[%s15217_s24 + $0x190] sm:$0xff]  ;;  %v4935_v0 = vld [vmem:[%s15217_s24 + $0x198] sm:$0xff] }
 0xb42   : > { %9398 = vmatprep.subr.bf16.mxu1 %v15650_v6 }
 0xb44   : > { %9272 = vmatpush1.bf16.msra.mxu0 %v15651_v34 }
 0xb45   : > { %9400 = vmatpush1.bf16.msra.mxu1 %v15652_v45  ;;  %9274 = vmatprep.subr.bf16.mxu0 %v15653_v48  ;;  %v4887_v48 = vld [vmem:[%s15217_s24 + $0x18] sm:$0xff] }
 0xb46   : > { %9402 = vmatprep.subr.bf16.mxu1 %v15654_v8  ;;  %v13969_v8 = vpack.c.bf16 %v4935_v0, %v4934_v32  ;;  %v4945_v32 = vld [vmem:[%s15217_s24 + $0x1e8] sm:$0xff] }
 0xb48   : > { %9276 = vmatpush1.bf16.msra.mxu0 %v15655_v56  ;;  %15688 = vst [vmem:[#allocation36_spill] sm:$0xff] %v13969_v8  ;;  %v4905_v56 = vld [vmem:[%s15217_s24 + $0xa8] sm:$0xff] }
 0xb49   : > { %9404 = vmatpush1.bf16.msra.mxu1 %v15656_v14  ;;  %9278 = vmatprep.subr.bf16.mxu0 %v15657_v39  ;;  %v4918_v14 = vld [vmem:[%s15217_s24 + $0x110] sm:$0xff]  ;;  %v4919_v39 = vld [vmem:[%s15217_s24 + $0x118] sm:$0xff] }
 0xb4a   : > { %9406 = vmatprep.subr.bf16.mxu1 %v15658_v20  ;;  %v4937_v20 = vld [vmem:[%s15217_s24 + $0x1a8] sm:$0xff] }
 0xb4c   : > { %9280 = vmatpush1.bf16.msra.mxu0 %v15659_v4 }
 0xb4d   : > { %9408 = vmatpush1.bf16.msra.mxu1 %v15660_v15  ;;  %9282 = vmatprep.subr.bf16.mxu0 %v15661_v54  ;;  %v4888_v15 = vld [vmem:[%s15217_s24 + $0x20] sm:$0xff]  ;;  %v4906_v54 = vld [vmem:[%s15217_s24 + $0xb0] sm:$0xff] }
 0xb4e   : > { %9410 = vmatprep.subr.bf16.mxu1 %v15662_v29 }
 0xb50   : > { %9284 = vmatpush1.bf16.msra.mxu0 %v15663_v3  ;;  %v4907_v3 = vld [vmem:[%s15217_s24 + $0xb8] sm:$0xff] }
 0xb51   : > { %9412 = vmatpush1.bf16.msra.mxu1 %v15664_v9  ;;  %9286 = vmatprep.subr.bf16.mxu0 %v15665_v58  ;;  %v4920_v9 = vld [vmem:[%s15217_s24 + $0x120] sm:$0xff]  ;;  %v4921_v58 = vld [vmem:[%s15217_s24 + $0x128] sm:$0xff] }
 0xb52   : > { %9414 = vmatprep.subr.bf16.mxu1 %v15666_v31  ;;  %v4939_v31 = vld [vmem:[%s15217_s24 + $0x1b8] sm:$0xff] }
 0xb54   : > { %9288 = vmatpush1.bf16.msra.mxu0 %v15667_v28 }
 0xb55   : > { %9416 = vmatpush1.bf16.msra.mxu1 %v15668_v62  ;;  %9290 = vmatprep.subr.bf16.mxu0 %v15669_v12  ;;  %v4890_v62 = vld [vmem:[%s15217_s24 + $0x30] sm:$0xff]  ;;  %v4908_v12 = vld [vmem:[%s15217_s24 + $0xc0] sm:$0xff] }
 0xb56   : > { %9418 = vmatprep.subr.bf16.mxu1 %v15670_v5 }
 0xb58   : > { %9292 = vmatpush1.bf16.msra.mxu0 %v15671_v60  ;;  %v4909_v60 = vld [vmem:[%s15217_s24 + $0xc8] sm:$0xff] }
 0xb59   : > { %9420 = vmatpush1.bf16.msra.mxu1 %v15672_v22  ;;  %9294 = vmatprep.subr.bf16.mxu0 %v15673_v47  ;;  %v4922_v22 = vld [vmem:[%s15217_s24 + $0x130] sm:$0xff]  ;;  %v4923_v47 = vld [vmem:[%s15217_s24 + $0x138] sm:$0xff] }
 0xb5a   : > { %9422 = vmatprep.subr.bf16.mxu1 %v15674_v55  ;;  %v4941_v55 = vld [vmem:[%s15217_s24 + $0x1c8] sm:$0xff] }
 0xb5c   : > { %9296 = vmatpush1.bf16.msra.mxu0 %v15675_v2 }
 0xb5d   : > { %9424 = vmatpush1.bf16.msra.mxu1 %v15676_v25  ;;  %9298 = vmatprep.subr.bf16.mxu0 %v15677_v33  ;;  %v4892_v25 = vld [vmem:[%s15217_s24 + $0x40] sm:$0xff]  ;;  %v4910_v33 = vld [vmem:[%s15217_s24 + $0xd0] sm:$0xff] }
 0xb5e   : > { %9426 = vmatprep.subr.bf16.mxu1 %v15678_v26 }
 0xb60   : > { %9300 = vmatpush1.bf16.msra.mxu0 %v13676_v19  ;;  %v4901_v19 = vld [vmem:[%s15217_s24 + $0x88] sm:$0xff] }
 0xb61   : > { %9428 = vmatpush1.bf16.msra.mxu1 %v15679_v30  ;;  %9302 = vmatprep.subr.bf16.mxu0 %v15680_v35  ;;  %v4911_v30 = vld [vmem:[%s15217_s24 + $0xd8] sm:$0xff]  ;;  %v4924_v35 = vld [vmem:[%s15217_s24 + $0x140] sm:$0xff] }
 0xb62   : > { %9430 = vmatprep.subr.bf16.mxu1 %v15681_v24  ;;  %v4925_v24 = vld [vmem:[%s15217_s24 + $0x148] sm:$0xff] }
 0xb64   : > { %9304 = vmatpush1.bf16.msra.mxu0 %v13700_v44  ;;  %v4933_v44 = vld [vmem:[%s15217_s24 + $0x188] sm:$0xff] }
 0xb65   : > { %9432 = vmatpush1.bf16.msra.mxu1 %v15682_v40  ;;  %9306 = vmatprep.subr.bf16.mxu0 %v13706_v21  ;;  %v13920_v21 = vpack.c.bf16 %v4901_v19, %v4900_v49  ;;  %v13929_v16 = vpack.c.bf16 %v4933_v44, %v4932_v38  ;;  %v4943_v40 = vld [vmem:[%s15217_s24 + $0x1d8] sm:$0xff]  ;;  %v14113_v19 = vpack.c.bf16 %v4911_v30, %v4910_v33  ;;  %v4894_v38 = vld [vmem:[%s15217_s24 + $0x50] sm:$0xff]  ;;  %v5157_v33 = vld [vmem:[%s15698_s3 + $0x100] sm:$0xff] }
 0xb66   : > { %9434 = vmatprep.subr.bf16.mxu1 %v13715_v36  ;;  %v4884_v36 = vld [vmem:[%s15217_s24] sm:$0xff]  ;;  %v4895_v44 = vld [vmem:[%s15217_s24 + $0x58] sm:$0xff] }
 0xb67   : > { %15683 = vst [vmem:[#allocation31_spill] sm:$0xff] %v13920_v21  ;;  %15684 = vst [vmem:[#allocation32_spill] sm:$0xff] %v13929_v16  ;;  %v13952_v6 = vpack.c.bf16 %v4885_v59, %v4884_v36  ;;  %v4912_v36 = vld [vmem:[%s15217_s24 + $0xe0] sm:$0xff]  ;;  %v14145_v0 = vpack.c.bf16 %v4895_v44, %v4894_v38  ;;  %v5159_v44 = vld [vmem:[%s15698_s3 + $0x110] sm:$0xff] }
 0xb68   : > { %9308 = vmatpush1.bf16.msra.mxu0 %v13724_v23  ;;  %v4902_v23 = vld [vmem:[%s15217_s24 + $0x90] sm:$0xff] }
 0xb69   : > { %9436 = vmatpush1.bf16.msra.mxu1 %v13728_v27  ;;  %9310 = vmatprep.subr.bf16.mxu0 %v13730_v63  ;;  %v4903_v27 = vld [vmem:[%s15217_s24 + $0x98] sm:$0xff]  ;;  %v4916_v63 = vld [vmem:[%s15217_s24 + $0x100] sm:$0xff]  ;;  %15685 = vst [vmem:[#allocation33_spill] sm:$0xff] %v13952_v6 }
 0xb6a   : > { %9438 = vmatprep.subr.bf16.mxu1 %v13739_v10  ;;  %v4917_v10 = vld [vmem:[%s15217_s24 + $0x108] sm:$0xff]  ;;  %v13955_v34 = vpack.c.bf16 %v4903_v27, %v4902_v23  ;;  %v4926_v27 = vld [vmem:[%s15217_s24 + $0x150] sm:$0xff] }
 0xb6b   : > { %v13957_v45 = vpack.c.bf16 %v4917_v10, %v4916_v63  ;;  %v4913_v23 = vld [vmem:[%s15217_s24 + $0xe8] sm:$0xff]  ;;  %v4927_v63 = vld [vmem:[%s15217_s24 + $0x158] sm:$0xff]  ;;  %v4944_v10 = vld [vmem:[%s15217_s24 + $0x1e0] sm:$0xff] }
 0xb6c   : > { %9312 = vmatpush1.bf16.msra.mxu0 %v13742_v57  ;;  %15686 = vst [vmem:[#allocation34_spill] sm:$0xff] %v13955_v34  ;;  %v4886_v57 = vld [vmem:[%s15217_s24 + $0x10] sm:$0xff] }
 0xb6d   : > { %9440 = vmatpush1.bf16.msra.mxu1 %v13746_v11  ;;  %9442 = vmatprep.subr.bf16.mxu0 %v13920_v21  ;;  %15687 = vst [vmem:[#allocation35_spill] sm:$0xff] %v13957_v45  ;;  %v4904_v11 = vld [vmem:[%s15217_s24 + $0xa0] sm:$0xff]  ;;  %v13990_v4 = vpack.c.bf16 %v4887_v48, %v4886_v57  ;;  %v14149_v57 = vpack.c.bf16 %v4913_v23, %v4912_v36  ;;  %v5160_v36 = vld [vmem:[%s15698_s3 + $0x118] sm:$0xff] }
 0xb6e   : > { %9474 = vmatprep.subr.bf16.mxu1 %v13929_v16  ;;  %v14151_v48 = vpack.c.bf16 %v4927_v63, %v4926_v27  ;;  %v14256_v23 = vpack.c.bf16 %v5160_v36, %v5159_v44  ;;  %v5177_v27 = vld [vmem:[%s15698_s3 + $0x1a0] sm:$0xff]  ;;  %v5178_v63 = vld [vmem:[%s15698_s3 + $0x1a8] sm:$0xff] }
 0xb6f   : > { %4666 = vmatmul.mubr.f32.vlgmr.msra.gmra.mrb[58].mxu0 %v13341_v52  ;;  %v4936_v52 = vld [vmem:[%s15217_s24 + $0x1a0] sm:$0xff] }
 0xb70   : > { %4852 = vmatmul.mubr.f32.vlgmr.msra.gmra.mrb[56].mxu1 %v13348_v50  ;;  %4671 = vmatprep.mubr.f32.mxu0 %v13364_v61  ;;  %v13994_v50 = vpack.c.bf16 %v4905_v56, %v4904_v11  ;;  %v13996_v61 = vpack.c.bf16 %v4919_v39, %v4918_v14  ;;  %v14009_v29 = vpack.c.bf16 %v4937_v20, %v4936_v52  ;;  %v4896_v11 = vld [vmem:[%s15217_s24 + $0x60] sm:$0xff]  ;;  %v4897_v56 = vld [vmem:[%s15217_s24 + $0x68] sm:$0xff]  ;;  %v4914_v14 = vld [vmem:[%s15217_s24 + $0xf0] sm:$0xff] }
 0xb71   : > { %4857 = vmatprep.mubr.f32.mxu1 %v13380_v53  ;;  %9444 = vmatpush3.bf16.msra.mxu0 %v13952_v6  ;;  %v4889_v53 = vld [vmem:[%s15217_s24 + $0x28] sm:$0xff]  ;;  %15693 = vst [vmem:[#allocation41_spill] sm:$0xff] %v14151_v48  ;;  %v14163_v39 = vpack.c.bf16 %v4945_v32, %v4944_v10  ;;  %v4915_v52 = vld [vmem:[%s15217_s24 + $0xf8] sm:$0xff]  ;;  %v4928_v20 = vld [vmem:[%s15217_s24 + $0x160] sm:$0xff]  ;;  %v14265_v10 = vpack.c.bf16 %v5178_v63, %v5177_v27 }
 0xb72   : > { %9446 = vmatprep.subr.bf16.mxu0 %v13955_v34  ;;  %9476 = vmatpush3.bf16.msra.mxu1 %v13957_v45  ;;  %15689 = vst [vmem:[#allocation37_spill] sm:$0xff] %v13996_v61  ;;  %v14030_v28 = vpack.c.bf16 %v4889_v53, %v4888_v15  ;;  %v4929_v15 = vld [vmem:[%s15217_s24 + $0x168] sm:$0xff]  ;;  %v4946_v53 = vld [vmem:[%s15217_s24 + $0x1f0] sm:$0xff]  ;;  %15703 = vst [vmem:[#allocation50_spill] sm:$0xff] %v14256_v23 }
 0xb73   : > { %4672 = vmatmul.mubr.f32.gmra.mrb[60].mxu0 %v13378_v43  ;;  %9478 = vmatprep.subr.bf16.mxu1 %v13969_v8  ;;  %v4938_v43 = vld [vmem:[%s15217_s24 + $0x1b0] sm:$0xff]  ;;  %15694 = vst [vmem:[#allocation42_spill] sm:$0xff] %v14163_v39  ;;  %15704 = vst [vmem:[#allocation51_spill] sm:$0xff] %v14265_v10  ;;  %v5161_v32 = vld [vmem:[%s15698_s3 + $0x120] sm:$0xff] }
 0xb74   : > { %4858 = vmatmul.mubr.f32.gmra.mrb[58].mxu1 %v13387_v18  ;;  %4677 = vmatprep.mubr.f32.mxu0 %v13404_v13  ;;  %v14034_v18 = vpack.c.bf16 %v4907_v3, %v4906_v54  ;;  %v14036_v13 = vpack.c.bf16 %v4921_v58, %v4920_v9  ;;  %v14049_v5 = vpack.c.bf16 %v4939_v31, %v4938_v43  ;;  %v4947_v54 = vld [vmem:[%s15217_s24 + $0x1f8] sm:$0xff]  ;;  %v4898_v43 = vld [vmem:[%s15217_s24 + $0x70] sm:$0xff]  ;;  %v5181_v63 = vld [vmem:[%s15698_s3 + $0x1c0] sm:$0xff] }
 0xb75   : > { %4863 = vmatprep.mubr.f32.mxu1 %v13414_v37  ;;  %9448 = vmatpush3.bf16.msra.mxu0 %v13990_v4  ;;  %v4891_v37 = vld [vmem:[%s15217_s24 + $0x38] sm:$0xff]  ;;  %v14181_v3 = vpack.c.bf16 %v4897_v56, %v4896_v11  ;;  %v14185_v9 = vpack.c.bf16 %v4915_v52, %v4914_v14  ;;  %v14187_v58 = vpack.c.bf16 %v4929_v15, %v4928_v20  ;;  %v5162_v11 = vld [vmem:[%s15698_s3 + $0x128] sm:$0xff]  ;;  %v5179_v14 = vld [vmem:[%s15698_s3 + $0x1b0] sm:$0xff] }
 0xb76   : > { %9450 = vmatprep.subr.bf16.mxu0 %v13994_v50  ;;  %9480 = vmatpush3.bf16.msra.mxu1 %v13996_v61  ;;  %v14070_v2 = vpack.c.bf16 %v4891_v37, %v4890_v62  ;;  %v4899_v31 = vld [vmem:[%s15217_s24 + $0x78] sm:$0xff]  ;;  %v4930_v62 = vld [vmem:[%s15217_s24 + $0x170] sm:$0xff]  ;;  %v14199_v37 = vpack.c.bf16 %v4947_v54, %v4946_v53  ;;  %v14274_v56 = vpack.c.bf16 %v5162_v11, %v5161_v32  ;;  %v5182_v32 = vld [vmem:[%s15698_s3 + $0x1c8] sm:$0xff] }
 0xb77   : > { %4678 = vmatmul.mubr.f32.gmra.mrb[62].mxu0 %v13412_v1  ;;  %9482 = vmatprep.subr.bf16.mxu1 %v14009_v29  ;;  %v4940_v1 = vld [vmem:[%s15217_s24 + $0x1c0] sm:$0xff]  ;;  %15695 = vst [vmem:[#allocation43_spill] sm:$0xff] %v14185_v9  ;;  %15696 = vst [vmem:[#allocation44_spill] sm:$0xff] %v14187_v58  ;;  %v5180_v52 = vld [vmem:[%s15698_s3 + $0x1b8] sm:$0xff]  ;;  %v14329_v11 = vpack.c.bf16 %v5182_v32, %v5181_v63 }
 0xb78   : > { %4864 = vmatmul.mubr.f32.gmra.mrb[60].mxu1 %v13427_v51  ;;  %4683 = vmatprep.mubr.f32.mxu0 %v13444_v7  ;;  %v14074_v51 = vpack.c.bf16 %v4909_v60, %v4908_v12  ;;  %v14076_v7 = vpack.c.bf16 %v4923_v47, %v4922_v22  ;;  %v14089_v26 = vpack.c.bf16 %v4941_v55, %v4940_v1  ;;  %v4931_v12 = vld [vmem:[%s15217_s24 + $0x178] sm:$0xff]  ;;  %v5141_v60 = vld [vmem:[%s15698_s3 + $0x80] sm:$0xff]  ;;  %v5142_v22 = vld [vmem:[%s15698_s3 + $0x88] sm:$0xff] }
 0xb79   : > { %4869 = vmatprep.mubr.f32.mxu1 %v13452_v17  ;;  %9452 = vmatpush3.bf16.msra.mxu0 %v14030_v28  ;;  %v4893_v17 = vld [vmem:[%s15217_s24 + $0x48] sm:$0xff]  ;;  %15697 = vst [vmem:[#allocation45_spill] sm:$0xff] %v14199_v37  ;;  %v14211_v47 = vpack.c.bf16 %v4899_v31, %v4898_v43  ;;  %v14215_v1 = vpack.c.bf16 %v4931_v12, %v4930_v62  ;;  %15705 = vst [vmem:[#allocation52_spill] sm:$0xff] %v14274_v56  ;;  %v5163_v15 = vld [vmem:[%s15698_s3 + $0x130] sm:$0xff] }
 0xb7a   : > { %9454 = vmatprep.subr.bf16.mxu0 %v14034_v18  ;;  %9484 = vmatpush3.bf16.msra.mxu1 %v14036_v13  ;;  %15690 = vst [vmem:[#allocation38_spill] sm:$0xff] %v14089_v26  ;;  %v14108_v49 = vpack.c.bf16 %v4893_v17, %v4892_v25  ;;  %v14217_v55 = vpack.c.bf16 %v5142_v22, %v5141_v60  ;;  %v5173_v25 = vld [vmem:[%s15698_s3 + $0x180] sm:$0xff]  ;;  %v5174_v17 = vld [vmem:[%s15698_s3 + $0x188] sm:$0xff]  ;;  %v5164_v53 = vld [vmem:[%s15698_s3 + $0x138] sm:$0xff] }
 0xb7b   : > { %4684 = vmatmul.mubr.f32.gmra.mrb[64].mxu0 %v13450_v42  ;;  %9486 = vmatprep.subr.bf16.mxu1 %v14049_v5  ;;  %v4942_v42 = vld [vmem:[%s15217_s24 + $0x1d0] sm:$0xff]  ;;  %15699 = vst [vmem:[#allocation46_spill] sm:$0xff] %v14215_v1  ;;  %v14233_v30 = vpack.c.bf16 %v5174_v17, %v5173_v25  ;;  %v14283_v20 = vpack.c.bf16 %v5180_v52, %v5179_v14  ;;  %v4000_v43 = vld [vmem:[%s15708_s26] sm:$0x3]  ;;  %v15709_v31 = vld [vmem:[#allocation29_spill] sm:$0xff] }
 0xb7c   : > { %4870 = vmatmul.mubr.f32.gmra.mrb[62].mxu1 %v15640_v41  ;;  %v14115_v41 = vpack.c.bf16 %v4925_v24, %v4924_v35  ;;  %v14127_v59 = vpack.c.bf16 %v4943_v40, %v4942_v42  ;;  %v5158_v35 = vld [vmem:[%s15698_s3 + $0x108] sm:$0xff]  ;;  %v5175_v24 = vld [vmem:[%s15698_s3 + $0x190] sm:$0xff]  ;;  %v5176_v42 = vld [vmem:[%s15698_s3 + $0x198] sm:$0xff]  ;;  %v14292_v54 = vpack.c.bf16 %v5164_v53, %v5163_v15  ;;  %v14300_v62 = vrot.slane %v4000_v43, %v15709_v31 }
 0xb7d   : > { %9456 = vmatpush3.bf16.msra.mxu0 %v14070_v2  ;;  %5104 = vmatprep.mubr.f32.mxu1 %v15561_v46  ;;  %15700 = vst [vmem:[#allocation47_spill] sm:$0xff] %v14233_v30  ;;  %v14244_v40 = vpack.c.bf16 %v5158_v35, %v5157_v33  ;;  %v14246_v38 = vpack.c.bf16 %v5176_v42, %v5175_v24  ;;  %15706 = vst [vmem:[#allocation53_spill] sm:$0xff] %v14283_v20  ;;  %v15710_v12 = vld [vmem:[#allocation30_spill] sm:$0xff]  ;;  %v5125_v35 = vld [vmem:[%s15698_s3] sm:$0xff] }
 0xb7e   : > { %9458 = vmatprep.subr.bf16.mxu0 %v14074_v51  ;;  %9488 = vmatpush3.bf16.msra.mxu1 %v14076_v7  ;;  %15691 = vst [vmem:[#allocation39_spill] sm:$0xff] %v14115_v41  ;;  %15692 = vst [vmem:[#allocation40_spill] sm:$0xff] %v14127_v59  ;;  %v14303_v60 = vrot.slane %v4000_v43, %v15710_v12  ;;  %v5126_v24 = vld [vmem:[%s15698_s3 + $0x8] sm:$0xff]  ;;  %v5143_v42 = vld [vmem:[%s15698_s3 + $0x90] sm:$0xff] }
 0xb7f   : > { %9490 = vmatprep.subr.bf16.mxu1 %v14089_v26  ;;  %15701 = vst [vmem:[#allocation48_spill] sm:$0xff] %v14244_v40  ;;  %15702 = vst [vmem:[#allocation49_spill] sm:$0xff] %v14246_v38  ;;  %v5144_v27 = vld [vmem:[%s15698_s3 + $0x98] sm:$0xff]  ;;  %v5165_v14 = vld [vmem:[%s15698_s3 + $0x140] sm:$0xff]  ;;  %v14339_v43 = vpack.c.bf16 %v5126_v24, %v5125_v35 }
 0xb80   : > { %15707 = vst [vmem:[#allocation54_spill] sm:$0xff] %v14292_v54  ;;  %15711 = vst [vmem:[#allocation55_spill] sm:$0xff] %v14329_v11  ;;  %v5166_v52 = vld [vmem:[%s15698_s3 + $0x148] sm:$0xff]  ;;  %v14348_v32 = vpack.c.bf16 %v5144_v27, %v5143_v42  ;;  %v5128_v35 = vld [vmem:[%s15698_s3 + $0x18] sm:$0xff] }
 0xb81   : > { %9460 = vmatpush3.bf16.msra.mxu0 %v14108_v49  ;;  %v14341_v31 = vpack.c.bf16 %v5166_v52, %v5165_v14  ;;  %v5146_v42 = vld [vmem:[%s15698_s3 + $0xa8] sm:$0xff]  ;;  %v5183_v27 = vld [vmem:[%s15698_s3 + $0x1d0] sm:$0xff]  ;;  %v5184_v14 = vld [vmem:[%s15698_s3 + $0x1d8] sm:$0xff] }
 0xb82   : > { %9462 = vmatprep.subr.bf16.mxu0 %v14113_v19  ;;  %9492 = vmatpush3.bf16.msra.mxu1 %v14115_v41  ;;  %v14375_v52 = vpack.c.bf16 %v5184_v14, %v5183_v27 }
 0xb83   : > { %9494 = vmatprep.subr.bf16.mxu1 %v14127_v59  ;;  %15712 = vst [vmem:[#allocation56_spill] sm:$0xff] %v14341_v31 }
 0xb84   : > { %15713 = vst [vmem:[#allocation57_spill] sm:$0xff] %v14375_v52 }
 0xb85   : > { %9464 = vmatpush3.bf16.msra.mxu0 %v14145_v0 }
 0xb86   : > { %9466 = vmatprep.subr.bf16.mxu0 %v14149_v57  ;;  %9496 = vmatpush3.bf16.msra.mxu1 %v14151_v48 }
 0xb87   : > { %9498 = vmatprep.subr.bf16.mxu1 %v14163_v39 }
 0xb89   : > { %9468 = vmatpush3.bf16.msra.mxu0 %v14181_v3 }
 0xb8a   : > { %9470 = vmatprep.subr.bf16.mxu0 %v14185_v9  ;;  %9500 = vmatpush3.bf16.msra.mxu1 %v14187_v58 }
 0xb8b   : > { %9502 = vmatprep.subr.bf16.mxu1 %v14199_v37 }
 0xb8d   : > { %9472 = vmatpush3.bf16.msra.mxu0 %v14211_v47 }
 0xb8e   : > { %9504 = vmatpush3.bf16.msra.mxu1 %v14215_v1  ;;  %9506 = vmatprep.subr.bf16.mxu0 %v14217_v55 }
 0xb8f   : > { %9538 = vmatprep.subr.bf16.mxu1 %v14233_v30 }
 0xb91   : > { %5105 = vmatmul.mubr.f32.vlgmr.msra.gmra.mrb[64].mxu1 %v15561_v46  ;;  %v5127_v46 = vld [vmem:[%s15698_s3 + $0x10] sm:$0xff] }
 0xb92   : > { %9540 = vmatpush3.bf16.msra.mxu1 %v14244_v40 }
 0xb93   : > { %9542 = vmatprep.subr.bf16.mxu1 %v14246_v38 }
 0xb96   : > { %9544 = vmatpush3.bf16.msra.mxu1 %v14256_v23 }
 0xb97   : > { %9546 = vmatprep.subr.bf16.mxu1 %v14265_v10 }
 0xb9a   : > { %9548 = vmatpush3.bf16.msra.mxu1 %v14274_v56 }
 0xb9b   : > { %9550 = vmatprep.subr.bf16.mxu1 %v14283_v20 }
 0xb9e   : > { %9552 = vmatpush3.bf16.msra.mxu1 %v14292_v54  ;;  %v14386_v54 = vpack.c.bf16 %v5128_v35, %v5127_v46  ;;  %v5130_v46 = vld [vmem:[%s15698_s3 + $0x28] sm:$0xff] }
 0xb9f   : > { %9554 = vmatprep.subr.bf16.mxu1 %v14329_v11 }
 0xba2   : > { %9556 = vmatpush3.bf16.msra.mxu1 %v14341_v31 }
 0xba3   : > { %9558 = vmatprep.subr.bf16.mxu1 %v14375_v52 }
 0xbc0   : > { %v4167_v22 = vpop.f32.mrb[50].mxu0 }
 0xbc1   : > { %v9969_v25 = vadd.f32 %v4167_v22, %v14300_v62  ;;  %v14306_v17 = vpop.f32.mrb[48].mxu1  ;;  %v4169_v33 = vpop.f32.mrb[51].mxu0 }
 0xbc2   : > { %v9970_v44 = vadd.f32 %v4169_v33, %v14303_v60  ;;  %v14318_v36 = vpop.f32.mrb[49].mxu1 }
 0xbc3   : > { %v14343_v12 = vmax.f32 %v9969_v25, 0.0  ;;  %v5145_v25 = vld [vmem:[%s15698_s3 + $0xa0] sm:$0xff] }
 0xbc4   : > { %v14337_v15 = vmax.f32 %v9970_v44, 0.0  ;;  %v4173_v53 = vpop.f32.mrb[52].mxu0  ;;  %v14396_v23 = vpack.c.bf16 %v5146_v42, %v5145_v25  ;;  %v5148_v25 = vld [vmem:[%s15698_s3 + $0xb8] sm:$0xff]  ;;  %v5185_v42 = vld [vmem:[%s15698_s3 + $0x1e0] sm:$0xff] }
 0xbc5   : > { %v9971_v22 = vadd.f32 %v4173_v53, %v14300_v62  ;;  %v14346_v33 = vpop.f32.mrb[50].mxu1  ;;  %v4175_v63 = vpop.f32.mrb[53].mxu0  ;;  %v5167_v53 = vld [vmem:[%s15698_s3 + $0x150] sm:$0xff] }
 0xbc6   : > { %v9972_v24 = vadd.f32 %v4175_v63, %v14303_v60  ;;  %v14361_v44 = vpop.f32.mrb[51].mxu1  ;;  %5019 = vmatprep.mubr.f32.mxu0 %v14337_v15  ;;  %v5168_v63 = vld [vmem:[%s15698_s3 + $0x158] sm:$0xff] }
 0xbc7   : > { %5020 = vmatmul.mubr.f32.vlgmr.msra.gmra.mrb[66].mxu0 %v14343_v12  ;;  %v14388_v20 = vpack.c.bf16 %v5168_v63, %v5167_v53  ;;  %v14390_v56 = vmax.f32 %v9971_v22, 0.0  ;;  %v5147_v22 = vld [vmem:[%s15698_s3 + $0xb0] sm:$0xff]  ;;  %v5186_v53 = vld [vmem:[%s15698_s3 + $0x1e8] sm:$0xff]  ;;  %v5169_v63 = vld [vmem:[%s15698_s3 + $0x160] sm:$0xff] }
 0xbc8   : > { %v14383_v31 = vmax.f32 %v9972_v24, 0.0  ;;  %9508 = vmatpush3.bf16.msra.mxu0 %v14339_v43  ;;  %v4179_v11 = vpop.f32.mrb[54].mxu0  ;;  %v5129_v24 = vld [vmem:[%s15698_s3 + $0x20] sm:$0xff]  ;;  %v14444_v58 = vpack.c.bf16 %v5148_v25, %v5147_v22  ;;  %v5150_v22 = vld [vmem:[%s15698_s3 + $0xc8] sm:$0xff]  ;;  %v5187_v25 = vld [vmem:[%s15698_s3 + $0x1f0] sm:$0xff] }
 0xbc9   : > { %15714 = vst [vmem:[#allocation58_spill] sm:$0xff] %v14388_v20  ;;  %15715 = vst [vmem:[#allocation59_spill] sm:$0xff] %v14390_v56  ;;  %v9973_v27 = vadd.f32 %v4179_v11, %v14300_v62  ;;  %v14393_v14 = vpop.f32.mrb[52].mxu1  ;;  %v4181_v10 = vpop.f32.mrb[55].mxu0  ;;  %9510 = vmatprep.subr.bf16.mxu0 %v14348_v32  ;;  %9560 = vmatpush3.bf16.msra.mxu1 %v14388_v20  ;;  %v5170_v20 = vld [vmem:[%s15698_s3 + $0x168] sm:$0xff]  ;;  %v14434_v40 = vpack.c.bf16 %v5130_v46, %v5129_v24 }
 0xbca   : > { %v9974_v11 = vadd.f32 %v4181_v10, %v14303_v60  ;;  %v14409_v35 = vpop.f32.mrb[53].mxu1  ;;  %5024 = vmatprep.mubr.f32.mxu0 %v14383_v31  ;;  %v14423_v10 = vpack.c.bf16 %v5186_v53, %v5185_v42  ;;  %v14436_v30 = vpack.c.bf16 %v5170_v20, %v5169_v63  ;;  %v5132_v20 = vld [vmem:[%s15698_s3 + $0x38] sm:$0xff]  ;;  %v5171_v63 = vld [vmem:[%s15698_s3 + $0x170] sm:$0xff] }
 0xbcb   : > { %5025 = vmatmul.mubr.f32.gmra.mrb[68].mxu0 %v14390_v56  ;;  %v14438_v1 = vmax.f32 %v9973_v27, 0.0  ;;  %v5149_v27 = vld [vmem:[%s15698_s3 + $0xc0] sm:$0xff] }
 0xbcc   : > { %15716 = vst [vmem:[#allocation60_spill] sm:$0xff] %v14423_v10  ;;  %v14431_v52 = vmax.f32 %v9974_v11, 0.0  ;;  %9512 = vmatpush3.bf16.msra.mxu0 %v14386_v54  ;;  %v4185_v38 = vpop.f32.mrb[56].mxu0  ;;  %15718 = vst [vmem:[#allocation62_spill] sm:$0xff] %v14436_v30  ;;  %v5131_v11 = vld [vmem:[%s15698_s3 + $0x30] sm:$0xff]  ;;  %9562 = vmatprep.subr.bf16.mxu1 %v14423_v10 }
 0xbcd   : > { %15719 = vst [vmem:[#allocation63_spill] sm:$0xff] %v14438_v1  ;;  %v9975_v42 = vadd.f32 %v4185_v38, %v14300_v62  ;;  %v14441_v53 = vpop.f32.mrb[54].mxu1  ;;  %v4187_v37 = vpop.f32.mrb[57].mxu0  ;;  %9514 = vmatprep.subr.bf16.mxu0 %v14396_v23  ;;  %v9978_v38 = vadd.f32 %v14318_v36, %v14303_v60  ;;  %9564 = vmatpush3.bf16.msra.mxu1 %v14436_v30  ;;  %v5188_v36 = vld [vmem:[%s15698_s3 + $0x1f8] sm:$0xff] }
 0xbce   : > { %15717 = vst [vmem:[#allocation61_spill] sm:$0xff] %v14431_v52  ;;  %v9976_v24 = vadd.f32 %v4187_v37, %v14303_v60  ;;  %v14459_v46 = vpop.f32.mrb[55].mxu1  ;;  %5029 = vmatprep.mubr.f32.mxu0 %v14431_v52  ;;  %v14473_v37 = vpack.c.bf16 %v5188_v36, %v5187_v25  ;;  %v5172_v30 = vld [vmem:[%s15698_s3 + $0x178] sm:$0xff]  ;;  %v14484_v39 = vpack.c.bf16 %v5132_v20, %v5131_v11  ;;  %v5133_v36 = vld [vmem:[%s15698_s3 + $0x40] sm:$0xff] }
 0xbcf   : > { %5030 = vmatmul.mubr.f32.gmra.mrb[70].mxu0 %v14438_v1  ;;  %v14486_v48 = vpack.c.bf16 %v5172_v30, %v5171_v63  ;;  %v14488_v59 = vmax.f32 %v9975_v42, 0.0  ;;  %v14491_v25 = vpack.c.bf16 %v5150_v22, %v5149_v27  ;;  %v14500_v11 = vmax.f32 %v9978_v38, 0.0  ;;  %v5151_v30 = vld [vmem:[%s15698_s3 + $0xd0] sm:$0xff]  ;;  %v5152_v42 = vld [vmem:[%s15698_s3 + $0xd8] sm:$0xff]  ;;  %v5153_v63 = vld [vmem:[%s15698_s3 + $0xe0] sm:$0xff] }
 0xbd0   : > { %15720 = vst [vmem:[#allocation64_spill] sm:$0xff] %v14473_v37  ;;  %v14481_v10 = vmax.f32 %v9976_v24, 0.0  ;;  %9516 = vmatpush3.bf16.msra.mxu0 %v14434_v40  ;;  %v5134_v24 = vld [vmem:[%s15698_s3 + $0x48] sm:$0xff]  ;;  %9566 = vmatprep.subr.bf16.mxu1 %v14473_v37  ;;  %v14517_v27 = vpack.c.bf16 %v5152_v42, %v5151_v30  ;;  %v5135_v38 = vld [vmem:[%s15698_s3 + $0x50] sm:$0xff]  ;;  %v5136_v22 = vld [vmem:[%s15698_s3 + $0x58] sm:$0xff] }
 0xbd1   : > { %15722 = vst [vmem:[#allocation66_spill] sm:$0xff] %v14486_v48  ;;  %15723 = vst [vmem:[#allocation68_spill] sm:$0xff] %v14488_v59  ;;  %9518 = vmatprep.subr.bf16.mxu0 %v14444_v58  ;;  %9568 = vmatpush3.bf16.msra.mxu1 %v14486_v48  ;;  %v14514_v20 = vpack.c.bf16 %v5134_v24, %v5133_v36  ;;  %v5154_v36 = vld [vmem:[%s15698_s3 + $0xe8] sm:$0xff]  ;;  %v14532_v24 = vpack.c.bf16 %v5136_v22, %v5135_v38  ;;  %v5137_v42 = vld [vmem:[%s15698_s3 + $0x60] sm:$0xff] }
 0xbd2   : > { %15721 = vst [vmem:[#allocation65_spill] sm:$0xff] %v14481_v10  ;;  %5034 = vmatprep.mubr.f32.mxu0 %v14481_v10  ;;  %9602 = vmatprep.subr.bf16.mxu1 %v13929_v16  ;;  %15724 = vst [vmem:[#allocation69_spill] sm:$0xff] %v14517_v27  ;;  %v14535_v30 = vpack.c.bf16 %v5154_v36, %v5153_v63  ;;  %v5138_v16 = vld [vmem:[%s15698_s3 + $0x68] sm:$0xff]  ;;  %v5155_v48 = vld [vmem:[%s15698_s3 + $0xf0] sm:$0xff] }
 0xbd3   : > { %5035 = vmatmul.mubr.f32.gmra.mrb[72].mxu0 %v14488_v59  ;;  %15725 = vst [vmem:[#allocation70_spill] sm:$0xff] %v14532_v24  ;;  %v5156_v38 = vld [vmem:[%s15698_s3 + $0xf8] sm:$0xff]  ;;  %v14550_v22 = vpack.c.bf16 %v5138_v16, %v5137_v42  ;;  %v5139_v36 = vld [vmem:[%s15698_s3 + $0x70] sm:$0xff]  ;;  %v9977_v16 = vadd.f32 %v14306_v17, %v14300_v62 }
 0xbd4   : > { %9520 = vmatpush3.bf16.msra.mxu0 %v14484_v39  ;;  %5253 = vmatprep.mubr.f32.mxu0 %v14500_v11  ;;  %15726 = vst [vmem:[#allocation71_spill] sm:$0xff] %v14535_v30  ;;  %v14553_v63 = vpack.c.bf16 %v5156_v38, %v5155_v48  ;;  %v5140_v37 = vld [vmem:[%s15698_s3 + $0x78] sm:$0xff]  ;;  %v9980_v48 = vadd.f32 %v14361_v44, %v14303_v60 }
 0xbd5   : > { %9522 = vmatprep.subr.bf16.mxu0 %v14491_v25  ;;  %15727 = vst [vmem:[#allocation72_spill] sm:$0xff] %v14550_v22  ;;  %v14562_v41 = vpack.c.bf16 %v5140_v37, %v5139_v36  ;;  %v14570_v42 = vmax.f32 %v9977_v16, 0.0  ;;  %v9979_v38 = vadd.f32 %v14346_v33, %v14300_v62  ;;  %v9982_v37 = vadd.f32 %v14409_v35, %v14303_v60 }
 0xbd6   : > { %15728 = vst [vmem:[#allocation73_spill] sm:$0xff] %v14553_v63  ;;  %v14575_v26 = vmax.f32 %v9980_v48, 0.0  ;;  %v9981_v44 = vadd.f32 %v14393_v14, %v14300_v62  ;;  %v9984_v36 = vadd.f32 %v14459_v46, %v14303_v60  ;;  %v9983_v16 = vadd.f32 %v14441_v53, %v14300_v62 }
 0xbd7   : > { %15729 = vst [vmem:[#allocation74_spill] sm:$0xff] %v14562_v41  ;;  %15730 = vst [vmem:[#allocation75_spill] sm:$0xff] %v14570_v42  ;;  %v14582_v17 = vmax.f32 %v9979_v38, 0.0  ;;  %v14587_v33 = vmax.f32 %v9982_v37, 0.0 }
 0xbd8   : > { %9524 = vmatpush3.bf16.msra.mxu0 %v14514_v20  ;;  %15731 = vst [vmem:[#allocation76_spill] sm:$0xff] %v14575_v26  ;;  %v14594_v35 = vmax.f32 %v9981_v44, 0.0  ;;  %v14599_v14 = vmax.f32 %v9984_v36, 0.0  ;;  %v14604_v46 = vmax.f32 %v9983_v16, 0.0 }
 0xbd9   : > { %9526 = vmatprep.subr.bf16.mxu0 %v14517_v27  ;;  %15732 = vst [vmem:[#allocation77_spill] sm:$0xff] %v14582_v17  ;;  %15733 = vst [vmem:[#allocation81_spill] sm:$0xff] %v14587_v33 }
 0xbda   : > { %15734 = vst [vmem:[#allocation78_spill] sm:$0xff] %v14594_v35  ;;  %15735 = vst [vmem:[#allocation67_spill] sm:$0xff] %v14599_v14 }
 0xbdb   : > { %15736 = vst [vmem:[#allocation79_spill] sm:$0xff] %v14604_v46 }
 0xbdc   : > { %9528 = vmatpush3.bf16.msra.mxu0 %v14532_v24 }
 0xbdd   : > { %9530 = vmatprep.subr.bf16.mxu0 %v14535_v30 }
 0xbe0   : > { %9532 = vmatpush3.bf16.msra.mxu0 %v14550_v22 }
 0xbe1   : > { %9534 = vmatprep.subr.bf16.mxu0 %v14553_v63 }
 0xbe4   : > { %9536 = vmatpush3.bf16.msra.mxu0 %v14562_v41 }
 0xbe5   : > { %9570 = vmatprep.subr.bf16.mxu0 %v13920_v21 }
 0xbe7   : > { %5254 = vmatmul.mubr.f32.vlgmr.msra.gmra.mrb[74].mxu0 %v14570_v42 }
 0xbe8   : > { %5258 = vmatprep.mubr.f32.mxu0 %v14575_v26  ;;  %9572 = vmatpush3.bf16.msra.mxu0 %v13952_v6 }
 0xbe9   : > { %9574 = vmatprep.subr.bf16.mxu0 %v13955_v34 }
 0xbeb   : > { %5259 = vmatmul.mubr.f32.gmra.mrb[76].mxu0 %v14582_v17 }
 0xbec   : > { %5263 = vmatprep.mubr.f32.mxu0 %v14587_v33  ;;  %9576 = vmatpush3.bf16.msra.mxu0 %v13990_v4 }
 0xbed   : > { %9578 = vmatprep.subr.bf16.mxu0 %v13994_v50 }
 0xbef   : > { %5264 = vmatmul.mubr.f32.gmra.mrb[78].mxu0 %v14594_v35 }
 0xbf0   : > { %5268 = vmatprep.mubr.f32.mxu0 %v14599_v14  ;;  %9580 = vmatpush3.bf16.msra.mxu0 %v14030_v28 }
 0xbf1   : > { %9582 = vmatprep.subr.bf16.mxu0 %v14034_v18 }
 0xbf3   : > { %5269 = vmatmul.mubr.f32.gmra.mrb[80].mxu0 %v14604_v46 }
 0xbf4   : > { %9584 = vmatpush3.bf16.msra.mxu0 %v14070_v2  ;;  %5423 = vmatprep.mubr.f32.mxu0 %v14500_v11 }
 0xbf5   : > { %9586 = vmatprep.subr.bf16.mxu0 %v14074_v51 }
 0xbf8   : > { %9588 = vmatpush3.bf16.msra.mxu0 %v14108_v49 }
 0xbf9   : > { %9590 = vmatprep.subr.bf16.mxu0 %v14113_v19 }
 0xbfc   : > { %9592 = vmatpush3.bf16.msra.mxu0 %v14145_v0 }
 0xbfd   : > { %9594 = vmatprep.subr.bf16.mxu0 %v14149_v57 }
 0xc00   : > { %9596 = vmatpush3.bf16.msra.mxu0 %v14181_v3 }
 0xc01   : > { %9598 = vmatprep.subr.bf16.mxu0 %v14185_v9 }
 0xc04   : > { %9600 = vmatpush3.bf16.msra.mxu0 %v14211_v47 }
 0xc05   : > { %9634 = vmatprep.subr.bf16.mxu0 %v14217_v55 }
 0xc07   : > { %5424 = vmatmul.mubr.f32.vlgmr.msra.gmra.mrb[82].mxu0 %v14570_v42 }
 0xc08   : > { %5428 = vmatprep.mubr.f32.mxu0 %v14575_v26  ;;  %9636 = vmatpush3.bf16.msra.mxu0 %v14339_v43 }
 0xc09   : > { %9638 = vmatprep.subr.bf16.mxu0 %v14348_v32 }
 0xc0b   : > { %5429 = vmatmul.mubr.f32.gmra.mrb[84].mxu0 %v14582_v17 }
 0xc0c   : > { %5433 = vmatprep.mubr.f32.mxu0 %v14587_v33  ;;  %9640 = vmatpush3.bf16.msra.mxu0 %v14386_v54 }
 0xc0d   : > { %9642 = vmatprep.subr.bf16.mxu0 %v14396_v23 }
 0xc0f   : > { %5434 = vmatmul.mubr.f32.gmra.mrb[86].mxu0 %v14594_v35 }
 0xc10   : > { %5438 = vmatprep.mubr.f32.mxu0 %v14599_v14  ;;  %9644 = vmatpush3.bf16.msra.mxu0 %v14434_v40 }
 0xc11   : > { %9646 = vmatprep.subr.bf16.mxu0 %v14444_v58 }
 0xc13   : > { %5439 = vmatmul.mubr.f32.gmra.mrb[88].mxu0 %v14604_v46 }
 0xc14   : > { %9648 = vmatpush3.bf16.msra.mxu0 %v14484_v39 }
 0xc15   : > { %9650 = vmatprep.subr.bf16.mxu0 %v14491_v25 }
 0xc18   : > { %9652 = vmatpush3.bf16.msra.mxu0 %v14514_v20 }
 0xc19   : > { %9654 = vmatprep.subr.bf16.mxu0 %v14517_v27 }
 0xc1c   : > { %9656 = vmatpush3.bf16.msra.mxu0 %v14532_v24 }
 0xc1d   : > { %9658 = vmatprep.subr.bf16.mxu0 %v14535_v30 }
 0xc20   : > { %9660 = vmatpush3.bf16.msra.mxu0 %v14550_v22 }
 0xc21   : > { %9662 = vmatprep.subr.bf16.mxu0 %v14553_v63 }
 0xc24   : > { %9664 = vmatpush3.bf16.msra.mxu0 %v14562_v41 }
 0xc25   : > { %9698 = vmatprep.subr.bf16.mxu0 %v13920_v21 }
 0xc42   : > { %v4667_v53 = vpop.f32.mrb[58].mxu0 }
 0xc43   : > { %v9985_v48 = vadd.f32 %v4667_v53, %v14300_v62  ;;  %v4853_v38 = vpop.f32.mrb[56].mxu1  ;;  %v4669_v37 = vpop.f32.mrb[59].mxu0 }
 0xc44   : > { %v9993_v44 = vadd.f32 %v4853_v38, %v14300_v62  ;;  %v9986_v36 = vadd.f32 %v4669_v37, %v14303_v60  ;;  %v4855_v16 = vpop.f32.mrb[57].mxu1 }
 0xc45   : > { %v9994_v46 = vadd.f32 %v4855_v16, %v14303_v60  ;;  %v14648_v33 = vmax.f32 %v9985_v48, 0.0 }
 0xc46   : > { %v14646_v14 = vmax.f32 %v9986_v36, 0.0  ;;  %v4673_v35 = vpop.f32.mrb[60].mxu0  ;;  %v14653_v21 = vmax.f32 %v9993_v44, 0.0 }
 0xc47   : > { %15738 = vst [vmem:[#allocation82_spill] sm:$0xff] %v14648_v33  ;;  %v14650_v17 = vmax.f32 %v9994_v46, 0.0  ;;  %v9987_v26 = vadd.f32 %v4673_v35, %v14300_v62  ;;  %v4859_v42 = vpop.f32.mrb[58].mxu1  ;;  %v4675_v53 = vpop.f32.mrb[61].mxu0 }
 0xc48   : > { %15737 = vst [vmem:[#allocation80_spill] sm:$0xff] %v14646_v14  ;;  %15740 = vst [vmem:[#allocation84_spill] sm:$0xff] %v14653_v21  ;;  %v9995_v38 = vadd.f32 %v4859_v42, %v14300_v62  ;;  %v9988_v37 = vadd.f32 %v4675_v53, %v14303_v60  ;;  %v4861_v41 = vpop.f32.mrb[59].mxu1  ;;  %5593 = vmatprep.mubr.f32.mxu0 %v14646_v14 }
 0xc49   : > { %15739 = vst [vmem:[#allocation83_spill] sm:$0xff] %v14650_v17  ;;  %v9996_v36 = vadd.f32 %v4861_v41, %v14303_v60  ;;  %5109 = vmatprep.mubr.f32.mxu1 %v14650_v17  ;;  %5594 = vmatmul.mubr.f32.vlgmr.msra.gmra.mrb[90].mxu0 %v14648_v33  ;;  %v14665_v48 = vmax.f32 %v9987_v26, 0.0 }
 0xc4a   : > { %v14661_v46 = vmax.f32 %v9988_v37, 0.0  ;;  %5110 = vmatmul.mubr.f32.gmra.mrb[66].mxu1 %v14653_v21  ;;  %9700 = vmatpush3.bf16.msra.mxu0 %v13952_v6  ;;  %v4679_v35 = vpop.f32.mrb[62].mxu0  ;;  %v14671_v41 = vmax.f32 %v9995_v38, 0.0 }
 0xc4b   : > { %15742 = vst [vmem:[#allocation86_spill] sm:$0xff] %v14665_v48  ;;  %v14667_v42 = vmax.f32 %v9996_v36, 0.0  ;;  %v9989_v44 = vadd.f32 %v4679_v35, %v14300_v62  ;;  %v4865_v16 = vpop.f32.mrb[60].mxu1  ;;  %v4681_v53 = vpop.f32.mrb[63].mxu0  ;;  %9702 = vmatprep.subr.bf16.mxu0 %v13955_v34 }
 0xc4c   : > { %15741 = vst [vmem:[#allocation85_spill] sm:$0xff] %v14661_v46  ;;  %v9997_v37 = vadd.f32 %v4865_v16, %v14300_v62  ;;  %v9990_v63 = vadd.f32 %v4681_v53, %v14303_v60  ;;  %v4867_v21 = vpop.f32.mrb[61].mxu1  ;;  %5598 = vmatprep.mubr.f32.mxu0 %v14661_v46 }
 0xc4d   : > { %15743 = vst [vmem:[#allocation87_spill] sm:$0xff] %v14667_v42  ;;  %v9998_v26 = vadd.f32 %v4867_v21, %v14303_v60  ;;  %5114 = vmatprep.mubr.f32.mxu1 %v14667_v42  ;;  %5599 = vmatmul.mubr.f32.gmra.mrb[92].mxu0 %v14665_v48  ;;  %v14683_v35 = vmax.f32 %v9989_v44, 0.0 }
 0xc4e   : > { %v14679_v36 = vmax.f32 %v9990_v63, 0.0  ;;  %5115 = vmatmul.mubr.f32.gmra.mrb[68].mxu1 %v14671_v41  ;;  %9704 = vmatpush3.bf16.msra.mxu0 %v13990_v4  ;;  %v4685_v38 = vpop.f32.mrb[64].mxu0  ;;  %v14691_v6 = vmax.f32 %v9997_v37, 0.0  ;;  %v15748_v37 = vld [vmem:[#allocation38_spill] sm:$0xff] }
 0xc4f   : > { %15745 = vst [vmem:[#allocation89_spill] sm:$0xff] %v14683_v35  ;;  %v14685_v16 = vmax.f32 %v9998_v26, 0.0  ;;  %v9991_v53 = vadd.f32 %v4685_v38, %v14300_v62  ;;  %v14688_v34 = vpop.f32.mrb[62].mxu1  ;;  %v4687_v21 = vpop.f32.mrb[65].mxu0  ;;  %9706 = vmatprep.subr.bf16.mxu0 %v13994_v50 }
 0xc50   : > { %15744 = vst [vmem:[#allocation88_spill] sm:$0xff] %v14679_v36  ;;  %v9992_v63 = vadd.f32 %v4687_v21, %v14303_v60  ;;  %v14694_v42 = vpop.f32.mrb[63].mxu1  ;;  %5603 = vmatprep.mubr.f32.mxu0 %v14679_v36 }
 0xc51   : > { %5119 = vmatprep.mubr.f32.mxu1 %v14685_v16  ;;  %5604 = vmatmul.mubr.f32.gmra.mrb[94].mxu0 %v14683_v35  ;;  %v14703_v26 = vmax.f32 %v9991_v53, 0.0 }
 0xc52   : > { %v14699_v44 = vmax.f32 %v9992_v63, 0.0  ;;  %5120 = vmatmul.mubr.f32.gmra.mrb[70].mxu1 %v14691_v6  ;;  %9708 = vmatpush3.bf16.msra.mxu0 %v14030_v28  ;;  %v15749_v63 = vld [vmem:[#allocation39_spill] sm:$0xff] }
 0xc53   : > { %15747 = vst [vmem:[#allocation91_spill] sm:$0xff] %v14703_v26  ;;  %5338 = vmatprep.mubr.f32.mxu1 %v14337_v15  ;;  %9710 = vmatprep.subr.bf16.mxu0 %v14034_v18 }
 0xc54   : > { %15746 = vst [vmem:[#allocation90_spill] sm:$0xff] %v14699_v44  ;;  %5608 = vmatprep.mubr.f32.mxu0 %v14699_v44 }
 0xc55   : > { %5609 = vmatmul.mubr.f32.gmra.mrb[96].mxu0 %v14703_v26 }
 0xc56   : > { %5339 = vmatmul.mubr.f32.vlgmr.msra.gmra.mrb[72].mxu1 %v14343_v12  ;;  %9712 = vmatpush3.bf16.msra.mxu0 %v14070_v2 }
 0xc57   : > { %9604 = vmatpush3.bf16.msra.mxu1 %v13957_v45  ;;  %5343 = vmatprep.mubr.f32.mxu1 %v14383_v31 }
 0xc58   : > { %5763 = vmatprep.mubr.f32.mxu0 %v14646_v14  ;;  %9606 = vmatprep.subr.bf16.mxu1 %v13969_v8  ;;  %v15750_v14 = vld [vmem:[#allocation40_spill] sm:$0xff] }
 0xc59   : > { %9714 = vmatprep.subr.bf16.mxu0 %v14074_v51 }
 0xc5a   : > { %5344 = vmatmul.mubr.f32.gmra.mrb[74].mxu1 %v14390_v56  ;;  %9716 = vmatpush3.bf16.msra.mxu0 %v14108_v49 }
 0xc5b   : > { %9608 = vmatpush3.bf16.msra.mxu1 %v13996_v61  ;;  %5348 = vmatprep.mubr.f32.mxu1 %v14431_v52 }
 0xc5c   : > { %9610 = vmatprep.subr.bf16.mxu1 %v14009_v29  ;;  %9718 = vmatprep.subr.bf16.mxu0 %v14113_v19 }
 0xc5e   : > { %5349 = vmatmul.mubr.f32.gmra.mrb[76].mxu1 %v14438_v1  ;;  %9720 = vmatpush3.bf16.msra.mxu0 %v14145_v0 }
 0xc5f   : > { %9612 = vmatpush3.bf16.msra.mxu1 %v14036_v13  ;;  %5353 = vmatprep.mubr.f32.mxu1 %v14481_v10 }
 0xc60   : > { %9614 = vmatprep.subr.bf16.mxu1 %v14049_v5  ;;  %9722 = vmatprep.subr.bf16.mxu0 %v14149_v57 }
 0xc62   : > { %5354 = vmatmul.mubr.f32.gmra.mrb[78].mxu1 %v14488_v59  ;;  %9724 = vmatpush3.bf16.msra.mxu0 %v14181_v3 }
 0xc63   : > { %9616 = vmatpush3.bf16.msra.mxu1 %v14076_v7  ;;  %5508 = vmatprep.mubr.f32.mxu1 %v14337_v15  ;;  %v15751_v15 = vld [vmem:[#allocation41_spill] sm:$0xff] }
 0xc64   : > { %9618 = vmatprep.subr.bf16.mxu1 %v15748_v37  ;;  %9726 = vmatprep.subr.bf16.mxu0 %v14185_v9  ;;  %v7345_v38 = vpop.f32.mrb[64].mxu1  ;;  %v15752_v9 = vld [vmem:[#allocation42_spill] sm:$0xff] }
 0xc65   : > { %v7346_v53 = vpop.f32.mrb[65].mxu1 }
 0xc66   : > { %9728 = vmatpush3.bf16.msra.mxu0 %v14211_v47  ;;  %v14735_v21 = vadd.f32 %v7346_v53, %v7345_v38  ;;  %v15753_v38 = vld [vmem:[#allocation44_spill] sm:$0xff]  ;;  %v15754_v53 = vld [vmem:[#allocation45_spill] sm:$0xff] }
 0xc67   : > { %9620 = vmatpush3.bf16.msra.mxu1 %v15749_v63  ;;  %9762 = vmatprep.subr.bf16.mxu0 %v14217_v55 }
 0xc68   : > { %9622 = vmatprep.subr.bf16.mxu1 %v15750_v14 }
 0xc69   : > { %5764 = vmatmul.mubr.f32.vlgmr.msra.gmra.mrb[98].mxu0 %v14648_v33  ;;  %v15762_v33 = vld [vmem:[#allocation53_spill] sm:$0xff] }
 0xc6a   : > { %5768 = vmatprep.mubr.f32.mxu0 %v14661_v46  ;;  %9764 = vmatpush3.bf16.msra.mxu0 %v14339_v43  ;;  %v15755_v46 = vld [vmem:[#allocation46_spill] sm:$0xff] }
 0xc6b   : > { %9624 = vmatpush3.bf16.msra.mxu1 %v15751_v15  ;;  %9766 = vmatprep.subr.bf16.mxu0 %v14348_v32 }
 0xc6c   : > { %9626 = vmatprep.subr.bf16.mxu1 %v15752_v9 }
 0xc6d   : > { %5769 = vmatmul.mubr.f32.gmra.mrb[100].mxu0 %v14665_v48  ;;  %v15756_v48 = vld [vmem:[#allocation47_spill] sm:$0xff] }
 0xc6e   : > { %5773 = vmatprep.mubr.f32.mxu0 %v14679_v36  ;;  %9768 = vmatpush3.bf16.msra.mxu0 %v14386_v54  ;;  %v15757_v36 = vld [vmem:[#allocation48_spill] sm:$0xff] }
 0xc6f   : > { %9628 = vmatpush3.bf16.msra.mxu1 %v15753_v38  ;;  %9770 = vmatprep.subr.bf16.mxu0 %v14396_v23 }
 0xc70   : > { %9630 = vmatprep.subr.bf16.mxu1 %v15754_v53 }
 0xc71   : > { %5774 = vmatmul.mubr.f32.gmra.mrb[102].mxu0 %v14683_v35  ;;  %v15761_v35 = vld [vmem:[#allocation52_spill] sm:$0xff] }
 0xc72   : > { %5778 = vmatprep.mubr.f32.mxu0 %v14699_v44  ;;  %9772 = vmatpush3.bf16.msra.mxu0 %v14434_v40  ;;  %v15758_v44 = vld [vmem:[#allocation49_spill] sm:$0xff] }
 0xc73   : > { %9632 = vmatpush3.bf16.msra.mxu1 %v15755_v46  ;;  %9774 = vmatprep.subr.bf16.mxu0 %v14444_v58 }
 0xc74   : > { %9666 = vmatprep.subr.bf16.mxu1 %v15756_v48 }
 0xc75   : > { %5779 = vmatmul.mubr.f32.gmra.mrb[104].mxu0 %v14703_v26  ;;  %v15759_v26 = vld [vmem:[#allocation50_spill] sm:$0xff] }
 0xc76   : > { %5509 = vmatmul.mubr.f32.vlgmr.msra.gmra.mrb[80].mxu1 %v14343_v12  ;;  %9776 = vmatpush3.bf16.msra.mxu0 %v14484_v39  ;;  %v15760_v12 = vld [vmem:[#allocation51_spill] sm:$0xff] }
 0xc77   : > { %5513 = vmatprep.mubr.f32.mxu1 %v14383_v31  ;;  %9668 = vmatpush3.bf16.msra.mxu1 %v15757_v36 }
 0xc78   : > { %5933 = vmatprep.mubr.f32.mxu0 %v14650_v17  ;;  %9670 = vmatprep.subr.bf16.mxu1 %v15758_v44 }
 0xc79   : > { %9778 = vmatprep.subr.bf16.mxu0 %v14491_v25 }
 0xc7a   : > { %5514 = vmatmul.mubr.f32.gmra.mrb[82].mxu1 %v14390_v56  ;;  %9780 = vmatpush3.bf16.msra.mxu0 %v14514_v20  ;;  %v15764_v56 = vld [vmem:[#allocation55_spill] sm:$0xff] }
 0xc7b   : > { %5518 = vmatprep.mubr.f32.mxu1 %v14431_v52  ;;  %9672 = vmatpush3.bf16.msra.mxu1 %v15759_v26  ;;  %v15763_v52 = vld [vmem:[#allocation54_spill] sm:$0xff] }
 0xc7c   : > { %9674 = vmatprep.subr.bf16.mxu1 %v15760_v12  ;;  %9782 = vmatprep.subr.bf16.mxu0 %v14517_v27  ;;  %v15774_v27 = vld [vmem:[#allocation34_spill] sm:$0xff] }
 0xc7e   : > { %5519 = vmatmul.mubr.f32.gmra.mrb[84].mxu1 %v14438_v1  ;;  %9784 = vmatpush3.bf16.msra.mxu0 %v14532_v24  ;;  %v15765_v1 = vld [vmem:[#allocation73_spill] sm:$0xff]  ;;  %v15766_v24 = vld [vmem:[#allocation74_spill] sm:$0xff] }
 0xc7f   : > { %5523 = vmatprep.mubr.f32.mxu1 %v14481_v10  ;;  %9676 = vmatpush3.bf16.msra.mxu1 %v15761_v35  ;;  %v15767_v10 = vld [vmem:[#allocation56_spill] sm:$0xff]  ;;  %v15768_v35 = vld [vmem:[#allocation31_spill] sm:$0xff] }
 0xc80   : > { %9678 = vmatprep.subr.bf16.mxu1 %v15762_v33  ;;  %9786 = vmatprep.subr.bf16.mxu0 %v14535_v30  ;;  %v15769_v33 = vld [vmem:[#allocation57_spill] sm:$0xff]  ;;  %v15770_v30 = vld [vmem:[#allocation84_spill] sm:$0xff] }
 0xc82   : > { %5524 = vmatmul.mubr.f32.gmra.mrb[86].mxu1 %v14488_v59  ;;  %9788 = vmatpush3.bf16.msra.mxu0 %v14550_v22  ;;  %v15771_v59 = vld [vmem:[#allocation87_spill] sm:$0xff]  ;;  %v15772_v22 = vld [vmem:[#allocation33_spill] sm:$0xff] }
 0xc83   : > { %9680 = vmatpush3.bf16.msra.mxu1 %v15763_v52  ;;  %5678 = vmatprep.mubr.f32.mxu1 %v14500_v11  ;;  %v15773_v52 = vld [vmem:[#allocation58_spill] sm:$0xff] }
 0xc84   : > { %9682 = vmatprep.subr.bf16.mxu1 %v15764_v56  ;;  %9790 = vmatprep.subr.bf16.mxu0 %v15765_v1  ;;  %v10000_v1 = vadd.f32 %v14694_v42, %v14303_v60 }
 0xc86   : > { %9792 = vmatpush3.bf16.msra.mxu0 %v15766_v24  ;;  %v15775_v24 = vld [vmem:[#allocation60_spill] sm:$0xff] }
 0xc87   : > { %9684 = vmatpush3.bf16.msra.mxu1 %v15767_v10  ;;  %9826 = vmatprep.subr.bf16.mxu0 %v15768_v35  ;;  %v9999_v35 = vadd.f32 %v14688_v34, %v14300_v62  ;;  %v15779_v34 = vld [vmem:[#allocation32_spill] sm:$0xff]  ;;  %v15783_v62 = vld [vmem:[#allocation81_spill] sm:$0xff] }
 0xc88   : > { %9686 = vmatprep.subr.bf16.mxu1 %v15769_v33  ;;  %v15776_v33 = vld [vmem:[#allocation62_spill] sm:$0xff] }
 0xc89   : > { %5934 = vmatmul.mubr.f32.vlgmr.msra.gmra.mrb[106].mxu0 %v15770_v30  ;;  %v14809_v60 = vmax.f32 %v9999_v35, 0.0  ;;  %v15785_v35 = vld [vmem:[#allocation78_spill] sm:$0xff] }
 0xc8a   : > { %5938 = vmatprep.mubr.f32.mxu0 %v15771_v59  ;;  %9828 = vmatpush3.bf16.msra.mxu0 %v15772_v22  ;;  %v14803_v22 = vmax.f32 %v10000_v1, 0.0  ;;  %v15781_v1 = vld [vmem:[#allocation76_spill] sm:$0xff] }
 0xc8b   : > { %9688 = vmatpush3.bf16.msra.mxu1 %v15773_v52  ;;  %9830 = vmatprep.subr.bf16.mxu0 %v15774_v27  ;;  %v15777_v27 = vld [vmem:[#allocation64_spill] sm:$0xff] }
 0xc8c   : > { %9690 = vmatprep.subr.bf16.mxu1 %v15775_v24 }
 0xc8d   : > { %5939 = vmatmul.mubr.f32.gmra.mrb[108].mxu0 %v14671_v41 }
 0xc8e   : > { %5943 = vmatprep.mubr.f32.mxu0 %v14685_v16  ;;  %9832 = vmatpush3.bf16.msra.mxu0 %v13990_v4  ;;  %v15778_v4 = vld [vmem:[#allocation66_spill] sm:$0xff] }
 0xc8f   : > { %9692 = vmatpush3.bf16.msra.mxu1 %v15776_v33  ;;  %9834 = vmatprep.subr.bf16.mxu0 %v13994_v50  ;;  %v15780_v50 = vld [vmem:[#allocation75_spill] sm:$0xff] }
 0xc90   : > { %9694 = vmatprep.subr.bf16.mxu1 %v15777_v27 }
 0xc91   : > { %5944 = vmatmul.mubr.f32.gmra.mrb[110].mxu0 %v14691_v6 }
 0xc92   : > { %5948 = vmatprep.mubr.f32.mxu0 %v14803_v22  ;;  %9836 = vmatpush3.bf16.msra.mxu0 %v14030_v28  ;;  %v15782_v28 = vld [vmem:[#allocation77_spill] sm:$0xff] }
 0xc93   : > { %9696 = vmatpush3.bf16.msra.mxu1 %v15778_v4  ;;  %9838 = vmatprep.subr.bf16.mxu0 %v14034_v18 }
 0xc94   : > { %9730 = vmatprep.subr.bf16.mxu1 %v15779_v34 }
 0xc95   : > { %5949 = vmatmul.mubr.f32.gmra.mrb[112].mxu0 %v14809_v60 }
 0xc96   : > { %5679 = vmatmul.mubr.f32.vlgmr.msra.gmra.mrb[88].mxu1 %v15780_v50  ;;  %9840 = vmatpush3.bf16.msra.mxu0 %v14070_v2  ;;  %v14829_v2 = vld [vmem:[%s15784_s23] ss:$0 sm:$0xff] }
 0xc97   : > { %5683 = vmatprep.mubr.f32.mxu1 %v15781_v1  ;;  %9732 = vmatpush3.bf16.msra.mxu1 %v13957_v45 }
 0xc98   : > { %6103 = vmatprep.mubr.f32.mxu0 %v14650_v17  ;;  %9734 = vmatprep.subr.bf16.mxu1 %v13969_v8  ;;  %v15786_v8 = vld [vmem:[#allocation67_spill] sm:$0xff] }
 0xc99   : > { %9842 = vmatprep.subr.bf16.mxu0 %v14074_v51 }
 0xc9a   : > { %5684 = vmatmul.mubr.f32.gmra.mrb[90].mxu1 %v15782_v28  ;;  %9844 = vmatpush3.bf16.msra.mxu0 %v14108_v49  ;;  %v7301_v18 = vpop.f32.mrb[66].mxu0 }
 0xc9b   : > { %5688 = vmatprep.mubr.f32.mxu1 %v15783_v62  ;;  %9736 = vmatpush3.bf16.msra.mxu1 %v13996_v61  ;;  %v7302_v42 = vpop.f32.mrb[67].mxu0 }
 0xc9c   : > { %9738 = vmatprep.subr.bf16.mxu1 %v14009_v29  ;;  %9846 = vmatprep.subr.bf16.mxu0 %v14113_v19  ;;  %v7303_v51 = vadd.f32 %v7302_v42, %v7301_v18  ;;  %v15787_v18 = vld [vmem:[#allocation79_spill] sm:$0xff] }
 0xc9e   : > { %5689 = vmatmul.mubr.f32.gmra.mrb[92].mxu1 %v15785_v35  ;;  %v5022_v49 = vadd.f32 %v7303_v51, %v14829_v2  ;;  %9848 = vmatpush3.bf16.msra.mxu0 %v14145_v0  ;;  %v7304_v17 = vpop.f32.mrb[68].mxu0 }
 0xc9f   : > { %5693 = vmatprep.mubr.f32.mxu1 %v15786_v8  ;;  %9740 = vmatpush3.bf16.msra.mxu1 %v14036_v13  ;;  %v7305_v61 = vpop.f32.mrb[69].mxu0 }
 0xca0   : > { %v14839_v45 = vadd.f32 %v14735_v21, %v5022_v49  ;;  %9742 = vmatprep.subr.bf16.mxu1 %v14049_v5  ;;  %9850 = vmatprep.subr.bf16.mxu0 %v14149_v57  ;;  %v14843_v19 = vadd.f32 %v7305_v61, %v7304_v17  ;;  %v15788_v21 = vld [vmem:[#allocation43_spill] sm:$0xff]  ;;  %v15795_v17 = vld [vmem:[#allocation54_spill] sm:$0xff] }
 0xca2   : > { %5694 = vmatmul.mubr.f32.gmra.mrb[94].mxu1 %v15787_v18  ;;  %9852 = vmatpush3.bf16.msra.mxu0 %v14181_v3  ;;  %v7307_v0 = vpop.f32.mrb[70].mxu0 }
 0xca3   : > { %9744 = vmatpush3.bf16.msra.mxu1 %v14076_v7  ;;  %5848 = vmatprep.mubr.f32.mxu1 %v14500_v11  ;;  %v7308_v42 = vpop.f32.mrb[71].mxu0  ;;  %v15794_v11 = vld [vmem:[#allocation72_spill] sm:$0xff] }
 0xca4   : > { %9746 = vmatprep.subr.bf16.mxu1 %v15748_v37  ;;  %9854 = vmatprep.subr.bf16.mxu0 %v15788_v21  ;;  %v14851_v51 = vadd.f32 %v7308_v42, %v7307_v0  ;;  %v15799_v0 = vld [vmem:[#allocation57_spill] sm:$0xff]  ;;  %v15800_v42 = vld [vmem:[#allocation59_spill] sm:$0xff] }
 0xca5   : > { %v15801_v21 = vld [vmem:[#allocation61_spill] sm:$0xff] }
 0xca6   : > { %9856 = vmatpush3.bf16.msra.mxu0 %v14211_v47  ;;  %v7310_v61 = vpop.f32.mrb[72].mxu0 }
 0xca7   : > { %9748 = vmatpush3.bf16.msra.mxu1 %v15749_v63  ;;  %9890 = vmatprep.subr.bf16.mxu0 %v14217_v55  ;;  %v7311_v57 = vpop.f32.mrb[73].mxu0  ;;  %v15789_v55 = vld [vmem:[#allocation69_spill] sm:$0xff] }
 0xca8   : > { %9750 = vmatprep.subr.bf16.mxu1 %v15750_v14  ;;  %v14857_v3 = vadd.f32 %v7311_v57, %v7310_v61  ;;  %v15802_v61 = vld [vmem:[#allocation63_spill] sm:$0xff]  ;;  %v15803_v57 = vld [vmem:[#allocation65_spill] sm:$0xff] }
 0xca9   : > { %6104 = vmatmul.mubr.f32.vlgmr.msra.gmra.mrb[114].mxu0 %v15770_v30 }
 0xcaa   : > { %6108 = vmatprep.mubr.f32.mxu0 %v15771_v59  ;;  %9892 = vmatpush3.bf16.msra.mxu0 %v14339_v43 }
 0xcab   : > { %9752 = vmatpush3.bf16.msra.mxu1 %v15751_v15  ;;  %9894 = vmatprep.subr.bf16.mxu0 %v14348_v32  ;;  %v15792_v32 = vld [vmem:[#allocation53_spill] sm:$0xff] }
 0xcac   : > { %9754 = vmatprep.subr.bf16.mxu1 %v15752_v9 }
 0xcad   : > { %6109 = vmatmul.mubr.f32.gmra.mrb[116].mxu0 %v14671_v41 }
 0xcae   : > { %6113 = vmatprep.mubr.f32.mxu0 %v14685_v16  ;;  %9896 = vmatpush3.bf16.msra.mxu0 %v14386_v54  ;;  %v15791_v54 = vld [vmem:[#allocation52_spill] sm:$0xff] }
 0xcaf   : > { %9756 = vmatpush3.bf16.msra.mxu1 %v15753_v38  ;;  %9898 = vmatprep.subr.bf16.mxu0 %v14396_v23 }
 0xcb0   : > { %9758 = vmatprep.subr.bf16.mxu1 %v15754_v53 }
 0xcb1   : > { %6114 = vmatmul.mubr.f32.gmra.mrb[118].mxu0 %v14691_v6 }
 0xcb2   : > { %6118 = vmatprep.mubr.f32.mxu0 %v14803_v22  ;;  %9900 = vmatpush3.bf16.msra.mxu0 %v14434_v40  ;;  %v15790_v40 = vld [vmem:[#allocation70_spill] sm:$0xff] }
 0xcb3   : > { %9760 = vmatpush3.bf16.msra.mxu1 %v15755_v46  ;;  %9902 = vmatprep.subr.bf16.mxu0 %v14444_v58 }
 0xcb4   : > { %9794 = vmatprep.subr.bf16.mxu1 %v15756_v48 }
 0xcb5   : > { %6119 = vmatmul.mubr.f32.gmra.mrb[120].mxu0 %v14809_v60 }
 0xcb6   : > { %5849 = vmatmul.mubr.f32.vlgmr.msra.gmra.mrb[96].mxu1 %v15780_v50  ;;  %9904 = vmatpush3.bf16.msra.mxu0 %v14484_v39  ;;  %v15796_v50 = vld [vmem:[#allocation80_spill] sm:$0xff] }
 0xcb7   : > { %5853 = vmatprep.mubr.f32.mxu1 %v15781_v1  ;;  %9796 = vmatpush3.bf16.msra.mxu1 %v15757_v36 }
 0xcb8   : > { %6273 = vmatprep.mubr.f32.mxu0 %v14383_v31  ;;  %9798 = vmatprep.subr.bf16.mxu1 %v15758_v44 }
 0xcb9   : > { %9906 = vmatprep.subr.bf16.mxu0 %v14491_v25  ;;  %v15793_v25 = vld [vmem:[#allocation71_spill] sm:$0xff] }
 0xcba   : > { %5854 = vmatmul.mubr.f32.gmra.mrb[98].mxu1 %v15782_v28  ;;  %9908 = vmatpush3.bf16.msra.mxu0 %v14514_v20  ;;  %v7389_v58 = vpop.f32.mrb[74].mxu0  ;;  %v15797_v28 = vld [vmem:[#allocation73_spill] sm:$0xff] }
 0xcbb   : > { %5858 = vmatprep.mubr.f32.mxu1 %v15783_v62  ;;  %9800 = vmatpush3.bf16.msra.mxu1 %v15759_v26  ;;  %v7390_v39 = vpop.f32.mrb[75].mxu0  ;;  %v15798_v62 = vld [vmem:[#allocation74_spill] sm:$0xff] }
 0xcbc   : > { %v14889_v47 = vadd.f32 %v7390_v39, %v7389_v58  ;;  %9802 = vmatprep.subr.bf16.mxu1 %v15760_v12  ;;  %9910 = vmatprep.subr.bf16.mxu0 %v15789_v55  ;;  %v15804_v58 = vld [vmem:[#allocation68_spill] sm:$0xff]  ;;  %v15805_v39 = vmov 0.0   ;;  %v15806_v55 = vld [vmem:[#allocation82_spill] sm:$0xff] }
 0xcbe   : > { %5859 = vmatmul.mubr.f32.gmra.mrb[100].mxu1 %v15785_v35  ;;  %9912 = vmatpush3.bf16.msra.mxu0 %v15790_v40  ;;  %v7392_v23 = vpop.f32.mrb[76].mxu0  ;;  %v15807_v40 = vld [vmem:[#allocation85_spill] sm:$0xff] }
 0xcbf   : > { %5863 = vmatprep.mubr.f32.mxu1 %v15786_v8  ;;  %9804 = vmatpush3.bf16.msra.mxu1 %v15791_v54  ;;  %v7393_v43 = vpop.f32.mrb[77].mxu0 }
 0xcc0   : > { %v14897_v31 = vadd.f32 %v7393_v43, %v7392_v23  ;;  %9806 = vmatprep.subr.bf16.mxu1 %v15792_v32  ;;  %9914 = vmatprep.subr.bf16.mxu0 %v15793_v25  ;;  %v15808_v23 = vld [vmem:[#allocation35_spill] sm:$0xff]  ;;  %v15809_v43 = vld [vmem:[#allocation36_spill] sm:$0xff]  ;;  %v15810_v25 = vld [vmem:[#allocation86_spill] sm:$0xff] }
 0xcc2   : > { %5864 = vmatmul.mubr.f32.gmra.mrb[102].mxu1 %v15787_v18  ;;  %9916 = vmatpush3.bf16.msra.mxu0 %v15794_v11  ;;  %v7395_v20 = vpop.f32.mrb[78].mxu0 }
 0xcc3   : > { %9808 = vmatpush3.bf16.msra.mxu1 %v15795_v17  ;;  %6018 = vmatprep.mubr.f32.mxu1 %v15796_v50  ;;  %v7396_v1 = vpop.f32.mrb[79].mxu0 }
 0xcc4   : > { %v14905_v8 = vadd.f32 %v7396_v1, %v7395_v20  ;;  %9810 = vmatprep.subr.bf16.mxu1 %v15764_v56  ;;  %9918 = vmatprep.subr.bf16.mxu0 %v15797_v28  ;;  %v15811_v20 = vld [vmem:[#allocation88_spill] sm:$0xff]  ;;  %v15812_v1 = vld [vmem:[#allocation37_spill] sm:$0xff] }
 0xcc6   : > { %9920 = vmatpush3.bf16.msra.mxu0 %v15798_v62  ;;  %v7398_v35 = vpop.f32.mrb[80].mxu0 }
 0xcc7   : > { %9812 = vmatpush3.bf16.msra.mxu1 %v15767_v10  ;;  %v7399_v49 = vpop.f32.mrb[81].mxu0 }
 0xcc8   : > { %v14911_v18 = vadd.f32 %v7399_v49, %v7398_v35  ;;  %9814 = vmatprep.subr.bf16.mxu1 %v15799_v0  ;;  %v15814_v49 = vld [vmem:[#allocation90_spill] sm:$0xff] }
 0xcc9   : > { %6274 = vmatmul.mubr.f32.vlgmr.msra.gmra.mrb[122].mxu0 %v15800_v42 }
 0xcca   : > { %6278 = vmatprep.mubr.f32.mxu0 %v15801_v21 }
 0xccb   : > { %9816 = vmatpush3.bf16.msra.mxu1 %v15773_v52 }
 0xccc   : > { %9818 = vmatprep.subr.bf16.mxu1 %v15775_v24 }
 0xccd   : > { %6279 = vmatmul.mubr.f32.gmra.mrb[124].mxu0 %v15802_v61  ;;  %v15815_v61 = vld [vmem:[#allocation91_spill] sm:$0xff] }
 0xcce   : > { %6283 = vmatprep.mubr.f32.mxu0 %v15803_v57 }
 0xccf   : > { %9820 = vmatpush3.bf16.msra.mxu1 %v15776_v33 }
 0xcd0   : > { %9822 = vmatprep.subr.bf16.mxu1 %v15777_v27 }
 0xcd1   : > { %6284 = vmatmul.mubr.f32.gmra.mrb[126].mxu0 %v15804_v58 }
 0xcd2   : > { %6288 = vmatprep.mubr.f32.mxu0 %v15805_v39 }
 0xcd3   : > { %9824 = vmatpush3.bf16.msra.mxu1 %v15778_v4 }
 0xcd4   : > { %9858 = vmatprep.subr.bf16.mxu1 %v15779_v34  ;;  %v15813_v34 = vld [vmem:[#allocation89_spill] sm:$0xff] }
 0xcd5   : > { %6289 = vmatmul.mubr.f32.gmra.mrb[128].mxu0 %v15805_v39 }
 0xcd6   : > { %6019 = vmatmul.mubr.f32.vlgmr.msra.gmra.mrb[104].mxu1 %v15806_v55 }
 0xcd7   : > { %6023 = vmatprep.mubr.f32.mxu1 %v15807_v40  ;;  %9860 = vmatpush3.bf16.msra.mxu1 %v15808_v23 }
 0xcd8   : > { %9862 = vmatprep.subr.bf16.mxu1 %v15809_v43 }
 0xcda   : > { %6024 = vmatmul.mubr.f32.gmra.mrb[106].mxu1 %v15810_v25  ;;  %v7477_v11 = vpop.f32.mrb[82].mxu0 }
 0xcdb   : > { %6028 = vmatprep.mubr.f32.mxu1 %v15811_v20  ;;  %9864 = vmatpush3.bf16.msra.mxu1 %v15812_v1  ;;  %v7478_v28 = vpop.f32.mrb[83].mxu0 }
 0xcdc   : > { %v14934_v62 = vadd.f32 %v7478_v28, %v7477_v11  ;;  %9866 = vmatprep.subr.bf16.mxu1 %v14009_v29  ;;  %v5271_v28 = vadd.f32 %v14911_v18, %v14829_v2 }
 0xcde   : > { %6029 = vmatmul.mubr.f32.gmra.mrb[108].mxu1 %v15813_v34  ;;  %v7480_v35 = vpop.f32.mrb[84].mxu0 }
 0xcdf   : > { %6033 = vmatprep.mubr.f32.mxu1 %v15814_v49  ;;  %9868 = vmatpush3.bf16.msra.mxu1 %v14036_v13  ;;  %v7481_v42 = vpop.f32.mrb[85].mxu0 }
 0xce0   : > { %v14940_v21 = vadd.f32 %v7481_v42, %v7480_v35  ;;  %9870 = vmatprep.subr.bf16.mxu1 %v14049_v5  ;;  %v15816_v5 = vld [vmem:[#allocation83_spill] sm:$0xff] }
 0xce2   : > { %6034 = vmatmul.mubr.f32.gmra.mrb[110].mxu1 %v15815_v61  ;;  %v7483_v57 = vpop.f32.mrb[86].mxu0 }
 0xce3   : > { %9872 = vmatpush3.bf16.msra.mxu1 %v14076_v7  ;;  %6188 = vmatprep.mubr.f32.mxu1 %v15796_v50  ;;  %v7484_v29 = vpop.f32.mrb[87].mxu0 }
 0xce4   : > { %v14946_v58 = vadd.f32 %v7484_v29, %v7483_v57  ;;  %9874 = vmatprep.subr.bf16.mxu1 %v15748_v37 }
 0xce6   : > { %v7486_v39 = vpop.f32.mrb[88].mxu0 }
 0xce7   : > { %9876 = vmatpush3.bf16.msra.mxu1 %v15749_v63  ;;  %v7487_v13 = vpop.f32.mrb[89].mxu0 }
 0xce8   : > { %v14950_v23 = vadd.f32 %v7487_v13, %v7486_v39  ;;  %9878 = vmatprep.subr.bf16.mxu1 %v15750_v14 }
 0xceb   : > { %9880 = vmatpush3.bf16.msra.mxu1 %v15751_v15 }
 0xcec   : > { %9882 = vmatprep.subr.bf16.mxu1 %v15752_v9 }
 0xcef   : > { %9884 = vmatpush3.bf16.msra.mxu1 %v15753_v38  ;;  %v5037_v38 = vadd.f32 %v14857_v3, %v14829_v2 }
 0xcf0   : > { %9886 = vmatprep.subr.bf16.mxu1 %v15754_v53 }
 0xcf3   : > { %9888 = vmatpush3.bf16.msra.mxu1 %v15755_v46 }
 0xcf4   : > { %9922 = vmatprep.subr.bf16.mxu1 %v15756_v48 }
 0xcf6   : > { %6189 = vmatmul.mubr.f32.vlgmr.msra.gmra.mrb[112].mxu1 %v15806_v55 }
 0xcf7   : > { %6193 = vmatprep.mubr.f32.mxu1 %v15807_v40  ;;  %9924 = vmatpush3.bf16.msra.mxu1 %v15757_v36 }
 0xcf8   : > { %9926 = vmatprep.subr.bf16.mxu1 %v15758_v44 }
 0xcfa   : > { %6194 = vmatmul.mubr.f32.gmra.mrb[114].mxu1 %v15810_v25  ;;  %v5266_v25 = vadd.f32 %v14905_v8, %v14829_v2 }
 0xcfb   : > { %6198 = vmatprep.mubr.f32.mxu1 %v15811_v20  ;;  %9928 = vmatpush3.bf16.msra.mxu1 %v15759_v26 }
 0xcfc   : > { %9930 = vmatprep.subr.bf16.mxu1 %v15760_v12 }
 0xcfe   : > { %6199 = vmatmul.mubr.f32.gmra.mrb[116].mxu1 %v15813_v34 }
 0xcff   : > { %6203 = vmatprep.mubr.f32.mxu1 %v15814_v49  ;;  %9932 = vmatpush3.bf16.msra.mxu1 %v15791_v54 }
 0xd00   : > { %9934 = vmatprep.subr.bf16.mxu1 %v15792_v32 }
 0xd02   : > { %6204 = vmatmul.mubr.f32.gmra.mrb[118].mxu1 %v15815_v61 }
 0xd03   : > { %9936 = vmatpush3.bf16.msra.mxu1 %v15795_v17  ;;  %6358 = vmatprep.mubr.f32.mxu1 %v15816_v5 }
 0xd04   : > { %9938 = vmatprep.subr.bf16.mxu1 %v15764_v56 }
 0xd07   : > { %9940 = vmatpush3.bf16.msra.mxu1 %v15767_v10 }
 0xd08   : > { %9942 = vmatprep.subr.bf16.mxu1 %v15799_v0  ;;  %v5261_v0 = vadd.f32 %v14897_v31, %v14829_v2 }
 0xd0b   : > { %9944 = vmatpush3.bf16.msra.mxu1 %v15773_v52 }
 0xd0c   : > { %9946 = vmatprep.subr.bf16.mxu1 %v15775_v24  ;;  %v5027_v24 = vadd.f32 %v14843_v19, %v14829_v2 }
 0xd0f   : > { %9948 = vmatpush3.bf16.msra.mxu1 %v15776_v33 }
 0xd10   : > { %9950 = vmatprep.subr.bf16.mxu1 %v15777_v27 }
 0xd13   : > { %9952 = vmatpush3.bf16.msra.mxu1 %v15778_v4 }
 0xd16   : > { %6359 = vmatmul.mubr.f32.vlgmr.msra.gmra.mrb[120].mxu1 %v15770_v30 }
 0xd17   : > { %6363 = vmatprep.mubr.f32.mxu1 %v15771_v59 }
 0xd1a   : > { %6364 = vmatmul.mubr.f32.gmra.mrb[122].mxu1 %v14671_v41 }
 0xd1b   : > { %6368 = vmatprep.mubr.f32.mxu1 %v14685_v16 }
 0xd1c   : > { %v7565_v7 = vpop.f32.mrb[90].mxu0 }
 0xd1d   : > { %v7348_v9 = vpop.f32.mrb[66].mxu1  ;;  %v7566_v56 = vpop.f32.mrb[91].mxu0 }
 0xd1e   : > { %6369 = vmatmul.mubr.f32.gmra.mrb[124].mxu1 %v14691_v6  ;;  %v7349_v52 = vpop.f32.mrb[67].mxu1  ;;  %v14987_v10 = vadd.f32 %v7566_v56, %v7565_v7  ;;  %v5032_v6 = vadd.f32 %v14851_v51, %v14829_v2  ;;  %v5256_v51 = vadd.f32 %v14889_v47, %v14829_v2 }
 0xd1f   : > { %v7350_v33 = vadd.f32 %v7349_v52, %v7348_v9  ;;  %6373 = vmatprep.mubr.f32.mxu1 %v14803_v22  ;;  %v5426_v52 = vadd.f32 %v14934_v62, %v14829_v2 }
 0xd20   : > { %v7568_v30 = vpop.f32.mrb[92].mxu0 }
 0xd21   : > { %v14992_v59 = vadd.f32 %v7350_v33, %v5027_v24  ;;  %v7351_v14 = vpop.f32.mrb[68].mxu1  ;;  %v7569_v46 = vpop.f32.mrb[93].mxu0 }
 0xd22   : > { %6374 = vmatmul.mubr.f32.gmra.mrb[126].mxu1 %v14809_v60  ;;  %v7352_v48 = vpop.f32.mrb[69].mxu1  ;;  %v14995_v41 = vadd.f32 %v7569_v46, %v7568_v30  ;;  %v5431_v46 = vadd.f32 %v14940_v21, %v14829_v2 }
 0xd23   : > { %v7353_v36 = vadd.f32 %v7352_v48, %v7351_v14 }
 0xd24   : > { %v7571_v16 = vpop.f32.mrb[94].mxu0 }
 0xd25   : > { %v14999_v44 = vadd.f32 %v7353_v36, %v5032_v6  ;;  %v7354_v26 = vpop.f32.mrb[70].mxu1  ;;  %v7572_v37 = vpop.f32.mrb[95].mxu0 }
 0xd26   : > { %v7355_v63 = vpop.f32.mrb[71].mxu1  ;;  %v15001_v15 = vadd.f32 %v7572_v37, %v7571_v16 }
 0xd27   : > { %v7356_v53 = vadd.f32 %v7355_v63, %v7354_v26  ;;  %v5436_v26 = vadd.f32 %v14946_v58, %v14829_v2 }
 0xd28   : > { %v7574_v12 = vpop.f32.mrb[96].mxu0 }
 0xd29   : > { %v15005_v22 = vadd.f32 %v7356_v53, %v5037_v38  ;;  %v7433_v27 = vpop.f32.mrb[72].mxu1  ;;  %v7575_v60 = vpop.f32.mrb[97].mxu0  ;;  %v5441_v53 = vadd.f32 %v14950_v23, %v14829_v2 }
 0xd2a   : > { %v7434_v4 = vpop.f32.mrb[73].mxu1  ;;  %v15007_v19 = vadd.f32 %v7575_v60, %v7574_v12 }
 0xd2b   : > { %v7435_v54 = vadd.f32 %v7434_v4, %v7433_v27 }
 0xd2d   : > { %v5341_v32 = vadd.f32 %v7435_v54, %v5256_v51  ;;  %v7436_v17 = vpop.f32.mrb[74].mxu1 }
 0xd2e   : > { %v7437_v50 = vpop.f32.mrb[75].mxu1 }
 0xd2f   : > { %v7438_v3 = vadd.f32 %v7437_v50, %v7436_v17  ;;  %6383 = vrot.lane.b32.xlu1 %v5341_v32, %s10735_s11 }
 0xd31   : > { %v5346_v55 = vadd.f32 %v7438_v3, %v5261_v0  ;;  %v7439_v40 = vpop.f32.mrb[76].mxu1 }
 0xd32   : > { %v7440_v43 = vpop.f32.mrb[77].mxu1 }
 0xd33   : > { %v7441_v11 = vadd.f32 %v7440_v43, %v7439_v40  ;;  %6385 = vrot.lane.b32.xlu1 %v5346_v55, %s10735_s11  ;;  %v5596_v43 = vadd.f32 %v14987_v10, %v14829_v2 }
 0xd35   : > { %v5351_v47 = vadd.f32 %v7441_v11, %v5266_v25  ;;  %v7442_v20 = vpop.f32.mrb[78].mxu1 }
 0xd36   : > { %v7443_v1 = vpop.f32.mrb[79].mxu1 }
 0xd37   : > { %v7444_v34 = vadd.f32 %v7443_v1, %v7442_v20  ;;  %6387 = vrot.lane.b32.xlu1 %v5351_v47, %s10735_s11  ;;  %v5601_v1 = vadd.f32 %v14995_v41, %v14829_v2 }
 0xd39   : > { %v5356_v31 = vadd.f32 %v7444_v34, %v5271_v28 }
 0xd3b   : > { %6389 = vrot.lane.b32.xlu1 %v5356_v31, %s10735_s11 }
 0xd3c   : > { %v7653_v35 = vpop.f32.mrb[98].mxu0 }
 0xd3d   : > { %v7654_v49 = vpop.f32.mrb[99].mxu0 }
 0xd3e   : > { %v15021_v42 = vadd.f32 %v7654_v49, %v7653_v35  ;;  %v5606_v49 = vadd.f32 %v15001_v15, %v14829_v2 }
 0xd40   : > { %v7656_v8 = vpop.f32.mrb[100].mxu0 }
 0xd41   : > { %v7657_v61 = vpop.f32.mrb[101].mxu0 }
 0xd42   : > { %v15023_v57 = vadd.f32 %v7657_v61, %v7656_v8 }
 0xd44   : > { %v7659_v29 = vpop.f32.mrb[102].mxu0 }
 0xd45   : > { %v7660_v39 = vpop.f32.mrb[103].mxu0 }
 0xd46   : > { %v15025_v13 = vadd.f32 %v7660_v39, %v7659_v29  ;;  %v5611_v39 = vadd.f32 %v15007_v19, %v14829_v2 }
 0xd48   : > { %v7662_v5 = vpop.f32.mrb[104].mxu0 }
 0xd49   : > { %v7521_v18 = vpop.f32.mrb[80].mxu1  ;;  %v7663_v7 = vpop.f32.mrb[105].mxu0 }
 0xd4a   : > { %v7522_v9 = vpop.f32.mrb[81].mxu1  ;;  %v15027_v56 = vadd.f32 %v7663_v7, %v7662_v5 }
 0xd4b   : > { %v7523_v24 = vadd.f32 %v7522_v9, %v7521_v18 }
 0xd4d   : > { %v5511_v33 = vadd.f32 %v7523_v24, %v5426_v52  ;;  %v7524_v30 = vpop.f32.mrb[82].mxu1 }
 0xd4e   : > { %v7525_v14 = vpop.f32.mrb[83].mxu1 }
 0xd4f   : > { %v7526_v48 = vadd.f32 %v7525_v14, %v7524_v30  ;;  %6399 = vrot.lane.b32.xlu0 %v5511_v33, %s15817_s14 }
 0xd51   : > { %v5516_v6 = vadd.f32 %v7526_v48, %v5431_v46  ;;  %v7527_v36 = vpop.f32.mrb[84].mxu1 }
 0xd52   : > { %v7528_v16 = vpop.f32.mrb[85].mxu1 }
 0xd53   : > { %v7529_v37 = vadd.f32 %v7528_v16, %v7527_v36  ;;  %6401 = vrot.lane.b32.xlu0 %v5516_v6, %s15817_s14  ;;  %v5766_v16 = vadd.f32 %v15021_v42, %v14829_v2 }
 0xd55   : > { %v5521_v62 = vadd.f32 %v7529_v37, %v5436_v26  ;;  %v7530_v63 = vpop.f32.mrb[86].mxu1 }
 0xd56   : > { %v7531_v38 = vpop.f32.mrb[87].mxu1 }
 0xd57   : > { %v7532_v12 = vadd.f32 %v7531_v38, %v7530_v63  ;;  %6403 = vrot.lane.b32.xlu0 %v5521_v62, %s15817_s14  ;;  %v5771_v38 = vadd.f32 %v15023_v57, %v14829_v2 }
 0xd59   : > { %v5526_v21 = vadd.f32 %v7532_v12, %v5441_v53 }
 0xd5b   : > { %6405 = vrot.lane.b32.xlu1 %v5526_v21, %s15817_s14 }
 0xd5c   : > { %v7741_v27 = vpop.f32.mrb[106].mxu0 }
 0xd5d   : > { %v7742_v60 = vpop.f32.mrb[107].mxu0 }
 0xd5e   : > { %v15041_v4 = vadd.f32 %v7742_v60, %v7741_v27  ;;  %v5776_v60 = vadd.f32 %v15025_v13, %v14829_v2 }
 0xd60   : > { %v7744_v58 = vpop.f32.mrb[108].mxu0 }
 0xd61   : > { %v7745_v51 = vpop.f32.mrb[109].mxu0 }
 0xd62   : > { %v15043_v54 = vadd.f32 %v7745_v51, %v7744_v58 }
 0xd64   : > { %v7747_v32 = vpop.f32.mrb[110].mxu0 }
 0xd65   : > { %v7748_v17 = vpop.f32.mrb[111].mxu0 }
 0xd66   : > { %v15045_v50 = vadd.f32 %v7748_v17, %v7747_v32  ;;  %v5781_v17 = vadd.f32 %v15027_v56, %v14829_v2 }
 0xd68   : > { %v7750_v0 = vpop.f32.mrb[112].mxu0 }
 0xd69   : > { %v7609_v23 = vpop.f32.mrb[88].mxu1  ;;  %v7751_v3 = vpop.f32.mrb[113].mxu0 }
 0xd6a   : > { %v7610_v55 = vpop.f32.mrb[89].mxu1  ;;  %v15047_v40 = vadd.f32 %v7751_v3, %v7750_v0 }
 0xd6b   : > { %v7611_v25 = vadd.f32 %v7610_v55, %v7609_v23 }
 0xd6d   : > { %v5681_v11 = vadd.f32 %v7611_v25, %v5596_v43  ;;  %v7612_v47 = vpop.f32.mrb[90].mxu1 }
 0xd6e   : > { %v7613_v20 = vpop.f32.mrb[91].mxu1 }
 0xd6f   : > { %v7614_v28 = vadd.f32 %v7613_v20, %v7612_v47  ;;  %6415 = vrot.lane.b32.xlu1 %v5681_v11, %s15818_s29 }
 0xd71   : > { %v5686_v34 = vadd.f32 %v7614_v28, %v5601_v1  ;;  %v7615_v31 = vpop.f32.mrb[92].mxu1 }
 0xd72   : > { %v7616_v35 = vpop.f32.mrb[93].mxu1 }
 0xd73   : > { %v7617_v8 = vadd.f32 %v7616_v35, %v7615_v31  ;;  %6417 = vrot.lane.b32.xlu1 %v5686_v34, %s15818_s29 }
 0xd75   : > { %v5691_v10 = vadd.f32 %v7617_v8, %v5606_v49  ;;  %v7618_v61 = vpop.f32.mrb[94].mxu1  ;;  %v5936_v8 = vadd.f32 %v15041_v4, %v14829_v2  ;;  %v5946_v4 = vadd.f32 %v15045_v50, %v14829_v2 }
 0xd76   : > { %v7619_v29 = vpop.f32.mrb[95].mxu1 }
 0xd77   : > { %v7620_v5 = vadd.f32 %v7619_v29, %v7618_v61  ;;  %6419 = vrot.lane.b32.xlu0 %v5691_v10, %s15818_s29 }
 0xd79   : > { %v15060_v41 = vadd.f32 %v7620_v5, %v5611_v39 }
 0xd7c   : > { %v7829_v18 = vpop.f32.mrb[114].mxu0 }
 0xd7d   : > { %v7830_v7 = vpop.f32.mrb[115].mxu0 }
 0xd7e   : > { %v15062_v9 = vadd.f32 %v7830_v7, %v7829_v18 }
 0xd80   : > { %v7832_v52 = vpop.f32.mrb[116].mxu0  ;;  %v6106_v50 = vadd.f32 %v15062_v9, %v14829_v2 }
 0xd81   : > { %v7833_v15 = vpop.f32.mrb[117].mxu0 }
 0xd82   : > { %v15064_v24 = vadd.f32 %v7833_v15, %v7832_v52  ;;  %v5941_v52 = vadd.f32 %v15043_v54, %v14829_v2 }
 0xd84   : > { %v7835_v33 = vpop.f32.mrb[118].mxu0 }
 0xd85   : > { %v7836_v30 = vpop.f32.mrb[119].mxu0 }
 0xd86   : > { %v15066_v14 = vadd.f32 %v7836_v30, %v7835_v33 }
 0xd88   : > { %v7838_v46 = vpop.f32.mrb[120].mxu0  ;;  %v6116_v9 = vadd.f32 %v15066_v14, %v14829_v2 }
 0xd89   : > { %v7697_v48 = vpop.f32.mrb[96].mxu1  ;;  %v7839_v19 = vpop.f32.mrb[121].mxu0 }
 0xd8a   : > { %v7698_v6 = vpop.f32.mrb[97].mxu1  ;;  %v15068_v36 = vadd.f32 %v7839_v19, %v7838_v46 }
 0xd8b   : > { %v7699_v26 = vadd.f32 %v7698_v6, %v7697_v48 }
 0xd8d   : > { %v15072_v37 = vadd.f32 %v7699_v26, %v5766_v16  ;;  %v7700_v62 = vpop.f32.mrb[98].mxu1 }
 0xd8e   : > { %v7701_v63 = vpop.f32.mrb[99].mxu1 }
 0xd8f   : > { %v7702_v53 = vadd.f32 %v7701_v63, %v7700_v62 }
 0xd91   : > { %v15076_v12 = vadd.f32 %v7702_v53, %v5771_v38  ;;  %v7703_v21 = vpop.f32.mrb[100].mxu1 }
 0xd92   : > { %v7704_v27 = vpop.f32.mrb[101].mxu1 }
 0xd93   : > { %v7705_v58 = vadd.f32 %v7704_v27, %v7703_v21 }
 0xd95   : > { %v15080_v51 = vadd.f32 %v7705_v58, %v5776_v60  ;;  %v7706_v42 = vpop.f32.mrb[102].mxu1 }
 0xd96   : > { %v7707_v32 = vpop.f32.mrb[103].mxu1 }
 0xd97   : > { %v7708_v0 = vadd.f32 %v7707_v32, %v7706_v42 }
 0xd99   : > { %v15084_v23 = vadd.f32 %v7708_v0, %v5781_v17 }
 0xd9c   : > { %v7917_v57 = vpop.f32.mrb[122].mxu0 }
 0xd9d   : > { %v7918_v3 = vpop.f32.mrb[123].mxu0 }
 0xd9e   : > { %v15086_v55 = vadd.f32 %v7918_v3, %v7917_v57 }
 0xda0   : > { %v7920_v43 = vpop.f32.mrb[124].mxu0 }
 0xda1   : > { %v7921_v25 = vpop.f32.mrb[125].mxu0  ;;  %v15088_v11 = vpop.permute.xlu1 %6383 }
 0xda2   : > { %v15090_v13 = vadd.f32 %v7921_v25, %v7920_v43  ;;  %v6475_v14 = vsel %vm1120_vm0, %v14839_v45, %v15088_v11 }
 0xda4   : > { %v7923_v47 = vpop.f32.mrb[126].mxu0 }
 0xda5   : > { %v7924_v20 = vpop.f32.mrb[127].mxu0  ;;  %v15092_v1 = vpop.permute.xlu1 %6385 }
 0xda6   : > { %v15094_v28 = vadd.f32 %v7924_v20, %v7923_v47  ;;  %v6121_v47 = vadd.f32 %v15068_v36, %v14829_v2 }
 0xda8   : > { %v7926_v56 = vpop.f32.mrb[128].mxu0 }
 0xda9   : > { %v7785_v34 = vpop.f32.mrb[104].mxu1  ;;  %v15096_v31 = vpop.permute.xlu1 %6387 }
 0xdaa   : > { %v7786_v35 = vpop.f32.mrb[105].mxu1  ;;  %v7927_v49 = vpop.f32.mrb[129].mxu0  ;;  %v6477_v11 = vsel %vm1120_vm0, %v14999_v44, %v15096_v31  ;;  %v6281_v44 = vadd.f32 %v15090_v13, %v14829_v2 }
 0xdab   : > { %v7787_v10 = vadd.f32 %v7786_v35, %v7785_v34  ;;  %v15100_v61 = vadd.f32 %v7927_v49, %v7926_v56 }
 0xdad   : > { %v6021_v29 = vadd.f32 %v7787_v10, %v5936_v8  ;;  %v7788_v39 = vpop.f32.mrb[106].mxu1  ;;  %v6390_v5 = vpop.permute.xlu1 %6389  ;;  %v6476_v10 = vsel %vm1120_vm0, %v14992_v59, %v15092_v1 }
 0xdae   : > { %v7789_v18 = vpop.f32.mrb[107].mxu1  ;;  %v6478_v7 = vsel %vm1120_vm0, %v15005_v22, %v6390_v5  ;;  %v5951_v22 = vadd.f32 %v15047_v40, %v14829_v2  ;;  %v6111_v40 = vadd.f32 %v15064_v24, %v14829_v2 }
 0xdaf   : > { %v7790_v15 = vadd.f32 %v7789_v18, %v7788_v39  ;;  %6431 = vrot.lane.b32.xlu0 %v6021_v29, %s10735_s11 }
 0xdb1   : > { %v6026_v33 = vadd.f32 %v7790_v15, %v5941_v52  ;;  %v7791_v30 = vpop.f32.mrb[108].mxu1 }
 0xdb2   : > { %v7792_v46 = vpop.f32.mrb[109].mxu1 }
 0xdb3   : > { %v7793_v48 = vadd.f32 %v7792_v46, %v7791_v30  ;;  %6433 = vrot.lane.b32.xlu1 %v6026_v33, %s10735_s11  ;;  %v6276_v30 = vadd.f32 %v15086_v55, %v14829_v2 }
 0xdb5   : > { %v6031_v19 = vadd.f32 %v7793_v48, %v5946_v4  ;;  %v7794_v6 = vpop.f32.mrb[110].mxu1 }
 0xdb6   : > { %v7795_v16 = vpop.f32.mrb[111].mxu1 }
 0xdb7   : > { %v7796_v26 = vadd.f32 %v7795_v16, %v7794_v6  ;;  %6435 = vrot.lane.b32.xlu0 %v6031_v19, %s10735_s11 }
 0xdb9   : > { %v6036_v54 = vadd.f32 %v7796_v26, %v5951_v22 }
 0xdbb   : > { %6437 = vrot.lane.b32.xlu0 %v6036_v54, %s10735_s11  ;;  %s6805_s11 = sshll.u32 %s10893_s30, 2 }
 0xdbc   : > { %p1030_p13 = scmp.lt.s32.totalorder %s6805_s11, 7 }
 0xdbe   : > { %s15824_s11 = smov (!%p1030_p13, %s6805_s11), 7 }
 0xdbf   : > { %s6825_s30 = sshll.u32 %s15824_s11, 4 }
 0xdc0   : > { %s15162_s10 = scalar_lea.vmem %s15819_s8, %s6825_s30 }
 0xdc1   : > { %v6400_v24 = vpop.permute.xlu0 %6399 }
 0xdc2   : > { %v6479_v35 = vsel %vm1125_vm1, %v6475_v14, %v6400_v24 }
 0xdc5   : > { %v6402_v34 = vpop.permute.xlu0 %6401 }
 0xdc6   : > { %v6480_v29 = vsel %vm1125_vm1, %v6476_v10, %v6402_v34 }
 0xdc9   : > { %v7873_v62 = vpop.f32.mrb[112].mxu1  ;;  %v6404_v39 = vpop.permute.xlu0 %6403 }
 0xdca   : > { %v7874_v63 = vpop.f32.mrb[113].mxu1 }
 0xdcb   : > { %v7875_v38 = vadd.f32 %v7874_v63, %v7873_v62  ;;  %v6286_v63 = vadd.f32 %v15094_v28, %v14829_v2 }
 0xdcd   : > { %v6191_v53 = vadd.f32 %v7875_v38, %v6106_v50  ;;  %v7876_v21 = vpop.f32.mrb[114].mxu1  ;;  %v6406_v27 = vpop.permute.xlu1 %6405 }
 0xdce   : > { %v15117_v60 = vsel %vm1125_vm1, %v6478_v7, %v6406_v27  ;;  %v7877_v58 = vpop.f32.mrb[115].mxu1  ;;  %v6481_v7 = vsel %vm1125_vm1, %v6477_v11, %v6404_v39 }
 0xdcf   : > { %v7878_v42 = vadd.f32 %v7877_v58, %v7876_v21  ;;  %6447 = vrot.lane.b32.xlu0 %v6191_v53, %s15817_s14  ;;  %v6291_v53 = vadd.f32 %v15100_v61, %v14829_v2 }
 0xdd1   : > { %v6196_v32 = vadd.f32 %v7878_v42, %v6111_v40  ;;  %v7879_v17 = vpop.f32.mrb[116].mxu1 }
 0xdd2   : > { %v7880_v0 = vpop.f32.mrb[117].mxu1 }
 0xdd3   : > { %v7881_v57 = vadd.f32 %v7880_v0, %v7879_v17  ;;  %6449 = vrot.lane.b32.xlu1 %v6196_v32, %s15817_s14 }
 0xdd5   : > { %v6201_v3 = vadd.f32 %v7881_v57, %v6116_v9  ;;  %v7882_v43 = vpop.f32.mrb[118].mxu1 }
 0xdd6   : > { %v7883_v25 = vpop.f32.mrb[119].mxu1 }
 0xdd7   : > { %v7884_v20 = vadd.f32 %v7883_v25, %v7882_v43  ;;  %6451 = vrot.lane.b32.xlu1 %v6201_v3, %s15817_s14 }
 0xdd9   : > { %v6206_v56 = vadd.f32 %v7884_v20, %v6121_v47 }
 0xddb   : > { %6453 = vrot.lane.b32.xlu1 %v6206_v56, %s15817_s14 }
 0xddf   : > { %6421 = vrot.lane.b32.xlu1 %v15060_v41, %s15818_s29 }
 0xde1   : > { %v6416_v49 = vpop.permute.xlu1 %6415 }
 0xde2   : > { %v6483_v36 = vsel %vm1130_vm2, %v6479_v35, %v6416_v49 }
 0xde3   : > { %v6499_v8 = vsub.f32 0.0, %v6483_v36 }
 0xde5   : > { %v6507_v5 = vmul.f32 1.442695, %v6499_v8  ;;  %v6418_v18 = vpop.permute.xlu1 %6417 }
 0xde6   : > { %v6484_v41 = vsel %vm1130_vm2, %v6480_v29, %v6418_v18 }
 0xde7   : > { %10313 = vpow2.f32 %v6507_v5  ;;  %v6501_v45 = vsub.f32 0.0, %v6484_v41 }
 0xde9   : > { %v6511_v52 = vmul.f32 1.442695, %v6501_v45  ;;  %v7961_v15 = vpop.f32.mrb[120].mxu1  ;;  %v6420_v33 = vpop.permute.xlu0 %6419 }
 0xdea   : > { %v6485_v59 = vsel %vm1130_vm2, %v6481_v7, %v6420_v33  ;;  %v7962_v1 = vpop.f32.mrb[121].mxu1 }
 0xdeb   : > { %10315 = vpow2.f32 %v6511_v52  ;;  %v6503_v46 = vsub.f32 0.0, %v6485_v59  ;;  %v7963_v4 = vadd.f32 %v7962_v1, %v7961_v15 }
 0xded   : > { %v6515_v48 = vmul.f32 1.442695, %v6503_v46  ;;  %v6361_v19 = vadd.f32 %v7963_v4, %v6276_v30  ;;  %v7964_v6 = vpop.f32.mrb[122].mxu1 }
 0xdee   : > { %v7965_v16 = vpop.f32.mrb[123].mxu1 }
 0xdef   : > { %10317 = vpow2.f32 %v6515_v48  ;;  %v7966_v31 = vadd.f32 %v7965_v16, %v7964_v6  ;;  %6463 = vrot.lane.b32.xlu0 %v6361_v19, %s15818_s29 }
 0xdf1   : > { %v10314_v22 = vpop.eup %10313  ;;  %v6366_v26 = vadd.f32 %v7966_v31, %v6281_v44  ;;  %v7967_v54 = vpop.f32.mrb[124].mxu1 }
 0xdf2   : > { %v6523_v55 = vadd.f32 1.0, %v10314_v22  ;;  %v7968_v62 = vpop.f32.mrb[125].mxu1 }
 0xdf3   : > { %v7969_v50 = vadd.f32 %v7968_v62, %v7967_v54  ;;  %6465 = vrot.lane.b32.xlu0 %v6366_v26, %s15818_s29 }
 0xdf4   : > { %10319 = vrcp.f32 %v6523_v55 }
 0xdf5   : > { %v10316_v38 = vpop.eup %10315  ;;  %v6371_v13 = vadd.f32 %v7969_v50, %v6286_v63  ;;  %v7970_v21 = vpop.f32.mrb[126].mxu1 }
 0xdf6   : > { %v6525_v27 = vadd.f32 1.0, %v10316_v38  ;;  %v7971_v58 = vpop.f32.mrb[127].mxu1 }
 0xdf7   : > { %v7972_v40 = vadd.f32 %v7971_v58, %v7970_v21  ;;  %6467 = vrot.lane.b32.xlu0 %v6371_v13, %s15818_s29 }
 0xdf8   : > { %10321 = vrcp.f32 %v6525_v27 }
 0xdf9   : > { %v10318_v42 = vpop.eup %10317  ;;  %v6376_v28 = vadd.f32 %v7972_v40, %v6291_v53 }
 0xdfa   : > { %v6527_v32 = vadd.f32 1.0, %v10318_v42 }
 0xdfb   : > { %6469 = vrot.lane.b32.xlu0 %v6376_v28, %s15818_s29 }
 0xdfc   : > { %10323 = vrcp.f32 %v6527_v32 }
 0xdfe   : > { %v10320_v2 = vpop.eup %10319 }
 0xdff   : > { %6547 = vst [vmem:[%s15162_s10] sm:$0xff] %v10320_v2 }
 0xe02   : > { %v10322_v61 = vpop.eup %10321 }
 0xe03   : > { %6549 = vst [vmem:[%s15162_s10 + $0x10] sm:$0xff] %v10322_v61 }
 0xe06   : > { %v10324_v17 = vpop.eup %10323 }
 0xe07   : > { %6551 = vst [vmem:[%s15162_s10 + $0x20] sm:$0xff] %v10324_v17 }
 0xe21   : > { %v6432_v43 = vpop.permute.xlu0 %6431 }
 0xe22   : > { %v6487_v35 = vsel %vm1120_vm0, %v15072_v37, %v6432_v43 }
 0xe25   : > { %v6434_v0 = vpop.permute.xlu1 %6433 }
 0xe29   : > { %v6436_v20 = vpop.permute.xlu0 %6435 }
 0xe2a   : > { %v6489_v11 = vsel %vm1120_vm0, %v15080_v51, %v6436_v20 }
 0xe2d   : > { %v6438_v34 = vpop.permute.xlu0 %6437 }
 0xe2e   : > { %v6490_v59 = vsel %vm1120_vm0, %v15084_v23, %v6438_v34 }
 0xe41   : > { %v6448_v14 = vpop.permute.xlu0 %6447 }
 0xe42   : > { %v6491_v36 = vsel %vm1125_vm1, %v6487_v35, %v6448_v14 }
 0xe45   : > { %v6450_v9 = vpop.permute.xlu1 %6449 }
 0xe49   : > { %v6452_v57 = vpop.permute.xlu1 %6451 }
 0xe4a   : > { %v6493_v7 = vsel %vm1125_vm1, %v6489_v11, %v6452_v57 }
 0xe4d   : > { %v6454_v3 = vpop.permute.xlu1 %6453 }
 0xe4e   : > { %v6494_v1 = vsel %vm1125_vm1, %v6490_v59, %v6454_v3 }
 0xe51   : > { %v6422_v25 = vpop.permute.xlu1 %6421 }
 0xe52   : > { %v6486_v47 = vsel %vm1130_vm2, %v15117_v60, %v6422_v25  ;;  %v6488_v60 = vsel %vm1120_vm0, %v15076_v12, %v6434_v0 }
 0xe53   : > { %v6505_v24 = vsub.f32 0.0, %v6486_v47  ;;  %v6492_v5 = vsel %vm1125_vm1, %v6488_v60, %v6450_v9 }
 0xe55   : > { %v6519_v56 = vmul.f32 1.442695, %v6505_v24 }
 0xe57   : > { %10325 = vpow2.f32 %v6519_v56 }
 0xe61   : > { %v10326_v49 = vpop.eup %10325  ;;  %v6464_v8 = vpop.permute.xlu0 %6463 }
 0xe62   : > { %v6529_v10 = vadd.f32 1.0, %v10326_v49  ;;  %v6495_v29 = vsel %vm1130_vm2, %v6491_v36, %v6464_v8 }
 0xe63   : > { %v6500_v39 = vsub.f32 0.0, %v6495_v29 }
 0xe64   : > { %10327 = vrcp.f32 %v6529_v10 }
 0xe65   : > { %v6509_v18 = vmul.f32 1.442695, %v6500_v39  ;;  %v6466_v41 = vpop.permute.xlu0 %6465 }
 0xe66   : > { %v6496_v45 = vsel %vm1130_vm2, %v6492_v5, %v6466_v41 }
 0xe67   : > { %10329 = vpow2.f32 %v6509_v18  ;;  %v6502_v37 = vsub.f32 0.0, %v6496_v45 }
 0xe69   : > { %v6513_v52 = vmul.f32 1.442695, %v6502_v37  ;;  %v6468_v15 = vpop.permute.xlu0 %6467 }
 0xe6a   : > { %v6497_v33 = vsel %vm1130_vm2, %v6493_v7, %v6468_v15 }
 0xe6b   : > { %10331 = vpow2.f32 %v6513_v52  ;;  %v6504_v12 = vsub.f32 0.0, %v6497_v33 }
 0xe6d   : > { %v6517_v30 = vmul.f32 1.442695, %v6504_v12  ;;  %v6470_v46 = vpop.permute.xlu0 %6469 }
 0xe6e   : > { %v10328_v4 = vpop.eup %10327  ;;  %v6498_v48 = vsel %vm1130_vm2, %v6494_v1, %v6470_v46 }
 0xe6f   : > { %6553 = vst [vmem:[%s15162_s10 + $0x30] sm:$0xff] %v10328_v4  ;;  %10333 = vpow2.f32 %v6517_v30  ;;  %v6506_v51 = vsub.f32 0.0, %v6498_v48 }
 0xe71   : > { %v10330_v19 = vpop.eup %10329  ;;  %v6521_v6 = vmul.f32 1.442695, %v6506_v51 }
 0xe72   : > { %v6524_v16 = vadd.f32 1.0, %v10330_v19 }
 0xe73   : > { %10335 = vpow2.f32 %v6521_v6 }
 0xe74   : > { %10337 = vrcp.f32 %v6524_v16 }
 0xe75   : > { %v10332_v44 = vpop.eup %10331 }
 0xe76   : > { %v6526_v23 = vadd.f32 1.0, %v10332_v44 }
 0xe78   : > { %10339 = vrcp.f32 %v6526_v23 }
 0xe79   : > { %v10334_v31 = vpop.eup %10333 }
 0xe7a   : > { %v6528_v22 = vadd.f32 1.0, %v10334_v31 }
 0xe7c   : > { %10341 = vrcp.f32 %v6528_v22 }
 0xe7d   : > { %v10336_v26 = vpop.eup %10335 }
 0xe7e   : > { %v10338_v54 = vpop.eup %10337  ;;  %v6530_v55 = vadd.f32 1.0, %v10336_v26 }
 0xe7f   : > { %6548 = vst [vmem:[%s15162_s10 + $0x8] sm:$0xff] %v10338_v54 }
 0xe80   : > { %10343 = vrcp.f32 %v6530_v55 }
 0xe82   : > { %v10340_v62 = vpop.eup %10339 }
 0xe83   : > { %6550 = vst [vmem:[%s15162_s10 + $0x18] sm:$0xff] %v10340_v62 }
 0xe86   : > { %v10342_v63 = vpop.eup %10341 }
 0xe87   : > { %6552 = vst [vmem:[%s15162_s10 + $0x28] sm:$0xff] %v10342_v63 }
 0xe8a   : > { %v10344_v50 = vpop.eup %10343 }
 0xe8b   : > { %6554 = vst [vmem:[%s15162_s10 + $0x38] sm:$0xff] %v10344_v50 }
 0xe8c PF: > { %s15820_s4 = sld [smem:[#allocation28_spill]] }
 0xe92   : > { %s46_s8 = sadd.s32 1, %s15820_s4  }
 0xe93   : > { %p43_p0 = scmp.ge.s32.totalorder %s46_s8, 4  }
 0xe95   :  { %45 = sbr.rel (!%p43_p0) target bundleno = 26 (0x1a), region = 222 }
 0xe9c   :  { %6593 = vsyncpa [#allocation3], 1 }
 0xe9d   :  { %6595 = vsyncpa [#allocation3 + $0x1], 1 }
 0xe9e   :  { %6596 = vsyncpa [#allocation5], 1 }
 0xe9f   :  { %6597 = vsyncpa [#allocation8], 1 }
 0xea0   :  { %6598 = vsyncpa [#allocation11], 1 }
 0xea1   :  { %6599 = vsyncpa [#allocation14], 1 }
 0xea2   :  { %6600 = vsyncpa [#allocation17], 1 }
 0xea3   :  { %6601 = vsyncpa [#allocation20], 1 }

</bundles_post_ra>
